<compile_context>
chip_gen: v5e
topology: v5e:2x2
jax: 0.10.0
libtpu: 0.0.40
codegen_flags: <defaults>
</compile_context>

<pallas_src>
import numpy as np
import jax
import jax.numpy as jnp
from jax.experimental import pallas as pl
from jax.experimental.pallas import tpu as pltpu

_LANES = 128                              # lane-dense inter-kernel activation width
_NC_TAPS = (0, 1, 2, 3, 5, 6, 7, 8)       # 3x3 tap indices excluding the centre (4)
_COMPILER_PARAMS = pltpu.CompilerParams(
    dimension_semantics=("arbitrary",),
    vmem_limit_bytes=32 * 1024 * 1024,    # safe on v5e/v6e (128 MiB) and v7x (64 MiB)
)


# ----------------------------- pallas_call plumbing --------------------------------

def _full_spec(shape):
    ndim = len(shape)
    return pl.BlockSpec(shape, lambda i: (0,) * ndim)


def _call_full(kernel, out_shape, *args):
    """Single-step grid; every operand is one full VMEM-resident block."""
    return pl.pallas_call(
        kernel,
        out_shape=out_shape,
        grid=(1,),
        in_specs=[_full_spec(a.shape) for a in args],
        out_specs=_full_spec(out_shape.shape),
        compiler_params=_COMPILER_PARAMS,
    )(*args)


# ----------------------------------- kernels ---------------------------------------

def _stem_kernel(p_ref, w_ref, s_ref, b_ref, o_ref):
    """out = relu((7x7-conv patches @ W) * scale + shift), 128-lane padded output."""
    h = jnp.dot(p_ref[...], w_ref[...], preferred_element_type=jnp.float32)
    o_ref[...] = jnp.maximum(h * s_ref[...] + b_ref[...], 0.0).astype(o_ref.dtype)


def _make_block_kernel(n_views, combine, c0, n_layers, h, w, final_mode):
    """One fused kernel: pooling prologue + all dense layers + transition/head."""
    use_smat = not (h == 1 and w == 1)    # at 1x1 spatial only the centre tap survives

    def kernel(*refs):
        it = iter(refs)
        views_ref = next(it)
        smat_ref = next(it) if use_smat else None
        layers = [tuple(next(it) for _ in range(6)) for _ in range(n_layers)]
        if final_mode == "transition":
            st_ref, bt_ref, wt_ref = next(it), next(it), next(it)
        else:
            s5_ref, b5_ref, wc_ref, bc_ref = next(it), next(it), next(it), next(it)
        out_ref = next(it)

        # --- prologue: fold the previous stage's spatial pooling --------------------
        acc = views_ref[0].astype(jnp.float32)
        for k in range(1, n_views):
            v = views_ref[k].astype(jnp.float32)
            acc = jnp.maximum(acc, v) if combine == "max" else acc + v
        if combine == "mean":
            acc = acc * (1.0 / n_views)

        # growing feature map kept as a list of VMEM-resident chunks (never concat'ed)
        chunks, offs = [acc[:, :c0]], [0]

        def bn_relu_matmul(s_ref, b_ref, w_ref):
            """sum_c relu(chunk_c * s_c + b_c) @ W_c   (K-split over feature chunks)."""
            out = None
            for x, o in zip(chunks, offs):
                c = x.shape[1]
                t = jnp.maximum(x * s_ref[:, o:o + c] + b_ref[:, o:o + c], 0.0)
                d = jnp.dot(t.astype(jnp.bfloat16), w_ref[o:o + c, :],
                            preferred_element_type=jnp.float32)
                out = d if out is None else out + d
            return out

        # --- dense layers ------------------------------------------------------------
        for s1_ref, b1_ref, w1_ref, s2_ref, b2_ref, w2_ref in layers:
            t = bn_relu_matmul(s1_ref, b1_ref, w1_ref)              # norm1+relu+conv1x1
            t = jnp.maximum(t * s2_ref[...] + b2_ref[...], 0.0)     # norm2 + relu
            t_bf = t.astype(jnp.bfloat16)
            # 3x3 conv: centre tap + 8 shifted taps (shift+border-mask as 0/1 matmul)
            y = jnp.dot(t_bf, w2_ref[4], preferred_element_type=jnp.float32)
            if use_smat:
                for k, tap in enumerate(_NC_TAPS):
                    sh = jnp.dot(smat_ref[k], t_bf,
                                 preferred_element_type=jnp.float32).astype(jnp.bfloat16)
                    y = y + jnp.dot(sh, w2_ref[tap],
                                    preferred_element_type=jnp.float32)
            offs.append(offs[-1] + chunks[-1].shape[1])
            chunks.append(y)

        # --- epilogue ----------------------------------------------------------------
        if final_mode == "transition":
            # per-pixel 1x1 conv of the transition; 2x2 avg-pool is done by the next
            # kernel's prologue (pool and 1x1 conv are both linear -> order preserved).
            out_ref[...] = bn_relu_matmul(st_ref, bt_ref, wt_ref).astype(out_ref.dtype)
        else:
            # head: relu(bn(x)) @ Wc + b per pixel, then GAP (commutes with matmul).
            pix = bn_relu_matmul(s5_ref, b5_ref, wc_ref) + bc_ref[...]
            hw = h * w
            if hw > 1:
                pix = pix.reshape(pix.shape[0] // hw, hw, pix.shape[1]).mean(axis=1)
            out_ref[...] = pix.astype(out_ref.dtype)

    return kernel


# --------------------------------- glue helpers -------------------------------------

def _im2col(x, k, stride, pad):
    """x: (N,H,W,C) -> ((N*Ho*Wo, k*k*C) patches, Ho, Wo) with conv zero padding."""
    n, h, w, c = x.shape
    if pad:
        x = jnp.pad(x, ((0, 0), (pad, pad), (pad, pad), (0, 0)))
    hp, wp = h + 2 * pad, w + 2 * pad
    ho = (hp - k) // stride + 1
    wo = (wp - k) // stride + 1
    views = [x[:, di:di + stride * (ho - 1) + 1:stride,
                dj:dj + stride * (wo - 1) + 1:stride, :]
             for di in range(k) for dj in range(k)]
    return jnp.concatenate(views, axis=-1).reshape(n * ho * wo, k * k * c), ho, wo


def _pool_views(x, k, stride, pad):
    """x: (N,H,W,C) -> (stacked k*k stride-`stride` views (k*k, N*Ho*Wo, C), Ho, Wo).

    Zero padding is exact for the 3x3 max-pool here because its input is post-ReLU
    (>= 0); the 2x2 transition avg-pools use pad=0."""
    n, h, w, c = x.shape
    if pad:
        x = jnp.pad(x, ((0, 0), (pad, pad), (pad, pad), (0, 0)))
    hp, wp = h + 2 * pad, w + 2 * pad
    ho = (hp - k) // stride + 1
    wo = (wp - k) // stride + 1
    views = [x[:, di:di + stride * (ho - 1) + 1:stride,
                dj:dj + stride * (wo - 1) + 1:stride, :].reshape(n * ho * wo, c)
             for di in range(k) for dj in range(k)]
    return jnp.stack(views, axis=0), ho, wo


def _shift_matrices(n, h, w):
    """(8, M, M) 0/1 matrices realising the 8 non-centre 3x3-conv taps (zero padded)."""
    m = n * h * w
    r = np.arange(m)
    i, j = (r // w) % h, r % w
    mats = []
    for di in (-1, 0, 1):
        for dj in (-1, 0, 1):
            if di == 0 and dj == 0:
                continue
            valid = (i + di >= 0) & (i + di < h) & (j + dj >= 0) & (j + dj < w)
            s = np.zeros((m, m), np.float32)
            s[r[valid], r[valid] + di * w + dj] = 1.0
            mats.append(s)
    return jnp.asarray(np.stack(mats)).astype(jnp.bfloat16)


def _fold_bn(bn, eps=1e-5):
    scale = bn["gamma"] / jnp.sqrt(bn["var"] + eps)
    shift = bn["beta"] - bn["mean"] * scale
    return scale.astype(jnp.float32)[None, :], shift.astype(jnp.float32)[None, :]


def _pad_lanes(a, width=_LANES, dtype=jnp.bfloat16):
    out = jnp.zeros(a.shape[:-1] + (width,), dtype)
    return out.at[..., :a.shape[-1]].set(a.astype(dtype))


# ------------------------------ model build / forward -------------------------------

def build_forward(params, batch, image_hw):
    """One-time parameter preprocessing; returns (forward_fn, fast_params)."""
    ih, iw = image_hw
    n_classes = params["classifier_w"].shape[-1]

    # stem: 7x7/s2/p3 conv + norm0 + relu (output padded to 128 lanes)
    w0 = params["conv0"].reshape(-1, params["conv0"].shape[-1])
    s0, b0 = _fold_bn(params["norm0"])
    fp = {"stem": {"w": _pad_lanes(w0),
                   "s": _pad_lanes(s0, dtype=jnp.float32),
                   "b": _pad_lanes(b0, dtype=jnp.float32)}}

    h, w = ih // 4, iw // 4            # spatial size each dense block runs at
    statics, fp_blocks = [], []
    for bi, block in enumerate(params["blocks"]):
        is_last = bi == len(params["blocks"]) - 1
        c0 = block["layers"][0]["conv1"].shape[-2]
        fb = {"layers": []}
        for layer in block["layers"]:
            cin, cmid = layer["conv1"].shape[-2], layer["conv1"].shape[-1]
            growth = layer["conv2"].shape[-1]
            s1, b1 = _fold_bn(layer["norm1"])
            s2, b2 = _fold_bn(layer["norm2"])
            fb["layers"].append({
                "s1": s1, "b1": b1,
                "w1": layer["conv1"].reshape(cin, cmid).astype(jnp.bfloat16),
                "s2": s2, "b2": b2,
                "w2": layer["conv2"].reshape(9, cmid, growth).astype(jnp.bfloat16),
            })
        if h > 1 or w > 1:
            fb["smat"] = _shift_matrices(batch, h, w)
        if not is_last:
            st, bt = _fold_bn(block["transition"]["norm"])
            wt = block["transition"]["conv"]
            wt = wt.reshape(wt.shape[-2], wt.shape[-1])
            fb["final"] = {"s": st, "b": bt, "w": _pad_lanes(wt)}
        else:
            s5, b5 = _fold_bn(params["norm5"])
            fb["final"] = {"s": s5, "b": b5,
                           "w": _pad_lanes(params["classifier_w"]),
                           "bias": _pad_lanes(params["classifier_b"][None, :],
                                              dtype=jnp.float32)}
        fp_blocks.append(fb)
        statics.append({
            "kernel": _make_block_kernel(
                n_views=9 if bi == 0 else 4,
                combine="max" if bi == 0 else "mean",
                c0=c0, n_layers=len(block["layers"]),
                h=h, w=w, final_mode="head" if is_last else "transition"),
            "pool": (3, 2, 1) if bi == 0 else (2, 2, 0),
            "last": is_last,
        })
        if not is_last:
            h, w = h // 2, w // 2
    fp["blocks"] = fp_blocks

    def forward(fpar, x_nchw):
        x = jnp.transpose(x_nchw, (0, 2, 3, 1)).astype(jnp.bfloat16)   # NCHW -> NHWC
        n = x.shape[0]
        patches, ho, wo = _im2col(x, 7, 2, 3)
        stem = _call_full(_stem_kernel,
                          jax.ShapeDtypeStruct((n * ho * wo, _LANES), jnp.bfloat16),
                          patches, fpar["stem"]["w"], fpar["stem"]["s"],
                          fpar["stem"]["b"])
        cur = stem.reshape(n, ho, wo, _LANES)
        out = None
        for st, fb in zip(statics, fpar["blocks"]):
            pk, ps, pp = st["pool"]
            views, ho, wo = _pool_views(cur, pk, ps, pp)
            args = [views]
            if "smat" in fb:
                args.append(fb["smat"])
            for lyr in fb["layers"]:
                args += [lyr["s1"], lyr["b1"], lyr["w1"],
                         lyr["s2"], lyr["b2"], lyr["w2"]]
            fin = fb["final"]
            if st["last"]:
                args += [fin["s"], fin["b"], fin["w"], fin["bias"]]
                out_shape = jax.ShapeDtypeStruct((n, _LANES), jnp.float32)
            else:
                args += [fin["s"], fin["b"], fin["w"]]
                out_shape = jax.ShapeDtypeStruct((n * ho * wo, _LANES), jnp.bfloat16)
            res = _call_full(st["kernel"], out_shape, *args)
            if st["last"]:
                out = res[:, :n_classes]
            else:
                cur = res.reshape(n, ho, wo, _LANES)
        return out

    return forward, fp


# --------------------------------- parameter init -----------------------------------

def init_densenet_params(key, in_ch=3, num_init=16, growth=8,
                         block_config=(2, 2, 2, 2), bn_size=4, n_classes=5):
    state = {"key": key}

    def nk():
        state["key"], sub = jax.random.split(state["key"])
        return sub

    def conv_w(kh, kw, cin, cout):
        fan_in = kh * kw * cin
        return (jax.random.normal(nk(), (kh, kw, cin, cout), jnp.float32)
                * (2.0 / fan_in) ** 0.5)

    def bn_p(c):
        return {
            "gamma": 1.0 + 0.1 * jax.random.normal(nk(), (c,), jnp.float32),
            "beta": 0.1 * jax.random.normal(nk(), (c,), jnp.float32),
            "mean": 0.1 * jax.random.normal(nk(), (c,), jnp.float32),
            "var": 1.0 + 0.1 * jax.random.uniform(nk(), (c,), jnp.float32),
        }

    params = {"conv0": conv_w(7, 7, in_ch, num_init), "norm0": bn_p(num_init)}
    ch = num_init
    blocks = []
    for i, nlayers in enumerate(block_config):
        layers = []
        for _ in range(nlayers):
            layers.append({
                "norm1": bn_p(ch),
                "conv1": conv_w(1, 1, ch, bn_size * growth),
                "norm2": bn_p(bn_size * growth),
                "conv2": conv_w(3, 3, bn_size * growth, growth),
            })
            ch += growth
        block = {"layers": layers}
        if i != len(block_config) - 1:
            block["transition"] = {"norm": bn_p(ch),
                                   "conv": conv_w(1, 1, ch, ch // 2)}
            ch //= 2
        blocks.append(block)
    params["blocks"] = blocks
    params["norm5"] = bn_p(ch)
    params["classifier_w"] = (jax.random.normal(nk(), (ch, n_classes), jnp.float32)
                              * (1.0 / ch) ** 0.5)
    params["classifier_b"] = 0.01 * jax.random.normal(nk(), (n_classes,), jnp.float32)
    return params


# -------------------------------------- main ----------------------------------------

if __name__ == "__main__":
    key = jax.random.PRNGKey(0)
    pkey, xkey = jax.random.split(key)

    params = init_densenet_params(pkey)
    x = jax.random.normal(xkey, (2, 3, 32, 32), jnp.float32)   # NCHW like PyTorch

    forward, fast_params = build_forward(params, batch=2, image_hw=(32, 32))
    fwd = jax.jit(forward)
    logits = jax.block_until_ready(fwd(fast_params, x))

    assert logits.shape == (2, 5) and logits.dtype == jnp.float32
    assert bool(jnp.all(jnp.isfinite(logits)))
    print("KERNEL_OK")
</pallas_src>

<mosaic_0001>
module attributes {stable_mosaic.version = 11 : i64} {
  func.func @_stem_kernel(%arg0: i32, %arg1: memref<512x147xbf16, #tpu.memory_space<vmem>>, %arg2: memref<147x128xbf16, #tpu.memory_space<vmem>>, %arg3: memref<1x128xf32, #tpu.memory_space<vmem>>, %arg4: memref<1x128xf32, #tpu.memory_space<vmem>>, %arg5: memref<512x128xbf16, #tpu.memory_space<vmem>>) attributes {dimension_semantics = [#tpu.dimension_semantics<arbitrary>], iteration_bounds = array<i64: 1>, scalar_prefetch = 0 : i64, scratch_operands = 0 : i64, tpu.core_type = #tpu.core_type<tc>, window_params = [{pipeline_mode = #tpu.pipeline_mode<synchronous>, transform_indices = @transform_0, window_bounds = array<i64: 512, 147>}, {pipeline_mode = #tpu.pipeline_mode<synchronous>, transform_indices = @transform_1, window_bounds = array<i64: 147, 128>}, {pipeline_mode = #tpu.pipeline_mode<synchronous>, transform_indices = @transform_2, window_bounds = array<i64: 1, 128>}, {pipeline_mode = #tpu.pipeline_mode<synchronous>, transform_indices = @transform_3, window_bounds = array<i64: 1, 128>}, {pipeline_mode = #tpu.pipeline_mode<synchronous>, transform_indices = @transform_4, window_bounds = array<i64: 512, 128>}]} {
    %c0 = arith.constant 0 : index
    %c0_0 = arith.constant 0 : index
    %0 = vector.load %arg1[%c0, %c0_0] : memref<512x147xbf16, #tpu.memory_space<vmem>>, vector<512x147xbf16>
    %c0_1 = arith.constant 0 : index
    %c0_2 = arith.constant 0 : index
    %1 = vector.load %arg2[%c0_1, %c0_2] : memref<147x128xbf16, #tpu.memory_space<vmem>>, vector<147x128xbf16>
    %cst = arith.constant dense<0.000000e+00> : vector<512x128xf32>
    %2 = tpu.matmul %0, %1, %cst {dimension_numbers = #tpu.dot_dimension_numbers<[1], [0], [0], [1], [0, 0, 1, 1], [], []>} : vector<512x147xbf16>, vector<147x128xbf16>, vector<512x128xf32> -> vector<512x128xf32>
    %c0_3 = arith.constant 0 : index
    %c0_4 = arith.constant 0 : index
    %3 = vector.load %arg3[%c0_3, %c0_4] : memref<1x128xf32, #tpu.memory_space<vmem>>, vector<1x128xf32>
    %4 = vector.broadcast %3 : vector<1x128xf32> to vector<512x128xf32>
    %5 = arith.mulf %2, %4 : vector<512x128xf32>
    %c0_5 = arith.constant 0 : index
    %c0_6 = arith.constant 0 : index
    %6 = vector.load %arg4[%c0_5, %c0_6] : memref<1x128xf32, #tpu.memory_space<vmem>>, vector<1x128xf32>
    %7 = vector.broadcast %6 : vector<1x128xf32> to vector<512x128xf32>
    %8 = arith.addf %5, %7 : vector<512x128xf32>
    %cst_7 = arith.constant 0.000000e+00 : f32
    %9 = vector.broadcast %cst_7 : f32 to vector<512x128xf32>
    %10 = arith.maximumf %8, %9 : vector<512x128xf32>
    %11 = arith.truncf %10 : vector<512x128xf32> to vector<512x128xbf16>
    %c0_8 = arith.constant 0 : index
    %c0_9 = arith.constant 0 : index
    %12 = vector.load %arg5[%c0_8, %c0_9] : memref<512x128xbf16, #tpu.memory_space<vmem>>, vector<512x128xbf16>
    tpu.vector_store %arg5[%c0_8, %c0_9], %11 {strides = array<i32>} : memref<512x128xbf16, #tpu.memory_space<vmem>>, vector<512x128xbf16>,
    return
  }
  func.func @transform_0(%arg0: i32) -> (i32, i32) {
    %c0_i32 = arith.constant 0 : i32
    %c0_i32_0 = arith.constant 0 : i32
    %c0_i32_1 = arith.constant 0 : i32
    return %c0_i32, %c0_i32_0 : i32, i32
  }
  func.func @transform_1(%arg0: i32) -> (i32, i32) {
    %c0_i32 = arith.constant 0 : i32
    %c0_i32_0 = arith.constant 0 : i32
    %c0_i32_1 = arith.constant 0 : i32
    return %c0_i32, %c0_i32_0 : i32, i32
  }
  func.func @transform_2(%arg0: i32) -> (i32, i32) {
    %c0_i32 = arith.constant 0 : i32
    %c0_i32_0 = arith.constant 0 : i32
    %c0_i32_1 = arith.constant 0 : i32
    return %c0_i32, %c0_i32_0 : i32, i32
  }
  func.func @transform_3(%arg0: i32) -> (i32, i32) {
    %c0_i32 = arith.constant 0 : i32
    %c0_i32_0 = arith.constant 0 : i32
    %c0_i32_1 = arith.constant 0 : i32
    return %c0_i32, %c0_i32_0 : i32, i32
  }
  func.func @transform_4(%arg0: i32) -> (i32, i32) {
    %c0_i32 = arith.constant 0 : i32
    %c0_i32_0 = arith.constant 0 : i32
    %c0_i32_1 = arith.constant 0 : i32
    return %c0_i32, %c0_i32_0 : i32, i32
  }
}

module attributes {stable_mosaic.version = 11 : i64} {
  func.func @kernel(%arg0: i32, %arg1: memref<9x128x128xbf16, #tpu.memory_space<vmem>>, %arg2: memref<8x128x128xbf16, #tpu.memory_space<vmem>>, %arg3: memref<1x16xf32, #tpu.memory_space<vmem>>, %arg4: memref<1x16xf32, #tpu.memory_space<vmem>>, %arg5: memref<16x32xbf16, #tpu.memory_space<vmem>>, %arg6: memref<1x32xf32, #tpu.memory_space<vmem>>, %arg7: memref<1x32xf32, #tpu.memory_space<vmem>>, %arg8: memref<9x32x8xbf16, #tpu.memory_space<vmem>>, %arg9: memref<1x24xf32, #tpu.memory_space<vmem>>, %arg10: memref<1x24xf32, #tpu.memory_space<vmem>>, %arg11: memref<24x32xbf16, #tpu.memory_space<vmem>>, %arg12: memref<1x32xf32, #tpu.memory_space<vmem>>, %arg13: memref<1x32xf32, #tpu.memory_space<vmem>>, %arg14: memref<9x32x8xbf16, #tpu.memory_space<vmem>>, %arg15: memref<1x32xf32, #tpu.memory_space<vmem>>, %arg16: memref<1x32xf32, #tpu.memory_space<vmem>>, %arg17: memref<32x128xbf16, #tpu.memory_space<vmem>>, %arg18: memref<128x128xbf16, #tpu.memory_space<vmem>>) attributes {dimension_semantics = [#tpu.dimension_semantics<arbitrary>], iteration_bounds = array<i64: 1>, scalar_prefetch = 0 : i64, scratch_operands = 0 : i64, tpu.core_type = #tpu.core_type<tc>, window_params = [{pipeline_mode = #tpu.pipeline_mode<synchronous>, transform_indices = @transform_0, window_bounds = array<i64: 9, 128, 128>}, {pipeline_mode = #tpu.pipeline_mode<synchronous>, transform_indices = @transform_1, window_bounds = array<i64: 8, 128, 128>}, {pipeline_mode = #tpu.pipeline_mode<synchronous>, transform_indices = @transform_2, window_bounds = array<i64: 1, 16>}, {pipeline_mode = #tpu.pipeline_mode<synchronous>, transform_indices = @transform_3, window_bounds = array<i64: 1, 16>}, {pipeline_mode = #tpu.pipeline_mode<synchronous>, transform_indices = @transform_4, window_bounds = array<i64: 16, 32>}, {pipeline_mode = #tpu.pipeline_mode<synchronous>, transform_indices = @transform_5, window_bounds = array<i64: 1, 32>}, {pipeline_mode = #tpu.pipeline_mode<synchronous>, transform_indices = @transform_6, window_bounds = array<i64: 1, 32>}, {pipeline_mode = #tpu.pipeline_mode<synchronous>, transform_indices = @transform_7, window_bounds = array<i64: 9, 32, 8>}, {pipeline_mode = #tpu.pipeline_mode<synchronous>, transform_indices = @transform_8, window_bounds = array<i64: 1, 24>}, {pipeline_mode = #tpu.pipeline_mode<synchronous>, transform_indices = @transform_9, window_bounds = array<i64: 1, 24>}, {pipeline_mode = #tpu.pipeline_mode<synchronous>, transform_indices = @transform_10, window_bounds = array<i64: 24, 32>}, {pipeline_mode = #tpu.pipeline_mode<synchronous>, transform_indices = @transform_11, window_bounds = array<i64: 1, 32>}, {pipeline_mode = #tpu.pipeline_mode<synchronous>, transform_indices = @transform_12, window_bounds = array<i64: 1, 32>}, {pipeline_mode = #tpu.pipeline_mode<synchronous>, transform_indices = @transform_13, window_bounds = array<i64: 9, 32, 8>}, {pipeline_mode = #tpu.pipeline_mode<synchronous>, transform_indices = @transform_14, window_bounds = array<i64: 1, 32>}, {pipeline_mode = #tpu.pipeline_mode<synchronous>, transform_indices = @transform_15, window_bounds = array<i64: 1, 32>}, {pipeline_mode = #tpu.pipeline_mode<synchronous>, transform_indices = @transform_16, window_bounds = array<i64: 32, 128>}, {pipeline_mode = #tpu.pipeline_mode<synchronous>, transform_indices = @transform_17, window_bounds = array<i64: 128, 128>}]} {
    %c0 = arith.constant 0 : index
    %c0_0 = arith.constant 0 : index
    %c0_1 = arith.constant 0 : index
    %0 = vector.load %arg1[%c0, %c0_0, %c0_1] : memref<9x128x128xbf16, #tpu.memory_space<vmem>>, vector<1x128x128xbf16>
    %1 = vector.shape_cast %0 : vector<1x128x128xbf16> to vector<128x128xbf16>
    %2 = arith.extf %1 : vector<128x128xbf16> to vector<128x128xf32>
    %c1 = arith.constant 1 : index
    %c0_2 = arith.constant 0 : index
    %c0_3 = arith.constant 0 : index
    %3 = vector.load %arg1[%c1, %c0_2, %c0_3] : memref<9x128x128xbf16, #tpu.memory_space<vmem>>, vector<1x128x128xbf16>
    %4 = vector.shape_cast %3 : vector<1x128x128xbf16> to vector<128x128xbf16>
    %5 = arith.extf %4 : vector<128x128xbf16> to vector<128x128xf32>
    %6 = arith.maximumf %2, %5 : vector<128x128xf32>
    %c2 = arith.constant 2 : index
    %c0_4 = arith.constant 0 : index
    %c0_5 = arith.constant 0 : index
    %7 = vector.load %arg1[%c2, %c0_4, %c0_5] : memref<9x128x128xbf16, #tpu.memory_space<vmem>>, vector<1x128x128xbf16>
    %8 = vector.shape_cast %7 : vector<1x128x128xbf16> to vector<128x128xbf16>
    %9 = arith.extf %8 : vector<128x128xbf16> to vector<128x128xf32>
    %10 = arith.maximumf %6, %9 : vector<128x128xf32>
    %c3 = arith.constant 3 : index
    %c0_6 = arith.constant 0 : index
    %c0_7 = arith.constant 0 : index
    %11 = vector.load %arg1[%c3, %c0_6, %c0_7] : memref<9x128x128xbf16, #tpu.memory_space<vmem>>, vector<1x128x128xbf16>
    %12 = vector.shape_cast %11 : vector<1x128x128xbf16> to vector<128x128xbf16>
    %13 = arith.extf %12 : vector<128x128xbf16> to vector<128x128xf32>
    %14 = arith.maximumf %10, %13 : vector<128x128xf32>
    %c4 = arith.constant 4 : index
    %c0_8 = arith.constant 0 : index
    %c0_9 = arith.constant 0 : index
    %15 = vector.load %arg1[%c4, %c0_8, %c0_9] : memref<9x128x128xbf16, #tpu.memory_space<vmem>>, vector<1x128x128xbf16>
    %16 = vector.shape_cast %15 : vector<1x128x128xbf16> to vector<128x128xbf16>
    %17 = arith.extf %16 : vector<128x128xbf16> to vector<128x128xf32>
    %18 = arith.maximumf %14, %17 : vector<128x128xf32>
    %c5 = arith.constant 5 : index
    %c0_10 = arith.constant 0 : index
    %c0_11 = arith.constant 0 : index
    %19 = vector.load %arg1[%c5, %c0_10, %c0_11] : memref<9x128x128xbf16, #tpu.memory_space<vmem>>, vector<1x128x128xbf16>
    %20 = vector.shape_cast %19 : vector<1x128x128xbf16> to vector<128x128xbf16>
    %21 = arith.extf %20 : vector<128x128xbf16> to vector<128x128xf32>
    %22 = arith.maximumf %18, %21 : vector<128x128xf32>
    %c6 = arith.constant 6 : index
    %c0_12 = arith.constant 0 : index
    %c0_13 = arith.constant 0 : index
    %23 = vector.load %arg1[%c6, %c0_12, %c0_13] : memref<9x128x128xbf16, #tpu.memory_space<vmem>>, vector<1x128x128xbf16>
    %24 = vector.shape_cast %23 : vector<1x128x128xbf16> to vector<128x128xbf16>
    %25 = arith.extf %24 : vector<128x128xbf16> to vector<128x128xf32>
    %26 = arith.maximumf %22, %25 : vector<128x128xf32>
    %c7 = arith.constant 7 : index
    %c0_14 = arith.constant 0 : index
    %c0_15 = arith.constant 0 : index
    %27 = vector.load %arg1[%c7, %c0_14, %c0_15] : memref<9x128x128xbf16, #tpu.memory_space<vmem>>, vector<1x128x128xbf16>
    %28 = vector.shape_cast %27 : vector<1x128x128xbf16> to vector<128x128xbf16>
    %29 = arith.extf %28 : vector<128x128xbf16> to vector<128x128xf32>
    %30 = arith.maximumf %26, %29 : vector<128x128xf32>
    %c8 = arith.constant 8 : index
    %c0_16 = arith.constant 0 : index
    %c0_17 = arith.constant 0 : index
    %31 = vector.load %arg1[%c8, %c0_16, %c0_17] : memref<9x128x128xbf16, #tpu.memory_space<vmem>>, vector<1x128x128xbf16>
    %32 = vector.shape_cast %31 : vector<1x128x128xbf16> to vector<128x128xbf16>
    %33 = arith.extf %32 : vector<128x128xbf16> to vector<128x128xf32>
    %34 = arith.maximumf %30, %33 : vector<128x128xf32>
    %35 = vector.extract_strided_slice %34 {offsets = [0, 0], sizes = [128, 16], strides = [1, 1]} : vector<128x128xf32> to vector<128x16xf32>
    %c0_18 = arith.constant 0 : index
    %c0_19 = arith.constant 0 : index
    %36 = vector.load %arg3[%c0_18, %c0_19] : memref<1x16xf32, #tpu.memory_space<vmem>>, vector<1x16xf32>
    %37 = vector.broadcast %36 : vector<1x16xf32> to vector<128x16xf32>
    %38 = arith.mulf %35, %37 : vector<128x16xf32>
    %c0_20 = arith.constant 0 : index
    %c0_21 = arith.constant 0 : index
    %39 = vector.load %arg4[%c0_20, %c0_21] : memref<1x16xf32, #tpu.memory_space<vmem>>, vector<1x16xf32>
    %40 = vector.broadcast %39 : vector<1x16xf32> to vector<128x16xf32>
    %41 = arith.addf %38, %40 : vector<128x16xf32>
    %cst = arith.constant 0.000000e+00 : f32
    %42 = vector.broadcast %cst : f32 to vector<128x16xf32>
    %43 = arith.maximumf %41, %42 : vector<128x16xf32>
    %44 = arith.truncf %43 : vector<128x16xf32> to vector<128x16xbf16>
    %c0_22 = arith.constant 0 : index
    %c0_23 = arith.constant 0 : index
    %45 = vector.load %arg5[%c0_22, %c0_23] : memref<16x32xbf16, #tpu.memory_space<vmem>>, vector<16x32xbf16>
    %cst_24 = arith.constant dense<0.000000e+00> : vector<128x32xf32>
    %46 = tpu.matmul %44, %45, %cst_24 {dimension_numbers = #tpu.dot_dimension_numbers<[1], [0], [0], [1], [0, 0, 1, 1], [], []>} : vector<128x16xbf16>, vector<16x32xbf16>, vector<128x32xf32> -> vector<128x32xf32>
    %c0_25 = arith.constant 0 : index
    %c0_26 = arith.constant 0 : index
    %47 = vector.load %arg6[%c0_25, %c0_26] : memref<1x32xf32, #tpu.memory_space<vmem>>, vector<1x32xf32>
    %48 = vector.broadcast %47 : vector<1x32xf32> to vector<128x32xf32>
    %49 = arith.mulf %46, %48 : vector<128x32xf32>
    %c0_27 = arith.constant 0 : index
    %c0_28 = arith.constant 0 : index
    %50 = vector.load %arg7[%c0_27, %c0_28] : memref<1x32xf32, #tpu.memory_space<vmem>>, vector<1x32xf32>
    %51 = vector.broadcast %50 : vector<1x32xf32> to vector<128x32xf32>
    %52 = arith.addf %49, %51 : vector<128x32xf32>
    %cst_29 = arith.constant 0.000000e+00 : f32
    %53 = vector.broadcast %cst_29 : f32 to vector<128x32xf32>
    %54 = arith.maximumf %52, %53 : vector<128x32xf32>
    %55 = arith.truncf %54 : vector<128x32xf32> to vector<128x32xbf16>
    %c4_30 = arith.constant 4 : index
    %c0_31 = arith.constant 0 : index
    %c0_32 = arith.constant 0 : index
    %56 = vector.load %arg8[%c4_30, %c0_31, %c0_32] : memref<9x32x8xbf16, #tpu.memory_space<vmem>>, vector<1x32x8xbf16>
    %57 = vector.shape_cast %56 : vector<1x32x8xbf16> to vector<32x8xbf16>
    %cst_33 = arith.constant dense<0.000000e+00> : vector<128x8xf32>
    %58 = tpu.matmul %55, %57, %cst_33 {dimension_numbers = #tpu.dot_dimension_numbers<[1], [0], [0], [1], [0, 0, 1, 1], [], []>} : vector<128x32xbf16>, vector<32x8xbf16>, vector<128x8xf32> -> vector<128x8xf32>
    %c0_34 = arith.constant 0 : index
    %c0_35 = arith.constant 0 : index
    %c0_36 = arith.constant 0 : index
    %59 = vector.load %arg2[%c0_34, %c0_35, %c0_36] : memref<8x128x128xbf16, #tpu.memory_space<vmem>>, vector<1x128x128xbf16>
    %60 = vector.shape_cast %59 : vector<1x128x128xbf16> to vector<128x128xbf16>
    %cst_37 = arith.constant dense<0.000000e+00> : vector<128x32xf32>
    %61 = tpu.matmul %60, %55, %cst_37 {dimension_numbers = #tpu.dot_dimension_numbers<[1], [0], [0], [1], [0, 0, 1, 1], [], []>} : vector<128x128xbf16>, vector<128x32xbf16>, vector<128x32xf32> -> vector<128x32xf32>
    %62 = arith.truncf %61 : vector<128x32xf32> to vector<128x32xbf16>
    %c0_38 = arith.constant 0 : index
    %c0_39 = arith.constant 0 : index
    %c0_40 = arith.constant 0 : index
    %63 = vector.load %arg8[%c0_38, %c0_39, %c0_40] : memref<9x32x8xbf16, #tpu.memory_space<vmem>>, vector<1x32x8xbf16>
    %64 = vector.shape_cast %63 : vector<1x32x8xbf16> to vector<32x8xbf16>
    %cst_41 = arith.constant dense<0.000000e+00> : vector<128x8xf32>
    %65 = tpu.matmul %62, %64, %cst_41 {dimension_numbers = #tpu.dot_dimension_numbers<[1], [0], [0], [1], [0, 0, 1, 1], [], []>} : vector<128x32xbf16>, vector<32x8xbf16>, vector<128x8xf32> -> vector<128x8xf32>
    %66 = arith.addf %58, %65 : vector<128x8xf32>
    %c1_42 = arith.constant 1 : index
    %c0_43 = arith.constant 0 : index
    %c0_44 = arith.constant 0 : index
    %67 = vector.load %arg2[%c1_42, %c0_43, %c0_44] : memref<8x128x128xbf16, #tpu.memory_space<vmem>>, vector<1x128x128xbf16>
    %68 = vector.shape_cast %67 : vector<1x128x128xbf16> to vector<128x128xbf16>
    %cst_45 = arith.constant dense<0.000000e+00> : vector<128x32xf32>
    %69 = tpu.matmul %68, %55, %cst_45 {dimension_numbers = #tpu.dot_dimension_numbers<[1], [0], [0], [1], [0, 0, 1, 1], [], []>} : vector<128x128xbf16>, vector<128x32xbf16>, vector<128x32xf32> -> vector<128x32xf32>
    %70 = arith.truncf %69 : vector<128x32xf32> to vector<128x32xbf16>
    %c1_46 = arith.constant 1 : index
    %c0_47 = arith.constant 0 : index
    %c0_48 = arith.constant 0 : index
    %71 = vector.load %arg8[%c1_46, %c0_47, %c0_48] : memref<9x32x8xbf16, #tpu.memory_space<vmem>>, vector<1x32x8xbf16>
    %72 = vector.shape_cast %71 : vector<1x32x8xbf16> to vector<32x8xbf16>
    %cst_49 = arith.constant dense<0.000000e+00> : vector<128x8xf32>
    %73 = tpu.matmul %70, %72, %cst_49 {dimension_numbers = #tpu.dot_dimension_numbers<[1], [0], [0], [1], [0, 0, 1, 1], [], []>} : vector<128x32xbf16>, vector<32x8xbf16>, vector<128x8xf32> -> vector<128x8xf32>
    %74 = arith.addf %66, %73 : vector<128x8xf32>
    %c2_50 = arith.constant 2 : index
    %c0_51 = arith.constant 0 : index
    %c0_52 = arith.constant 0 : index
    %75 = vector.load %arg2[%c2_50, %c0_51, %c0_52] : memref<8x128x128xbf16, #tpu.memory_space<vmem>>, vector<1x128x128xbf16>
    %76 = vector.shape_cast %75 : vector<1x128x128xbf16> to vector<128x128xbf16>
    %cst_53 = arith.constant dense<0.000000e+00> : vector<128x32xf32>
    %77 = tpu.matmul %76, %55, %cst_53 {dimension_numbers = #tpu.dot_dimension_numbers<[1], [0], [0], [1], [0, 0, 1, 1], [], []>} : vector<128x128xbf16>, vector<128x32xbf16>, vector<128x32xf32> -> vector<128x32xf32>
    %78 = arith.truncf %77 : vector<128x32xf32> to vector<128x32xbf16>
    %c2_54 = arith.constant 2 : index
    %c0_55 = arith.constant 0 : index
    %c0_56 = arith.constant 0 : index
    %79 = vector.load %arg8[%c2_54, %c0_55, %c0_56] : memref<9x32x8xbf16, #tpu.memory_space<vmem>>, vector<1x32x8xbf16>
    %80 = vector.shape_cast %79 : vector<1x32x8xbf16> to vector<32x8xbf16>
    %cst_57 = arith.constant dense<0.000000e+00> : vector<128x8xf32>
    %81 = tpu.matmul %78, %80, %cst_57 {dimension_numbers = #tpu.dot_dimension_numbers<[1], [0], [0], [1], [0, 0, 1, 1], [], []>} : vector<128x32xbf16>, vector<32x8xbf16>, vector<128x8xf32> -> vector<128x8xf32>
    %82 = arith.addf %74, %81 : vector<128x8xf32>
    %c3_58 = arith.constant 3 : index
    %c0_59 = arith.constant 0 : index
    %c0_60 = arith.constant 0 : index
    %83 = vector.load %arg2[%c3_58, %c0_59, %c0_60] : memref<8x128x128xbf16, #tpu.memory_space<vmem>>, vector<1x128x128xbf16>
    %84 = vector.shape_cast %83 : vector<1x128x128xbf16> to vector<128x128xbf16>
    %cst_61 = arith.constant dense<0.000000e+00> : vector<128x32xf32>
    %85 = tpu.matmul %84, %55, %cst_61 {dimension_numbers = #tpu.dot_dimension_numbers<[1], [0], [0], [1], [0, 0, 1, 1], [], []>} : vector<128x128xbf16>, vector<128x32xbf16>, vector<128x32xf32> -> vector<128x32xf32>
    %86 = arith.truncf %85 : vector<128x32xf32> to vector<128x32xbf16>
    %c3_62 = arith.constant 3 : index
    %c0_63 = arith.constant 0 : index
    %c0_64 = arith.constant 0 : index
    %87 = vector.load %arg8[%c3_62, %c0_63, %c0_64] : memref<9x32x8xbf16, #tpu.memory_space<vmem>>, vector<1x32x8xbf16>
    %88 = vector.shape_cast %87 : vector<1x32x8xbf16> to vector<32x8xbf16>
    %cst_65 = arith.constant dense<0.000000e+00> : vector<128x8xf32>
    %89 = tpu.matmul %86, %88, %cst_65 {dimension_numbers = #tpu.dot_dimension_numbers<[1], [0], [0], [1], [0, 0, 1, 1], [], []>} : vector<128x32xbf16>, vector<32x8xbf16>, vector<128x8xf32> -> vector<128x8xf32>
    %90 = arith.addf %82, %89 : vector<128x8xf32>
    %c4_66 = arith.constant 4 : index
    %c0_67 = arith.constant 0 : index
    %c0_68 = arith.constant 0 : index
    %91 = vector.load %arg2[%c4_66, %c0_67, %c0_68] : memref<8x128x128xbf16, #tpu.memory_space<vmem>>, vector<1x128x128xbf16>
    %92 = vector.shape_cast %91 : vector<1x128x128xbf16> to vector<128x128xbf16>
    %cst_69 = arith.constant dense<0.000000e+00> : vector<128x32xf32>
    %93 = tpu.matmul %92, %55, %cst_69 {dimension_numbers = #tpu.dot_dimension_numbers<[1], [0], [0], [1], [0, 0, 1, 1], [], []>} : vector<128x128xbf16>, vector<128x32xbf16>, vector<128x32xf32> -> vector<128x32xf32>
    %94 = arith.truncf %93 : vector<128x32xf32> to vector<128x32xbf16>
    %c5_70 = arith.constant 5 : index
    %c0_71 = arith.constant 0 : index
    %c0_72 = arith.constant 0 : index
    %95 = vector.load %arg8[%c5_70, %c0_71, %c0_72] : memref<9x32x8xbf16, #tpu.memory_space<vmem>>, vector<1x32x8xbf16>
    %96 = vector.shape_cast %95 : vector<1x32x8xbf16> to vector<32x8xbf16>
    %cst_73 = arith.constant dense<0.000000e+00> : vector<128x8xf32>
    %97 = tpu.matmul %94, %96, %cst_73 {dimension_numbers = #tpu.dot_dimension_numbers<[1], [0], [0], [1], [0, 0, 1, 1], [], []>} : vector<128x32xbf16>, vector<32x8xbf16>, vector<128x8xf32> -> vector<128x8xf32>
    %98 = arith.addf %90, %97 : vector<128x8xf32>
    %c5_74 = arith.constant 5 : index
    %c0_75 = arith.constant 0 : index
    %c0_76 = arith.constant 0 : index
    %99 = vector.load %arg2[%c5_74, %c0_75, %c0_76] : memref<8x128x128xbf16, #tpu.memory_space<vmem>>, vector<1x128x128xbf16>
    %100 = vector.shape_cast %99 : vector<1x128x128xbf16> to vector<128x128xbf16>
    %cst_77 = arith.constant dense<0.000000e+00> : vector<128x32xf32>
    %101 = tpu.matmul %100, %55, %cst_77 {dimension_numbers = #tpu.dot_dimension_numbers<[1], [0], [0], [1], [0, 0, 1, 1], [], []>} : vector<128x128xbf16>, vector<128x32xbf16>, vector<128x32xf32> -> vector<128x32xf32>
    %102 = arith.truncf %101 : vector<128x32xf32> to vector<128x32xbf16>
    %c6_78 = arith.constant 6 : index
    %c0_79 = arith.constant 0 : index
    %c0_80 = arith.constant 0 : index
    %103 = vector.load %arg8[%c6_78, %c0_79, %c0_80] : memref<9x32x8xbf16, #tpu.memory_space<vmem>>, vector<1x32x8xbf16>
    %104 = vector.shape_cast %103 : vector<1x32x8xbf16> to vector<32x8xbf16>
    %cst_81 = arith.constant dense<0.000000e+00> : vector<128x8xf32>
    %105 = tpu.matmul %102, %104, %cst_81 {dimension_numbers = #tpu.dot_dimension_numbers<[1], [0], [0], [1], [0, 0, 1, 1], [], []>} : vector<128x32xbf16>, vector<32x8xbf16>, vector<128x8xf32> -> vector<128x8xf32>
    %106 = arith.addf %98, %105 : vector<128x8xf32>
    %c6_82 = arith.constant 6 : index
    %c0_83 = arith.constant 0 : index
    %c0_84 = arith.constant 0 : index
    %107 = vector.load %arg2[%c6_82, %c0_83, %c0_84] : memref<8x128x128xbf16, #tpu.memory_space<vmem>>, vector<1x128x128xbf16>
    %108 = vector.shape_cast %107 : vector<1x128x128xbf16> to vector<128x128xbf16>
    %cst_85 = arith.constant dense<0.000000e+00> : vector<128x32xf32>
    %109 = tpu.matmul %108, %55, %cst_85 {dimension_numbers = #tpu.dot_dimension_numbers<[1], [0], [0], [1], [0, 0, 1, 1], [], []>} : vector<128x128xbf16>, vector<128x32xbf16>, vector<128x32xf32> -> vector<128x32xf32>
    %110 = arith.truncf %109 : vector<128x32xf32> to vector<128x32xbf16>
    %c7_86 = arith.constant 7 : index
    %c0_87 = arith.constant 0 : index
    %c0_88 = arith.constant 0 : index
    %111 = vector.load %arg8[%c7_86, %c0_87, %c0_88] : memref<9x32x8xbf16, #tpu.memory_space<vmem>>, vector<1x32x8xbf16>
    %112 = vector.shape_cast %111 : vector<1x32x8xbf16> to vector<32x8xbf16>
    %cst_89 = arith.constant dense<0.000000e+00> : vector<128x8xf32>
    %113 = tpu.matmul %110, %112, %cst_89 {dimension_numbers = #tpu.dot_dimension_numbers<[1], [0], [0], [1], [0, 0, 1, 1], [], []>} : vector<128x32xbf16>, vector<32x8xbf16>, vector<128x8xf32> -> vector<128x8xf32>
    %114 = arith.addf %106, %113 : vector<128x8xf32>
    %c7_90 = arith.constant 7 : index
    %c0_91 = arith.constant 0 : index
    %c0_92 = arith.constant 0 : index
    %115 = vector.load %arg2[%c7_90, %c0_91, %c0_92] : memref<8x128x128xbf16, #tpu.memory_space<vmem>>, vector<1x128x128xbf16>
    %116 = vector.shape_cast %115 : vector<1x128x128xbf16> to vector<128x128xbf16>
    %cst_93 = arith.constant dense<0.000000e+00> : vector<128x32xf32>
    %117 = tpu.matmul %116, %55, %cst_93 {dimension_numbers = #tpu.dot_dimension_numbers<[1], [0], [0], [1], [0, 0, 1, 1], [], []>} : vector<128x128xbf16>, vector<128x32xbf16>, vector<128x32xf32> -> vector<128x32xf32>
    %118 = arith.truncf %117 : vector<128x32xf32> to vector<128x32xbf16>
    %c8_94 = arith.constant 8 : index
    %c0_95 = arith.constant 0 : index
    %c0_96 = arith.constant 0 : index
    %119 = vector.load %arg8[%c8_94, %c0_95, %c0_96] : memref<9x32x8xbf16, #tpu.memory_space<vmem>>, vector<1x32x8xbf16>
    %120 = vector.shape_cast %119 : vector<1x32x8xbf16> to vector<32x8xbf16>
    %cst_97 = arith.constant dense<0.000000e+00> : vector<128x8xf32>
    %121 = tpu.matmul %118, %120, %cst_97 {dimension_numbers = #tpu.dot_dimension_numbers<[1], [0], [0], [1], [0, 0, 1, 1], [], []>} : vector<128x32xbf16>, vector<32x8xbf16>, vector<128x8xf32> -> vector<128x8xf32>
    %122 = arith.addf %114, %121 : vector<128x8xf32>
    %c0_98 = arith.constant 0 : index
    %c0_99 = arith.constant 0 : index
    %123 = vector.load %arg9[%c0_98, %c0_99] : memref<1x24xf32, #tpu.memory_space<vmem>>, vector<1x16xf32>
    %124 = vector.broadcast %123 : vector<1x16xf32> to vector<128x16xf32>
    %125 = arith.mulf %35, %124 : vector<128x16xf32>
    %c0_100 = arith.constant 0 : index
    %c0_101 = arith.constant 0 : index
    %126 = vector.load %arg10[%c0_100, %c0_101] : memref<1x24xf32, #tpu.memory_space<vmem>>, vector<1x16xf32>
    %127 = vector.broadcast %126 : vector<1x16xf32> to vector<128x16xf32>
    %128 = arith.addf %125, %127 : vector<128x16xf32>
    %cst_102 = arith.constant 0.000000e+00 : f32
    %129 = vector.broadcast %cst_102 : f32 to vector<128x16xf32>
    %130 = arith.maximumf %128, %129 : vector<128x16xf32>
    %131 = arith.truncf %130 : vector<128x16xf32> to vector<128x16xbf16>
    %c0_103 = arith.constant 0 : index
    %c0_104 = arith.constant 0 : index
    %132 = vector.load %arg11[%c0_103, %c0_104] : memref<24x32xbf16, #tpu.memory_space<vmem>>, vector<16x32xbf16>
    %cst_105 = arith.constant dense<0.000000e+00> : vector<128x32xf32>
    %133 = tpu.matmul %131, %132, %cst_105 {dimension_numbers = #tpu.dot_dimension_numbers<[1], [0], [0], [1], [0, 0, 1, 1], [], []>} : vector<128x16xbf16>, vector<16x32xbf16>, vector<128x32xf32> -> vector<128x32xf32>
    %c0_106 = arith.constant 0 : index
    %c16 = arith.constant 16 : index
    %134 = vector.load %arg9[%c0_106, %c16] : memref<1x24xf32, #tpu.memory_space<vmem>>, vector<1x8xf32>
    %135 = vector.broadcast %134 : vector<1x8xf32> to vector<128x8xf32>
    %136 = arith.mulf %122, %135 : vector<128x8xf32>
    %c0_107 = arith.constant 0 : index
    %c16_108 = arith.constant 16 : index
    %137 = vector.load %arg10[%c0_107, %c16_108] : memref<1x24xf32, #tpu.memory_space<vmem>>, vector<1x8xf32>
    %138 = vector.broadcast %137 : vector<1x8xf32> to vector<128x8xf32>
    %139 = arith.addf %136, %138 : vector<128x8xf32>
    %cst_109 = arith.constant 0.000000e+00 : f32
    %140 = vector.broadcast %cst_109 : f32 to vector<128x8xf32>
    %141 = arith.maximumf %139, %140 : vector<128x8xf32>
    %142 = arith.truncf %141 : vector<128x8xf32> to vector<128x8xbf16>
    %c16_110 = arith.constant 16 : index
    %c0_111 = arith.constant 0 : index
    %143 = vector.load %arg11[%c16_110, %c0_111] : memref<24x32xbf16, #tpu.memory_space<vmem>>, vector<8x32xbf16>
    %cst_112 = arith.constant dense<0.000000e+00> : vector<128x32xf32>
    %144 = tpu.matmul %142, %143, %cst_112 {dimension_numbers = #tpu.dot_dimension_numbers<[1], [0], [0], [1], [0, 0, 1, 1], [], []>} : vector<128x8xbf16>, vector<8x32xbf16>, vector<128x32xf32> -> vector<128x32xf32>
    %145 = arith.addf %133, %144 : vector<128x32xf32>
    %c0_113 = arith.constant 0 : index
    %c0_114 = arith.constant 0 : index
    %146 = vector.load %arg12[%c0_113, %c0_114] : memref<1x32xf32, #tpu.memory_space<vmem>>, vector<1x32xf32>
    %147 = vector.broadcast %146 : vector<1x32xf32> to vector<128x32xf32>
    %148 = arith.mulf %145, %147 : vector<128x32xf32>
    %c0_115 = arith.constant 0 : index
    %c0_116 = arith.constant 0 : index
    %149 = vector.load %arg13[%c0_115, %c0_116] : memref<1x32xf32, #tpu.memory_space<vmem>>, vector<1x32xf32>
    %150 = vector.broadcast %149 : vector<1x32xf32> to vector<128x32xf32>
    %151 = arith.addf %148, %150 : vector<128x32xf32>
    %cst_117 = arith.constant 0.000000e+00 : f32
    %152 = vector.broadcast %cst_117 : f32 to vector<128x32xf32>
    %153 = arith.maximumf %151, %152 : vector<128x32xf32>
    %154 = arith.truncf %153 : vector<128x32xf32> to vector<128x32xbf16>
    %c4_118 = arith.constant 4 : index
    %c0_119 = arith.constant 0 : index
    %c0_120 = arith.constant 0 : index
    %155 = vector.load %arg14[%c4_118, %c0_119, %c0_120] : memref<9x32x8xbf16, #tpu.memory_space<vmem>>, vector<1x32x8xbf16>
    %156 = vector.shape_cast %155 : vector<1x32x8xbf16> to vector<32x8xbf16>
    %cst_121 = arith.constant dense<0.000000e+00> : vector<128x8xf32>
    %157 = tpu.matmul %154, %156, %cst_121 {dimension_numbers = #tpu.dot_dimension_numbers<[1], [0], [0], [1], [0, 0, 1, 1], [], []>} : vector<128x32xbf16>, vector<32x8xbf16>, vector<128x8xf32> -> vector<128x8xf32>
    %c0_122 = arith.constant 0 : index
    %c0_123 = arith.constant 0 : index
    %c0_124 = arith.constant 0 : index
    %158 = vector.load %arg2[%c0_122, %c0_123, %c0_124] : memref<8x128x128xbf16, #tpu.memory_space<vmem>>, vector<1x128x128xbf16>
    %159 = vector.shape_cast %158 : vector<1x128x128xbf16> to vector<128x128xbf16>
    %cst_125 = arith.constant dense<0.000000e+00> : vector<128x32xf32>
    %160 = tpu.matmul %159, %154, %cst_125 {dimension_numbers = #tpu.dot_dimension_numbers<[1], [0], [0], [1], [0, 0, 1, 1], [], []>} : vector<128x128xbf16>, vector<128x32xbf16>, vector<128x32xf32> -> vector<128x32xf32>
    %161 = arith.truncf %160 : vector<128x32xf32> to vector<128x32xbf16>
    %c0_126 = arith.constant 0 : index
    %c0_127 = arith.constant 0 : index
    %c0_128 = arith.constant 0 : index
    %162 = vector.load %arg14[%c0_126, %c0_127, %c0_128] : memref<9x32x8xbf16, #tpu.memory_space<vmem>>, vector<1x32x8xbf16>
    %163 = vector.shape_cast %162 : vector<1x32x8xbf16> to vector<32x8xbf16>
    %cst_129 = arith.constant dense<0.000000e+00> : vector<128x8xf32>
    %164 = tpu.matmul %161, %163, %cst_129 {dimension_numbers = #tpu.dot_dimension_numbers<[1], [0], [0], [1], [0, 0, 1, 1], [], []>} : vector<128x32xbf16>, vector<32x8xbf16>, vector<128x8xf32> -> vector<128x8xf32>
    %165 = arith.addf %157, %164 : vector<128x8xf32>
    %c1_130 = arith.constant 1 : index
    %c0_131 = arith.constant 0 : index
    %c0_132 = arith.constant 0 : index
    %166 = vector.load %arg2[%c1_130, %c0_131, %c0_132] : memref<8x128x128xbf16, #tpu.memory_space<vmem>>, vector<1x128x128xbf16>
    %167 = vector.shape_cast %166 : vector<1x128x128xbf16> to vector<128x128xbf16>
    %cst_133 = arith.constant dense<0.000000e+00> : vector<128x32xf32>
    %168 = tpu.matmul %167, %154, %cst_133 {dimension_numbers = #tpu.dot_dimension_numbers<[1], [0], [0], [1], [0, 0, 1, 1], [], []>} : vector<128x128xbf16>, vector<128x32xbf16>, vector<128x32xf32> -> vector<128x32xf32>
    %169 = arith.truncf %168 : vector<128x32xf32> to vector<128x32xbf16>
    %c1_134 = arith.constant 1 : index
    %c0_135 = arith.constant 0 : index
    %c0_136 = arith.constant 0 : index
    %170 = vector.load %arg14[%c1_134, %c0_135, %c0_136] : memref<9x32x8xbf16, #tpu.memory_space<vmem>>, vector<1x32x8xbf16>
    %171 = vector.shape_cast %170 : vector<1x32x8xbf16> to vector<32x8xbf16>
    %cst_137 = arith.constant dense<0.000000e+00> : vector<128x8xf32>
    %172 = tpu.matmul %169, %171, %cst_137 {dimension_numbers = #tpu.dot_dimension_numbers<[1], [0], [0], [1], [0, 0, 1, 1], [], []>} : vector<128x32xbf16>, vector<32x8xbf16>, vector<128x8xf32> -> vector<128x8xf32>
    %173 = arith.addf %165, %172 : vector<128x8xf32>
    %c2_138 = arith.constant 2 : index
    %c0_139 = arith.constant 0 : index
    %c0_140 = arith.constant 0 : index
    %174 = vector.load %arg2[%c2_138, %c0_139, %c0_140] : memref<8x128x128xbf16, #tpu.memory_space<vmem>>, vector<1x128x128xbf16>
    %175 = vector.shape_cast %174 : vector<1x128x128xbf16> to vector<128x128xbf16>
    %cst_141 = arith.constant dense<0.000000e+00> : vector<128x32xf32>
    %176 = tpu.matmul %175, %154, %cst_141 {dimension_numbers = #tpu.dot_dimension_numbers<[1], [0], [0], [1], [0, 0, 1, 1], [], []>} : vector<128x128xbf16>, vector<128x32xbf16>, vector<128x32xf32> -> vector<128x32xf32>
    %177 = arith.truncf %176 : vector<128x32xf32> to vector<128x32xbf16>
    %c2_142 = arith.constant 2 : index
    %c0_143 = arith.constant 0 : index
    %c0_144 = arith.constant 0 : index
    %178 = vector.load %arg14[%c2_142, %c0_143, %c0_144] : memref<9x32x8xbf16, #tpu.memory_space<vmem>>, vector<1x32x8xbf16>
    %179 = vector.shape_cast %178 : vector<1x32x8xbf16> to vector<32x8xbf16>
    %cst_145 = arith.constant dense<0.000000e+00> : vector<128x8xf32>
    %180 = tpu.matmul %177, %179, %cst_145 {dimension_numbers = #tpu.dot_dimension_numbers<[1], [0], [0], [1], [0, 0, 1, 1], [], []>} : vector<128x32xbf16>, vector<32x8xbf16>, vector<128x8xf32> -> vector<128x8xf32>
    %181 = arith.addf %173, %180 : vector<128x8xf32>
    %c3_146 = arith.constant 3 : index
    %c0_147 = arith.constant 0 : index
    %c0_148 = arith.constant 0 : index
    %182 = vector.load %arg2[%c3_146, %c0_147, %c0_148] : memref<8x128x128xbf16, #tpu.memory_space<vmem>>, vector<1x128x128xbf16>
    %183 = vector.shape_cast %182 : vector<1x128x128xbf16> to vector<128x128xbf16>
    %cst_149 = arith.constant dense<0.000000e+00> : vector<128x32xf32>
    %184 = tpu.matmul %183, %154, %cst_149 {dimension_numbers = #tpu.dot_dimension_numbers<[1], [0], [0], [1], [0, 0, 1, 1], [], []>} : vector<128x128xbf16>, vector<128x32xbf16>, vector<128x32xf32> -> vector<128x32xf32>
    %185 = arith.truncf %184 : vector<128x32xf32> to vector<128x32xbf16>
    %c3_150 = arith.constant 3 : index
    %c0_151 = arith.constant 0 : index
    %c0_152 = arith.constant 0 : index
    %186 = vector.load %arg14[%c3_150, %c0_151, %c0_152] : memref<9x32x8xbf16, #tpu.memory_space<vmem>>, vector<1x32x8xbf16>
    %187 = vector.shape_cast %186 : vector<1x32x8xbf16> to vector<32x8xbf16>
    %cst_153 = arith.constant dense<0.000000e+00> : vector<128x8xf32>
    %188 = tpu.matmul %185, %187, %cst_153 {dimension_numbers = #tpu.dot_dimension_numbers<[1], [0], [0], [1], [0, 0, 1, 1], [], []>} : vector<128x32xbf16>, vector<32x8xbf16>, vector<128x8xf32> -> vector<128x8xf32>
    %189 = arith.addf %181, %188 : vector<128x8xf32>
    %c4_154 = arith.constant 4 : index
    %c0_155 = arith.constant 0 : index
    %c0_156 = arith.constant 0 : index
    %190 = vector.load %arg2[%c4_154, %c0_155, %c0_156] : memref<8x128x128xbf16, #tpu.memory_space<vmem>>, vector<1x128x128xbf16>
    %191 = vector.shape_cast %190 : vector<1x128x128xbf16> to vector<128x128xbf16>
    %cst_157 = arith.constant dense<0.000000e+00> : vector<128x32xf32>
    %192 = tpu.matmul %191, %154, %cst_157 {dimension_numbers = #tpu.dot_dimension_numbers<[1], [0], [0], [1], [0, 0, 1, 1], [], []>} : vector<128x128xbf16>, vector<128x32xbf16>, vector<128x32xf32> -> vector<128x32xf32>
    %193 = arith.truncf %192 : vector<128x32xf32> to vector<128x32xbf16>
    %c5_158 = arith.constant 5 : index
    %c0_159 = arith.constant 0 : index
    %c0_160 = arith.constant 0 : index
    %194 = vector.load %arg14[%c5_158, %c0_159, %c0_160] : memref<9x32x8xbf16, #tpu.memory_space<vmem>>, vector<1x32x8xbf16>
    %195 = vector.shape_cast %194 : vector<1x32x8xbf16> to vector<32x8xbf16>
    %cst_161 = arith.constant dense<0.000000e+00> : vector<128x8xf32>
    %196 = tpu.matmul %193, %195, %cst_161 {dimension_numbers = #tpu.dot_dimension_numbers<[1], [0], [0], [1], [0, 0, 1, 1], [], []>} : vector<128x32xbf16>, vector<32x8xbf16>, vector<128x8xf32> -> vector<128x8xf32>
    %197 = arith.addf %189, %196 : vector<128x8xf32>
    %c5_162 = arith.constant 5 : index
    %c0_163 = arith.constant 0 : index
    %c0_164 = arith.constant 0 : index
    %198 = vector.load %arg2[%c5_162, %c0_163, %c0_164] : memref<8x128x128xbf16, #tpu.memory_space<vmem>>, vector<1x128x128xbf16>
    %199 = vector.shape_cast %198 : vector<1x128x128xbf16> to vector<128x128xbf16>
    %cst_165 = arith.constant dense<0.000000e+00> : vector<128x32xf32>
    %200 = tpu.matmul %199, %154, %cst_165 {dimension_numbers = #tpu.dot_dimension_numbers<[1], [0], [0], [1], [0, 0, 1, 1], [], []>} : vector<128x128xbf16>, vector<128x32xbf16>, vector<128x32xf32> -> vector<128x32xf32>
    %201 = arith.truncf %200 : vector<128x32xf32> to vector<128x32xbf16>
    %c6_166 = arith.constant 6 : index
    %c0_167 = arith.constant 0 : index
    %c0_168 = arith.constant 0 : index
    %202 = vector.load %arg14[%c6_166, %c0_167, %c0_168] : memref<9x32x8xbf16, #tpu.memory_space<vmem>>, vector<1x32x8xbf16>
    %203 = vector.shape_cast %202 : vector<1x32x8xbf16> to vector<32x8xbf16>
    %cst_169 = arith.constant dense<0.000000e+00> : vector<128x8xf32>
    %204 = tpu.matmul %201, %203, %cst_169 {dimension_numbers = #tpu.dot_dimension_numbers<[1], [0], [0], [1], [0, 0, 1, 1], [], []>} : vector<128x32xbf16>, vector<32x8xbf16>, vector<128x8xf32> -> vector<128x8xf32>
    %205 = arith.addf %197, %204 : vector<128x8xf32>
    %c6_170 = arith.constant 6 : index
    %c0_171 = arith.constant 0 : index
    %c0_172 = arith.constant 0 : index
    %206 = vector.load %arg2[%c6_170, %c0_171, %c0_172] : memref<8x128x128xbf16, #tpu.memory_space<vmem>>, vector<1x128x128xbf16>
    %207 = vector.shape_cast %206 : vector<1x128x128xbf16> to vector<128x128xbf16>
    %cst_173 = arith.constant dense<0.000000e+00> : vector<128x32xf32>
    %208 = tpu.matmul %207, %154, %cst_173 {dimension_numbers = #tpu.dot_dimension_numbers<[1], [0], [0], [1], [0, 0, 1, 1], [], []>} : vector<128x128xbf16>, vector<128x32xbf16>, vector<128x32xf32> -> vector<128x32xf32>
    %209 = arith.truncf %208 : vector<128x32xf32> to vector<128x32xbf16>
    %c7_174 = arith.constant 7 : index
    %c0_175 = arith.constant 0 : index
    %c0_176 = arith.constant 0 : index
    %210 = vector.load %arg14[%c7_174, %c0_175, %c0_176] : memref<9x32x8xbf16, #tpu.memory_space<vmem>>, vector<1x32x8xbf16>
    %211 = vector.shape_cast %210 : vector<1x32x8xbf16> to vector<32x8xbf16>
    %cst_177 = arith.constant dense<0.000000e+00> : vector<128x8xf32>
    %212 = tpu.matmul %209, %211, %cst_177 {dimension_numbers = #tpu.dot_dimension_numbers<[1], [0], [0], [1], [0, 0, 1, 1], [], []>} : vector<128x32xbf16>, vector<32x8xbf16>, vector<128x8xf32> -> vector<128x8xf32>
    %213 = arith.addf %205, %212 : vector<128x8xf32>
    %c7_178 = arith.constant 7 : index
    %c0_179 = arith.constant 0 : index
    %c0_180 = arith.constant 0 : index
    %214 = vector.load %arg2[%c7_178, %c0_179, %c0_180] : memref<8x128x128xbf16, #tpu.memory_space<vmem>>, vector<1x128x128xbf16>
    %215 = vector.shape_cast %214 : vector<1x128x128xbf16> to vector<128x128xbf16>
    %cst_181 = arith.constant dense<0.000000e+00> : vector<128x32xf32>
    %216 = tpu.matmul %215, %154, %cst_181 {dimension_numbers = #tpu.dot_dimension_numbers<[1], [0], [0], [1], [0, 0, 1, 1], [], []>} : vector<128x128xbf16>, vector<128x32xbf16>, vector<128x32xf32> -> vector<128x32xf32>
    %217 = arith.truncf %216 : vector<128x32xf32> to vector<128x32xbf16>
    %c8_182 = arith.constant 8 : index
    %c0_183 = arith.constant 0 : index
    %c0_184 = arith.constant 0 : index
    %218 = vector.load %arg14[%c8_182, %c0_183, %c0_184] : memref<9x32x8xbf16, #tpu.memory_space<vmem>>, vector<1x32x8xbf16>
    %219 = vector.shape_cast %218 : vector<1x32x8xbf16> to vector<32x8xbf16>
    %cst_185 = arith.constant dense<0.000000e+00> : vector<128x8xf32>
    %220 = tpu.matmul %217, %219, %cst_185 {dimension_numbers = #tpu.dot_dimension_numbers<[1], [0], [0], [1], [0, 0, 1, 1], [], []>} : vector<128x32xbf16>, vector<32x8xbf16>, vector<128x8xf32> -> vector<128x8xf32>
    %221 = arith.addf %213, %220 : vector<128x8xf32>
    %c0_186 = arith.constant 0 : index
    %c0_187 = arith.constant 0 : index
    %222 = vector.load %arg15[%c0_186, %c0_187] : memref<1x32xf32, #tpu.memory_space<vmem>>, vector<1x16xf32>
    %223 = vector.broadcast %222 : vector<1x16xf32> to vector<128x16xf32>
    %224 = arith.mulf %35, %223 : vector<128x16xf32>
    %c0_188 = arith.constant 0 : index
    %c0_189 = arith.constant 0 : index
    %225 = vector.load %arg16[%c0_188, %c0_189] : memref<1x32xf32, #tpu.memory_space<vmem>>, vector<1x16xf32>
    %226 = vector.broadcast %225 : vector<1x16xf32> to vector<128x16xf32>
    %227 = arith.addf %224, %226 : vector<128x16xf32>
    %cst_190 = arith.constant 0.000000e+00 : f32
    %228 = vector.broadcast %cst_190 : f32 to vector<128x16xf32>
    %229 = arith.maximumf %227, %228 : vector<128x16xf32>
    %230 = arith.truncf %229 : vector<128x16xf32> to vector<128x16xbf16>
    %c0_191 = arith.constant 0 : index
    %c0_192 = arith.constant 0 : index
    %231 = vector.load %arg17[%c0_191, %c0_192] : memref<32x128xbf16, #tpu.memory_space<vmem>>, vector<16x128xbf16>
    %cst_193 = arith.constant dense<0.000000e+00> : vector<128x128xf32>
    %232 = tpu.matmul %230, %231, %cst_193 {dimension_numbers = #tpu.dot_dimension_numbers<[1], [0], [0], [1], [0, 0, 1, 1], [], []>} : vector<128x16xbf16>, vector<16x128xbf16>, vector<128x128xf32> -> vector<128x128xf32>
    %c0_194 = arith.constant 0 : index
    %c16_195 = arith.constant 16 : index
    %233 = vector.load %arg15[%c0_194, %c16_195] : memref<1x32xf32, #tpu.memory_space<vmem>>, vector<1x8xf32>
    %234 = vector.broadcast %233 : vector<1x8xf32> to vector<128x8xf32>
    %235 = arith.mulf %122, %234 : vector<128x8xf32>
    %c0_196 = arith.constant 0 : index
    %c16_197 = arith.constant 16 : index
    %236 = vector.load %arg16[%c0_196, %c16_197] : memref<1x32xf32, #tpu.memory_space<vmem>>, vector<1x8xf32>
    %237 = vector.broadcast %236 : vector<1x8xf32> to vector<128x8xf32>
    %238 = arith.addf %235, %237 : vector<128x8xf32>
    %cst_198 = arith.constant 0.000000e+00 : f32
    %239 = vector.broadcast %cst_198 : f32 to vector<128x8xf32>
    %240 = arith.maximumf %238, %239 : vector<128x8xf32>
    %241 = arith.truncf %240 : vector<128x8xf32> to vector<128x8xbf16>
    %c16_199 = arith.constant 16 : index
    %c0_200 = arith.constant 0 : index
    %242 = vector.load %arg17[%c16_199, %c0_200] : memref<32x128xbf16, #tpu.memory_space<vmem>>, vector<8x128xbf16>
    %cst_201 = arith.constant dense<0.000000e+00> : vector<128x128xf32>
    %243 = tpu.matmul %241, %242, %cst_201 {dimension_numbers = #tpu.dot_dimension_numbers<[1], [0], [0], [1], [0, 0, 1, 1], [], []>} : vector<128x8xbf16>, vector<8x128xbf16>, vector<128x128xf32> -> vector<128x128xf32>
    %244 = arith.addf %232, %243 : vector<128x128xf32>
    %c0_202 = arith.constant 0 : index
    %c24 = arith.constant 24 : index
    %245 = vector.load %arg15[%c0_202, %c24] : memref<1x32xf32, #tpu.memory_space<vmem>>, vector<1x8xf32>
    %246 = vector.broadcast %245 : vector<1x8xf32> to vector<128x8xf32>
    %247 = arith.mulf %221, %246 : vector<128x8xf32>
    %c0_203 = arith.constant 0 : index
    %c24_204 = arith.constant 24 : index
    %248 = vector.load %arg16[%c0_203, %c24_204] : memref<1x32xf32, #tpu.memory_space<vmem>>, vector<1x8xf32>
    %249 = vector.broadcast %248 : vector<1x8xf32> to vector<128x8xf32>
    %250 = arith.addf %247, %249 : vector<128x8xf32>
    %cst_205 = arith.constant 0.000000e+00 : f32
    %251 = vector.broadcast %cst_205 : f32 to vector<128x8xf32>
    %252 = arith.maximumf %250, %251 : vector<128x8xf32>
    %253 = arith.truncf %252 : vector<128x8xf32> to vector<128x8xbf16>
    %c24_206 = arith.constant 24 : index
    %c0_207 = arith.constant 0 : index
    %254 = vector.load %arg17[%c24_206, %c0_207] : memref<32x128xbf16, #tpu.memory_space<vmem>>, vector<8x128xbf16>
    %cst_208 = arith.constant dense<0.000000e+00> : vector<128x128xf32>
    %255 = tpu.matmul %253, %254, %cst_208 {dimension_numbers = #tpu.dot_dimension_numbers<[1], [0], [0], [1], [0, 0, 1, 1], [], []>} : vector<128x8xbf16>, vector<8x128xbf16>, vector<128x128xf32> -> vector<128x128xf32>
    %256 = arith.addf %244, %255 : vector<128x128xf32>
    %257 = arith.truncf %256 : vector<128x128xf32> to vector<128x128xbf16>
    %c0_209 = arith.constant 0 : index
    %c0_210 = arith.constant 0 : index
    %258 = vector.load %arg18[%c0_209, %c0_210] : memref<128x128xbf16, #tpu.memory_space<vmem>>, vector<128x128xbf16>
    tpu.vector_store %arg18[%c0_209, %c0_210], %257 {strides = array<i32>} : memref<128x128xbf16, #tpu.memory_space<vmem>>, vector<128x128xbf16>,
    return
  }
  func.func @transform_0(%arg0: i32) -> (i32, i32, i32) {
    %c0_i32 = arith.constant 0 : i32
    %c0_i32_0 = arith.constant 0 : i32
    %c0_i32_1 = arith.constant 0 : i32
    %c0_i32_2 = arith.constant 0 : i32
    return %c0_i32, %c0_i32_0, %c0_i32_1 : i32, i32, i32
  }
  func.func @transform_1(%arg0: i32) -> (i32, i32, i32) {
    %c0_i32 = arith.constant 0 : i32
    %c0_i32_0 = arith.constant 0 : i32
    %c0_i32_1 = arith.constant 0 : i32
    %c0_i32_2 = arith.constant 0 : i32
    return %c0_i32, %c0_i32_0, %c0_i32_1 : i32, i32, i32
  }
  func.func @transform_2(%arg0: i32) -> (i32, i32) {
    %c0_i32 = arith.constant 0 : i32
    %c0_i32_0 = arith.constant 0 : i32
    %c0_i32_1 = arith.constant 0 : i32
    return %c0_i32, %c0_i32_0 : i32, i32
  }
  func.func @transform_3(%arg0: i32) -> (i32, i32) {
    %c0_i32 = arith.constant 0 : i32
    %c0_i32_0 = arith.constant 0 : i32
    %c0_i32_1 = arith.constant 0 : i32
    return %c0_i32, %c0_i32_0 : i32, i32
  }
  func.func @transform_4(%arg0: i32) -> (i32, i32) {
    %c0_i32 = arith.constant 0 : i32
    %c0_i32_0 = arith.constant 0 : i32
    %c0_i32_1 = arith.constant 0 : i32
    return %c0_i32, %c0_i32_0 : i32, i32
  }
  func.func @transform_5(%arg0: i32) -> (i32, i32) {
    %c0_i32 = arith.constant 0 : i32
    %c0_i32_0 = arith.constant 0 : i32
    %c0_i32_1 = arith.constant 0 : i32
    return %c0_i32, %c0_i32_0 : i32, i32
  }
  func.func @transform_6(%arg0: i32) -> (i32, i32) {
    %c0_i32 = arith.constant 0 : i32
    %c0_i32_0 = arith.constant 0 : i32
    %c0_i32_1 = arith.constant 0 : i32
    return %c0_i32, %c0_i32_0 : i32, i32
  }
  func.func @transform_7(%arg0: i32) -> (i32, i32, i32) {
    %c0_i32 = arith.constant 0 : i32
    %c0_i32_0 = arith.constant 0 : i32
    %c0_i32_1 = arith.constant 0 : i32
    %c0_i32_2 = arith.constant 0 : i32
    return %c0_i32, %c0_i32_0, %c0_i32_1 : i32, i32, i32
  }
  func.func @transform_8(%arg0: i32) -> (i32, i32) {
    %c0_i32 = arith.constant 0 : i32
    %c0_i32_0 = arith.constant 0 : i32
    %c0_i32_1 = arith.constant 0 : i32
    return %c0_i32, %c0_i32_0 : i32, i32
  }
  func.func @transform_9(%arg0: i32) -> (i32, i32) {
    %c0_i32 = arith.constant 0 : i32
    %c0_i32_0 = arith.constant 0 : i32
    %c0_i32_1 = arith.constant 0 : i32
    return %c0_i32, %c0_i32_0 : i32, i32
  }
  func.func @transform_10(%arg0: i32) -> (i32, i32) {
    %c0_i32 = arith.constant 0 : i32
    %c0_i32_0 = arith.constant 0 : i32
    %c0_i32_1 = arith.constant 0 : i32
    return %c0_i32, %c0_i32_0 : i32, i32
  }
  func.func @transform_11(%arg0: i32) -> (i32, i32) {
    %c0_i32 = arith.constant 0 : i32
    %c0_i32_0 = arith.constant 0 : i32
    %c0_i32_1 = arith.constant 0 : i32
    return %c0_i32, %c0_i32_0 : i32, i32
  }
  func.func @transform_12(%arg0: i32) -> (i32, i32) {
    %c0_i32 = arith.constant 0 : i32
    %c0_i32_0 = arith.constant 0 : i32
    %c0_i32_1 = arith.constant 0 : i32
    return %c0_i32, %c0_i32_0 : i32, i32
  }
  func.func @transform_13(%arg0: i32) -> (i32, i32, i32) {
    %c0_i32 = arith.constant 0 : i32
    %c0_i32_0 = arith.constant 0 : i32
    %c0_i32_1 = arith.constant 0 : i32
    %c0_i32_2 = arith.constant 0 : i32
    return %c0_i32, %c0_i32_0, %c0_i32_1 : i32, i32, i32
  }
  func.func @transform_14(%arg0: i32) -> (i32, i32) {
    %c0_i32 = arith.constant 0 : i32
    %c0_i32_0 = arith.constant 0 : i32
    %c0_i32_1 = arith.constant 0 : i32
    return %c0_i32, %c0_i32_0 : i32, i32
  }
  func.func @transform_15(%arg0: i32) -> (i32, i32) {
    %c0_i32 = arith.constant 0 : i32
    %c0_i32_0 = arith.constant 0 : i32
    %c0_i32_1 = arith.constant 0 : i32
    return %c0_i32, %c0_i32_0 : i32, i32
  }
  func.func @transform_16(%arg0: i32) -> (i32, i32) {
    %c0_i32 = arith.constant 0 : i32
    %c0_i32_0 = arith.constant 0 : i32
    %c0_i32_1 = arith.constant 0 : i32
    return %c0_i32, %c0_i32_0 : i32, i32
  }
  func.func @transform_17(%arg0: i32) -> (i32, i32) {
    %c0_i32 = arith.constant 0 : i32
    %c0_i32_0 = arith.constant 0 : i32
    %c0_i32_1 = arith.constant 0 : i32
    return %c0_i32, %c0_i32_0 : i32, i32
  }
}

module attributes {stable_mosaic.version = 11 : i64} {
  func.func @kernel(%arg0: i32, %arg1: memref<4x32x128xbf16, #tpu.memory_space<vmem>>, %arg2: memref<8x32x32xbf16, #tpu.memory_space<vmem>>, %arg3: memref<1x16xf32, #tpu.memory_space<vmem>>, %arg4: memref<1x16xf32, #tpu.memory_space<vmem>>, %arg5: memref<16x32xbf16, #tpu.memory_space<vmem>>, %arg6: memref<1x32xf32, #tpu.memory_space<vmem>>, %arg7: memref<1x32xf32, #tpu.memory_space<vmem>>, %arg8: memref<9x32x8xbf16, #tpu.memory_space<vmem>>, %arg9: memref<1x24xf32, #tpu.memory_space<vmem>>, %arg10: memref<1x24xf32, #tpu.memory_space<vmem>>, %arg11: memref<24x32xbf16, #tpu.memory_space<vmem>>, %arg12: memref<1x32xf32, #tpu.memory_space<vmem>>, %arg13: memref<1x32xf32, #tpu.memory_space<vmem>>, %arg14: memref<9x32x8xbf16, #tpu.memory_space<vmem>>, %arg15: memref<1x32xf32, #tpu.memory_space<vmem>>, %arg16: memref<1x32xf32, #tpu.memory_space<vmem>>, %arg17: memref<32x128xbf16, #tpu.memory_space<vmem>>, %arg18: memref<32x128xbf16, #tpu.memory_space<vmem>>) attributes {dimension_semantics = [#tpu.dimension_semantics<arbitrary>], iteration_bounds = array<i64: 1>, scalar_prefetch = 0 : i64, scratch_operands = 0 : i64, tpu.core_type = #tpu.core_type<tc>, window_params = [{pipeline_mode = #tpu.pipeline_mode<synchronous>, transform_indices = @transform_0, window_bounds = array<i64: 4, 32, 128>}, {pipeline_mode = #tpu.pipeline_mode<synchronous>, transform_indices = @transform_1, window_bounds = array<i64: 8, 32, 32>}, {pipeline_mode = #tpu.pipeline_mode<synchronous>, transform_indices = @transform_2, window_bounds = array<i64: 1, 16>}, {pipeline_mode = #tpu.pipeline_mode<synchronous>, transform_indices = @transform_3, window_bounds = array<i64: 1, 16>}, {pipeline_mode = #tpu.pipeline_mode<synchronous>, transform_indices = @transform_4, window_bounds = array<i64: 16, 32>}, {pipeline_mode = #tpu.pipeline_mode<synchronous>, transform_indices = @transform_5, window_bounds = array<i64: 1, 32>}, {pipeline_mode = #tpu.pipeline_mode<synchronous>, transform_indices = @transform_6, window_bounds = array<i64: 1, 32>}, {pipeline_mode = #tpu.pipeline_mode<synchronous>, transform_indices = @transform_7, window_bounds = array<i64: 9, 32, 8>}, {pipeline_mode = #tpu.pipeline_mode<synchronous>, transform_indices = @transform_8, window_bounds = array<i64: 1, 24>}, {pipeline_mode = #tpu.pipeline_mode<synchronous>, transform_indices = @transform_9, window_bounds = array<i64: 1, 24>}, {pipeline_mode = #tpu.pipeline_mode<synchronous>, transform_indices = @transform_10, window_bounds = array<i64: 24, 32>}, {pipeline_mode = #tpu.pipeline_mode<synchronous>, transform_indices = @transform_11, window_bounds = array<i64: 1, 32>}, {pipeline_mode = #tpu.pipeline_mode<synchronous>, transform_indices = @transform_12, window_bounds = array<i64: 1, 32>}, {pipeline_mode = #tpu.pipeline_mode<synchronous>, transform_indices = @transform_13, window_bounds = array<i64: 9, 32, 8>}, {pipeline_mode = #tpu.pipeline_mode<synchronous>, transform_indices = @transform_14, window_bounds = array<i64: 1, 32>}, {pipeline_mode = #tpu.pipeline_mode<synchronous>, transform_indices = @transform_15, window_bounds = array<i64: 1, 32>}, {pipeline_mode = #tpu.pipeline_mode<synchronous>, transform_indices = @transform_16, window_bounds = array<i64: 32, 128>}, {pipeline_mode = #tpu.pipeline_mode<synchronous>, transform_indices = @transform_17, window_bounds = array<i64: 32, 128>}]} {
    %c0 = arith.constant 0 : index
    %c0_0 = arith.constant 0 : index
    %c0_1 = arith.constant 0 : index
    %0 = vector.load %arg1[%c0, %c0_0, %c0_1] : memref<4x32x128xbf16, #tpu.memory_space<vmem>>, vector<1x32x128xbf16>
    %1 = vector.shape_cast %0 : vector<1x32x128xbf16> to vector<32x128xbf16>
    %2 = arith.extf %1 : vector<32x128xbf16> to vector<32x128xf32>
    %c1 = arith.constant 1 : index
    %c0_2 = arith.constant 0 : index
    %c0_3 = arith.constant 0 : index
    %3 = vector.load %arg1[%c1, %c0_2, %c0_3] : memref<4x32x128xbf16, #tpu.memory_space<vmem>>, vector<1x32x128xbf16>
    %4 = vector.shape_cast %3 : vector<1x32x128xbf16> to vector<32x128xbf16>
    %5 = arith.extf %4 : vector<32x128xbf16> to vector<32x128xf32>
    %6 = arith.addf %2, %5 : vector<32x128xf32>
    %c2 = arith.constant 2 : index
    %c0_4 = arith.constant 0 : index
    %c0_5 = arith.constant 0 : index
    %7 = vector.load %arg1[%c2, %c0_4, %c0_5] : memref<4x32x128xbf16, #tpu.memory_space<vmem>>, vector<1x32x128xbf16>
    %8 = vector.shape_cast %7 : vector<1x32x128xbf16> to vector<32x128xbf16>
    %9 = arith.extf %8 : vector<32x128xbf16> to vector<32x128xf32>
    %10 = arith.addf %6, %9 : vector<32x128xf32>
    %c3 = arith.constant 3 : index
    %c0_6 = arith.constant 0 : index
    %c0_7 = arith.constant 0 : index
    %11 = vector.load %arg1[%c3, %c0_6, %c0_7] : memref<4x32x128xbf16, #tpu.memory_space<vmem>>, vector<1x32x128xbf16>
    %12 = vector.shape_cast %11 : vector<1x32x128xbf16> to vector<32x128xbf16>
    %13 = arith.extf %12 : vector<32x128xbf16> to vector<32x128xf32>
    %14 = arith.addf %10, %13 : vector<32x128xf32>
    %cst = arith.constant 2.500000e-01 : f32
    %15 = vector.broadcast %cst : f32 to vector<32x128xf32>
    %16 = arith.mulf %14, %15 : vector<32x128xf32>
    %17 = vector.extract_strided_slice %16 {offsets = [0, 0], sizes = [32, 16], strides = [1, 1]} : vector<32x128xf32> to vector<32x16xf32>
    %c0_8 = arith.constant 0 : index
    %c0_9 = arith.constant 0 : index
    %18 = vector.load %arg3[%c0_8, %c0_9] : memref<1x16xf32, #tpu.memory_space<vmem>>, vector<1x16xf32>
    %19 = vector.broadcast %18 : vector<1x16xf32> to vector<32x16xf32>
    %20 = arith.mulf %17, %19 : vector<32x16xf32>
    %c0_10 = arith.constant 0 : index
    %c0_11 = arith.constant 0 : index
    %21 = vector.load %arg4[%c0_10, %c0_11] : memref<1x16xf32, #tpu.memory_space<vmem>>, vector<1x16xf32>
    %22 = vector.broadcast %21 : vector<1x16xf32> to vector<32x16xf32>
    %23 = arith.addf %20, %22 : vector<32x16xf32>
    %cst_12 = arith.constant 0.000000e+00 : f32
    %24 = vector.broadcast %cst_12 : f32 to vector<32x16xf32>
    %25 = arith.maximumf %23, %24 : vector<32x16xf32>
    %26 = arith.truncf %25 : vector<32x16xf32> to vector<32x16xbf16>
    %c0_13 = arith.constant 0 : index
    %c0_14 = arith.constant 0 : index
    %27 = vector.load %arg5[%c0_13, %c0_14] : memref<16x32xbf16, #tpu.memory_space<vmem>>, vector<16x32xbf16>
    %cst_15 = arith.constant dense<0.000000e+00> : vector<32x32xf32>
    %28 = tpu.matmul %26, %27, %cst_15 {dimension_numbers = #tpu.dot_dimension_numbers<[1], [0], [0], [1], [0, 0, 1, 1], [], []>} : vector<32x16xbf16>, vector<16x32xbf16>, vector<32x32xf32> -> vector<32x32xf32>
    %c0_16 = arith.constant 0 : index
    %c0_17 = arith.constant 0 : index
    %29 = vector.load %arg6[%c0_16, %c0_17] : memref<1x32xf32, #tpu.memory_space<vmem>>, vector<1x32xf32>
    %30 = vector.broadcast %29 : vector<1x32xf32> to vector<32x32xf32>
    %31 = arith.mulf %28, %30 : vector<32x32xf32>
    %c0_18 = arith.constant 0 : index
    %c0_19 = arith.constant 0 : index
    %32 = vector.load %arg7[%c0_18, %c0_19] : memref<1x32xf32, #tpu.memory_space<vmem>>, vector<1x32xf32>
    %33 = vector.broadcast %32 : vector<1x32xf32> to vector<32x32xf32>
    %34 = arith.addf %31, %33 : vector<32x32xf32>
    %cst_20 = arith.constant 0.000000e+00 : f32
    %35 = vector.broadcast %cst_20 : f32 to vector<32x32xf32>
    %36 = arith.maximumf %34, %35 : vector<32x32xf32>
    %37 = arith.truncf %36 : vector<32x32xf32> to vector<32x32xbf16>
    %c4 = arith.constant 4 : index
    %c0_21 = arith.constant 0 : index
    %c0_22 = arith.constant 0 : index
    %38 = vector.load %arg8[%c4, %c0_21, %c0_22] : memref<9x32x8xbf16, #tpu.memory_space<vmem>>, vector<1x32x8xbf16>
    %39 = vector.shape_cast %38 : vector<1x32x8xbf16> to vector<32x8xbf16>
    %cst_23 = arith.constant dense<0.000000e+00> : vector<32x8xf32>
    %40 = tpu.matmul %37, %39, %cst_23 {dimension_numbers = #tpu.dot_dimension_numbers<[1], [0], [0], [1], [0, 0, 1, 1], [], []>} : vector<32x32xbf16>, vector<32x8xbf16>, vector<32x8xf32> -> vector<32x8xf32>
    %c0_24 = arith.constant 0 : index
    %c0_25 = arith.constant 0 : index
    %c0_26 = arith.constant 0 : index
    %41 = vector.load %arg2[%c0_24, %c0_25, %c0_26] : memref<8x32x32xbf16, #tpu.memory_space<vmem>>, vector<1x32x32xbf16>
    %42 = vector.shape_cast %41 : vector<1x32x32xbf16> to vector<32x32xbf16>
    %cst_27 = arith.constant dense<0.000000e+00> : vector<32x32xf32>
    %43 = tpu.matmul %42, %37, %cst_27 {dimension_numbers = #tpu.dot_dimension_numbers<[1], [0], [0], [1], [0, 0, 1, 1], [], []>} : vector<32x32xbf16>, vector<32x32xbf16>, vector<32x32xf32> -> vector<32x32xf32>
    %44 = arith.truncf %43 : vector<32x32xf32> to vector<32x32xbf16>
    %c0_28 = arith.constant 0 : index
    %c0_29 = arith.constant 0 : index
    %c0_30 = arith.constant 0 : index
    %45 = vector.load %arg8[%c0_28, %c0_29, %c0_30] : memref<9x32x8xbf16, #tpu.memory_space<vmem>>, vector<1x32x8xbf16>
    %46 = vector.shape_cast %45 : vector<1x32x8xbf16> to vector<32x8xbf16>
    %cst_31 = arith.constant dense<0.000000e+00> : vector<32x8xf32>
    %47 = tpu.matmul %44, %46, %cst_31 {dimension_numbers = #tpu.dot_dimension_numbers<[1], [0], [0], [1], [0, 0, 1, 1], [], []>} : vector<32x32xbf16>, vector<32x8xbf16>, vector<32x8xf32> -> vector<32x8xf32>
    %48 = arith.addf %40, %47 : vector<32x8xf32>
    %c1_32 = arith.constant 1 : index
    %c0_33 = arith.constant 0 : index
    %c0_34 = arith.constant 0 : index
    %49 = vector.load %arg2[%c1_32, %c0_33, %c0_34] : memref<8x32x32xbf16, #tpu.memory_space<vmem>>, vector<1x32x32xbf16>
    %50 = vector.shape_cast %49 : vector<1x32x32xbf16> to vector<32x32xbf16>
    %cst_35 = arith.constant dense<0.000000e+00> : vector<32x32xf32>
    %51 = tpu.matmul %50, %37, %cst_35 {dimension_numbers = #tpu.dot_dimension_numbers<[1], [0], [0], [1], [0, 0, 1, 1], [], []>} : vector<32x32xbf16>, vector<32x32xbf16>, vector<32x32xf32> -> vector<32x32xf32>
    %52 = arith.truncf %51 : vector<32x32xf32> to vector<32x32xbf16>
    %c1_36 = arith.constant 1 : index
    %c0_37 = arith.constant 0 : index
    %c0_38 = arith.constant 0 : index
    %53 = vector.load %arg8[%c1_36, %c0_37, %c0_38] : memref<9x32x8xbf16, #tpu.memory_space<vmem>>, vector<1x32x8xbf16>
    %54 = vector.shape_cast %53 : vector<1x32x8xbf16> to vector<32x8xbf16>
    %cst_39 = arith.constant dense<0.000000e+00> : vector<32x8xf32>
    %55 = tpu.matmul %52, %54, %cst_39 {dimension_numbers = #tpu.dot_dimension_numbers<[1], [0], [0], [1], [0, 0, 1, 1], [], []>} : vector<32x32xbf16>, vector<32x8xbf16>, vector<32x8xf32> -> vector<32x8xf32>
    %56 = arith.addf %48, %55 : vector<32x8xf32>
    %c2_40 = arith.constant 2 : index
    %c0_41 = arith.constant 0 : index
    %c0_42 = arith.constant 0 : index
    %57 = vector.load %arg2[%c2_40, %c0_41, %c0_42] : memref<8x32x32xbf16, #tpu.memory_space<vmem>>, vector<1x32x32xbf16>
    %58 = vector.shape_cast %57 : vector<1x32x32xbf16> to vector<32x32xbf16>
    %cst_43 = arith.constant dense<0.000000e+00> : vector<32x32xf32>
    %59 = tpu.matmul %58, %37, %cst_43 {dimension_numbers = #tpu.dot_dimension_numbers<[1], [0], [0], [1], [0, 0, 1, 1], [], []>} : vector<32x32xbf16>, vector<32x32xbf16>, vector<32x32xf32> -> vector<32x32xf32>
    %60 = arith.truncf %59 : vector<32x32xf32> to vector<32x32xbf16>
    %c2_44 = arith.constant 2 : index
    %c0_45 = arith.constant 0 : index
    %c0_46 = arith.constant 0 : index
    %61 = vector.load %arg8[%c2_44, %c0_45, %c0_46] : memref<9x32x8xbf16, #tpu.memory_space<vmem>>, vector<1x32x8xbf16>
    %62 = vector.shape_cast %61 : vector<1x32x8xbf16> to vector<32x8xbf16>
    %cst_47 = arith.constant dense<0.000000e+00> : vector<32x8xf32>
    %63 = tpu.matmul %60, %62, %cst_47 {dimension_numbers = #tpu.dot_dimension_numbers<[1], [0], [0], [1], [0, 0, 1, 1], [], []>} : vector<32x32xbf16>, vector<32x8xbf16>, vector<32x8xf32> -> vector<32x8xf32>
    %64 = arith.addf %56, %63 : vector<32x8xf32>
    %c3_48 = arith.constant 3 : index
    %c0_49 = arith.constant 0 : index
    %c0_50 = arith.constant 0 : index
    %65 = vector.load %arg2[%c3_48, %c0_49, %c0_50] : memref<8x32x32xbf16, #tpu.memory_space<vmem>>, vector<1x32x32xbf16>
    %66 = vector.shape_cast %65 : vector<1x32x32xbf16> to vector<32x32xbf16>
    %cst_51 = arith.constant dense<0.000000e+00> : vector<32x32xf32>
    %67 = tpu.matmul %66, %37, %cst_51 {dimension_numbers = #tpu.dot_dimension_numbers<[1], [0], [0], [1], [0, 0, 1, 1], [], []>} : vector<32x32xbf16>, vector<32x32xbf16>, vector<32x32xf32> -> vector<32x32xf32>
    %68 = arith.truncf %67 : vector<32x32xf32> to vector<32x32xbf16>
    %c3_52 = arith.constant 3 : index
    %c0_53 = arith.constant 0 : index
    %c0_54 = arith.constant 0 : index
    %69 = vector.load %arg8[%c3_52, %c0_53, %c0_54] : memref<9x32x8xbf16, #tpu.memory_space<vmem>>, vector<1x32x8xbf16>
    %70 = vector.shape_cast %69 : vector<1x32x8xbf16> to vector<32x8xbf16>
    %cst_55 = arith.constant dense<0.000000e+00> : vector<32x8xf32>
    %71 = tpu.matmul %68, %70, %cst_55 {dimension_numbers = #tpu.dot_dimension_numbers<[1], [0], [0], [1], [0, 0, 1, 1], [], []>} : vector<32x32xbf16>, vector<32x8xbf16>, vector<32x8xf32> -> vector<32x8xf32>
    %72 = arith.addf %64, %71 : vector<32x8xf32>
    %c4_56 = arith.constant 4 : index
    %c0_57 = arith.constant 0 : index
    %c0_58 = arith.constant 0 : index
    %73 = vector.load %arg2[%c4_56, %c0_57, %c0_58] : memref<8x32x32xbf16, #tpu.memory_space<vmem>>, vector<1x32x32xbf16>
    %74 = vector.shape_cast %73 : vector<1x32x32xbf16> to vector<32x32xbf16>
    %cst_59 = arith.constant dense<0.000000e+00> : vector<32x32xf32>
    %75 = tpu.matmul %74, %37, %cst_59 {dimension_numbers = #tpu.dot_dimension_numbers<[1], [0], [0], [1], [0, 0, 1, 1], [], []>} : vector<32x32xbf16>, vector<32x32xbf16>, vector<32x32xf32> -> vector<32x32xf32>
    %76 = arith.truncf %75 : vector<32x32xf32> to vector<32x32xbf16>
    %c5 = arith.constant 5 : index
    %c0_60 = arith.constant 0 : index
    %c0_61 = arith.constant 0 : index
    %77 = vector.load %arg8[%c5, %c0_60, %c0_61] : memref<9x32x8xbf16, #tpu.memory_space<vmem>>, vector<1x32x8xbf16>
    %78 = vector.shape_cast %77 : vector<1x32x8xbf16> to vector<32x8xbf16>
    %cst_62 = arith.constant dense<0.000000e+00> : vector<32x8xf32>
    %79 = tpu.matmul %76, %78, %cst_62 {dimension_numbers = #tpu.dot_dimension_numbers<[1], [0], [0], [1], [0, 0, 1, 1], [], []>} : vector<32x32xbf16>, vector<32x8xbf16>, vector<32x8xf32> -> vector<32x8xf32>
    %80 = arith.addf %72, %79 : vector<32x8xf32>
    %c5_63 = arith.constant 5 : index
    %c0_64 = arith.constant 0 : index
    %c0_65 = arith.constant 0 : index
    %81 = vector.load %arg2[%c5_63, %c0_64, %c0_65] : memref<8x32x32xbf16, #tpu.memory_space<vmem>>, vector<1x32x32xbf16>
    %82 = vector.shape_cast %81 : vector<1x32x32xbf16> to vector<32x32xbf16>
    %cst_66 = arith.constant dense<0.000000e+00> : vector<32x32xf32>
    %83 = tpu.matmul %82, %37, %cst_66 {dimension_numbers = #tpu.dot_dimension_numbers<[1], [0], [0], [1], [0, 0, 1, 1], [], []>} : vector<32x32xbf16>, vector<32x32xbf16>, vector<32x32xf32> -> vector<32x32xf32>
    %84 = arith.truncf %83 : vector<32x32xf32> to vector<32x32xbf16>
    %c6 = arith.constant 6 : index
    %c0_67 = arith.constant 0 : index
    %c0_68 = arith.constant 0 : index
    %85 = vector.load %arg8[%c6, %c0_67, %c0_68] : memref<9x32x8xbf16, #tpu.memory_space<vmem>>, vector<1x32x8xbf16>
    %86 = vector.shape_cast %85 : vector<1x32x8xbf16> to vector<32x8xbf16>
    %cst_69 = arith.constant dense<0.000000e+00> : vector<32x8xf32>
    %87 = tpu.matmul %84, %86, %cst_69 {dimension_numbers = #tpu.dot_dimension_numbers<[1], [0], [0], [1], [0, 0, 1, 1], [], []>} : vector<32x32xbf16>, vector<32x8xbf16>, vector<32x8xf32> -> vector<32x8xf32>
    %88 = arith.addf %80, %87 : vector<32x8xf32>
    %c6_70 = arith.constant 6 : index
    %c0_71 = arith.constant 0 : index
    %c0_72 = arith.constant 0 : index
    %89 = vector.load %arg2[%c6_70, %c0_71, %c0_72] : memref<8x32x32xbf16, #tpu.memory_space<vmem>>, vector<1x32x32xbf16>
    %90 = vector.shape_cast %89 : vector<1x32x32xbf16> to vector<32x32xbf16>
    %cst_73 = arith.constant dense<0.000000e+00> : vector<32x32xf32>
    %91 = tpu.matmul %90, %37, %cst_73 {dimension_numbers = #tpu.dot_dimension_numbers<[1], [0], [0], [1], [0, 0, 1, 1], [], []>} : vector<32x32xbf16>, vector<32x32xbf16>, vector<32x32xf32> -> vector<32x32xf32>
    %92 = arith.truncf %91 : vector<32x32xf32> to vector<32x32xbf16>
    %c7 = arith.constant 7 : index
    %c0_74 = arith.constant 0 : index
    %c0_75 = arith.constant 0 : index
    %93 = vector.load %arg8[%c7, %c0_74, %c0_75] : memref<9x32x8xbf16, #tpu.memory_space<vmem>>, vector<1x32x8xbf16>
    %94 = vector.shape_cast %93 : vector<1x32x8xbf16> to vector<32x8xbf16>
    %cst_76 = arith.constant dense<0.000000e+00> : vector<32x8xf32>
    %95 = tpu.matmul %92, %94, %cst_76 {dimension_numbers = #tpu.dot_dimension_numbers<[1], [0], [0], [1], [0, 0, 1, 1], [], []>} : vector<32x32xbf16>, vector<32x8xbf16>, vector<32x8xf32> -> vector<32x8xf32>
    %96 = arith.addf %88, %95 : vector<32x8xf32>
    %c7_77 = arith.constant 7 : index
    %c0_78 = arith.constant 0 : index
    %c0_79 = arith.constant 0 : index
    %97 = vector.load %arg2[%c7_77, %c0_78, %c0_79] : memref<8x32x32xbf16, #tpu.memory_space<vmem>>, vector<1x32x32xbf16>
    %98 = vector.shape_cast %97 : vector<1x32x32xbf16> to vector<32x32xbf16>
    %cst_80 = arith.constant dense<0.000000e+00> : vector<32x32xf32>
    %99 = tpu.matmul %98, %37, %cst_80 {dimension_numbers = #tpu.dot_dimension_numbers<[1], [0], [0], [1], [0, 0, 1, 1], [], []>} : vector<32x32xbf16>, vector<32x32xbf16>, vector<32x32xf32> -> vector<32x32xf32>
    %100 = arith.truncf %99 : vector<32x32xf32> to vector<32x32xbf16>
    %c8 = arith.constant 8 : index
    %c0_81 = arith.constant 0 : index
    %c0_82 = arith.constant 0 : index
    %101 = vector.load %arg8[%c8, %c0_81, %c0_82] : memref<9x32x8xbf16, #tpu.memory_space<vmem>>, vector<1x32x8xbf16>
    %102 = vector.shape_cast %101 : vector<1x32x8xbf16> to vector<32x8xbf16>
    %cst_83 = arith.constant dense<0.000000e+00> : vector<32x8xf32>
    %103 = tpu.matmul %100, %102, %cst_83 {dimension_numbers = #tpu.dot_dimension_numbers<[1], [0], [0], [1], [0, 0, 1, 1], [], []>} : vector<32x32xbf16>, vector<32x8xbf16>, vector<32x8xf32> -> vector<32x8xf32>
    %104 = arith.addf %96, %103 : vector<32x8xf32>
    %c0_84 = arith.constant 0 : index
    %c0_85 = arith.constant 0 : index
    %105 = vector.load %arg9[%c0_84, %c0_85] : memref<1x24xf32, #tpu.memory_space<vmem>>, vector<1x16xf32>
    %106 = vector.broadcast %105 : vector<1x16xf32> to vector<32x16xf32>
    %107 = arith.mulf %17, %106 : vector<32x16xf32>
    %c0_86 = arith.constant 0 : index
    %c0_87 = arith.constant 0 : index
    %108 = vector.load %arg10[%c0_86, %c0_87] : memref<1x24xf32, #tpu.memory_space<vmem>>, vector<1x16xf32>
    %109 = vector.broadcast %108 : vector<1x16xf32> to vector<32x16xf32>
    %110 = arith.addf %107, %109 : vector<32x16xf32>
    %cst_88 = arith.constant 0.000000e+00 : f32
    %111 = vector.broadcast %cst_88 : f32 to vector<32x16xf32>
    %112 = arith.maximumf %110, %111 : vector<32x16xf32>
    %113 = arith.truncf %112 : vector<32x16xf32> to vector<32x16xbf16>
    %c0_89 = arith.constant 0 : index
    %c0_90 = arith.constant 0 : index
    %114 = vector.load %arg11[%c0_89, %c0_90] : memref<24x32xbf16, #tpu.memory_space<vmem>>, vector<16x32xbf16>
    %cst_91 = arith.constant dense<0.000000e+00> : vector<32x32xf32>
    %115 = tpu.matmul %113, %114, %cst_91 {dimension_numbers = #tpu.dot_dimension_numbers<[1], [0], [0], [1], [0, 0, 1, 1], [], []>} : vector<32x16xbf16>, vector<16x32xbf16>, vector<32x32xf32> -> vector<32x32xf32>
    %c0_92 = arith.constant 0 : index
    %c16 = arith.constant 16 : index
    %116 = vector.load %arg9[%c0_92, %c16] : memref<1x24xf32, #tpu.memory_space<vmem>>, vector<1x8xf32>
    %117 = vector.broadcast %116 : vector<1x8xf32> to vector<32x8xf32>
    %118 = arith.mulf %104, %117 : vector<32x8xf32>
    %c0_93 = arith.constant 0 : index
    %c16_94 = arith.constant 16 : index
    %119 = vector.load %arg10[%c0_93, %c16_94] : memref<1x24xf32, #tpu.memory_space<vmem>>, vector<1x8xf32>
    %120 = vector.broadcast %119 : vector<1x8xf32> to vector<32x8xf32>
    %121 = arith.addf %118, %120 : vector<32x8xf32>
    %cst_95 = arith.constant 0.000000e+00 : f32
    %122 = vector.broadcast %cst_95 : f32 to vector<32x8xf32>
    %123 = arith.maximumf %121, %122 : vector<32x8xf32>
    %124 = arith.truncf %123 : vector<32x8xf32> to vector<32x8xbf16>
    %c16_96 = arith.constant 16 : index
    %c0_97 = arith.constant 0 : index
    %125 = vector.load %arg11[%c16_96, %c0_97] : memref<24x32xbf16, #tpu.memory_space<vmem>>, vector<8x32xbf16>
    %cst_98 = arith.constant dense<0.000000e+00> : vector<32x32xf32>
    %126 = tpu.matmul %124, %125, %cst_98 {dimension_numbers = #tpu.dot_dimension_numbers<[1], [0], [0], [1], [0, 0, 1, 1], [], []>} : vector<32x8xbf16>, vector<8x32xbf16>, vector<32x32xf32> -> vector<32x32xf32>
    %127 = arith.addf %115, %126 : vector<32x32xf32>
    %c0_99 = arith.constant 0 : index
    %c0_100 = arith.constant 0 : index
    %128 = vector.load %arg12[%c0_99, %c0_100] : memref<1x32xf32, #tpu.memory_space<vmem>>, vector<1x32xf32>
    %129 = vector.broadcast %128 : vector<1x32xf32> to vector<32x32xf32>
    %130 = arith.mulf %127, %129 : vector<32x32xf32>
    %c0_101 = arith.constant 0 : index
    %c0_102 = arith.constant 0 : index
    %131 = vector.load %arg13[%c0_101, %c0_102] : memref<1x32xf32, #tpu.memory_space<vmem>>, vector<1x32xf32>
    %132 = vector.broadcast %131 : vector<1x32xf32> to vector<32x32xf32>
    %133 = arith.addf %130, %132 : vector<32x32xf32>
    %cst_103 = arith.constant 0.000000e+00 : f32
    %134 = vector.broadcast %cst_103 : f32 to vector<32x32xf32>
    %135 = arith.maximumf %133, %134 : vector<32x32xf32>
    %136 = arith.truncf %135 : vector<32x32xf32> to vector<32x32xbf16>
    %c4_104 = arith.constant 4 : index
    %c0_105 = arith.constant 0 : index
    %c0_106 = arith.constant 0 : index
    %137 = vector.load %arg14[%c4_104, %c0_105, %c0_106] : memref<9x32x8xbf16, #tpu.memory_space<vmem>>, vector<1x32x8xbf16>
    %138 = vector.shape_cast %137 : vector<1x32x8xbf16> to vector<32x8xbf16>
    %cst_107 = arith.constant dense<0.000000e+00> : vector<32x8xf32>
    %139 = tpu.matmul %136, %138, %cst_107 {dimension_numbers = #tpu.dot_dimension_numbers<[1], [0], [0], [1], [0, 0, 1, 1], [], []>} : vector<32x32xbf16>, vector<32x8xbf16>, vector<32x8xf32> -> vector<32x8xf32>
    %c0_108 = arith.constant 0 : index
    %c0_109 = arith.constant 0 : index
    %c0_110 = arith.constant 0 : index
    %140 = vector.load %arg2[%c0_108, %c0_109, %c0_110] : memref<8x32x32xbf16, #tpu.memory_space<vmem>>, vector<1x32x32xbf16>
    %141 = vector.shape_cast %140 : vector<1x32x32xbf16> to vector<32x32xbf16>
    %cst_111 = arith.constant dense<0.000000e+00> : vector<32x32xf32>
    %142 = tpu.matmul %141, %136, %cst_111 {dimension_numbers = #tpu.dot_dimension_numbers<[1], [0], [0], [1], [0, 0, 1, 1], [], []>} : vector<32x32xbf16>, vector<32x32xbf16>, vector<32x32xf32> -> vector<32x32xf32>
    %143 = arith.truncf %142 : vector<32x32xf32> to vector<32x32xbf16>
    %c0_112 = arith.constant 0 : index
    %c0_113 = arith.constant 0 : index
    %c0_114 = arith.constant 0 : index
    %144 = vector.load %arg14[%c0_112, %c0_113, %c0_114] : memref<9x32x8xbf16, #tpu.memory_space<vmem>>, vector<1x32x8xbf16>
    %145 = vector.shape_cast %144 : vector<1x32x8xbf16> to vector<32x8xbf16>
    %cst_115 = arith.constant dense<0.000000e+00> : vector<32x8xf32>
    %146 = tpu.matmul %143, %145, %cst_115 {dimension_numbers = #tpu.dot_dimension_numbers<[1], [0], [0], [1], [0, 0, 1, 1], [], []>} : vector<32x32xbf16>, vector<32x8xbf16>, vector<32x8xf32> -> vector<32x8xf32>
    %147 = arith.addf %139, %146 : vector<32x8xf32>
    %c1_116 = arith.constant 1 : index
    %c0_117 = arith.constant 0 : index
    %c0_118 = arith.constant 0 : index
    %148 = vector.load %arg2[%c1_116, %c0_117, %c0_118] : memref<8x32x32xbf16, #tpu.memory_space<vmem>>, vector<1x32x32xbf16>
    %149 = vector.shape_cast %148 : vector<1x32x32xbf16> to vector<32x32xbf16>
    %cst_119 = arith.constant dense<0.000000e+00> : vector<32x32xf32>
    %150 = tpu.matmul %149, %136, %cst_119 {dimension_numbers = #tpu.dot_dimension_numbers<[1], [0], [0], [1], [0, 0, 1, 1], [], []>} : vector<32x32xbf16>, vector<32x32xbf16>, vector<32x32xf32> -> vector<32x32xf32>
    %151 = arith.truncf %150 : vector<32x32xf32> to vector<32x32xbf16>
    %c1_120 = arith.constant 1 : index
    %c0_121 = arith.constant 0 : index
    %c0_122 = arith.constant 0 : index
    %152 = vector.load %arg14[%c1_120, %c0_121, %c0_122] : memref<9x32x8xbf16, #tpu.memory_space<vmem>>, vector<1x32x8xbf16>
    %153 = vector.shape_cast %152 : vector<1x32x8xbf16> to vector<32x8xbf16>
    %cst_123 = arith.constant dense<0.000000e+00> : vector<32x8xf32>
    %154 = tpu.matmul %151, %153, %cst_123 {dimension_numbers = #tpu.dot_dimension_numbers<[1], [0], [0], [1], [0, 0, 1, 1], [], []>} : vector<32x32xbf16>, vector<32x8xbf16>, vector<32x8xf32> -> vector<32x8xf32>
    %155 = arith.addf %147, %154 : vector<32x8xf32>
    %c2_124 = arith.constant 2 : index
    %c0_125 = arith.constant 0 : index
    %c0_126 = arith.constant 0 : index
    %156 = vector.load %arg2[%c2_124, %c0_125, %c0_126] : memref<8x32x32xbf16, #tpu.memory_space<vmem>>, vector<1x32x32xbf16>
    %157 = vector.shape_cast %156 : vector<1x32x32xbf16> to vector<32x32xbf16>
    %cst_127 = arith.constant dense<0.000000e+00> : vector<32x32xf32>
    %158 = tpu.matmul %157, %136, %cst_127 {dimension_numbers = #tpu.dot_dimension_numbers<[1], [0], [0], [1], [0, 0, 1, 1], [], []>} : vector<32x32xbf16>, vector<32x32xbf16>, vector<32x32xf32> -> vector<32x32xf32>
    %159 = arith.truncf %158 : vector<32x32xf32> to vector<32x32xbf16>
    %c2_128 = arith.constant 2 : index
    %c0_129 = arith.constant 0 : index
    %c0_130 = arith.constant 0 : index
    %160 = vector.load %arg14[%c2_128, %c0_129, %c0_130] : memref<9x32x8xbf16, #tpu.memory_space<vmem>>, vector<1x32x8xbf16>
    %161 = vector.shape_cast %160 : vector<1x32x8xbf16> to vector<32x8xbf16>
    %cst_131 = arith.constant dense<0.000000e+00> : vector<32x8xf32>
    %162 = tpu.matmul %159, %161, %cst_131 {dimension_numbers = #tpu.dot_dimension_numbers<[1], [0], [0], [1], [0, 0, 1, 1], [], []>} : vector<32x32xbf16>, vector<32x8xbf16>, vector<32x8xf32> -> vector<32x8xf32>
    %163 = arith.addf %155, %162 : vector<32x8xf32>
    %c3_132 = arith.constant 3 : index
    %c0_133 = arith.constant 0 : index
    %c0_134 = arith.constant 0 : index
    %164 = vector.load %arg2[%c3_132, %c0_133, %c0_134] : memref<8x32x32xbf16, #tpu.memory_space<vmem>>, vector<1x32x32xbf16>
    %165 = vector.shape_cast %164 : vector<1x32x32xbf16> to vector<32x32xbf16>
    %cst_135 = arith.constant dense<0.000000e+00> : vector<32x32xf32>
    %166 = tpu.matmul %165, %136, %cst_135 {dimension_numbers = #tpu.dot_dimension_numbers<[1], [0], [0], [1], [0, 0, 1, 1], [], []>} : vector<32x32xbf16>, vector<32x32xbf16>, vector<32x32xf32> -> vector<32x32xf32>
    %167 = arith.truncf %166 : vector<32x32xf32> to vector<32x32xbf16>
    %c3_136 = arith.constant 3 : index
    %c0_137 = arith.constant 0 : index
    %c0_138 = arith.constant 0 : index
    %168 = vector.load %arg14[%c3_136, %c0_137, %c0_138] : memref<9x32x8xbf16, #tpu.memory_space<vmem>>, vector<1x32x8xbf16>
    %169 = vector.shape_cast %168 : vector<1x32x8xbf16> to vector<32x8xbf16>
    %cst_139 = arith.constant dense<0.000000e+00> : vector<32x8xf32>
    %170 = tpu.matmul %167, %169, %cst_139 {dimension_numbers = #tpu.dot_dimension_numbers<[1], [0], [0], [1], [0, 0, 1, 1], [], []>} : vector<32x32xbf16>, vector<32x8xbf16>, vector<32x8xf32> -> vector<32x8xf32>
    %171 = arith.addf %163, %170 : vector<32x8xf32>
    %c4_140 = arith.constant 4 : index
    %c0_141 = arith.constant 0 : index
    %c0_142 = arith.constant 0 : index
    %172 = vector.load %arg2[%c4_140, %c0_141, %c0_142] : memref<8x32x32xbf16, #tpu.memory_space<vmem>>, vector<1x32x32xbf16>
    %173 = vector.shape_cast %172 : vector<1x32x32xbf16> to vector<32x32xbf16>
    %cst_143 = arith.constant dense<0.000000e+00> : vector<32x32xf32>
    %174 = tpu.matmul %173, %136, %cst_143 {dimension_numbers = #tpu.dot_dimension_numbers<[1], [0], [0], [1], [0, 0, 1, 1], [], []>} : vector<32x32xbf16>, vector<32x32xbf16>, vector<32x32xf32> -> vector<32x32xf32>
    %175 = arith.truncf %174 : vector<32x32xf32> to vector<32x32xbf16>
    %c5_144 = arith.constant 5 : index
    %c0_145 = arith.constant 0 : index
    %c0_146 = arith.constant 0 : index
    %176 = vector.load %arg14[%c5_144, %c0_145, %c0_146] : memref<9x32x8xbf16, #tpu.memory_space<vmem>>, vector<1x32x8xbf16>
    %177 = vector.shape_cast %176 : vector<1x32x8xbf16> to vector<32x8xbf16>
    %cst_147 = arith.constant dense<0.000000e+00> : vector<32x8xf32>
    %178 = tpu.matmul %175, %177, %cst_147 {dimension_numbers = #tpu.dot_dimension_numbers<[1], [0], [0], [1], [0, 0, 1, 1], [], []>} : vector<32x32xbf16>, vector<32x8xbf16>, vector<32x8xf32> -> vector<32x8xf32>
    %179 = arith.addf %171, %178 : vector<32x8xf32>
    %c5_148 = arith.constant 5 : index
    %c0_149 = arith.constant 0 : index
    %c0_150 = arith.constant 0 : index
    %180 = vector.load %arg2[%c5_148, %c0_149, %c0_150] : memref<8x32x32xbf16, #tpu.memory_space<vmem>>, vector<1x32x32xbf16>
    %181 = vector.shape_cast %180 : vector<1x32x32xbf16> to vector<32x32xbf16>
    %cst_151 = arith.constant dense<0.000000e+00> : vector<32x32xf32>
    %182 = tpu.matmul %181, %136, %cst_151 {dimension_numbers = #tpu.dot_dimension_numbers<[1], [0], [0], [1], [0, 0, 1, 1], [], []>} : vector<32x32xbf16>, vector<32x32xbf16>, vector<32x32xf32> -> vector<32x32xf32>
    %183 = arith.truncf %182 : vector<32x32xf32> to vector<32x32xbf16>
    %c6_152 = arith.constant 6 : index
    %c0_153 = arith.constant 0 : index
    %c0_154 = arith.constant 0 : index
    %184 = vector.load %arg14[%c6_152, %c0_153, %c0_154] : memref<9x32x8xbf16, #tpu.memory_space<vmem>>, vector<1x32x8xbf16>
    %185 = vector.shape_cast %184 : vector<1x32x8xbf16> to vector<32x8xbf16>
    %cst_155 = arith.constant dense<0.000000e+00> : vector<32x8xf32>
    %186 = tpu.matmul %183, %185, %cst_155 {dimension_numbers = #tpu.dot_dimension_numbers<[1], [0], [0], [1], [0, 0, 1, 1], [], []>} : vector<32x32xbf16>, vector<32x8xbf16>, vector<32x8xf32> -> vector<32x8xf32>
    %187 = arith.addf %179, %186 : vector<32x8xf32>
    %c6_156 = arith.constant 6 : index
    %c0_157 = arith.constant 0 : index
    %c0_158 = arith.constant 0 : index
    %188 = vector.load %arg2[%c6_156, %c0_157, %c0_158] : memref<8x32x32xbf16, #tpu.memory_space<vmem>>, vector<1x32x32xbf16>
    %189 = vector.shape_cast %188 : vector<1x32x32xbf16> to vector<32x32xbf16>
    %cst_159 = arith.constant dense<0.000000e+00> : vector<32x32xf32>
    %190 = tpu.matmul %189, %136, %cst_159 {dimension_numbers = #tpu.dot_dimension_numbers<[1], [0], [0], [1], [0, 0, 1, 1], [], []>} : vector<32x32xbf16>, vector<32x32xbf16>, vector<32x32xf32> -> vector<32x32xf32>
    %191 = arith.truncf %190 : vector<32x32xf32> to vector<32x32xbf16>
    %c7_160 = arith.constant 7 : index
    %c0_161 = arith.constant 0 : index
    %c0_162 = arith.constant 0 : index
    %192 = vector.load %arg14[%c7_160, %c0_161, %c0_162] : memref<9x32x8xbf16, #tpu.memory_space<vmem>>, vector<1x32x8xbf16>
    %193 = vector.shape_cast %192 : vector<1x32x8xbf16> to vector<32x8xbf16>
    %cst_163 = arith.constant dense<0.000000e+00> : vector<32x8xf32>
    %194 = tpu.matmul %191, %193, %cst_163 {dimension_numbers = #tpu.dot_dimension_numbers<[1], [0], [0], [1], [0, 0, 1, 1], [], []>} : vector<32x32xbf16>, vector<32x8xbf16>, vector<32x8xf32> -> vector<32x8xf32>
    %195 = arith.addf %187, %194 : vector<32x8xf32>
    %c7_164 = arith.constant 7 : index
    %c0_165 = arith.constant 0 : index
    %c0_166 = arith.constant 0 : index
    %196 = vector.load %arg2[%c7_164, %c0_165, %c0_166] : memref<8x32x32xbf16, #tpu.memory_space<vmem>>, vector<1x32x32xbf16>
    %197 = vector.shape_cast %196 : vector<1x32x32xbf16> to vector<32x32xbf16>
    %cst_167 = arith.constant dense<0.000000e+00> : vector<32x32xf32>
    %198 = tpu.matmul %197, %136, %cst_167 {dimension_numbers = #tpu.dot_dimension_numbers<[1], [0], [0], [1], [0, 0, 1, 1], [], []>} : vector<32x32xbf16>, vector<32x32xbf16>, vector<32x32xf32> -> vector<32x32xf32>
    %199 = arith.truncf %198 : vector<32x32xf32> to vector<32x32xbf16>
    %c8_168 = arith.constant 8 : index
    %c0_169 = arith.constant 0 : index
    %c0_170 = arith.constant 0 : index
    %200 = vector.load %arg14[%c8_168, %c0_169, %c0_170] : memref<9x32x8xbf16, #tpu.memory_space<vmem>>, vector<1x32x8xbf16>
    %201 = vector.shape_cast %200 : vector<1x32x8xbf16> to vector<32x8xbf16>
    %cst_171 = arith.constant dense<0.000000e+00> : vector<32x8xf32>
    %202 = tpu.matmul %199, %201, %cst_171 {dimension_numbers = #tpu.dot_dimension_numbers<[1], [0], [0], [1], [0, 0, 1, 1], [], []>} : vector<32x32xbf16>, vector<32x8xbf16>, vector<32x8xf32> -> vector<32x8xf32>
    %203 = arith.addf %195, %202 : vector<32x8xf32>
    %c0_172 = arith.constant 0 : index
    %c0_173 = arith.constant 0 : index
    %204 = vector.load %arg15[%c0_172, %c0_173] : memref<1x32xf32, #tpu.memory_space<vmem>>, vector<1x16xf32>
    %205 = vector.broadcast %204 : vector<1x16xf32> to vector<32x16xf32>
    %206 = arith.mulf %17, %205 : vector<32x16xf32>
    %c0_174 = arith.constant 0 : index
    %c0_175 = arith.constant 0 : index
    %207 = vector.load %arg16[%c0_174, %c0_175] : memref<1x32xf32, #tpu.memory_space<vmem>>, vector<1x16xf32>
    %208 = vector.broadcast %207 : vector<1x16xf32> to vector<32x16xf32>
    %209 = arith.addf %206, %208 : vector<32x16xf32>
    %cst_176 = arith.constant 0.000000e+00 : f32
    %210 = vector.broadcast %cst_176 : f32 to vector<32x16xf32>
    %211 = arith.maximumf %209, %210 : vector<32x16xf32>
    %212 = arith.truncf %211 : vector<32x16xf32> to vector<32x16xbf16>
    %c0_177 = arith.constant 0 : index
    %c0_178 = arith.constant 0 : index
    %213 = vector.load %arg17[%c0_177, %c0_178] : memref<32x128xbf16, #tpu.memory_space<vmem>>, vector<16x128xbf16>
    %cst_179 = arith.constant dense<0.000000e+00> : vector<32x128xf32>
    %214 = tpu.matmul %212, %213, %cst_179 {dimension_numbers = #tpu.dot_dimension_numbers<[1], [0], [0], [1], [0, 0, 1, 1], [], []>} : vector<32x16xbf16>, vector<16x128xbf16>, vector<32x128xf32> -> vector<32x128xf32>
    %c0_180 = arith.constant 0 : index
    %c16_181 = arith.constant 16 : index
    %215 = vector.load %arg15[%c0_180, %c16_181] : memref<1x32xf32, #tpu.memory_space<vmem>>, vector<1x8xf32>
    %216 = vector.broadcast %215 : vector<1x8xf32> to vector<32x8xf32>
    %217 = arith.mulf %104, %216 : vector<32x8xf32>
    %c0_182 = arith.constant 0 : index
    %c16_183 = arith.constant 16 : index
    %218 = vector.load %arg16[%c0_182, %c16_183] : memref<1x32xf32, #tpu.memory_space<vmem>>, vector<1x8xf32>
    %219 = vector.broadcast %218 : vector<1x8xf32> to vector<32x8xf32>
    %220 = arith.addf %217, %219 : vector<32x8xf32>
    %cst_184 = arith.constant 0.000000e+00 : f32
    %221 = vector.broadcast %cst_184 : f32 to vector<32x8xf32>
    %222 = arith.maximumf %220, %221 : vector<32x8xf32>
    %223 = arith.truncf %222 : vector<32x8xf32> to vector<32x8xbf16>
    %c16_185 = arith.constant 16 : index
    %c0_186 = arith.constant 0 : index
    %224 = vector.load %arg17[%c16_185, %c0_186] : memref<32x128xbf16, #tpu.memory_space<vmem>>, vector<8x128xbf16>
    %cst_187 = arith.constant dense<0.000000e+00> : vector<32x128xf32>
    %225 = tpu.matmul %223, %224, %cst_187 {dimension_numbers = #tpu.dot_dimension_numbers<[1], [0], [0], [1], [0, 0, 1, 1], [], []>} : vector<32x8xbf16>, vector<8x128xbf16>, vector<32x128xf32> -> vector<32x128xf32>
    %226 = arith.addf %214, %225 : vector<32x128xf32>
    %c0_188 = arith.constant 0 : index
    %c24 = arith.constant 24 : index
    %227 = vector.load %arg15[%c0_188, %c24] : memref<1x32xf32, #tpu.memory_space<vmem>>, vector<1x8xf32>
    %228 = vector.broadcast %227 : vector<1x8xf32> to vector<32x8xf32>
    %229 = arith.mulf %203, %228 : vector<32x8xf32>
    %c0_189 = arith.constant 0 : index
    %c24_190 = arith.constant 24 : index
    %230 = vector.load %arg16[%c0_189, %c24_190] : memref<1x32xf32, #tpu.memory_space<vmem>>, vector<1x8xf32>
    %231 = vector.broadcast %230 : vector<1x8xf32> to vector<32x8xf32>
    %232 = arith.addf %229, %231 : vector<32x8xf32>
    %cst_191 = arith.constant 0.000000e+00 : f32
    %233 = vector.broadcast %cst_191 : f32 to vector<32x8xf32>
    %234 = arith.maximumf %232, %233 : vector<32x8xf32>
    %235 = arith.truncf %234 : vector<32x8xf32> to vector<32x8xbf16>
    %c24_192 = arith.constant 24 : index
    %c0_193 = arith.constant 0 : index
    %236 = vector.load %arg17[%c24_192, %c0_193] : memref<32x128xbf16, #tpu.memory_space<vmem>>, vector<8x128xbf16>
    %cst_194 = arith.constant dense<0.000000e+00> : vector<32x128xf32>
    %237 = tpu.matmul %235, %236, %cst_194 {dimension_numbers = #tpu.dot_dimension_numbers<[1], [0], [0], [1], [0, 0, 1, 1], [], []>} : vector<32x8xbf16>, vector<8x128xbf16>, vector<32x128xf32> -> vector<32x128xf32>
    %238 = arith.addf %226, %237 : vector<32x128xf32>
    %239 = arith.truncf %238 : vector<32x128xf32> to vector<32x128xbf16>
    %c0_195 = arith.constant 0 : index
    %c0_196 = arith.constant 0 : index
    %240 = vector.load %arg18[%c0_195, %c0_196] : memref<32x128xbf16, #tpu.memory_space<vmem>>, vector<32x128xbf16>
    tpu.vector_store %arg18[%c0_195, %c0_196], %239 {strides = array<i32>} : memref<32x128xbf16, #tpu.memory_space<vmem>>, vector<32x128xbf16>,
    return
  }
  func.func @transform_0(%arg0: i32) -> (i32, i32, i32) {
    %c0_i32 = arith.constant 0 : i32
    %c0_i32_0 = arith.constant 0 : i32
    %c0_i32_1 = arith.constant 0 : i32
    %c0_i32_2 = arith.constant 0 : i32
    return %c0_i32, %c0_i32_0, %c0_i32_1 : i32, i32, i32
  }
  func.func @transform_1(%arg0: i32) -> (i32, i32, i32) {
    %c0_i32 = arith.constant 0 : i32
    %c0_i32_0 = arith.constant 0 : i32
    %c0_i32_1 = arith.constant 0 : i32
    %c0_i32_2 = arith.constant 0 : i32
    return %c0_i32, %c0_i32_0, %c0_i32_1 : i32, i32, i32
  }
  func.func @transform_2(%arg0: i32) -> (i32, i32) {
    %c0_i32 = arith.constant 0 : i32
    %c0_i32_0 = arith.constant 0 : i32
    %c0_i32_1 = arith.constant 0 : i32
    return %c0_i32, %c0_i32_0 : i32, i32
  }
  func.func @transform_3(%arg0: i32) -> (i32, i32) {
    %c0_i32 = arith.constant 0 : i32
    %c0_i32_0 = arith.constant 0 : i32
    %c0_i32_1 = arith.constant 0 : i32
    return %c0_i32, %c0_i32_0 : i32, i32
  }
  func.func @transform_4(%arg0: i32) -> (i32, i32) {
    %c0_i32 = arith.constant 0 : i32
    %c0_i32_0 = arith.constant 0 : i32
    %c0_i32_1 = arith.constant 0 : i32
    return %c0_i32, %c0_i32_0 : i32, i32
  }
  func.func @transform_5(%arg0: i32) -> (i32, i32) {
    %c0_i32 = arith.constant 0 : i32
    %c0_i32_0 = arith.constant 0 : i32
    %c0_i32_1 = arith.constant 0 : i32
    return %c0_i32, %c0_i32_0 : i32, i32
  }
  func.func @transform_6(%arg0: i32) -> (i32, i32) {
    %c0_i32 = arith.constant 0 : i32
    %c0_i32_0 = arith.constant 0 : i32
    %c0_i32_1 = arith.constant 0 : i32
    return %c0_i32, %c0_i32_0 : i32, i32
  }
  func.func @transform_7(%arg0: i32) -> (i32, i32, i32) {
    %c0_i32 = arith.constant 0 : i32
    %c0_i32_0 = arith.constant 0 : i32
    %c0_i32_1 = arith.constant 0 : i32
    %c0_i32_2 = arith.constant 0 : i32
    return %c0_i32, %c0_i32_0, %c0_i32_1 : i32, i32, i32
  }
  func.func @transform_8(%arg0: i32) -> (i32, i32) {
    %c0_i32 = arith.constant 0 : i32
    %c0_i32_0 = arith.constant 0 : i32
    %c0_i32_1 = arith.constant 0 : i32
    return %c0_i32, %c0_i32_0 : i32, i32
  }
  func.func @transform_9(%arg0: i32) -> (i32, i32) {
    %c0_i32 = arith.constant 0 : i32
    %c0_i32_0 = arith.constant 0 : i32
    %c0_i32_1 = arith.constant 0 : i32
    return %c0_i32, %c0_i32_0 : i32, i32
  }
  func.func @transform_10(%arg0: i32) -> (i32, i32) {
    %c0_i32 = arith.constant 0 : i32
    %c0_i32_0 = arith.constant 0 : i32
    %c0_i32_1 = arith.constant 0 : i32
    return %c0_i32, %c0_i32_0 : i32, i32
  }
  func.func @transform_11(%arg0: i32) -> (i32, i32) {
    %c0_i32 = arith.constant 0 : i32
    %c0_i32_0 = arith.constant 0 : i32
    %c0_i32_1 = arith.constant 0 : i32
    return %c0_i32, %c0_i32_0 : i32, i32
  }
  func.func @transform_12(%arg0: i32) -> (i32, i32) {
    %c0_i32 = arith.constant 0 : i32
    %c0_i32_0 = arith.constant 0 : i32
    %c0_i32_1 = arith.constant 0 : i32
    return %c0_i32, %c0_i32_0 : i32, i32
  }
  func.func @transform_13(%arg0: i32) -> (i32, i32, i32) {
    %c0_i32 = arith.constant 0 : i32
    %c0_i32_0 = arith.constant 0 : i32
    %c0_i32_1 = arith.constant 0 : i32
    %c0_i32_2 = arith.constant 0 : i32
    return %c0_i32, %c0_i32_0, %c0_i32_1 : i32, i32, i32
  }
  func.func @transform_14(%arg0: i32) -> (i32, i32) {
    %c0_i32 = arith.constant 0 : i32
    %c0_i32_0 = arith.constant 0 : i32
    %c0_i32_1 = arith.constant 0 : i32
    return %c0_i32, %c0_i32_0 : i32, i32
  }
  func.func @transform_15(%arg0: i32) -> (i32, i32) {
    %c0_i32 = arith.constant 0 : i32
    %c0_i32_0 = arith.constant 0 : i32
    %c0_i32_1 = arith.constant 0 : i32
    return %c0_i32, %c0_i32_0 : i32, i32
  }
  func.func @transform_16(%arg0: i32) -> (i32, i32) {
    %c0_i32 = arith.constant 0 : i32
    %c0_i32_0 = arith.constant 0 : i32
    %c0_i32_1 = arith.constant 0 : i32
    return %c0_i32, %c0_i32_0 : i32, i32
  }
  func.func @transform_17(%arg0: i32) -> (i32, i32) {
    %c0_i32 = arith.constant 0 : i32
    %c0_i32_0 = arith.constant 0 : i32
    %c0_i32_1 = arith.constant 0 : i32
    return %c0_i32, %c0_i32_0 : i32, i32
  }
}

module attributes {stable_mosaic.version = 11 : i64} {
  func.func @kernel(%arg0: i32, %arg1: memref<4x8x128xbf16, #tpu.memory_space<vmem>>, %arg2: memref<8x8x8xbf16, #tpu.memory_space<vmem>>, %arg3: memref<1x16xf32, #tpu.memory_space<vmem>>, %arg4: memref<1x16xf32, #tpu.memory_space<vmem>>, %arg5: memref<16x32xbf16, #tpu.memory_space<vmem>>, %arg6: memref<1x32xf32, #tpu.memory_space<vmem>>, %arg7: memref<1x32xf32, #tpu.memory_space<vmem>>, %arg8: memref<9x32x8xbf16, #tpu.memory_space<vmem>>, %arg9: memref<1x24xf32, #tpu.memory_space<vmem>>, %arg10: memref<1x24xf32, #tpu.memory_space<vmem>>, %arg11: memref<24x32xbf16, #tpu.memory_space<vmem>>, %arg12: memref<1x32xf32, #tpu.memory_space<vmem>>, %arg13: memref<1x32xf32, #tpu.memory_space<vmem>>, %arg14: memref<9x32x8xbf16, #tpu.memory_space<vmem>>, %arg15: memref<1x32xf32, #tpu.memory_space<vmem>>, %arg16: memref<1x32xf32, #tpu.memory_space<vmem>>, %arg17: memref<32x128xbf16, #tpu.memory_space<vmem>>, %arg18: memref<8x128xbf16, #tpu.memory_space<vmem>>) attributes {dimension_semantics = [#tpu.dimension_semantics<arbitrary>], iteration_bounds = array<i64: 1>, scalar_prefetch = 0 : i64, scratch_operands = 0 : i64, tpu.core_type = #tpu.core_type<tc>, window_params = [{pipeline_mode = #tpu.pipeline_mode<synchronous>, transform_indices = @transform_0, window_bounds = array<i64: 4, 8, 128>}, {pipeline_mode = #tpu.pipeline_mode<synchronous>, transform_indices = @transform_1, window_bounds = array<i64: 8, 8, 8>}, {pipeline_mode = #tpu.pipeline_mode<synchronous>, transform_indices = @transform_2, window_bounds = array<i64: 1, 16>}, {pipeline_mode = #tpu.pipeline_mode<synchronous>, transform_indices = @transform_3, window_bounds = array<i64: 1, 16>}, {pipeline_mode = #tpu.pipeline_mode<synchronous>, transform_indices = @transform_4, window_bounds = array<i64: 16, 32>}, {pipeline_mode = #tpu.pipeline_mode<synchronous>, transform_indices = @transform_5, window_bounds = array<i64: 1, 32>}, {pipeline_mode = #tpu.pipeline_mode<synchronous>, transform_indices = @transform_6, window_bounds = array<i64: 1, 32>}, {pipeline_mode = #tpu.pipeline_mode<synchronous>, transform_indices = @transform_7, window_bounds = array<i64: 9, 32, 8>}, {pipeline_mode = #tpu.pipeline_mode<synchronous>, transform_indices = @transform_8, window_bounds = array<i64: 1, 24>}, {pipeline_mode = #tpu.pipeline_mode<synchronous>, transform_indices = @transform_9, window_bounds = array<i64: 1, 24>}, {pipeline_mode = #tpu.pipeline_mode<synchronous>, transform_indices = @transform_10, window_bounds = array<i64: 24, 32>}, {pipeline_mode = #tpu.pipeline_mode<synchronous>, transform_indices = @transform_11, window_bounds = array<i64: 1, 32>}, {pipeline_mode = #tpu.pipeline_mode<synchronous>, transform_indices = @transform_12, window_bounds = array<i64: 1, 32>}, {pipeline_mode = #tpu.pipeline_mode<synchronous>, transform_indices = @transform_13, window_bounds = array<i64: 9, 32, 8>}, {pipeline_mode = #tpu.pipeline_mode<synchronous>, transform_indices = @transform_14, window_bounds = array<i64: 1, 32>}, {pipeline_mode = #tpu.pipeline_mode<synchronous>, transform_indices = @transform_15, window_bounds = array<i64: 1, 32>}, {pipeline_mode = #tpu.pipeline_mode<synchronous>, transform_indices = @transform_16, window_bounds = array<i64: 32, 128>}, {pipeline_mode = #tpu.pipeline_mode<synchronous>, transform_indices = @transform_17, window_bounds = array<i64: 8, 128>}]} {
    %c0 = arith.constant 0 : index
    %c0_0 = arith.constant 0 : index
    %c0_1 = arith.constant 0 : index
    %0 = vector.load %arg1[%c0, %c0_0, %c0_1] : memref<4x8x128xbf16, #tpu.memory_space<vmem>>, vector<1x8x128xbf16>
    %1 = vector.shape_cast %0 : vector<1x8x128xbf16> to vector<8x128xbf16>
    %2 = arith.extf %1 : vector<8x128xbf16> to vector<8x128xf32>
    %c1 = arith.constant 1 : index
    %c0_2 = arith.constant 0 : index
    %c0_3 = arith.constant 0 : index
    %3 = vector.load %arg1[%c1, %c0_2, %c0_3] : memref<4x8x128xbf16, #tpu.memory_space<vmem>>, vector<1x8x128xbf16>
    %4 = vector.shape_cast %3 : vector<1x8x128xbf16> to vector<8x128xbf16>
    %5 = arith.extf %4 : vector<8x128xbf16> to vector<8x128xf32>
    %6 = arith.addf %2, %5 : vector<8x128xf32>
    %c2 = arith.constant 2 : index
    %c0_4 = arith.constant 0 : index
    %c0_5 = arith.constant 0 : index
    %7 = vector.load %arg1[%c2, %c0_4, %c0_5] : memref<4x8x128xbf16, #tpu.memory_space<vmem>>, vector<1x8x128xbf16>
    %8 = vector.shape_cast %7 : vector<1x8x128xbf16> to vector<8x128xbf16>
    %9 = arith.extf %8 : vector<8x128xbf16> to vector<8x128xf32>
    %10 = arith.addf %6, %9 : vector<8x128xf32>
    %c3 = arith.constant 3 : index
    %c0_6 = arith.constant 0 : index
    %c0_7 = arith.constant 0 : index
    %11 = vector.load %arg1[%c3, %c0_6, %c0_7] : memref<4x8x128xbf16, #tpu.memory_space<vmem>>, vector<1x8x128xbf16>
    %12 = vector.shape_cast %11 : vector<1x8x128xbf16> to vector<8x128xbf16>
    %13 = arith.extf %12 : vector<8x128xbf16> to vector<8x128xf32>
    %14 = arith.addf %10, %13 : vector<8x128xf32>
    %cst = arith.constant 2.500000e-01 : f32
    %15 = vector.broadcast %cst : f32 to vector<8x128xf32>
    %16 = arith.mulf %14, %15 : vector<8x128xf32>
    %17 = vector.extract_strided_slice %16 {offsets = [0, 0], sizes = [8, 16], strides = [1, 1]} : vector<8x128xf32> to vector<8x16xf32>
    %c0_8 = arith.constant 0 : index
    %c0_9 = arith.constant 0 : index
    %18 = vector.load %arg3[%c0_8, %c0_9] : memref<1x16xf32, #tpu.memory_space<vmem>>, vector<1x16xf32>
    %19 = vector.broadcast %18 : vector<1x16xf32> to vector<8x16xf32>
    %20 = arith.mulf %17, %19 : vector<8x16xf32>
    %c0_10 = arith.constant 0 : index
    %c0_11 = arith.constant 0 : index
    %21 = vector.load %arg4[%c0_10, %c0_11] : memref<1x16xf32, #tpu.memory_space<vmem>>, vector<1x16xf32>
    %22 = vector.broadcast %21 : vector<1x16xf32> to vector<8x16xf32>
    %23 = arith.addf %20, %22 : vector<8x16xf32>
    %cst_12 = arith.constant 0.000000e+00 : f32
    %24 = vector.broadcast %cst_12 : f32 to vector<8x16xf32>
    %25 = arith.maximumf %23, %24 : vector<8x16xf32>
    %26 = arith.truncf %25 : vector<8x16xf32> to vector<8x16xbf16>
    %c0_13 = arith.constant 0 : index
    %c0_14 = arith.constant 0 : index
    %27 = vector.load %arg5[%c0_13, %c0_14] : memref<16x32xbf16, #tpu.memory_space<vmem>>, vector<16x32xbf16>
    %cst_15 = arith.constant dense<0.000000e+00> : vector<8x32xf32>
    %28 = tpu.matmul %26, %27, %cst_15 {dimension_numbers = #tpu.dot_dimension_numbers<[1], [0], [0], [1], [0, 0, 1, 1], [], []>} : vector<8x16xbf16>, vector<16x32xbf16>, vector<8x32xf32> -> vector<8x32xf32>
    %c0_16 = arith.constant 0 : index
    %c0_17 = arith.constant 0 : index
    %29 = vector.load %arg6[%c0_16, %c0_17] : memref<1x32xf32, #tpu.memory_space<vmem>>, vector<1x32xf32>
    %30 = vector.broadcast %29 : vector<1x32xf32> to vector<8x32xf32>
    %31 = arith.mulf %28, %30 : vector<8x32xf32>
    %c0_18 = arith.constant 0 : index
    %c0_19 = arith.constant 0 : index
    %32 = vector.load %arg7[%c0_18, %c0_19] : memref<1x32xf32, #tpu.memory_space<vmem>>, vector<1x32xf32>
    %33 = vector.broadcast %32 : vector<1x32xf32> to vector<8x32xf32>
    %34 = arith.addf %31, %33 : vector<8x32xf32>
    %cst_20 = arith.constant 0.000000e+00 : f32
    %35 = vector.broadcast %cst_20 : f32 to vector<8x32xf32>
    %36 = arith.maximumf %34, %35 : vector<8x32xf32>
    %37 = arith.truncf %36 : vector<8x32xf32> to vector<8x32xbf16>
    %c4 = arith.constant 4 : index
    %c0_21 = arith.constant 0 : index
    %c0_22 = arith.constant 0 : index
    %38 = vector.load %arg8[%c4, %c0_21, %c0_22] : memref<9x32x8xbf16, #tpu.memory_space<vmem>>, vector<1x32x8xbf16>
    %39 = vector.shape_cast %38 : vector<1x32x8xbf16> to vector<32x8xbf16>
    %cst_23 = arith.constant dense<0.000000e+00> : vector<8x8xf32>
    %40 = tpu.matmul %37, %39, %cst_23 {dimension_numbers = #tpu.dot_dimension_numbers<[1], [0], [0], [1], [0, 0, 1, 1], [], []>} : vector<8x32xbf16>, vector<32x8xbf16>, vector<8x8xf32> -> vector<8x8xf32>
    %c0_24 = arith.constant 0 : index
    %c0_25 = arith.constant 0 : index
    %c0_26 = arith.constant 0 : index
    %41 = vector.load %arg2[%c0_24, %c0_25, %c0_26] : memref<8x8x8xbf16, #tpu.memory_space<vmem>>, vector<1x8x8xbf16>
    %42 = vector.shape_cast %41 : vector<1x8x8xbf16> to vector<8x8xbf16>
    %cst_27 = arith.constant dense<0.000000e+00> : vector<8x32xf32>
    %43 = tpu.matmul %42, %37, %cst_27 {dimension_numbers = #tpu.dot_dimension_numbers<[1], [0], [0], [1], [0, 0, 1, 1], [], []>} : vector<8x8xbf16>, vector<8x32xbf16>, vector<8x32xf32> -> vector<8x32xf32>
    %44 = arith.truncf %43 : vector<8x32xf32> to vector<8x32xbf16>
    %c0_28 = arith.constant 0 : index
    %c0_29 = arith.constant 0 : index
    %c0_30 = arith.constant 0 : index
    %45 = vector.load %arg8[%c0_28, %c0_29, %c0_30] : memref<9x32x8xbf16, #tpu.memory_space<vmem>>, vector<1x32x8xbf16>
    %46 = vector.shape_cast %45 : vector<1x32x8xbf16> to vector<32x8xbf16>
    %cst_31 = arith.constant dense<0.000000e+00> : vector<8x8xf32>
    %47 = tpu.matmul %44, %46, %cst_31 {dimension_numbers = #tpu.dot_dimension_numbers<[1], [0], [0], [1], [0, 0, 1, 1], [], []>} : vector<8x32xbf16>, vector<32x8xbf16>, vector<8x8xf32> -> vector<8x8xf32>
    %48 = arith.addf %40, %47 : vector<8x8xf32>
    %c1_32 = arith.constant 1 : index
    %c0_33 = arith.constant 0 : index
    %c0_34 = arith.constant 0 : index
    %49 = vector.load %arg2[%c1_32, %c0_33, %c0_34] : memref<8x8x8xbf16, #tpu.memory_space<vmem>>, vector<1x8x8xbf16>
    %50 = vector.shape_cast %49 : vector<1x8x8xbf16> to vector<8x8xbf16>
    %cst_35 = arith.constant dense<0.000000e+00> : vector<8x32xf32>
    %51 = tpu.matmul %50, %37, %cst_35 {dimension_numbers = #tpu.dot_dimension_numbers<[1], [0], [0], [1], [0, 0, 1, 1], [], []>} : vector<8x8xbf16>, vector<8x32xbf16>, vector<8x32xf32> -> vector<8x32xf32>
    %52 = arith.truncf %51 : vector<8x32xf32> to vector<8x32xbf16>
    %c1_36 = arith.constant 1 : index
    %c0_37 = arith.constant 0 : index
    %c0_38 = arith.constant 0 : index
    %53 = vector.load %arg8[%c1_36, %c0_37, %c0_38] : memref<9x32x8xbf16, #tpu.memory_space<vmem>>, vector<1x32x8xbf16>
    %54 = vector.shape_cast %53 : vector<1x32x8xbf16> to vector<32x8xbf16>
    %cst_39 = arith.constant dense<0.000000e+00> : vector<8x8xf32>
    %55 = tpu.matmul %52, %54, %cst_39 {dimension_numbers = #tpu.dot_dimension_numbers<[1], [0], [0], [1], [0, 0, 1, 1], [], []>} : vector<8x32xbf16>, vector<32x8xbf16>, vector<8x8xf32> -> vector<8x8xf32>
    %56 = arith.addf %48, %55 : vector<8x8xf32>
    %c2_40 = arith.constant 2 : index
    %c0_41 = arith.constant 0 : index
    %c0_42 = arith.constant 0 : index
    %57 = vector.load %arg2[%c2_40, %c0_41, %c0_42] : memref<8x8x8xbf16, #tpu.memory_space<vmem>>, vector<1x8x8xbf16>
    %58 = vector.shape_cast %57 : vector<1x8x8xbf16> to vector<8x8xbf16>
    %cst_43 = arith.constant dense<0.000000e+00> : vector<8x32xf32>
    %59 = tpu.matmul %58, %37, %cst_43 {dimension_numbers = #tpu.dot_dimension_numbers<[1], [0], [0], [1], [0, 0, 1, 1], [], []>} : vector<8x8xbf16>, vector<8x32xbf16>, vector<8x32xf32> -> vector<8x32xf32>
    %60 = arith.truncf %59 : vector<8x32xf32> to vector<8x32xbf16>
    %c2_44 = arith.constant 2 : index
    %c0_45 = arith.constant 0 : index
    %c0_46 = arith.constant 0 : index
    %61 = vector.load %arg8[%c2_44, %c0_45, %c0_46] : memref<9x32x8xbf16, #tpu.memory_space<vmem>>, vector<1x32x8xbf16>
    %62 = vector.shape_cast %61 : vector<1x32x8xbf16> to vector<32x8xbf16>
    %cst_47 = arith.constant dense<0.000000e+00> : vector<8x8xf32>
    %63 = tpu.matmul %60, %62, %cst_47 {dimension_numbers = #tpu.dot_dimension_numbers<[1], [0], [0], [1], [0, 0, 1, 1], [], []>} : vector<8x32xbf16>, vector<32x8xbf16>, vector<8x8xf32> -> vector<8x8xf32>
    %64 = arith.addf %56, %63 : vector<8x8xf32>
    %c3_48 = arith.constant 3 : index
    %c0_49 = arith.constant 0 : index
    %c0_50 = arith.constant 0 : index
    %65 = vector.load %arg2[%c3_48, %c0_49, %c0_50] : memref<8x8x8xbf16, #tpu.memory_space<vmem>>, vector<1x8x8xbf16>
    %66 = vector.shape_cast %65 : vector<1x8x8xbf16> to vector<8x8xbf16>
    %cst_51 = arith.constant dense<0.000000e+00> : vector<8x32xf32>
    %67 = tpu.matmul %66, %37, %cst_51 {dimension_numbers = #tpu.dot_dimension_numbers<[1], [0], [0], [1], [0, 0, 1, 1], [], []>} : vector<8x8xbf16>, vector<8x32xbf16>, vector<8x32xf32> -> vector<8x32xf32>
    %68 = arith.truncf %67 : vector<8x32xf32> to vector<8x32xbf16>
    %c3_52 = arith.constant 3 : index
    %c0_53 = arith.constant 0 : index
    %c0_54 = arith.constant 0 : index
    %69 = vector.load %arg8[%c3_52, %c0_53, %c0_54] : memref<9x32x8xbf16, #tpu.memory_space<vmem>>, vector<1x32x8xbf16>
    %70 = vector.shape_cast %69 : vector<1x32x8xbf16> to vector<32x8xbf16>
    %cst_55 = arith.constant dense<0.000000e+00> : vector<8x8xf32>
    %71 = tpu.matmul %68, %70, %cst_55 {dimension_numbers = #tpu.dot_dimension_numbers<[1], [0], [0], [1], [0, 0, 1, 1], [], []>} : vector<8x32xbf16>, vector<32x8xbf16>, vector<8x8xf32> -> vector<8x8xf32>
    %72 = arith.addf %64, %71 : vector<8x8xf32>
    %c4_56 = arith.constant 4 : index
    %c0_57 = arith.constant 0 : index
    %c0_58 = arith.constant 0 : index
    %73 = vector.load %arg2[%c4_56, %c0_57, %c0_58] : memref<8x8x8xbf16, #tpu.memory_space<vmem>>, vector<1x8x8xbf16>
    %74 = vector.shape_cast %73 : vector<1x8x8xbf16> to vector<8x8xbf16>
    %cst_59 = arith.constant dense<0.000000e+00> : vector<8x32xf32>
    %75 = tpu.matmul %74, %37, %cst_59 {dimension_numbers = #tpu.dot_dimension_numbers<[1], [0], [0], [1], [0, 0, 1, 1], [], []>} : vector<8x8xbf16>, vector<8x32xbf16>, vector<8x32xf32> -> vector<8x32xf32>
    %76 = arith.truncf %75 : vector<8x32xf32> to vector<8x32xbf16>
    %c5 = arith.constant 5 : index
    %c0_60 = arith.constant 0 : index
    %c0_61 = arith.constant 0 : index
    %77 = vector.load %arg8[%c5, %c0_60, %c0_61] : memref<9x32x8xbf16, #tpu.memory_space<vmem>>, vector<1x32x8xbf16>
    %78 = vector.shape_cast %77 : vector<1x32x8xbf16> to vector<32x8xbf16>
    %cst_62 = arith.constant dense<0.000000e+00> : vector<8x8xf32>
    %79 = tpu.matmul %76, %78, %cst_62 {dimension_numbers = #tpu.dot_dimension_numbers<[1], [0], [0], [1], [0, 0, 1, 1], [], []>} : vector<8x32xbf16>, vector<32x8xbf16>, vector<8x8xf32> -> vector<8x8xf32>
    %80 = arith.addf %72, %79 : vector<8x8xf32>
    %c5_63 = arith.constant 5 : index
    %c0_64 = arith.constant 0 : index
    %c0_65 = arith.constant 0 : index
    %81 = vector.load %arg2[%c5_63, %c0_64, %c0_65] : memref<8x8x8xbf16, #tpu.memory_space<vmem>>, vector<1x8x8xbf16>
    %82 = vector.shape_cast %81 : vector<1x8x8xbf16> to vector<8x8xbf16>
    %cst_66 = arith.constant dense<0.000000e+00> : vector<8x32xf32>
    %83 = tpu.matmul %82, %37, %cst_66 {dimension_numbers = #tpu.dot_dimension_numbers<[1], [0], [0], [1], [0, 0, 1, 1], [], []>} : vector<8x8xbf16>, vector<8x32xbf16>, vector<8x32xf32> -> vector<8x32xf32>
    %84 = arith.truncf %83 : vector<8x32xf32> to vector<8x32xbf16>
    %c6 = arith.constant 6 : index
    %c0_67 = arith.constant 0 : index
    %c0_68 = arith.constant 0 : index
    %85 = vector.load %arg8[%c6, %c0_67, %c0_68] : memref<9x32x8xbf16, #tpu.memory_space<vmem>>, vector<1x32x8xbf16>
    %86 = vector.shape_cast %85 : vector<1x32x8xbf16> to vector<32x8xbf16>
    %cst_69 = arith.constant dense<0.000000e+00> : vector<8x8xf32>
    %87 = tpu.matmul %84, %86, %cst_69 {dimension_numbers = #tpu.dot_dimension_numbers<[1], [0], [0], [1], [0, 0, 1, 1], [], []>} : vector<8x32xbf16>, vector<32x8xbf16>, vector<8x8xf32> -> vector<8x8xf32>
    %88 = arith.addf %80, %87 : vector<8x8xf32>
    %c6_70 = arith.constant 6 : index
    %c0_71 = arith.constant 0 : index
    %c0_72 = arith.constant 0 : index
    %89 = vector.load %arg2[%c6_70, %c0_71, %c0_72] : memref<8x8x8xbf16, #tpu.memory_space<vmem>>, vector<1x8x8xbf16>
    %90 = vector.shape_cast %89 : vector<1x8x8xbf16> to vector<8x8xbf16>
    %cst_73 = arith.constant dense<0.000000e+00> : vector<8x32xf32>
    %91 = tpu.matmul %90, %37, %cst_73 {dimension_numbers = #tpu.dot_dimension_numbers<[1], [0], [0], [1], [0, 0, 1, 1], [], []>} : vector<8x8xbf16>, vector<8x32xbf16>, vector<8x32xf32> -> vector<8x32xf32>
    %92 = arith.truncf %91 : vector<8x32xf32> to vector<8x32xbf16>
    %c7 = arith.constant 7 : index
    %c0_74 = arith.constant 0 : index
    %c0_75 = arith.constant 0 : index
    %93 = vector.load %arg8[%c7, %c0_74, %c0_75] : memref<9x32x8xbf16, #tpu.memory_space<vmem>>, vector<1x32x8xbf16>
    %94 = vector.shape_cast %93 : vector<1x32x8xbf16> to vector<32x8xbf16>
    %cst_76 = arith.constant dense<0.000000e+00> : vector<8x8xf32>
    %95 = tpu.matmul %92, %94, %cst_76 {dimension_numbers = #tpu.dot_dimension_numbers<[1], [0], [0], [1], [0, 0, 1, 1], [], []>} : vector<8x32xbf16>, vector<32x8xbf16>, vector<8x8xf32> -> vector<8x8xf32>
    %96 = arith.addf %88, %95 : vector<8x8xf32>
    %c7_77 = arith.constant 7 : index
    %c0_78 = arith.constant 0 : index
    %c0_79 = arith.constant 0 : index
    %97 = vector.load %arg2[%c7_77, %c0_78, %c0_79] : memref<8x8x8xbf16, #tpu.memory_space<vmem>>, vector<1x8x8xbf16>
    %98 = vector.shape_cast %97 : vector<1x8x8xbf16> to vector<8x8xbf16>
    %cst_80 = arith.constant dense<0.000000e+00> : vector<8x32xf32>
    %99 = tpu.matmul %98, %37, %cst_80 {dimension_numbers = #tpu.dot_dimension_numbers<[1], [0], [0], [1], [0, 0, 1, 1], [], []>} : vector<8x8xbf16>, vector<8x32xbf16>, vector<8x32xf32> -> vector<8x32xf32>
    %100 = arith.truncf %99 : vector<8x32xf32> to vector<8x32xbf16>
    %c8 = arith.constant 8 : index
    %c0_81 = arith.constant 0 : index
    %c0_82 = arith.constant 0 : index
    %101 = vector.load %arg8[%c8, %c0_81, %c0_82] : memref<9x32x8xbf16, #tpu.memory_space<vmem>>, vector<1x32x8xbf16>
    %102 = vector.shape_cast %101 : vector<1x32x8xbf16> to vector<32x8xbf16>
    %cst_83 = arith.constant dense<0.000000e+00> : vector<8x8xf32>
    %103 = tpu.matmul %100, %102, %cst_83 {dimension_numbers = #tpu.dot_dimension_numbers<[1], [0], [0], [1], [0, 0, 1, 1], [], []>} : vector<8x32xbf16>, vector<32x8xbf16>, vector<8x8xf32> -> vector<8x8xf32>
    %104 = arith.addf %96, %103 : vector<8x8xf32>
    %c0_84 = arith.constant 0 : index
    %c0_85 = arith.constant 0 : index
    %105 = vector.load %arg9[%c0_84, %c0_85] : memref<1x24xf32, #tpu.memory_space<vmem>>, vector<1x16xf32>
    %106 = vector.broadcast %105 : vector<1x16xf32> to vector<8x16xf32>
    %107 = arith.mulf %17, %106 : vector<8x16xf32>
    %c0_86 = arith.constant 0 : index
    %c0_87 = arith.constant 0 : index
    %108 = vector.load %arg10[%c0_86, %c0_87] : memref<1x24xf32, #tpu.memory_space<vmem>>, vector<1x16xf32>
    %109 = vector.broadcast %108 : vector<1x16xf32> to vector<8x16xf32>
    %110 = arith.addf %107, %109 : vector<8x16xf32>
    %cst_88 = arith.constant 0.000000e+00 : f32
    %111 = vector.broadcast %cst_88 : f32 to vector<8x16xf32>
    %112 = arith.maximumf %110, %111 : vector<8x16xf32>
    %113 = arith.truncf %112 : vector<8x16xf32> to vector<8x16xbf16>
    %c0_89 = arith.constant 0 : index
    %c0_90 = arith.constant 0 : index
    %114 = vector.load %arg11[%c0_89, %c0_90] : memref<24x32xbf16, #tpu.memory_space<vmem>>, vector<16x32xbf16>
    %cst_91 = arith.constant dense<0.000000e+00> : vector<8x32xf32>
    %115 = tpu.matmul %113, %114, %cst_91 {dimension_numbers = #tpu.dot_dimension_numbers<[1], [0], [0], [1], [0, 0, 1, 1], [], []>} : vector<8x16xbf16>, vector<16x32xbf16>, vector<8x32xf32> -> vector<8x32xf32>
    %c0_92 = arith.constant 0 : index
    %c16 = arith.constant 16 : index
    %116 = vector.load %arg9[%c0_92, %c16] : memref<1x24xf32, #tpu.memory_space<vmem>>, vector<1x8xf32>
    %117 = vector.broadcast %116 : vector<1x8xf32> to vector<8x8xf32>
    %118 = arith.mulf %104, %117 : vector<8x8xf32>
    %c0_93 = arith.constant 0 : index
    %c16_94 = arith.constant 16 : index
    %119 = vector.load %arg10[%c0_93, %c16_94] : memref<1x24xf32, #tpu.memory_space<vmem>>, vector<1x8xf32>
    %120 = vector.broadcast %119 : vector<1x8xf32> to vector<8x8xf32>
    %121 = arith.addf %118, %120 : vector<8x8xf32>
    %cst_95 = arith.constant 0.000000e+00 : f32
    %122 = vector.broadcast %cst_95 : f32 to vector<8x8xf32>
    %123 = arith.maximumf %121, %122 : vector<8x8xf32>
    %124 = arith.truncf %123 : vector<8x8xf32> to vector<8x8xbf16>
    %c16_96 = arith.constant 16 : index
    %c0_97 = arith.constant 0 : index
    %125 = vector.load %arg11[%c16_96, %c0_97] : memref<24x32xbf16, #tpu.memory_space<vmem>>, vector<8x32xbf16>
    %cst_98 = arith.constant dense<0.000000e+00> : vector<8x32xf32>
    %126 = tpu.matmul %124, %125, %cst_98 {dimension_numbers = #tpu.dot_dimension_numbers<[1], [0], [0], [1], [0, 0, 1, 1], [], []>} : vector<8x8xbf16>, vector<8x32xbf16>, vector<8x32xf32> -> vector<8x32xf32>
    %127 = arith.addf %115, %126 : vector<8x32xf32>
    %c0_99 = arith.constant 0 : index
    %c0_100 = arith.constant 0 : index
    %128 = vector.load %arg12[%c0_99, %c0_100] : memref<1x32xf32, #tpu.memory_space<vmem>>, vector<1x32xf32>
    %129 = vector.broadcast %128 : vector<1x32xf32> to vector<8x32xf32>
    %130 = arith.mulf %127, %129 : vector<8x32xf32>
    %c0_101 = arith.constant 0 : index
    %c0_102 = arith.constant 0 : index
    %131 = vector.load %arg13[%c0_101, %c0_102] : memref<1x32xf32, #tpu.memory_space<vmem>>, vector<1x32xf32>
    %132 = vector.broadcast %131 : vector<1x32xf32> to vector<8x32xf32>
    %133 = arith.addf %130, %132 : vector<8x32xf32>
    %cst_103 = arith.constant 0.000000e+00 : f32
    %134 = vector.broadcast %cst_103 : f32 to vector<8x32xf32>
    %135 = arith.maximumf %133, %134 : vector<8x32xf32>
    %136 = arith.truncf %135 : vector<8x32xf32> to vector<8x32xbf16>
    %c4_104 = arith.constant 4 : index
    %c0_105 = arith.constant 0 : index
    %c0_106 = arith.constant 0 : index
    %137 = vector.load %arg14[%c4_104, %c0_105, %c0_106] : memref<9x32x8xbf16, #tpu.memory_space<vmem>>, vector<1x32x8xbf16>
    %138 = vector.shape_cast %137 : vector<1x32x8xbf16> to vector<32x8xbf16>
    %cst_107 = arith.constant dense<0.000000e+00> : vector<8x8xf32>
    %139 = tpu.matmul %136, %138, %cst_107 {dimension_numbers = #tpu.dot_dimension_numbers<[1], [0], [0], [1], [0, 0, 1, 1], [], []>} : vector<8x32xbf16>, vector<32x8xbf16>, vector<8x8xf32> -> vector<8x8xf32>
    %c0_108 = arith.constant 0 : index
    %c0_109 = arith.constant 0 : index
    %c0_110 = arith.constant 0 : index
    %140 = vector.load %arg2[%c0_108, %c0_109, %c0_110] : memref<8x8x8xbf16, #tpu.memory_space<vmem>>, vector<1x8x8xbf16>
    %141 = vector.shape_cast %140 : vector<1x8x8xbf16> to vector<8x8xbf16>
    %cst_111 = arith.constant dense<0.000000e+00> : vector<8x32xf32>
    %142 = tpu.matmul %141, %136, %cst_111 {dimension_numbers = #tpu.dot_dimension_numbers<[1], [0], [0], [1], [0, 0, 1, 1], [], []>} : vector<8x8xbf16>, vector<8x32xbf16>, vector<8x32xf32> -> vector<8x32xf32>
    %143 = arith.truncf %142 : vector<8x32xf32> to vector<8x32xbf16>
    %c0_112 = arith.constant 0 : index
    %c0_113 = arith.constant 0 : index
    %c0_114 = arith.constant 0 : index
    %144 = vector.load %arg14[%c0_112, %c0_113, %c0_114] : memref<9x32x8xbf16, #tpu.memory_space<vmem>>, vector<1x32x8xbf16>
    %145 = vector.shape_cast %144 : vector<1x32x8xbf16> to vector<32x8xbf16>
    %cst_115 = arith.constant dense<0.000000e+00> : vector<8x8xf32>
    %146 = tpu.matmul %143, %145, %cst_115 {dimension_numbers = #tpu.dot_dimension_numbers<[1], [0], [0], [1], [0, 0, 1, 1], [], []>} : vector<8x32xbf16>, vector<32x8xbf16>, vector<8x8xf32> -> vector<8x8xf32>
    %147 = arith.addf %139, %146 : vector<8x8xf32>
    %c1_116 = arith.constant 1 : index
    %c0_117 = arith.constant 0 : index
    %c0_118 = arith.constant 0 : index
    %148 = vector.load %arg2[%c1_116, %c0_117, %c0_118] : memref<8x8x8xbf16, #tpu.memory_space<vmem>>, vector<1x8x8xbf16>
    %149 = vector.shape_cast %148 : vector<1x8x8xbf16> to vector<8x8xbf16>
    %cst_119 = arith.constant dense<0.000000e+00> : vector<8x32xf32>
    %150 = tpu.matmul %149, %136, %cst_119 {dimension_numbers = #tpu.dot_dimension_numbers<[1], [0], [0], [1], [0, 0, 1, 1], [], []>} : vector<8x8xbf16>, vector<8x32xbf16>, vector<8x32xf32> -> vector<8x32xf32>
    %151 = arith.truncf %150 : vector<8x32xf32> to vector<8x32xbf16>
    %c1_120 = arith.constant 1 : index
    %c0_121 = arith.constant 0 : index
    %c0_122 = arith.constant 0 : index
    %152 = vector.load %arg14[%c1_120, %c0_121, %c0_122] : memref<9x32x8xbf16, #tpu.memory_space<vmem>>, vector<1x32x8xbf16>
    %153 = vector.shape_cast %152 : vector<1x32x8xbf16> to vector<32x8xbf16>
    %cst_123 = arith.constant dense<0.000000e+00> : vector<8x8xf32>
    %154 = tpu.matmul %151, %153, %cst_123 {dimension_numbers = #tpu.dot_dimension_numbers<[1], [0], [0], [1], [0, 0, 1, 1], [], []>} : vector<8x32xbf16>, vector<32x8xbf16>, vector<8x8xf32> -> vector<8x8xf32>
    %155 = arith.addf %147, %154 : vector<8x8xf32>
    %c2_124 = arith.constant 2 : index
    %c0_125 = arith.constant 0 : index
    %c0_126 = arith.constant 0 : index
    %156 = vector.load %arg2[%c2_124, %c0_125, %c0_126] : memref<8x8x8xbf16, #tpu.memory_space<vmem>>, vector<1x8x8xbf16>
    %157 = vector.shape_cast %156 : vector<1x8x8xbf16> to vector<8x8xbf16>
    %cst_127 = arith.constant dense<0.000000e+00> : vector<8x32xf32>
    %158 = tpu.matmul %157, %136, %cst_127 {dimension_numbers = #tpu.dot_dimension_numbers<[1], [0], [0], [1], [0, 0, 1, 1], [], []>} : vector<8x8xbf16>, vector<8x32xbf16>, vector<8x32xf32> -> vector<8x32xf32>
    %159 = arith.truncf %158 : vector<8x32xf32> to vector<8x32xbf16>
    %c2_128 = arith.constant 2 : index
    %c0_129 = arith.constant 0 : index
    %c0_130 = arith.constant 0 : index
    %160 = vector.load %arg14[%c2_128, %c0_129, %c0_130] : memref<9x32x8xbf16, #tpu.memory_space<vmem>>, vector<1x32x8xbf16>
    %161 = vector.shape_cast %160 : vector<1x32x8xbf16> to vector<32x8xbf16>
    %cst_131 = arith.constant dense<0.000000e+00> : vector<8x8xf32>
    %162 = tpu.matmul %159, %161, %cst_131 {dimension_numbers = #tpu.dot_dimension_numbers<[1], [0], [0], [1], [0, 0, 1, 1], [], []>} : vector<8x32xbf16>, vector<32x8xbf16>, vector<8x8xf32> -> vector<8x8xf32>
    %163 = arith.addf %155, %162 : vector<8x8xf32>
    %c3_132 = arith.constant 3 : index
    %c0_133 = arith.constant 0 : index
    %c0_134 = arith.constant 0 : index
    %164 = vector.load %arg2[%c3_132, %c0_133, %c0_134] : memref<8x8x8xbf16, #tpu.memory_space<vmem>>, vector<1x8x8xbf16>
    %165 = vector.shape_cast %164 : vector<1x8x8xbf16> to vector<8x8xbf16>
    %cst_135 = arith.constant dense<0.000000e+00> : vector<8x32xf32>
    %166 = tpu.matmul %165, %136, %cst_135 {dimension_numbers = #tpu.dot_dimension_numbers<[1], [0], [0], [1], [0, 0, 1, 1], [], []>} : vector<8x8xbf16>, vector<8x32xbf16>, vector<8x32xf32> -> vector<8x32xf32>
    %167 = arith.truncf %166 : vector<8x32xf32> to vector<8x32xbf16>
    %c3_136 = arith.constant 3 : index
    %c0_137 = arith.constant 0 : index
    %c0_138 = arith.constant 0 : index
    %168 = vector.load %arg14[%c3_136, %c0_137, %c0_138] : memref<9x32x8xbf16, #tpu.memory_space<vmem>>, vector<1x32x8xbf16>
    %169 = vector.shape_cast %168 : vector<1x32x8xbf16> to vector<32x8xbf16>
    %cst_139 = arith.constant dense<0.000000e+00> : vector<8x8xf32>
    %170 = tpu.matmul %167, %169, %cst_139 {dimension_numbers = #tpu.dot_dimension_numbers<[1], [0], [0], [1], [0, 0, 1, 1], [], []>} : vector<8x32xbf16>, vector<32x8xbf16>, vector<8x8xf32> -> vector<8x8xf32>
    %171 = arith.addf %163, %170 : vector<8x8xf32>
    %c4_140 = arith.constant 4 : index
    %c0_141 = arith.constant 0 : index
    %c0_142 = arith.constant 0 : index
    %172 = vector.load %arg2[%c4_140, %c0_141, %c0_142] : memref<8x8x8xbf16, #tpu.memory_space<vmem>>, vector<1x8x8xbf16>
    %173 = vector.shape_cast %172 : vector<1x8x8xbf16> to vector<8x8xbf16>
    %cst_143 = arith.constant dense<0.000000e+00> : vector<8x32xf32>
    %174 = tpu.matmul %173, %136, %cst_143 {dimension_numbers = #tpu.dot_dimension_numbers<[1], [0], [0], [1], [0, 0, 1, 1], [], []>} : vector<8x8xbf16>, vector<8x32xbf16>, vector<8x32xf32> -> vector<8x32xf32>
    %175 = arith.truncf %174 : vector<8x32xf32> to vector<8x32xbf16>
    %c5_144 = arith.constant 5 : index
    %c0_145 = arith.constant 0 : index
    %c0_146 = arith.constant 0 : index
    %176 = vector.load %arg14[%c5_144, %c0_145, %c0_146] : memref<9x32x8xbf16, #tpu.memory_space<vmem>>, vector<1x32x8xbf16>
    %177 = vector.shape_cast %176 : vector<1x32x8xbf16> to vector<32x8xbf16>
    %cst_147 = arith.constant dense<0.000000e+00> : vector<8x8xf32>
    %178 = tpu.matmul %175, %177, %cst_147 {dimension_numbers = #tpu.dot_dimension_numbers<[1], [0], [0], [1], [0, 0, 1, 1], [], []>} : vector<8x32xbf16>, vector<32x8xbf16>, vector<8x8xf32> -> vector<8x8xf32>
    %179 = arith.addf %171, %178 : vector<8x8xf32>
    %c5_148 = arith.constant 5 : index
    %c0_149 = arith.constant 0 : index
    %c0_150 = arith.constant 0 : index
    %180 = vector.load %arg2[%c5_148, %c0_149, %c0_150] : memref<8x8x8xbf16, #tpu.memory_space<vmem>>, vector<1x8x8xbf16>
    %181 = vector.shape_cast %180 : vector<1x8x8xbf16> to vector<8x8xbf16>
    %cst_151 = arith.constant dense<0.000000e+00> : vector<8x32xf32>
    %182 = tpu.matmul %181, %136, %cst_151 {dimension_numbers = #tpu.dot_dimension_numbers<[1], [0], [0], [1], [0, 0, 1, 1], [], []>} : vector<8x8xbf16>, vector<8x32xbf16>, vector<8x32xf32> -> vector<8x32xf32>
    %183 = arith.truncf %182 : vector<8x32xf32> to vector<8x32xbf16>
    %c6_152 = arith.constant 6 : index
    %c0_153 = arith.constant 0 : index
    %c0_154 = arith.constant 0 : index
    %184 = vector.load %arg14[%c6_152, %c0_153, %c0_154] : memref<9x32x8xbf16, #tpu.memory_space<vmem>>, vector<1x32x8xbf16>
    %185 = vector.shape_cast %184 : vector<1x32x8xbf16> to vector<32x8xbf16>
    %cst_155 = arith.constant dense<0.000000e+00> : vector<8x8xf32>
    %186 = tpu.matmul %183, %185, %cst_155 {dimension_numbers = #tpu.dot_dimension_numbers<[1], [0], [0], [1], [0, 0, 1, 1], [], []>} : vector<8x32xbf16>, vector<32x8xbf16>, vector<8x8xf32> -> vector<8x8xf32>
    %187 = arith.addf %179, %186 : vector<8x8xf32>
    %c6_156 = arith.constant 6 : index
    %c0_157 = arith.constant 0 : index
    %c0_158 = arith.constant 0 : index
    %188 = vector.load %arg2[%c6_156, %c0_157, %c0_158] : memref<8x8x8xbf16, #tpu.memory_space<vmem>>, vector<1x8x8xbf16>
    %189 = vector.shape_cast %188 : vector<1x8x8xbf16> to vector<8x8xbf16>
    %cst_159 = arith.constant dense<0.000000e+00> : vector<8x32xf32>
    %190 = tpu.matmul %189, %136, %cst_159 {dimension_numbers = #tpu.dot_dimension_numbers<[1], [0], [0], [1], [0, 0, 1, 1], [], []>} : vector<8x8xbf16>, vector<8x32xbf16>, vector<8x32xf32> -> vector<8x32xf32>
    %191 = arith.truncf %190 : vector<8x32xf32> to vector<8x32xbf16>
    %c7_160 = arith.constant 7 : index
    %c0_161 = arith.constant 0 : index
    %c0_162 = arith.constant 0 : index
    %192 = vector.load %arg14[%c7_160, %c0_161, %c0_162] : memref<9x32x8xbf16, #tpu.memory_space<vmem>>, vector<1x32x8xbf16>
    %193 = vector.shape_cast %192 : vector<1x32x8xbf16> to vector<32x8xbf16>
    %cst_163 = arith.constant dense<0.000000e+00> : vector<8x8xf32>
    %194 = tpu.matmul %191, %193, %cst_163 {dimension_numbers = #tpu.dot_dimension_numbers<[1], [0], [0], [1], [0, 0, 1, 1], [], []>} : vector<8x32xbf16>, vector<32x8xbf16>, vector<8x8xf32> -> vector<8x8xf32>
    %195 = arith.addf %187, %194 : vector<8x8xf32>
    %c7_164 = arith.constant 7 : index
    %c0_165 = arith.constant 0 : index
    %c0_166 = arith.constant 0 : index
    %196 = vector.load %arg2[%c7_164, %c0_165, %c0_166] : memref<8x8x8xbf16, #tpu.memory_space<vmem>>, vector<1x8x8xbf16>
    %197 = vector.shape_cast %196 : vector<1x8x8xbf16> to vector<8x8xbf16>
    %cst_167 = arith.constant dense<0.000000e+00> : vector<8x32xf32>
    %198 = tpu.matmul %197, %136, %cst_167 {dimension_numbers = #tpu.dot_dimension_numbers<[1], [0], [0], [1], [0, 0, 1, 1], [], []>} : vector<8x8xbf16>, vector<8x32xbf16>, vector<8x32xf32> -> vector<8x32xf32>
    %199 = arith.truncf %198 : vector<8x32xf32> to vector<8x32xbf16>
    %c8_168 = arith.constant 8 : index
    %c0_169 = arith.constant 0 : index
    %c0_170 = arith.constant 0 : index
    %200 = vector.load %arg14[%c8_168, %c0_169, %c0_170] : memref<9x32x8xbf16, #tpu.memory_space<vmem>>, vector<1x32x8xbf16>
    %201 = vector.shape_cast %200 : vector<1x32x8xbf16> to vector<32x8xbf16>
    %cst_171 = arith.constant dense<0.000000e+00> : vector<8x8xf32>
    %202 = tpu.matmul %199, %201, %cst_171 {dimension_numbers = #tpu.dot_dimension_numbers<[1], [0], [0], [1], [0, 0, 1, 1], [], []>} : vector<8x32xbf16>, vector<32x8xbf16>, vector<8x8xf32> -> vector<8x8xf32>
    %203 = arith.addf %195, %202 : vector<8x8xf32>
    %c0_172 = arith.constant 0 : index
    %c0_173 = arith.constant 0 : index
    %204 = vector.load %arg15[%c0_172, %c0_173] : memref<1x32xf32, #tpu.memory_space<vmem>>, vector<1x16xf32>
    %205 = vector.broadcast %204 : vector<1x16xf32> to vector<8x16xf32>
    %206 = arith.mulf %17, %205 : vector<8x16xf32>
    %c0_174 = arith.constant 0 : index
    %c0_175 = arith.constant 0 : index
    %207 = vector.load %arg16[%c0_174, %c0_175] : memref<1x32xf32, #tpu.memory_space<vmem>>, vector<1x16xf32>
    %208 = vector.broadcast %207 : vector<1x16xf32> to vector<8x16xf32>
    %209 = arith.addf %206, %208 : vector<8x16xf32>
    %cst_176 = arith.constant 0.000000e+00 : f32
    %210 = vector.broadcast %cst_176 : f32 to vector<8x16xf32>
    %211 = arith.maximumf %209, %210 : vector<8x16xf32>
    %212 = arith.truncf %211 : vector<8x16xf32> to vector<8x16xbf16>
    %c0_177 = arith.constant 0 : index
    %c0_178 = arith.constant 0 : index
    %213 = vector.load %arg17[%c0_177, %c0_178] : memref<32x128xbf16, #tpu.memory_space<vmem>>, vector<16x128xbf16>
    %cst_179 = arith.constant dense<0.000000e+00> : vector<8x128xf32>
    %214 = tpu.matmul %212, %213, %cst_179 {dimension_numbers = #tpu.dot_dimension_numbers<[1], [0], [0], [1], [0, 0, 1, 1], [], []>} : vector<8x16xbf16>, vector<16x128xbf16>, vector<8x128xf32> -> vector<8x128xf32>
    %c0_180 = arith.constant 0 : index
    %c16_181 = arith.constant 16 : index
    %215 = vector.load %arg15[%c0_180, %c16_181] : memref<1x32xf32, #tpu.memory_space<vmem>>, vector<1x8xf32>
    %216 = vector.broadcast %215 : vector<1x8xf32> to vector<8x8xf32>
    %217 = arith.mulf %104, %216 : vector<8x8xf32>
    %c0_182 = arith.constant 0 : index
    %c16_183 = arith.constant 16 : index
    %218 = vector.load %arg16[%c0_182, %c16_183] : memref<1x32xf32, #tpu.memory_space<vmem>>, vector<1x8xf32>
    %219 = vector.broadcast %218 : vector<1x8xf32> to vector<8x8xf32>
    %220 = arith.addf %217, %219 : vector<8x8xf32>
    %cst_184 = arith.constant 0.000000e+00 : f32
    %221 = vector.broadcast %cst_184 : f32 to vector<8x8xf32>
    %222 = arith.maximumf %220, %221 : vector<8x8xf32>
    %223 = arith.truncf %222 : vector<8x8xf32> to vector<8x8xbf16>
    %c16_185 = arith.constant 16 : index
    %c0_186 = arith.constant 0 : index
    %224 = vector.load %arg17[%c16_185, %c0_186] : memref<32x128xbf16, #tpu.memory_space<vmem>>, vector<8x128xbf16>
    %cst_187 = arith.constant dense<0.000000e+00> : vector<8x128xf32>
    %225 = tpu.matmul %223, %224, %cst_187 {dimension_numbers = #tpu.dot_dimension_numbers<[1], [0], [0], [1], [0, 0, 1, 1], [], []>} : vector<8x8xbf16>, vector<8x128xbf16>, vector<8x128xf32> -> vector<8x128xf32>
    %226 = arith.addf %214, %225 : vector<8x128xf32>
    %c0_188 = arith.constant 0 : index
    %c24 = arith.constant 24 : index
    %227 = vector.load %arg15[%c0_188, %c24] : memref<1x32xf32, #tpu.memory_space<vmem>>, vector<1x8xf32>
    %228 = vector.broadcast %227 : vector<1x8xf32> to vector<8x8xf32>
    %229 = arith.mulf %203, %228 : vector<8x8xf32>
    %c0_189 = arith.constant 0 : index
    %c24_190 = arith.constant 24 : index
    %230 = vector.load %arg16[%c0_189, %c24_190] : memref<1x32xf32, #tpu.memory_space<vmem>>, vector<1x8xf32>
    %231 = vector.broadcast %230 : vector<1x8xf32> to vector<8x8xf32>
    %232 = arith.addf %229, %231 : vector<8x8xf32>
    %cst_191 = arith.constant 0.000000e+00 : f32
    %233 = vector.broadcast %cst_191 : f32 to vector<8x8xf32>
    %234 = arith.maximumf %232, %233 : vector<8x8xf32>
    %235 = arith.truncf %234 : vector<8x8xf32> to vector<8x8xbf16>
    %c24_192 = arith.constant 24 : index
    %c0_193 = arith.constant 0 : index
    %236 = vector.load %arg17[%c24_192, %c0_193] : memref<32x128xbf16, #tpu.memory_space<vmem>>, vector<8x128xbf16>
    %cst_194 = arith.constant dense<0.000000e+00> : vector<8x128xf32>
    %237 = tpu.matmul %235, %236, %cst_194 {dimension_numbers = #tpu.dot_dimension_numbers<[1], [0], [0], [1], [0, 0, 1, 1], [], []>} : vector<8x8xbf16>, vector<8x128xbf16>, vector<8x128xf32> -> vector<8x128xf32>
    %238 = arith.addf %226, %237 : vector<8x128xf32>
    %239 = arith.truncf %238 : vector<8x128xf32> to vector<8x128xbf16>
    %c0_195 = arith.constant 0 : index
    %c0_196 = arith.constant 0 : index
    %240 = vector.load %arg18[%c0_195, %c0_196] : memref<8x128xbf16, #tpu.memory_space<vmem>>, vector<8x128xbf16>
    tpu.vector_store %arg18[%c0_195, %c0_196], %239 {strides = array<i32>} : memref<8x128xbf16, #tpu.memory_space<vmem>>, vector<8x128xbf16>,
    return
  }
  func.func @transform_0(%arg0: i32) -> (i32, i32, i32) {
    %c0_i32 = arith.constant 0 : i32
    %c0_i32_0 = arith.constant 0 : i32
    %c0_i32_1 = arith.constant 0 : i32
    %c0_i32_2 = arith.constant 0 : i32
    return %c0_i32, %c0_i32_0, %c0_i32_1 : i32, i32, i32
  }
  func.func @transform_1(%arg0: i32) -> (i32, i32, i32) {
    %c0_i32 = arith.constant 0 : i32
    %c0_i32_0 = arith.constant 0 : i32
    %c0_i32_1 = arith.constant 0 : i32
    %c0_i32_2 = arith.constant 0 : i32
    return %c0_i32, %c0_i32_0, %c0_i32_1 : i32, i32, i32
  }
  func.func @transform_2(%arg0: i32) -> (i32, i32) {
    %c0_i32 = arith.constant 0 : i32
    %c0_i32_0 = arith.constant 0 : i32
    %c0_i32_1 = arith.constant 0 : i32
    return %c0_i32, %c0_i32_0 : i32, i32
  }
  func.func @transform_3(%arg0: i32) -> (i32, i32) {
    %c0_i32 = arith.constant 0 : i32
    %c0_i32_0 = arith.constant 0 : i32
    %c0_i32_1 = arith.constant 0 : i32
    return %c0_i32, %c0_i32_0 : i32, i32
  }
  func.func @transform_4(%arg0: i32) -> (i32, i32) {
    %c0_i32 = arith.constant 0 : i32
    %c0_i32_0 = arith.constant 0 : i32
    %c0_i32_1 = arith.constant 0 : i32
    return %c0_i32, %c0_i32_0 : i32, i32
  }
  func.func @transform_5(%arg0: i32) -> (i32, i32) {
    %c0_i32 = arith.constant 0 : i32
    %c0_i32_0 = arith.constant 0 : i32
    %c0_i32_1 = arith.constant 0 : i32
    return %c0_i32, %c0_i32_0 : i32, i32
  }
  func.func @transform_6(%arg0: i32) -> (i32, i32) {
    %c0_i32 = arith.constant 0 : i32
    %c0_i32_0 = arith.constant 0 : i32
    %c0_i32_1 = arith.constant 0 : i32
    return %c0_i32, %c0_i32_0 : i32, i32
  }
  func.func @transform_7(%arg0: i32) -> (i32, i32, i32) {
    %c0_i32 = arith.constant 0 : i32
    %c0_i32_0 = arith.constant 0 : i32
    %c0_i32_1 = arith.constant 0 : i32
    %c0_i32_2 = arith.constant 0 : i32
    return %c0_i32, %c0_i32_0, %c0_i32_1 : i32, i32, i32
  }
  func.func @transform_8(%arg0: i32) -> (i32, i32) {
    %c0_i32 = arith.constant 0 : i32
    %c0_i32_0 = arith.constant 0 : i32
    %c0_i32_1 = arith.constant 0 : i32
    return %c0_i32, %c0_i32_0 : i32, i32
  }
  func.func @transform_9(%arg0: i32) -> (i32, i32) {
    %c0_i32 = arith.constant 0 : i32
    %c0_i32_0 = arith.constant 0 : i32
    %c0_i32_1 = arith.constant 0 : i32
    return %c0_i32, %c0_i32_0 : i32, i32
  }
  func.func @transform_10(%arg0: i32) -> (i32, i32) {
    %c0_i32 = arith.constant 0 : i32
    %c0_i32_0 = arith.constant 0 : i32
    %c0_i32_1 = arith.constant 0 : i32
    return %c0_i32, %c0_i32_0 : i32, i32
  }
  func.func @transform_11(%arg0: i32) -> (i32, i32) {
    %c0_i32 = arith.constant 0 : i32
    %c0_i32_0 = arith.constant 0 : i32
    %c0_i32_1 = arith.constant 0 : i32
    return %c0_i32, %c0_i32_0 : i32, i32
  }
  func.func @transform_12(%arg0: i32) -> (i32, i32) {
    %c0_i32 = arith.constant 0 : i32
    %c0_i32_0 = arith.constant 0 : i32
    %c0_i32_1 = arith.constant 0 : i32
    return %c0_i32, %c0_i32_0 : i32, i32
  }
  func.func @transform_13(%arg0: i32) -> (i32, i32, i32) {
    %c0_i32 = arith.constant 0 : i32
    %c0_i32_0 = arith.constant 0 : i32
    %c0_i32_1 = arith.constant 0 : i32
    %c0_i32_2 = arith.constant 0 : i32
    return %c0_i32, %c0_i32_0, %c0_i32_1 : i32, i32, i32
  }
  func.func @transform_14(%arg0: i32) -> (i32, i32) {
    %c0_i32 = arith.constant 0 : i32
    %c0_i32_0 = arith.constant 0 : i32
    %c0_i32_1 = arith.constant 0 : i32
    return %c0_i32, %c0_i32_0 : i32, i32
  }
  func.func @transform_15(%arg0: i32) -> (i32, i32) {
    %c0_i32 = arith.constant 0 : i32
    %c0_i32_0 = arith.constant 0 : i32
    %c0_i32_1 = arith.constant 0 : i32
    return %c0_i32, %c0_i32_0 : i32, i32
  }
  func.func @transform_16(%arg0: i32) -> (i32, i32) {
    %c0_i32 = arith.constant 0 : i32
    %c0_i32_0 = arith.constant 0 : i32
    %c0_i32_1 = arith.constant 0 : i32
    return %c0_i32, %c0_i32_0 : i32, i32
  }
  func.func @transform_17(%arg0: i32) -> (i32, i32) {
    %c0_i32 = arith.constant 0 : i32
    %c0_i32_0 = arith.constant 0 : i32
    %c0_i32_1 = arith.constant 0 : i32
    return %c0_i32, %c0_i32_0 : i32, i32
  }
}

module attributes {stable_mosaic.version = 11 : i64} {
  func.func @kernel(%arg0: i32, %arg1: memref<4x2x128xbf16, #tpu.memory_space<vmem>>, %arg2: memref<1x16xf32, #tpu.memory_space<vmem>>, %arg3: memref<1x16xf32, #tpu.memory_space<vmem>>, %arg4: memref<16x32xbf16, #tpu.memory_space<vmem>>, %arg5: memref<1x32xf32, #tpu.memory_space<vmem>>, %arg6: memref<1x32xf32, #tpu.memory_space<vmem>>, %arg7: memref<9x32x8xbf16, #tpu.memory_space<vmem>>, %arg8: memref<1x24xf32, #tpu.memory_space<vmem>>, %arg9: memref<1x24xf32, #tpu.memory_space<vmem>>, %arg10: memref<24x32xbf16, #tpu.memory_space<vmem>>, %arg11: memref<1x32xf32, #tpu.memory_space<vmem>>, %arg12: memref<1x32xf32, #tpu.memory_space<vmem>>, %arg13: memref<9x32x8xbf16, #tpu.memory_space<vmem>>, %arg14: memref<1x32xf32, #tpu.memory_space<vmem>>, %arg15: memref<1x32xf32, #tpu.memory_space<vmem>>, %arg16: memref<32x128xbf16, #tpu.memory_space<vmem>>, %arg17: memref<1x128xf32, #tpu.memory_space<vmem>>, %arg18: memref<2x128xf32, #tpu.memory_space<vmem>>) attributes {dimension_semantics = [#tpu.dimension_semantics<arbitrary>], iteration_bounds = array<i64: 1>, scalar_prefetch = 0 : i64, scratch_operands = 0 : i64, tpu.core_type = #tpu.core_type<tc>, window_params = [{pipeline_mode = #tpu.pipeline_mode<synchronous>, transform_indices = @transform_0, window_bounds = array<i64: 4, 2, 128>}, {pipeline_mode = #tpu.pipeline_mode<synchronous>, transform_indices = @transform_1, window_bounds = array<i64: 1, 16>}, {pipeline_mode = #tpu.pipeline_mode<synchronous>, transform_indices = @transform_2, window_bounds = array<i64: 1, 16>}, {pipeline_mode = #tpu.pipeline_mode<synchronous>, transform_indices = @transform_3, window_bounds = array<i64: 16, 32>}, {pipeline_mode = #tpu.pipeline_mode<synchronous>, transform_indices = @transform_4, window_bounds = array<i64: 1, 32>}, {pipeline_mode = #tpu.pipeline_mode<synchronous>, transform_indices = @transform_5, window_bounds = array<i64: 1, 32>}, {pipeline_mode = #tpu.pipeline_mode<synchronous>, transform_indices = @transform_6, window_bounds = array<i64: 9, 32, 8>}, {pipeline_mode = #tpu.pipeline_mode<synchronous>, transform_indices = @transform_7, window_bounds = array<i64: 1, 24>}, {pipeline_mode = #tpu.pipeline_mode<synchronous>, transform_indices = @transform_8, window_bounds = array<i64: 1, 24>}, {pipeline_mode = #tpu.pipeline_mode<synchronous>, transform_indices = @transform_9, window_bounds = array<i64: 24, 32>}, {pipeline_mode = #tpu.pipeline_mode<synchronous>, transform_indices = @transform_10, window_bounds = array<i64: 1, 32>}, {pipeline_mode = #tpu.pipeline_mode<synchronous>, transform_indices = @transform_11, window_bounds = array<i64: 1, 32>}, {pipeline_mode = #tpu.pipeline_mode<synchronous>, transform_indices = @transform_12, window_bounds = array<i64: 9, 32, 8>}, {pipeline_mode = #tpu.pipeline_mode<synchronous>, transform_indices = @transform_13, window_bounds = array<i64: 1, 32>}, {pipeline_mode = #tpu.pipeline_mode<synchronous>, transform_indices = @transform_14, window_bounds = array<i64: 1, 32>}, {pipeline_mode = #tpu.pipeline_mode<synchronous>, transform_indices = @transform_15, window_bounds = array<i64: 32, 128>}, {pipeline_mode = #tpu.pipeline_mode<synchronous>, transform_indices = @transform_16, window_bounds = array<i64: 1, 128>}, {pipeline_mode = #tpu.pipeline_mode<synchronous>, transform_indices = @transform_17, window_bounds = array<i64: 2, 128>}]} {
    %c0 = arith.constant 0 : index
    %c0_0 = arith.constant 0 : index
    %c0_1 = arith.constant 0 : index
    %0 = vector.load %arg1[%c0, %c0_0, %c0_1] : memref<4x2x128xbf16, #tpu.memory_space<vmem>>, vector<1x2x128xbf16>
    %1 = vector.shape_cast %0 : vector<1x2x128xbf16> to vector<2x128xbf16>
    %2 = arith.extf %1 : vector<2x128xbf16> to vector<2x128xf32>
    %c1 = arith.constant 1 : index
    %c0_2 = arith.constant 0 : index
    %c0_3 = arith.constant 0 : index
    %3 = vector.load %arg1[%c1, %c0_2, %c0_3] : memref<4x2x128xbf16, #tpu.memory_space<vmem>>, vector<1x2x128xbf16>
    %4 = vector.shape_cast %3 : vector<1x2x128xbf16> to vector<2x128xbf16>
    %5 = arith.extf %4 : vector<2x128xbf16> to vector<2x128xf32>
    %6 = arith.addf %2, %5 : vector<2x128xf32>
    %c2 = arith.constant 2 : index
    %c0_4 = arith.constant 0 : index
    %c0_5 = arith.constant 0 : index
    %7 = vector.load %arg1[%c2, %c0_4, %c0_5] : memref<4x2x128xbf16, #tpu.memory_space<vmem>>, vector<1x2x128xbf16>
    %8 = vector.shape_cast %7 : vector<1x2x128xbf16> to vector<2x128xbf16>
    %9 = arith.extf %8 : vector<2x128xbf16> to vector<2x128xf32>
    %10 = arith.addf %6, %9 : vector<2x128xf32>
    %c3 = arith.constant 3 : index
    %c0_6 = arith.constant 0 : index
    %c0_7 = arith.constant 0 : index
    %11 = vector.load %arg1[%c3, %c0_6, %c0_7] : memref<4x2x128xbf16, #tpu.memory_space<vmem>>, vector<1x2x128xbf16>
    %12 = vector.shape_cast %11 : vector<1x2x128xbf16> to vector<2x128xbf16>
    %13 = arith.extf %12 : vector<2x128xbf16> to vector<2x128xf32>
    %14 = arith.addf %10, %13 : vector<2x128xf32>
    %cst = arith.constant 2.500000e-01 : f32
    %15 = vector.broadcast %cst : f32 to vector<2x128xf32>
    %16 = arith.mulf %14, %15 : vector<2x128xf32>
    %17 = vector.extract_strided_slice %16 {offsets = [0, 0], sizes = [2, 16], strides = [1, 1]} : vector<2x128xf32> to vector<2x16xf32>
    %c0_8 = arith.constant 0 : index
    %c0_9 = arith.constant 0 : index
    %18 = vector.load %arg2[%c0_8, %c0_9] : memref<1x16xf32, #tpu.memory_space<vmem>>, vector<1x16xf32>
    %19 = vector.broadcast %18 : vector<1x16xf32> to vector<2x16xf32>
    %20 = arith.mulf %17, %19 : vector<2x16xf32>
    %c0_10 = arith.constant 0 : index
    %c0_11 = arith.constant 0 : index
    %21 = vector.load %arg3[%c0_10, %c0_11] : memref<1x16xf32, #tpu.memory_space<vmem>>, vector<1x16xf32>
    %22 = vector.broadcast %21 : vector<1x16xf32> to vector<2x16xf32>
    %23 = arith.addf %20, %22 : vector<2x16xf32>
    %cst_12 = arith.constant 0.000000e+00 : f32
    %24 = vector.broadcast %cst_12 : f32 to vector<2x16xf32>
    %25 = arith.maximumf %23, %24 : vector<2x16xf32>
    %26 = arith.truncf %25 : vector<2x16xf32> to vector<2x16xbf16>
    %c0_13 = arith.constant 0 : index
    %c0_14 = arith.constant 0 : index
    %27 = vector.load %arg4[%c0_13, %c0_14] : memref<16x32xbf16, #tpu.memory_space<vmem>>, vector<16x32xbf16>
    %cst_15 = arith.constant dense<0.000000e+00> : vector<2x32xf32>
    %28 = tpu.matmul %26, %27, %cst_15 {dimension_numbers = #tpu.dot_dimension_numbers<[1], [0], [0], [1], [0, 0, 1, 1], [], []>} : vector<2x16xbf16>, vector<16x32xbf16>, vector<2x32xf32> -> vector<2x32xf32>
    %c0_16 = arith.constant 0 : index
    %c0_17 = arith.constant 0 : index
    %29 = vector.load %arg5[%c0_16, %c0_17] : memref<1x32xf32, #tpu.memory_space<vmem>>, vector<1x32xf32>
    %30 = vector.broadcast %29 : vector<1x32xf32> to vector<2x32xf32>
    %31 = arith.mulf %28, %30 : vector<2x32xf32>
    %c0_18 = arith.constant 0 : index
    %c0_19 = arith.constant 0 : index
    %32 = vector.load %arg6[%c0_18, %c0_19] : memref<1x32xf32, #tpu.memory_space<vmem>>, vector<1x32xf32>
    %33 = vector.broadcast %32 : vector<1x32xf32> to vector<2x32xf32>
    %34 = arith.addf %31, %33 : vector<2x32xf32>
    %cst_20 = arith.constant 0.000000e+00 : f32
    %35 = vector.broadcast %cst_20 : f32 to vector<2x32xf32>
    %36 = arith.maximumf %34, %35 : vector<2x32xf32>
    %37 = arith.truncf %36 : vector<2x32xf32> to vector<2x32xbf16>
    %c4 = arith.constant 4 : index
    %c0_21 = arith.constant 0 : index
    %c0_22 = arith.constant 0 : index
    %38 = vector.load %arg7[%c4, %c0_21, %c0_22] : memref<9x32x8xbf16, #tpu.memory_space<vmem>>, vector<1x32x8xbf16>
    %39 = vector.shape_cast %38 : vector<1x32x8xbf16> to vector<32x8xbf16>
    %cst_23 = arith.constant dense<0.000000e+00> : vector<2x8xf32>
    %40 = tpu.matmul %37, %39, %cst_23 {dimension_numbers = #tpu.dot_dimension_numbers<[1], [0], [0], [1], [0, 0, 1, 1], [], []>} : vector<2x32xbf16>, vector<32x8xbf16>, vector<2x8xf32> -> vector<2x8xf32>
    %c0_24 = arith.constant 0 : index
    %c0_25 = arith.constant 0 : index
    %41 = vector.load %arg8[%c0_24, %c0_25] : memref<1x24xf32, #tpu.memory_space<vmem>>, vector<1x16xf32>
    %42 = vector.broadcast %41 : vector<1x16xf32> to vector<2x16xf32>
    %43 = arith.mulf %17, %42 : vector<2x16xf32>
    %c0_26 = arith.constant 0 : index
    %c0_27 = arith.constant 0 : index
    %44 = vector.load %arg9[%c0_26, %c0_27] : memref<1x24xf32, #tpu.memory_space<vmem>>, vector<1x16xf32>
    %45 = vector.broadcast %44 : vector<1x16xf32> to vector<2x16xf32>
    %46 = arith.addf %43, %45 : vector<2x16xf32>
    %cst_28 = arith.constant 0.000000e+00 : f32
    %47 = vector.broadcast %cst_28 : f32 to vector<2x16xf32>
    %48 = arith.maximumf %46, %47 : vector<2x16xf32>
    %49 = arith.truncf %48 : vector<2x16xf32> to vector<2x16xbf16>
    %c0_29 = arith.constant 0 : index
    %c0_30 = arith.constant 0 : index
    %50 = vector.load %arg10[%c0_29, %c0_30] : memref<24x32xbf16, #tpu.memory_space<vmem>>, vector<16x32xbf16>
    %cst_31 = arith.constant dense<0.000000e+00> : vector<2x32xf32>
    %51 = tpu.matmul %49, %50, %cst_31 {dimension_numbers = #tpu.dot_dimension_numbers<[1], [0], [0], [1], [0, 0, 1, 1], [], []>} : vector<2x16xbf16>, vector<16x32xbf16>, vector<2x32xf32> -> vector<2x32xf32>
    %c0_32 = arith.constant 0 : index
    %c16 = arith.constant 16 : index
    %52 = vector.load %arg8[%c0_32, %c16] : memref<1x24xf32, #tpu.memory_space<vmem>>, vector<1x8xf32>
    %53 = vector.broadcast %52 : vector<1x8xf32> to vector<2x8xf32>
    %54 = arith.mulf %40, %53 : vector<2x8xf32>
    %c0_33 = arith.constant 0 : index
    %c16_34 = arith.constant 16 : index
    %55 = vector.load %arg9[%c0_33, %c16_34] : memref<1x24xf32, #tpu.memory_space<vmem>>, vector<1x8xf32>
    %56 = vector.broadcast %55 : vector<1x8xf32> to vector<2x8xf32>
    %57 = arith.addf %54, %56 : vector<2x8xf32>
    %cst_35 = arith.constant 0.000000e+00 : f32
    %58 = vector.broadcast %cst_35 : f32 to vector<2x8xf32>
    %59 = arith.maximumf %57, %58 : vector<2x8xf32>
    %60 = arith.truncf %59 : vector<2x8xf32> to vector<2x8xbf16>
    %c16_36 = arith.constant 16 : index
    %c0_37 = arith.constant 0 : index
    %61 = vector.load %arg10[%c16_36, %c0_37] : memref<24x32xbf16, #tpu.memory_space<vmem>>, vector<8x32xbf16>
    %cst_38 = arith.constant dense<0.000000e+00> : vector<2x32xf32>
    %62 = tpu.matmul %60, %61, %cst_38 {dimension_numbers = #tpu.dot_dimension_numbers<[1], [0], [0], [1], [0, 0, 1, 1], [], []>} : vector<2x8xbf16>, vector<8x32xbf16>, vector<2x32xf32> -> vector<2x32xf32>
    %63 = arith.addf %51, %62 : vector<2x32xf32>
    %c0_39 = arith.constant 0 : index
    %c0_40 = arith.constant 0 : index
    %64 = vector.load %arg11[%c0_39, %c0_40] : memref<1x32xf32, #tpu.memory_space<vmem>>, vector<1x32xf32>
    %65 = vector.broadcast %64 : vector<1x32xf32> to vector<2x32xf32>
    %66 = arith.mulf %63, %65 : vector<2x32xf32>
    %c0_41 = arith.constant 0 : index
    %c0_42 = arith.constant 0 : index
    %67 = vector.load %arg12[%c0_41, %c0_42] : memref<1x32xf32, #tpu.memory_space<vmem>>, vector<1x32xf32>
    %68 = vector.broadcast %67 : vector<1x32xf32> to vector<2x32xf32>
    %69 = arith.addf %66, %68 : vector<2x32xf32>
    %cst_43 = arith.constant 0.000000e+00 : f32
    %70 = vector.broadcast %cst_43 : f32 to vector<2x32xf32>
    %71 = arith.maximumf %69, %70 : vector<2x32xf32>
    %72 = arith.truncf %71 : vector<2x32xf32> to vector<2x32xbf16>
    %c4_44 = arith.constant 4 : index
    %c0_45 = arith.constant 0 : index
    %c0_46 = arith.constant 0 : index
    %73 = vector.load %arg13[%c4_44, %c0_45, %c0_46] : memref<9x32x8xbf16, #tpu.memory_space<vmem>>, vector<1x32x8xbf16>
    %74 = vector.shape_cast %73 : vector<1x32x8xbf16> to vector<32x8xbf16>
    %cst_47 = arith.constant dense<0.000000e+00> : vector<2x8xf32>
    %75 = tpu.matmul %72, %74, %cst_47 {dimension_numbers = #tpu.dot_dimension_numbers<[1], [0], [0], [1], [0, 0, 1, 1], [], []>} : vector<2x32xbf16>, vector<32x8xbf16>, vector<2x8xf32> -> vector<2x8xf32>
    %c0_48 = arith.constant 0 : index
    %c0_49 = arith.constant 0 : index
    %76 = vector.load %arg14[%c0_48, %c0_49] : memref<1x32xf32, #tpu.memory_space<vmem>>, vector<1x16xf32>
    %77 = vector.broadcast %76 : vector<1x16xf32> to vector<2x16xf32>
    %78 = arith.mulf %17, %77 : vector<2x16xf32>
    %c0_50 = arith.constant 0 : index
    %c0_51 = arith.constant 0 : index
    %79 = vector.load %arg15[%c0_50, %c0_51] : memref<1x32xf32, #tpu.memory_space<vmem>>, vector<1x16xf32>
    %80 = vector.broadcast %79 : vector<1x16xf32> to vector<2x16xf32>
    %81 = arith.addf %78, %80 : vector<2x16xf32>
    %cst_52 = arith.constant 0.000000e+00 : f32
    %82 = vector.broadcast %cst_52 : f32 to vector<2x16xf32>
    %83 = arith.maximumf %81, %82 : vector<2x16xf32>
    %84 = arith.truncf %83 : vector<2x16xf32> to vector<2x16xbf16>
    %c0_53 = arith.constant 0 : index
    %c0_54 = arith.constant 0 : index
    %85 = vector.load %arg16[%c0_53, %c0_54] : memref<32x128xbf16, #tpu.memory_space<vmem>>, vector<16x128xbf16>
    %cst_55 = arith.constant dense<0.000000e+00> : vector<2x128xf32>
    %86 = tpu.matmul %84, %85, %cst_55 {dimension_numbers = #tpu.dot_dimension_numbers<[1], [0], [0], [1], [0, 0, 1, 1], [], []>} : vector<2x16xbf16>, vector<16x128xbf16>, vector<2x128xf32> -> vector<2x128xf32>
    %c0_56 = arith.constant 0 : index
    %c16_57 = arith.constant 16 : index
    %87 = vector.load %arg14[%c0_56, %c16_57] : memref<1x32xf32, #tpu.memory_space<vmem>>, vector<1x8xf32>
    %88 = vector.broadcast %87 : vector<1x8xf32> to vector<2x8xf32>
    %89 = arith.mulf %40, %88 : vector<2x8xf32>
    %c0_58 = arith.constant 0 : index
    %c16_59 = arith.constant 16 : index
    %90 = vector.load %arg15[%c0_58, %c16_59] : memref<1x32xf32, #tpu.memory_space<vmem>>, vector<1x8xf32>
    %91 = vector.broadcast %90 : vector<1x8xf32> to vector<2x8xf32>
    %92 = arith.addf %89, %91 : vector<2x8xf32>
    %cst_60 = arith.constant 0.000000e+00 : f32
    %93 = vector.broadcast %cst_60 : f32 to vector<2x8xf32>
    %94 = arith.maximumf %92, %93 : vector<2x8xf32>
    %95 = arith.truncf %94 : vector<2x8xf32> to vector<2x8xbf16>
    %c16_61 = arith.constant 16 : index
    %c0_62 = arith.constant 0 : index
    %96 = vector.load %arg16[%c16_61, %c0_62] : memref<32x128xbf16, #tpu.memory_space<vmem>>, vector<8x128xbf16>
    %cst_63 = arith.constant dense<0.000000e+00> : vector<2x128xf32>
    %97 = tpu.matmul %95, %96, %cst_63 {dimension_numbers = #tpu.dot_dimension_numbers<[1], [0], [0], [1], [0, 0, 1, 1], [], []>} : vector<2x8xbf16>, vector<8x128xbf16>, vector<2x128xf32> -> vector<2x128xf32>
    %98 = arith.addf %86, %97 : vector<2x128xf32>
    %c0_64 = arith.constant 0 : index
    %c24 = arith.constant 24 : index
    %99 = vector.load %arg14[%c0_64, %c24] : memref<1x32xf32, #tpu.memory_space<vmem>>, vector<1x8xf32>
    %100 = vector.broadcast %99 : vector<1x8xf32> to vector<2x8xf32>
    %101 = arith.mulf %75, %100 : vector<2x8xf32>
    %c0_65 = arith.constant 0 : index
    %c24_66 = arith.constant 24 : index
    %102 = vector.load %arg15[%c0_65, %c24_66] : memref<1x32xf32, #tpu.memory_space<vmem>>, vector<1x8xf32>
    %103 = vector.broadcast %102 : vector<1x8xf32> to vector<2x8xf32>
    %104 = arith.addf %101, %103 : vector<2x8xf32>
    %cst_67 = arith.constant 0.000000e+00 : f32
    %105 = vector.broadcast %cst_67 : f32 to vector<2x8xf32>
    %106 = arith.maximumf %104, %105 : vector<2x8xf32>
    %107 = arith.truncf %106 : vector<2x8xf32> to vector<2x8xbf16>
    %c24_68 = arith.constant 24 : index
    %c0_69 = arith.constant 0 : index
    %108 = vector.load %arg16[%c24_68, %c0_69] : memref<32x128xbf16, #tpu.memory_space<vmem>>, vector<8x128xbf16>
    %cst_70 = arith.constant dense<0.000000e+00> : vector<2x128xf32>
    %109 = tpu.matmul %107, %108, %cst_70 {dimension_numbers = #tpu.dot_dimension_numbers<[1], [0], [0], [1], [0, 0, 1, 1], [], []>} : vector<2x8xbf16>, vector<8x128xbf16>, vector<2x128xf32> -> vector<2x128xf32>
    %110 = arith.addf %98, %109 : vector<2x128xf32>
    %c0_71 = arith.constant 0 : index
    %c0_72 = arith.constant 0 : index
    %111 = vector.load %arg17[%c0_71, %c0_72] : memref<1x128xf32, #tpu.memory_space<vmem>>, vector<1x128xf32>
    %112 = vector.broadcast %111 : vector<1x128xf32> to vector<2x128xf32>
    %113 = arith.addf %110, %112 : vector<2x128xf32>
    %c0_73 = arith.constant 0 : index
    %c0_74 = arith.constant 0 : index
    %114 = vector.load %arg18[%c0_73, %c0_74] : memref<2x128xf32, #tpu.memory_space<vmem>>, vector<2x128xf32>
    tpu.vector_store %arg18[%c0_73, %c0_74], %113 {strides = array<i32>} : memref<2x128xf32, #tpu.memory_space<vmem>>, vector<2x128xf32>,
    return
  }
  func.func @transform_0(%arg0: i32) -> (i32, i32, i32) {
    %c0_i32 = arith.constant 0 : i32
    %c0_i32_0 = arith.constant 0 : i32
    %c0_i32_1 = arith.constant 0 : i32
    %c0_i32_2 = arith.constant 0 : i32
    return %c0_i32, %c0_i32_0, %c0_i32_1 : i32, i32, i32
  }
  func.func @transform_1(%arg0: i32) -> (i32, i32) {
    %c0_i32 = arith.constant 0 : i32
    %c0_i32_0 = arith.constant 0 : i32
    %c0_i32_1 = arith.constant 0 : i32
    return %c0_i32, %c0_i32_0 : i32, i32
  }
  func.func @transform_2(%arg0: i32) -> (i32, i32) {
    %c0_i32 = arith.constant 0 : i32
    %c0_i32_0 = arith.constant 0 : i32
    %c0_i32_1 = arith.constant 0 : i32
    return %c0_i32, %c0_i32_0 : i32, i32
  }
  func.func @transform_3(%arg0: i32) -> (i32, i32) {
    %c0_i32 = arith.constant 0 : i32
    %c0_i32_0 = arith.constant 0 : i32
    %c0_i32_1 = arith.constant 0 : i32
    return %c0_i32, %c0_i32_0 : i32, i32
  }
  func.func @transform_4(%arg0: i32) -> (i32, i32) {
    %c0_i32 = arith.constant 0 : i32
    %c0_i32_0 = arith.constant 0 : i32
    %c0_i32_1 = arith.constant 0 : i32
    return %c0_i32, %c0_i32_0 : i32, i32
  }
  func.func @transform_5(%arg0: i32) -> (i32, i32) {
    %c0_i32 = arith.constant 0 : i32
    %c0_i32_0 = arith.constant 0 : i32
    %c0_i32_1 = arith.constant 0 : i32
    return %c0_i32, %c0_i32_0 : i32, i32
  }
  func.func @transform_6(%arg0: i32) -> (i32, i32, i32) {
    %c0_i32 = arith.constant 0 : i32
    %c0_i32_0 = arith.constant 0 : i32
    %c0_i32_1 = arith.constant 0 : i32
    %c0_i32_2 = arith.constant 0 : i32
    return %c0_i32, %c0_i32_0, %c0_i32_1 : i32, i32, i32
  }
  func.func @transform_7(%arg0: i32) -> (i32, i32) {
    %c0_i32 = arith.constant 0 : i32
    %c0_i32_0 = arith.constant 0 : i32
    %c0_i32_1 = arith.constant 0 : i32
    return %c0_i32, %c0_i32_0 : i32, i32
  }
  func.func @transform_8(%arg0: i32) -> (i32, i32) {
    %c0_i32 = arith.constant 0 : i32
    %c0_i32_0 = arith.constant 0 : i32
    %c0_i32_1 = arith.constant 0 : i32
    return %c0_i32, %c0_i32_0 : i32, i32
  }
  func.func @transform_9(%arg0: i32) -> (i32, i32) {
    %c0_i32 = arith.constant 0 : i32
    %c0_i32_0 = arith.constant 0 : i32
    %c0_i32_1 = arith.constant 0 : i32
    return %c0_i32, %c0_i32_0 : i32, i32
  }
  func.func @transform_10(%arg0: i32) -> (i32, i32) {
    %c0_i32 = arith.constant 0 : i32
    %c0_i32_0 = arith.constant 0 : i32
    %c0_i32_1 = arith.constant 0 : i32
    return %c0_i32, %c0_i32_0 : i32, i32
  }
  func.func @transform_11(%arg0: i32) -> (i32, i32) {
    %c0_i32 = arith.constant 0 : i32
    %c0_i32_0 = arith.constant 0 : i32
    %c0_i32_1 = arith.constant 0 : i32
    return %c0_i32, %c0_i32_0 : i32, i32
  }
  func.func @transform_12(%arg0: i32) -> (i32, i32, i32) {
    %c0_i32 = arith.constant 0 : i32
    %c0_i32_0 = arith.constant 0 : i32
    %c0_i32_1 = arith.constant 0 : i32
    %c0_i32_2 = arith.constant 0 : i32
    return %c0_i32, %c0_i32_0, %c0_i32_1 : i32, i32, i32
  }
  func.func @transform_13(%arg0: i32) -> (i32, i32) {
    %c0_i32 = arith.constant 0 : i32
    %c0_i32_0 = arith.constant 0 : i32
    %c0_i32_1 = arith.constant 0 : i32
    return %c0_i32, %c0_i32_0 : i32, i32
  }
  func.func @transform_14(%arg0: i32) -> (i32, i32) {
    %c0_i32 = arith.constant 0 : i32
    %c0_i32_0 = arith.constant 0 : i32
    %c0_i32_1 = arith.constant 0 : i32
    return %c0_i32, %c0_i32_0 : i32, i32
  }
  func.func @transform_15(%arg0: i32) -> (i32, i32) {
    %c0_i32 = arith.constant 0 : i32
    %c0_i32_0 = arith.constant 0 : i32
    %c0_i32_1 = arith.constant 0 : i32
    return %c0_i32, %c0_i32_0 : i32, i32
  }
  func.func @transform_16(%arg0: i32) -> (i32, i32) {
    %c0_i32 = arith.constant 0 : i32
    %c0_i32_0 = arith.constant 0 : i32
    %c0_i32_1 = arith.constant 0 : i32
    return %c0_i32, %c0_i32_0 : i32, i32
  }
  func.func @transform_17(%arg0: i32) -> (i32, i32) {
    %c0_i32 = arith.constant 0 : i32
    %c0_i32_0 = arith.constant 0 : i32
    %c0_i32_1 = arith.constant 0 : i32
    return %c0_i32, %c0_i32_0 : i32, i32
  }
}

</mosaic_0001>

<bundles_post_ra>
// kernel: forward.5
= control target key start
LH: loop header
LB: loop body
LE: loop exit
PB: predicated region body
PF: predicated region fallthrough
CT: control target
= control target key end

     0   :  { %vm543_vm0 = vcmask 1040384   ;;  %vm544_vm1 = vcmask 1041408   ;;  %v1823_v2 = vmov 65535   ;;  %vm446_vm2 = vcmask 154624   ;;  %s2575_s1 = inlined_call_operand.vmem [shape: bf16[147,128], index: 1, kind: input, shape index: {}]   ;;  %s2576_s0 = inlined_call_operand.vmem [shape: bf16[512,147], index: 0, kind: input, shape index: {}]   ;;  %s2577_s2 = inlined_call_operand.vmem [shape: f32[1,128], index: 2, kind: input, shape index: {}]   ;;  %s2578_s3 = inlined_call_operand.vmem [shape: f32[1,128], index: 3, kind: input, shape index: {}]   ;;  %s2579_s4 = inlined_call_operand.vmem [shape: bf16[512,128], index: 4, kind: output, shape index: {}]  }
   0x1   :  { %v1615_v0 = vld [vmem:[%s2575_s1 + $0x38] sm:$0xff]  ;;  %v100_v1 = vld [vmem:[%s2575_s1 + $0x48] sm:$0x3]  ;;  %v545_v3 = vsel %vm543_vm0, 4294967295, %v1823_v2  ;;  %v1614_v5 = vld [vmem:[%s2575_s1 + $0x30] sm:$0xff] }
   0x2   :  { %v426_v4 = vunpack.c.l.b16 %v100_v1  ;;  %550 = vmatpush.bf16.msra.mxu0 %v1615_v0  ;;  %1808 = vmatpush.bf16.msra.mxu2 %v1615_v0  ;;  %v546_v6 = vsel %vm544_vm1, %v545_v3, 0  ;;  %v1613_v9 = vld [vmem:[%s2575_s1 + $0x28] sm:$0xff]  ;;  %v1616_v10 = vld [vmem:[%s2575_s1 + $0x40] sm:$0xff]  ;;  %v1578_v13 = vld [vmem:[%s2576_s0 + $0x114] sm:$0xf] }
   0x3   :  { %v1544_v11 = vld [vmem:[%s2576_s0 + $0x4] sm:$0xf]  ;;  %v1224_v12 = vld [vmem:[%s2576_s0 + $0x8] sm:$0xf0]  ;;  %v1360_v14 = vld [vmem:[%s2576_s0 + $0x118] sm:$0xf0] }
   0x4   :  { %v436_v7 = vpack.c.b16 %v426_v4, %v426_v4  ;;  %v1227_v15 = vor.u32 %v1544_v11, %v1224_v12  ;;  %v1612_v16 = vld [vmem:[%s2575_s1 + $0x20] sm:$0xff]  ;;  %v1363_v17 = vor.u32 %v1578_v13, %v1360_v14  ;;  %v1611_v18 = vld [vmem:[%s2575_s1 + $0x18] sm:$0xff]  ;;  %v1610_v19 = vld [vmem:[%s2575_s1 + $0x10] sm:$0xff] }
   0x5   :  { %v1609_v20 = vld [vmem:[%s2575_s1 + $0x8] sm:$0xff]  ;;  %v1546_v21 = vld [vmem:[%s2576_s0 + $0x14] sm:$0xf]  ;;  %v1232_v22 = vld [vmem:[%s2576_s0 + $0x18] sm:$0xf0] }
   0x6   :  { %v548_v8 = vand.u32 %v546_v6, %v436_v7  ;;  %551 = vmatpush.bf16.msra.mxu0 %v1614_v5  ;;  %1809 = vmatpush.bf16.msra.mxu2 %v1614_v5  ;;  %v1580_v23 = vld [vmem:[%s2576_s0 + $0x124] sm:$0xf]  ;;  %v1368_v24 = vld [vmem:[%s2576_s0 + $0x128] sm:$0xf0]  ;;  %v1235_v25 = vor.u32 %v1546_v21, %v1232_v22  ;;  %v1222_v27 = vld [vmem:[%s2576_s0] sm:$0xf] }
   0x7   :  { %v1608_v26 = vld [vmem:[%s2575_s1] sm:$0xff]  ;;  %v1545_v28 = vld [vmem:[%s2576_s0 + $0x4] sm:$0xf0]  ;;  %v1371_v31 = vor.u32 %v1580_v23, %v1368_v24  ;;  %v1240_v35 = vld [vmem:[%s2576_s0 + $0x28] sm:$0xf0] }
   0x8   :  { %725 = vmatpush.bf16.msra.mxu1 %v548_v8  ;;  %1816 = vmatpush.bf16.msra.mxu3 %v548_v8  ;;  %v1350_v29 = vld [vmem:[%s2576_s0 + $0x100] sm:$0xf]  ;;  %v1577_v30 = vld [vmem:[%s2576_s0 + $0x104] sm:$0xf0]  ;;  %v1223_v32 = vor.u32 %v1545_v28, %v1222_v27  ;;  %v1548_v34 = vld [vmem:[%s2576_s0 + $0x24] sm:$0xf] }
   0x9   :  { %v1351_v33 = vor.u32 %v1577_v30, %v1350_v29  ;;  %v1582_v36 = vld [vmem:[%s2576_s0 + $0x134] sm:$0xf]  ;;  %v1376_v37 = vld [vmem:[%s2576_s0 + $0x138] sm:$0xf0]  ;;  %v1243_v38 = vor.u32 %v1548_v34, %v1240_v35  ;;  %v1230_v39 = vld [vmem:[%s2576_s0 + $0x10] sm:$0xf] }
   0xa   :  { %552 = vmatpush.bf16.msra.mxu0 %v1613_v9  ;;  %1810 = vmatpush.bf16.msra.mxu2 %v1613_v9  ;;  %v1547_v40 = vld [vmem:[%s2576_s0 + $0x14] sm:$0xf0]  ;;  %v1358_v41 = vld [vmem:[%s2576_s0 + $0x110] sm:$0xf]  ;;  %v1379_v43 = vor.u32 %v1582_v36, %v1376_v37  ;;  %v1550_v46 = vld [vmem:[%s2576_s0 + $0x34] sm:$0xf] }
   0xb   :  { %v1579_v42 = vld [vmem:[%s2576_s0 + $0x114] sm:$0xf0]  ;;  %v1231_v44 = vor.u32 %v1547_v40, %v1230_v39  ;;  %v1248_v47 = vld [vmem:[%s2576_s0 + $0x38] sm:$0xf0]  ;;  %v1584_v48 = vld [vmem:[%s2576_s0 + $0x144] sm:$0xf] }
   0xc   :  { %726 = vmatpush.bf16.msra.mxu1 %v1616_v10  ;;  %1817 = vmatpush.bf16.msra.mxu3 %v1616_v10  ;;  %v1359_v45 = vor.u32 %v1579_v42, %v1358_v41  ;;  %v1384_v49 = vld [vmem:[%s2576_s0 + $0x148] sm:$0xf0]  ;;  %v1251_v50 = vor.u32 %v1550_v46, %v1248_v47  ;;  %v1238_v51 = vld [vmem:[%s2576_s0 + $0x20] sm:$0xf]  ;;  %v1549_v52 = vld [vmem:[%s2576_s0 + $0x24] sm:$0xf0] }
   0xd   :  { %v1366_v53 = vld [vmem:[%s2576_s0 + $0x120] sm:$0xf]  ;;  %v1581_v54 = vld [vmem:[%s2576_s0 + $0x124] sm:$0xf0]  ;;  %v1387_v55 = vor.u32 %v1584_v48, %v1384_v49  ;;  %v1239_v56 = vor.u32 %v1549_v52, %v1238_v51  ;;  %v1552_v58 = vld [vmem:[%s2576_s0 + $0x44] sm:$0xf] }
   0xe   :  { %553 = vmatpush.bf16.msra.mxu0 %v1612_v16  ;;  %1811 = vmatpush.bf16.msra.mxu2 %v1612_v16  ;;  %v1367_v57 = vor.u32 %v1581_v54, %v1366_v53  ;;  %v1256_v59 = vld [vmem:[%s2576_s0 + $0x48] sm:$0xf0]  ;;  %v1586_v60 = vld [vmem:[%s2576_s0 + $0x154] sm:$0xf]  ;;  %v1392_v61 = vld [vmem:[%s2576_s0 + $0x158] sm:$0xf0] }
   0xf   :  { %1512 = vmatmul.msk.bf16.vlgmr.msra.gmra.mxu1 %vm446_vm2, %v1227_v15  ;;  %1529 = vmatmul.msk.bf16.vlgmr.msra.gmra.mxu3 %vm446_vm2, %v1363_v17  ;;  %v1259_v62 = vor.u32 %v1552_v58, %v1256_v59  ;;  %v1246_v63 = vld [vmem:[%s2576_s0 + $0x30] sm:$0xf]  ;;  %v1551_v0 = vld [vmem:[%s2576_s0 + $0x34] sm:$0xf0]  ;;  %v1395_v3 = vor.u32 %v1586_v60, %v1392_v61  ;;  %v1554_v6 = vld [vmem:[%s2576_s0 + $0x54] sm:$0xf] }
  0x10   :  { %v1374_v1 = vld [vmem:[%s2576_s0 + $0x130] sm:$0xf]  ;;  %v1583_v2 = vld [vmem:[%s2576_s0 + $0x134] sm:$0xf0]  ;;  %v1247_v4 = vor.u32 %v1551_v0, %v1246_v63  ;;  %v1264_v7 = vld [vmem:[%s2576_s0 + $0x58] sm:$0xf0] }
  0x11   :  { %v1375_v5 = vor.u32 %v1583_v2, %v1374_v1  ;;  %v1588_v8 = vld [vmem:[%s2576_s0 + $0x164] sm:$0xf]  ;;  %v1400_v9 = vld [vmem:[%s2576_s0 + $0x168] sm:$0xf0]  ;;  %v1267_v10 = vor.u32 %v1554_v6, %v1264_v7  ;;  %v1254_v11 = vld [vmem:[%s2576_s0 + $0x40] sm:$0xf] }
  0x12   :  { %554 = vmatpush.bf16.msra.mxu0 %v1611_v18  ;;  %1812 = vmatpush.bf16.msra.mxu2 %v1611_v18  ;;  %v1553_v12 = vld [vmem:[%s2576_s0 + $0x44] sm:$0xf0]  ;;  %v1382_v13 = vld [vmem:[%s2576_s0 + $0x140] sm:$0xf]  ;;  %v1403_v15 = vor.u32 %v1588_v8, %v1400_v9  ;;  %v1556_v18 = vld [vmem:[%s2576_s0 + $0x64] sm:$0xf] }
  0x13   :  { %v1585_v14 = vld [vmem:[%s2576_s0 + $0x144] sm:$0xf0]  ;;  %v1255_v16 = vor.u32 %v1553_v12, %v1254_v11  ;;  %v1408_v21 = vld [vmem:[%s2576_s0 + $0x178] sm:$0xf0]  ;;  %v1262_v23 = vld [vmem:[%s2576_s0 + $0x50] sm:$0xf] }
  0x14   :  { %v1383_v17 = vor.u32 %v1585_v14, %v1382_v13  ;;  %v1555_v24 = vld [vmem:[%s2576_s0 + $0x54] sm:$0xf0]  ;;  %v1558_v30 = vld [vmem:[%s2576_s0 + $0x74] sm:$0xf]  ;;  %v1270_v35 = vld [vmem:[%s2576_s0 + $0x60] sm:$0xf] }
  0x15   :  { %v1263_v28 = vor.u32 %v1555_v24, %v1262_v23  ;;  %v1557_v36 = vld [vmem:[%s2576_s0 + $0x64] sm:$0xf0]  ;;  %v1398_v37 = vld [vmem:[%s2576_s0 + $0x160] sm:$0xf]  ;;  %v1560_v42 = vld [vmem:[%s2576_s0 + $0x84] sm:$0xf] }
  0x16   :  { %555 = vmatpush.bf16.msra.mxu0 %v1610_v19  ;;  %1813 = vmatpush.bf16.msra.mxu2 %v1610_v19  ;;  %v1272_v19 = vld [vmem:[%s2576_s0 + $0x68] sm:$0xf0]  ;;  %v1271_v40 = vor.u32 %v1557_v36, %v1270_v35  ;;  %v1278_v47 = vld [vmem:[%s2576_s0 + $0x70] sm:$0xf]  ;;  %v1559_v48 = vld [vmem:[%s2576_s0 + $0x74] sm:$0xf0] }
  0x17   :  { %v1275_v22 = vor.u32 %v1556_v18, %v1272_v19  ;;  %v1591_v51 = vld [vmem:[%s2576_s0 + $0x174] sm:$0xf0]  ;;  %v1279_v53 = vor.u32 %v1559_v48, %v1278_v47  ;;  %v1296_v58 = vld [vmem:[%s2576_s0 + $0x98] sm:$0xf0]  ;;  %v1596_v59 = vld [vmem:[%s2576_s0 + $0x1a4] sm:$0xf] }
  0x18   :  { %v1432_v60 = vld [vmem:[%s2576_s0 + $0x1a8] sm:$0xf0]  ;;  %v1561_v63 = vld [vmem:[%s2576_s0 + $0x84] sm:$0xf0]  ;;  %v1414_v2 = vld [vmem:[%s2576_s0 + $0x180] sm:$0xf] }
  0x19   :  { %v2134_v9 = vld [vmem:[%s2577_s2] ss:$0 sm:$0xff]  ;;  %v1304_v18 = vld [vmem:[%s2576_s0 + $0xa8] sm:$0xf0]  ;;  %v1598_v19 = vld [vmem:[%s2576_s0 + $0x1b4] sm:$0xf] }
  0x1a   :  { %556 = vmatpush.bf16.msra.mxu0 %v1609_v20  ;;  %1814 = vmatpush.bf16.msra.mxu2 %v1609_v20  ;;  %v1590_v20 = vld [vmem:[%s2576_s0 + $0x174] sm:$0xf]  ;;  %v2142_v13 = vld [vmem:[%s2578_s3] ss:$0 sm:$0xff]  ;;  %v1294_v24 = vld [vmem:[%s2576_s0 + $0x90] sm:$0xf] }
  0x1b   :  { %v1411_v27 = vor.u32 %v1590_v20, %v1408_v21  ;;  %v1440_v20 = vld [vmem:[%s2576_s0 + $0x1b8] sm:$0xf0] }
  0x1c   :  { %v1312_v47 = vld [vmem:[%s2576_s0 + $0xb8] sm:$0xf0] }
  0x1e   :  { %557 = vmatpush.bf16.msra.mxu0 %v1608_v26  ;;  %1815 = vmatpush.bf16.msra.mxu2 %v1608_v26  ;;  %v1587_v26 = vld [vmem:[%s2576_s0 + $0x154] sm:$0xf0] }
  0x1f   :  { %1513 = vmatmul.msk.bf16.gmra.mxu1 %vm446_vm2, %v1235_v25  ;;  %1530 = vmatmul.msk.bf16.gmra.mxu3 %vm446_vm2, %v1371_v31  ;;  %v1390_v25 = vld [vmem:[%s2576_s0 + $0x150] sm:$0xf]  ;;  %v1280_v31 = vld [vmem:[%s2576_s0 + $0x78] sm:$0xf0] }
  0x20   :  { %v1391_v29 = vor.u32 %v1587_v26, %v1390_v25  ;;  %v1283_v34 = vor.u32 %v1558_v30, %v1280_v31  ;;  %v1563_v25 = vld [vmem:[%s2576_s0 + $0x94] sm:$0xf0]  ;;  %v1443_v31 = vor.u32 %v1598_v19, %v1440_v20 }
  0x21   :  { %558 = vmatmul.bf16.vlgmr.msra.gmra.mxu0 %v1223_v32  ;;  %638 = vmatmul.bf16.vlgmr.msra.gmra.mxu2 %v1351_v33  ;;  %v1592_v32 = vld [vmem:[%s2576_s0 + $0x184] sm:$0xf]  ;;  %v1416_v33 = vld [vmem:[%s2576_s0 + $0x188] sm:$0xf0]  ;;  %v1595_v30 = vld [vmem:[%s2576_s0 + $0x194] sm:$0xf0]  ;;  %v1295_v35 = vor.u32 %v1563_v25, %v1294_v24 }
  0x22   :  { %v1419_v39 = vor.u32 %v1592_v32, %v1416_v33  ;;  %v1568_v24 = vld [vmem:[%s2576_s0 + $0xc4] sm:$0xf]  ;;  %v1320_v25 = vld [vmem:[%s2576_s0 + $0xc8] sm:$0xf0] }
  0x2f   :  { %1514 = vmatmul.msk.bf16.gmra.mxu1 %vm446_vm2, %v1243_v38  ;;  %1531 = vmatmul.msk.bf16.gmra.mxu3 %vm446_vm2, %v1379_v43  ;;  %v1589_v38 = vld [vmem:[%s2576_s0 + $0x164] sm:$0xf0]  ;;  %v1288_v43 = vld [vmem:[%s2576_s0 + $0x88] sm:$0xf0] }
  0x30   :  { %v1399_v41 = vor.u32 %v1589_v38, %v1398_v37  ;;  %v1291_v46 = vor.u32 %v1560_v42, %v1288_v43 }
  0x31   :  { %563 = vmatmul.bf16.gmra.mxu0 %v1231_v44  ;;  %643 = vmatmul.bf16.gmra.mxu2 %v1359_v45  ;;  %v1594_v44 = vld [vmem:[%s2576_s0 + $0x194] sm:$0xf]  ;;  %v1424_v45 = vld [vmem:[%s2576_s0 + $0x198] sm:$0xf0] }
  0x32   :  { %v1427_v52 = vor.u32 %v1594_v44, %v1424_v45 }
  0x3f   :  { %1515 = vmatmul.msk.bf16.gmra.mxu1 %vm446_vm2, %v1251_v50  ;;  %1532 = vmatmul.msk.bf16.gmra.mxu3 %vm446_vm2, %v1387_v55  ;;  %v1406_v50 = vld [vmem:[%s2576_s0 + $0x170] sm:$0xf] }
  0x40   :  { %v1407_v54 = vor.u32 %v1591_v51, %v1406_v50  ;;  %v1448_v50 = vld [vmem:[%s2576_s0 + $0x1c8] sm:$0xf0] }
  0x41   :  { %568 = vmatmul.bf16.gmra.mxu0 %v1239_v56  ;;  %648 = vmatmul.bf16.gmra.mxu2 %v1367_v57  ;;  %v1562_v57 = vld [vmem:[%s2576_s0 + $0x94] sm:$0xf] }
  0x42   :  { %v1299_v61 = vor.u32 %v1562_v57, %v1296_v58 }
  0x4f   :  { %1516 = vmatmul.msk.bf16.gmra.mxu1 %vm446_vm2, %v1259_v62  ;;  %1533 = vmatmul.msk.bf16.gmra.mxu3 %vm446_vm2, %v1395_v3  ;;  %v1286_v62 = vld [vmem:[%s2576_s0 + $0x80] sm:$0xf]  ;;  %v1593_v3 = vld [vmem:[%s2576_s0 + $0x184] sm:$0xf0] }
  0x50   :  { %v1415_v7 = vor.u32 %v1593_v3, %v1414_v2 }
  0x51   :  { %573 = vmatmul.bf16.gmra.mxu0 %v1247_v4  ;;  %653 = vmatmul.bf16.gmra.mxu2 %v1375_v5  ;;  %v1435_v4 = vor.u32 %v1596_v59, %v1432_v60  ;;  %v1287_v5 = vor.u32 %v1561_v63, %v1286_v62  ;;  %v1430_v59 = vld [vmem:[%s2576_s0 + $0x1a0] sm:$0xf]  ;;  %v1597_v60 = vld [vmem:[%s2576_s0 + $0x1a4] sm:$0xf0] }
  0x5f   :  { %1517 = vmatmul.msk.bf16.gmra.mxu1 %vm446_vm2, %v1267_v10  ;;  %1534 = vmatmul.msk.bf16.gmra.mxu3 %vm446_vm2, %v1403_v15 }
  0x61   :  { %578 = vmatmul.bf16.gmra.mxu0 %v1255_v16  ;;  %658 = vmatmul.bf16.gmra.mxu2 %v1383_v17  ;;  %v1564_v17 = vld [vmem:[%s2576_s0 + $0xa4] sm:$0xf] }
  0x62   :  { %v1307_v23 = vor.u32 %v1564_v17, %v1304_v18 }
  0x6f   :  { %1518 = vmatmul.msk.bf16.gmra.mxu1 %vm446_vm2, %v1275_v22  ;;  %1535 = vmatmul.msk.bf16.gmra.mxu3 %vm446_vm2, %v1411_v27 }
  0x71   :  { %583 = vmatmul.bf16.gmra.mxu0 %v1263_v28  ;;  %663 = vmatmul.bf16.gmra.mxu2 %v1391_v29  ;;  %v1422_v29 = vld [vmem:[%s2576_s0 + $0x190] sm:$0xf] }
  0x72   :  { %v1423_v37 = vor.u32 %v1595_v30, %v1422_v29  ;;  %v1456_v29 = vld [vmem:[%s2576_s0 + $0x1d8] sm:$0xf0] }
  0x7f   :  { %1519 = vmatmul.msk.bf16.gmra.mxu1 %vm446_vm2, %v1283_v34  ;;  %1536 = vmatmul.msk.bf16.gmra.mxu3 %vm446_vm2, %v1419_v39 }
  0x81   :  { %588 = vmatmul.bf16.gmra.mxu0 %v1271_v40  ;;  %668 = vmatmul.bf16.gmra.mxu2 %v1399_v41 }
  0x8c   :  { %v728_v49 = vpop.f32.mrf.mxu1 }
  0x8f   :  { %1520 = vmatmul.msk.bf16.gmra.mxu1 %vm446_vm2, %v1291_v46  ;;  %1537 = vmatmul.msk.bf16.gmra.mxu3 %vm446_vm2, %v1427_v52  ;;  %v1566_v46 = vld [vmem:[%s2576_s0 + $0xb4] sm:$0xf] }
  0x91   :  { %593 = vmatmul.bf16.gmra.mxu0 %v1279_v53  ;;  %673 = vmatmul.bf16.gmra.mxu2 %v1407_v54  ;;  %v1315_v53 = vor.u32 %v1566_v46, %v1312_v47  ;;  %v1302_v54 = vld [vmem:[%s2576_s0 + $0xa0] sm:$0xf] }
  0x92   :  { %v2101_v55 = vpop.f32.mrf.mxu3 }
  0x94   :  { %v730_v56 = vpop.f32.mrf.mxu1 }
  0x9a   :  { %v2121_v0 = vpop.f32.mrf.mxu3 }
  0x9c   :  { %v733_v1 = vpop.f32.mrf.mxu1 }
  0x9e   :  { %v559_v6 = vpop.f32.mrf.mxu0 }
  0x9f   :  { %1521 = vmatmul.msk.bf16.gmra.mxu1 %vm446_vm2, %v1299_v61  ;;  %1538 = vmatmul.msk.bf16.gmra.mxu3 %vm446_vm2, %v1435_v4  ;;  %v729_v8 = vadd.f32 %v728_v49, %v559_v6  ;;  %v1600_v49 = vld [vmem:[%s2576_s0 + $0x1c4] sm:$0xf]  ;;  %v1431_v6 = vor.u32 %v1597_v60, %v1430_v59 }
  0xa0   :  { %v1451_v61 = vor.u32 %v1600_v49, %v1448_v50 }
  0xa1   :  { %598 = vmatmul.bf16.gmra.mxu0 %v1287_v5  ;;  %678 = vmatmul.bf16.gmra.mxu2 %v1415_v7  ;;  %v892_v12 = vmul.f32 %v2134_v9, %v729_v8 }
  0xa2   :  { %v2136_v10 = vpop.f32.mrf.mxu3 }
  0xa3   :  { %v960_v21 = vadd.f32 %v2142_v13, %v892_v12 }
  0xa4   :  { %v735_v11 = vpop.f32.mrf.mxu1  ;;  %v2144_v14 = vpop.f32.mrf.mxu2 }
  0xa5   :  { %v1024_v32 = vmax.f32 %v960_v21, 0.0 }
  0xa6   :  { %v561_v15 = vpop.f32.mrf.mxu0 }
  0xa7   :  { %v731_v16 = vadd.f32 %v730_v56, %v561_v15 }
  0xa9   :  { %v893_v22 = vmul.f32 %v2134_v9, %v731_v16 }
  0xaa   :  { %v2166_v26 = vpop.f32.mrf.mxu3 }
  0xab   :  { %v961_v27 = vadd.f32 %v2142_v13, %v893_v22 }
  0xac   :  { %v738_v28 = vpop.f32.mrf.mxu1  ;;  %v2175_v34 = vpop.f32.mrf.mxu2 }
  0xad   :  { %v1025_v33 = vmax.f32 %v961_v27, 0.0 }
  0xae   :  { %v564_v36 = vpop.f32.mrf.mxu0 }
  0xaf   :  { %1522 = vmatmul.msk.bf16.gmra.mxu1 %vm446_vm2, %v1307_v23  ;;  %v1620_v38 = vpack.c.bf16 %v1025_v33, %v1024_v32  ;;  %1539 = vmatmul.msk.bf16.gmra.mxu3 %vm446_vm2, %v1443_v31  ;;  %v734_v39 = vadd.f32 %v733_v1, %v564_v36  ;;  %v1323_v32 = vor.u32 %v1568_v24, %v1320_v25  ;;  %v1310_v33 = vld [vmem:[%s2576_s0 + $0xb0] sm:$0xf] }
  0xb1   :  { %1621 = vst [vmem:[%s2579_s4] sm:$0xff] %v1620_v38   ;;  %603 = vmatmul.bf16.gmra.mxu0 %v1295_v35  ;;  %683 = vmatmul.bf16.gmra.mxu2 %v1423_v37  ;;  %v894_v42 = vmul.f32 %v2134_v9, %v734_v39  ;;  %v1438_v38 = vld [vmem:[%s2576_s0 + $0x1b0] sm:$0xf]  ;;  %v1599_v39 = vld [vmem:[%s2576_s0 + $0x1b4] sm:$0xf0] }
  0xb2   :  { %v2182_v40 = vpop.f32.mrf.mxu3  ;;  %v1439_v49 = vor.u32 %v1599_v39, %v1438_v38 }
  0xb3   :  { %v962_v51 = vadd.f32 %v2142_v13, %v894_v42 }
  0xb4   :  { %v740_v41 = vpop.f32.mrf.mxu1  ;;  %v644_v43 = vpop.f32.mrf.mxu2 }
  0xb5   :  { %v814_v48 = vadd.f32 %v2101_v55, %v644_v43  ;;  %v1565_v55 = vld [vmem:[%s2576_s0 + $0xa4] sm:$0xf0]  ;;  %v1026_v63 = vmax.f32 %v962_v51, 0.0 }
  0xb6   :  { %v566_v44 = vpop.f32.mrf.mxu0  ;;  %v1303_v3 = vor.u32 %v1565_v55, %v1302_v54 }
  0xb7   :  { %v736_v45 = vadd.f32 %v735_v11, %v566_v44  ;;  %v926_v62 = vmul.f32 %v2134_v9, %v814_v48 }
  0xb9   :  { %v895_v52 = vmul.f32 %v2134_v9, %v736_v45  ;;  %v994_v8 = vadd.f32 %v2142_v13, %v926_v62 }
  0xba   :  { %v2206_v56 = vpop.f32.mrf.mxu3 }
  0xbb   :  { %v963_v57 = vadd.f32 %v2142_v13, %v895_v52  ;;  %v1058_v17 = vmax.f32 %v994_v8, 0.0 }
  0xbc   :  { %v743_v58 = vpop.f32.mrf.mxu1  ;;  %v646_v2 = vpop.f32.mrf.mxu2 }
  0xbd   :  { %v1027_v1 = vmax.f32 %v963_v57, 0.0  ;;  %v816_v4 = vadd.f32 %v2121_v0, %v646_v2  ;;  %v1570_v2 = vld [vmem:[%s2576_s0 + $0xd4] sm:$0xf] }
  0xbe   :  { %v569_v5 = vpop.f32.mrf.mxu0 }
  0xbf   :  { %1523 = vmatmul.msk.bf16.gmra.mxu1 %vm446_vm2, %v1315_v53  ;;  %v1625_v7 = vpack.c.bf16 %v1027_v1, %v1026_v63  ;;  %1540 = vmatmul.msk.bf16.gmra.mxu3 %vm446_vm2, %v1451_v61  ;;  %v927_v11 = vmul.f32 %v2134_v9, %v816_v4  ;;  %v739_v12 = vadd.f32 %v738_v28, %v569_v5  ;;  %v1602_v28 = vld [vmem:[%s2576_s0 + $0x1d4] sm:$0xf]  ;;  %v1604_v4 = vld [vmem:[%s2576_s0 + $0x1e4] sm:$0xf]  ;;  %v1464_v5 = vld [vmem:[%s2576_s0 + $0x1e8] sm:$0xf0] }
  0xc1   :  { %1777 = vst [vmem:[%s2579_s4 + $0x8] sm:$0xff] %v1625_v7   ;;  %608 = vmatmul.bf16.gmra.mxu0 %v1303_v3  ;;  %v995_v15 = vadd.f32 %v2142_v13, %v927_v11  ;;  %688 = vmatmul.bf16.gmra.mxu2 %v1431_v6  ;;  %v896_v19 = vmul.f32 %v2134_v9, %v739_v12  ;;  %v1318_v11 = vld [vmem:[%s2576_s0 + $0xc0] sm:$0xf] }
  0xc2   :  { %v2225_v0 = vpop.f32.mrf.mxu3 }
  0xc3   :  { %v1059_v18 = vmax.f32 %v995_v15, 0.0  ;;  %v964_v30 = vadd.f32 %v2142_v13, %v896_v19  ;;  %v1467_v19 = vor.u32 %v1604_v4, %v1464_v5 }
  0xc4   :  { %v745_v16 = vpop.f32.mrf.mxu1  ;;  %v649_v20 = vpop.f32.mrf.mxu2 }
  0xc5   :  { %v1705_v21 = vpack.c.bf16 %v1059_v18, %v1058_v17  ;;  %v819_v27 = vadd.f32 %v2136_v10, %v649_v20  ;;  %v1567_v10 = vld [vmem:[%s2576_s0 + $0xb4] sm:$0xf0]  ;;  %v1028_v43 = vmax.f32 %v964_v30, 0.0  ;;  %v1446_v17 = vld [vmem:[%s2576_s0 + $0x1c0] sm:$0xf] }
  0xc6   :  { %v571_v22 = vpop.f32.mrf.mxu0  ;;  %v1311_v46 = vor.u32 %v1567_v10, %v1310_v33  ;;  %v1601_v18 = vld [vmem:[%s2576_s0 + $0x1c4] sm:$0xf0] }
  0xc7   :  { %v741_v23 = vadd.f32 %v740_v41, %v571_v22  ;;  %1793 = vst [vmem:[%s2579_s4 + $0x88] sm:$0xff] %v1705_v21   ;;  %v1459_v41 = vor.u32 %v1602_v28, %v1456_v29  ;;  %v928_v42 = vmul.f32 %v2134_v9, %v819_v27  ;;  %v1447_v28 = vor.u32 %v1601_v18, %v1446_v17 }
  0xc9   :  { %v897_v31 = vmul.f32 %v2134_v9, %v741_v23  ;;  %v996_v51 = vadd.f32 %v2142_v13, %v928_v42 }
  0xca   :  { %v2252_v35 = vpop.f32.mrf.mxu3 }
  0xcb   :  { %v965_v36 = vadd.f32 %v2142_v13, %v897_v31  ;;  %v1060_v57 = vmax.f32 %v996_v51, 0.0 }
  0xcc   :  { %v748_v37 = vpop.f32.mrf.mxu1  ;;  %v651_v45 = vpop.f32.mrf.mxu2 }
  0xcd   :  { %v1029_v44 = vmax.f32 %v965_v36, 0.0  ;;  %v821_v47 = vadd.f32 %v2166_v26, %v651_v45  ;;  %v1572_v45 = vld [vmem:[%s2576_s0 + $0xe4] sm:$0xf] }
  0xce   :  { %v574_v48 = vpop.f32.mrf.mxu0 }
  0xcf   :  { %1524 = vmatmul.msk.bf16.gmra.mxu1 %vm446_vm2, %v1323_v32  ;;  %v1630_v50 = vpack.c.bf16 %v1029_v44, %v1028_v43  ;;  %1541 = vmatmul.msk.bf16.gmra.mxu3 %vm446_vm2, %v1459_v41  ;;  %v929_v52 = vmul.f32 %v2134_v9, %v821_v47  ;;  %v744_v53 = vadd.f32 %v743_v58, %v574_v48  ;;  %v1328_v58 = vld [vmem:[%s2576_s0 + $0xd8] sm:$0xf0]  ;;  %v1606_v47 = vld [vmem:[%s2576_s0 + $0x1f4] sm:$0xf] }
  0xd0   :  { %v1331_v8 = vor.u32 %v1570_v2, %v1328_v58  ;;  %v1472_v48 = vld [vmem:[%s2576_s0 + $0x1f8] sm:$0xf0] }
  0xd1   :  { %1778 = vst [vmem:[%s2579_s4 + $0x10] sm:$0xff] %v1630_v50   ;;  %613 = vmatmul.bf16.gmra.mxu0 %v1311_v46  ;;  %v997_v54 = vadd.f32 %v2142_v13, %v929_v52  ;;  %693 = vmatmul.bf16.gmra.mxu2 %v1439_v49  ;;  %v898_v60 = vmul.f32 %v2134_v9, %v744_v53  ;;  %v1326_v52 = vld [vmem:[%s2576_s0 + $0xd0] sm:$0xf] }
  0xd2   :  { %v2271_v26 = vpop.f32.mrf.mxu3 }
  0xd3   :  { %v1061_v59 = vmax.f32 %v997_v54, 0.0  ;;  %v966_v6 = vadd.f32 %v2142_v13, %v898_v60  ;;  %v1475_v60 = vor.u32 %v1606_v47, %v1472_v48 }
  0xd4   :  { %v750_v55 = vpop.f32.mrf.mxu1  ;;  %v654_v61 = vpop.f32.mrf.mxu2 }
  0xd5   :  { %v1710_v62 = vpack.c.bf16 %v1061_v59, %v1060_v57  ;;  %v824_v3 = vadd.f32 %v2182_v40, %v654_v61  ;;  %v1569_v40 = vld [vmem:[%s2576_s0 + $0xc4] sm:$0xf0]  ;;  %v1030_v21 = vmax.f32 %v966_v6, 0.0  ;;  %v1454_v57 = vld [vmem:[%s2576_s0 + $0x1d0] sm:$0xf] }
  0xd6   :  { %v576_v63 = vpop.f32.mrf.mxu0  ;;  %v1319_v24 = vor.u32 %v1569_v40, %v1318_v11  ;;  %v1603_v59 = vld [vmem:[%s2576_s0 + $0x1d4] sm:$0xf0] }
  0xd7   :  { %v746_v1 = vadd.f32 %v745_v16, %v576_v63  ;;  %1794 = vst [vmem:[%s2579_s4 + $0x90] sm:$0xff] %v1710_v62   ;;  %v930_v20 = vmul.f32 %v2134_v9, %v824_v3  ;;  %v1455_v4 = vor.u32 %v1603_v59, %v1454_v57 }
  0xd9   :  { %v899_v7 = vmul.f32 %v2134_v9, %v746_v1  ;;  %v998_v30 = vadd.f32 %v2142_v13, %v930_v20 }
  0xda   :  { %v2298_v12 = vpop.f32.mrf.mxu3 }
  0xdb   :  { %v967_v15 = vadd.f32 %v2142_v13, %v899_v7  ;;  %v1062_v36 = vmax.f32 %v998_v30, 0.0  ;;  %v1573_v30 = vld [vmem:[%s2576_s0 + $0xe4] sm:$0xf0] }
  0xdc   :  { %v753_v16 = vpop.f32.mrf.mxu1  ;;  %v656_v23 = vpop.f32.mrf.mxu2 }
  0xdd   :  { %v1031_v22 = vmax.f32 %v967_v15, 0.0  ;;  %v826_v25 = vadd.f32 %v2206_v56, %v656_v23  ;;  %v1574_v23 = vld [vmem:[%s2576_s0 + $0xf4] sm:$0xf] }
  0xde   :  { %v579_v27 = vpop.f32.mrf.mxu0 }
  0xdf   :  { %1525 = vmatmul.msk.bf16.gmra.mxu1 %vm446_vm2, %v1331_v8  ;;  %v1635_v29 = vpack.c.bf16 %v1031_v22, %v1030_v21  ;;  %1542 = vmatmul.msk.bf16.gmra.mxu3 %vm446_vm2, %v1467_v19  ;;  %v931_v31 = vmul.f32 %v2134_v9, %v826_v25  ;;  %v749_v32 = vadd.f32 %v748_v37, %v579_v27  ;;  %v1336_v37 = vld [vmem:[%s2576_s0 + $0xe8] sm:$0xf0] }
  0xe0   :  { %v1339_v51 = vor.u32 %v1572_v45, %v1336_v37 }
  0xe1   :  { %1779 = vst [vmem:[%s2579_s4 + $0x18] sm:$0xff] %v1635_v29   ;;  %618 = vmatmul.bf16.gmra.mxu0 %v1319_v24  ;;  %v999_v33 = vadd.f32 %v2142_v13, %v931_v31  ;;  %698 = vmatmul.bf16.gmra.mxu2 %v1447_v28  ;;  %v900_v39 = vmul.f32 %v2134_v9, %v749_v32  ;;  %v1334_v29 = vld [vmem:[%s2576_s0 + $0xe0] sm:$0xf] }
  0xe2   :  { %v2317_v56 = vpop.f32.mrf.mxu3 }
  0xe3   :  { %v1063_v38 = vmax.f32 %v999_v33, 0.0  ;;  %v968_v49 = vadd.f32 %v2142_v13, %v900_v39  ;;  %v1605_v33 = vld [vmem:[%s2576_s0 + $0x1e4] sm:$0xf0] }
  0xe4   :  { %v755_v10 = vpop.f32.mrf.mxu1  ;;  %v659_v41 = vpop.f32.mrf.mxu2 }
  0xe5   :  { %v1715_v42 = vpack.c.bf16 %v1063_v38, %v1062_v36  ;;  %v829_v46 = vadd.f32 %v2225_v0, %v659_v41  ;;  %v1571_v0 = vld [vmem:[%s2576_s0 + $0xd4] sm:$0xf0]  ;;  %v1032_v62 = vmax.f32 %v968_v49, 0.0  ;;  %v1335_v41 = vor.u32 %v1573_v30, %v1334_v29 }
  0xe6   :  { %v581_v43 = vpop.f32.mrf.mxu0  ;;  %v1327_v2 = vor.u32 %v1571_v0, %v1326_v52 }
  0xe7   :  { %v751_v44 = vadd.f32 %v750_v55, %v581_v43  ;;  %1795 = vst [vmem:[%s2579_s4 + $0x98] sm:$0xff] %v1715_v42   ;;  %v932_v61 = vmul.f32 %v2134_v9, %v829_v46 }
  0xe9   :  { %v901_v50 = vmul.f32 %v2134_v9, %v751_v44  ;;  %v1000_v6 = vadd.f32 %v2142_v13, %v932_v61 }
  0xea   :  { %v2344_v53 = vpop.f32.mrf.mxu3 }
  0xeb   :  { %v969_v54 = vadd.f32 %v2142_v13, %v901_v50  ;;  %v1064_v15 = vmax.f32 %v1000_v6, 0.0  ;;  %v1607_v6 = vld [vmem:[%s2576_s0 + $0x1f4] sm:$0xf0] }
  0xec   :  { %v758_v55 = vpop.f32.mrf.mxu1  ;;  %v661_v1 = vpop.f32.mrf.mxu2 }
  0xed   :  { %v1033_v63 = vmax.f32 %v969_v54, 0.0  ;;  %v831_v58 = vadd.f32 %v2252_v35, %v661_v1 }
  0xee   :  { %v584_v3 = vpop.f32.mrf.mxu0 }
  0xef   :  { %1526 = vmatmul.msk.bf16.gmra.mxu1 %vm446_vm2, %v1339_v51  ;;  %v1640_v5 = vpack.c.bf16 %v1033_v63, %v1032_v62  ;;  %1543 = vmatmul.msk.bf16.gmra.mxu3 %vm446_vm2, %v1475_v60  ;;  %v933_v7 = vmul.f32 %v2134_v9, %v831_v58  ;;  %v754_v8 = vadd.f32 %v753_v16, %v584_v3  ;;  %v1344_v16 = vld [vmem:[%s2576_s0 + $0xf8] sm:$0xf0]  ;;  %v1576_v60 = vld [vmem:[%s2576_s0 + $0x104] sm:$0xf]  ;;  %v1342_v58 = vld [vmem:[%s2576_s0 + $0xf0] sm:$0xf] }
  0xf0   :  { %v1347_v28 = vor.u32 %v1574_v23, %v1344_v16  ;;  %v1575_v3 = vld [vmem:[%s2576_s0 + $0xf4] sm:$0xf0] }
  0xf1   :  { %1780 = vst [vmem:[%s2579_s4 + $0x20] sm:$0xff] %v1640_v5   ;;  %623 = vmatmul.bf16.gmra.mxu0 %v1327_v2  ;;  %v1001_v11 = vadd.f32 %v2142_v13, %v933_v7  ;;  %703 = vmatmul.bf16.gmra.mxu2 %v1455_v4  ;;  %v902_v18 = vmul.f32 %v2134_v9, %v754_v8 }
  0xf2   :  { %v2363_v40 = vpop.f32.mrf.mxu3 }
  0xf3   :  { %v1065_v17 = vmax.f32 %v1001_v11, 0.0  ;;  %v970_v25 = vadd.f32 %v2142_v13, %v902_v18 }
  0xf4   :  { %v760_v35 = vpop.f32.mrf.mxu1  ;;  %v664_v19 = vpop.f32.mrf.mxu2 }
  0xf5   :  { %v1720_v20 = vpack.c.bf16 %v1065_v17, %v1064_v15  ;;  %v834_v24 = vadd.f32 %v2271_v26, %v664_v19  ;;  %v1462_v26 = vld [vmem:[%s2576_s0 + $0x1e0] sm:$0xf]  ;;  %v1034_v36 = vmax.f32 %v970_v25, 0.0  ;;  %v1343_v15 = vor.u32 %v1575_v3, %v1342_v58 }
  0xf6   :  { %v586_v21 = vpop.f32.mrf.mxu0  ;;  %v1463_v45 = vor.u32 %v1605_v33, %v1462_v26 }
  0xf7   :  { %v756_v22 = vadd.f32 %v755_v10, %v586_v21  ;;  %1796 = vst [vmem:[%s2579_s4 + $0xa0] sm:$0xff] %v1720_v20   ;;  %v934_v10 = vmul.f32 %v2134_v9, %v834_v24 }
  0xf9   :  { %v903_v27 = vmul.f32 %v2134_v9, %v756_v22  ;;  %v1002_v46 = vadd.f32 %v2142_v13, %v934_v10 }
  0xfa   :  { %v2392_v42 = vpop.f32.mrf.mxu3 }
  0xfb   :  { %v971_v31 = vadd.f32 %v2142_v13, %v903_v27 }
  0xfc   :  { %v763_v32 = vpop.f32.mrf.mxu1  ;;  %v666_v39 = vpop.f32.mrf.mxu2 }
  0xfd   :  { %v1035_v38 = vmax.f32 %v971_v31, 0.0  ;;  %v836_v43 = vadd.f32 %v2298_v12, %v666_v39  ;;  %v1066_v12 = vmax.f32 %v1002_v46, 0.0 }
  0xfe   :  { %v589_v44 = vpop.f32.mrf.mxu0 }
  0xff   :  { %1527 = vmatmul.msk.bf16.gmra.mxu1 %vm446_vm2, %v1347_v28  ;;  %v1645_v37 = vpack.c.bf16 %v1035_v38, %v1034_v36  ;;  %v935_v47 = vmul.f32 %v2134_v9, %v836_v43  ;;  %v759_v48 = vadd.f32 %v758_v55, %v589_v44  ;;  %v1352_v55 = vld [vmem:[%s2576_s0 + $0x108] sm:$0xf0] }
 0x100   :  { %v1355_v2 = vor.u32 %v1576_v60, %v1352_v55 }
 0x101   :  { %1781 = vst [vmem:[%s2579_s4 + $0x28] sm:$0xff] %v1645_v37   ;;  %628 = vmatmul.bf16.gmra.mxu0 %v1335_v41  ;;  %v1003_v49 = vadd.f32 %v2142_v13, %v935_v47  ;;  %708 = vmatmul.bf16.gmra.mxu2 %v1463_v45  ;;  %v904_v52 = vmul.f32 %v2134_v9, %v759_v48 }
 0x102   :  { %v2409_v61 = vpop.f32.mrf.mxu3 }
 0x103   :  { %v1067_v51 = vmax.f32 %v1003_v49, 0.0  ;;  %v972_v63 = vadd.f32 %v2142_v13, %v904_v52 }
 0x104   :  { %v765_v50 = vpop.f32.mrf.mxu1  ;;  %v669_v0 = vpop.f32.mrf.mxu2 }
 0x105   :  { %v1725_v54 = vpack.c.bf16 %v1067_v51, %v1066_v12  ;;  %v839_v62 = vadd.f32 %v2317_v56, %v669_v0  ;;  %v1470_v56 = vld [vmem:[%s2576_s0 + $0x1f0] sm:$0xf]  ;;  %v1036_v8 = vmax.f32 %v972_v63, 0.0 }
 0x106   :  { %v591_v57 = vpop.f32.mrf.mxu0  ;;  %v1471_v19 = vor.u32 %v1607_v6, %v1470_v56 }
 0x107   :  { %v761_v59 = vadd.f32 %v760_v35, %v591_v57  ;;  %1797 = vst [vmem:[%s2579_s4 + $0xa8] sm:$0xff] %v1725_v54   ;;  %v936_v7 = vmul.f32 %v2134_v9, %v839_v62 }
 0x109   :  { %v905_v1 = vmul.f32 %v2134_v9, %v761_v59  ;;  %v1004_v21 = vadd.f32 %v2142_v13, %v936_v7 }
 0x10a   :  { %v850_v16 = vpop.f32.mrf.mxu3 }
 0x10b   :  { %v973_v4 = vadd.f32 %v2142_v13, %v905_v1  ;;  %v1068_v25 = vmax.f32 %v1004_v21, 0.0 }
 0x10c   :  { %v768_v5 = vpop.f32.mrf.mxu1  ;;  %v671_v35 = vpop.f32.mrf.mxu2 }
 0x10d   :  { %v1037_v11 = vmax.f32 %v973_v4, 0.0  ;;  %v841_v17 = vadd.f32 %v2344_v53, %v671_v35 }
 0x10e   :  { %v594_v18 = vpop.f32.mrf.mxu0 }
 0x10f   :  { %1528 = vmatmul.msk.bf16.gmra.mxu1 %vm446_vm2, %v1355_v2  ;;  %v1650_v20 = vpack.c.bf16 %v1037_v11, %v1036_v8  ;;  %v937_v22 = vmul.f32 %v2134_v9, %v841_v17  ;;  %v764_v23 = vadd.f32 %v763_v32, %v594_v18 }
 0x111   :  { %1782 = vst [vmem:[%s2579_s4 + $0x30] sm:$0xff] %v1650_v20   ;;  %633 = vmatmul.bf16.gmra.mxu0 %v1343_v15  ;;  %v1005_v24 = vadd.f32 %v2142_v13, %v937_v22  ;;  %713 = vmatmul.bf16.gmra.mxu2 %v1471_v19  ;;  %v906_v28 = vmul.f32 %v2134_v9, %v764_v23 }
 0x112   :  { %v853_v39 = vpop.f32.mrf.mxu3 }
 0x113   :  { %v1069_v27 = vmax.f32 %v1005_v24, 0.0  ;;  %v974_v33 = vadd.f32 %v2142_v13, %v906_v28 }
 0x114   :  { %v770_v53 = vpop.f32.mrf.mxu1  ;;  %v674_v29 = vpop.f32.mrf.mxu2 }
 0x115   :  { %v1730_v30 = vpack.c.bf16 %v1069_v27, %v1068_v25  ;;  %v844_v32 = vadd.f32 %v2363_v40, %v674_v29  ;;  %v1038_v43 = vmax.f32 %v974_v33, 0.0 }
 0x116   :  { %v596_v31 = vpop.f32.mrf.mxu0 }
 0x117   :  { %v766_v26 = vadd.f32 %v765_v50, %v596_v31  ;;  %1798 = vst [vmem:[%s2579_s4 + $0xb0] sm:$0xff] %v1730_v30   ;;  %v938_v41 = vmul.f32 %v2134_v9, %v844_v32 }
 0x119   :  { %v907_v10 = vmul.f32 %v2134_v9, %v766_v26  ;;  %v1006_v48 = vadd.f32 %v2142_v13, %v938_v41 }
 0x11b   :  { %v975_v36 = vadd.f32 %v2142_v13, %v907_v10  ;;  %v1070_v51 = vmax.f32 %v1006_v48, 0.0 }
 0x11c   :  { %v773_v38 = vpop.f32.mrf.mxu1  ;;  %v676_v45 = vpop.f32.mrf.mxu2 }
 0x11d   :  { %v1039_v44 = vmax.f32 %v975_v36, 0.0  ;;  %v846_v37 = vadd.f32 %v2392_v42, %v676_v45  ;;  %v855_v42 = vpop.f32.mrf.mxu3 }
 0x11e   :  { %v599_v46 = vpop.f32.mrf.mxu0 }
 0x11f   :  { %v1655_v47 = vpack.c.bf16 %v1039_v44, %v1038_v43  ;;  %v939_v40 = vmul.f32 %v2134_v9, %v846_v37  ;;  %v769_v49 = vadd.f32 %v768_v5, %v599_v46 }
 0x121   :  { %1783 = vst [vmem:[%s2579_s4 + $0x38] sm:$0xff] %v1655_v47   ;;  %v1007_v50 = vadd.f32 %v2142_v13, %v939_v40  ;;  %v908_v0 = vmul.f32 %v2134_v9, %v769_v49 }
 0x123   :  { %v1071_v52 = vmax.f32 %v1007_v50, 0.0  ;;  %v976_v62 = vadd.f32 %v2142_v13, %v908_v0 }
 0x124   :  { %v775_v12 = vpop.f32.mrf.mxu1  ;;  %v679_v54 = vpop.f32.mrf.mxu2 }
 0x125   :  { %v1735_v57 = vpack.c.bf16 %v1071_v52, %v1070_v51  ;;  %v849_v55 = vadd.f32 %v2409_v61, %v679_v54  ;;  %v1040_v3 = vmax.f32 %v976_v62, 0.0  ;;  %v858_v8 = vpop.f32.mrf.mxu3 }
 0x126   :  { %v601_v59 = vpop.f32.mrf.mxu0 }
 0x127   :  { %v771_v60 = vadd.f32 %v770_v53, %v601_v59  ;;  %1799 = vst [vmem:[%s2579_s4 + $0xb8] sm:$0xff] %v1735_v57   ;;  %v940_v58 = vmul.f32 %v2134_v9, %v849_v55 }
 0x129   :  { %v909_v63 = vmul.f32 %v2134_v9, %v771_v60  ;;  %v1008_v11 = vadd.f32 %v2142_v13, %v940_v58 }
 0x12b   :  { %v977_v1 = vadd.f32 %v2142_v13, %v909_v63  ;;  %v1072_v18 = vmax.f32 %v1008_v11, 0.0 }
 0x12c   :  { %v778_v2 = vpop.f32.mrf.mxu1  ;;  %v681_v5 = vpop.f32.mrf.mxu2 }
 0x12d   :  { %v1041_v4 = vmax.f32 %v977_v1, 0.0  ;;  %v851_v56 = vadd.f32 %v850_v16, %v681_v5  ;;  %v860_v27 = vpop.f32.mrf.mxu3 }
 0x12e   :  { %v604_v6 = vpop.f32.mrf.mxu0 }
 0x12f   :  { %v1660_v7 = vpack.c.bf16 %v1041_v4, %v1040_v3  ;;  %v941_v61 = vmul.f32 %v2134_v9, %v851_v56  ;;  %v774_v35 = vadd.f32 %v773_v38, %v604_v6 }
 0x131   :  { %1784 = vst [vmem:[%s2579_s4 + $0x40] sm:$0xff] %v1660_v7   ;;  %v1009_v15 = vadd.f32 %v2142_v13, %v941_v61  ;;  %v910_v20 = vmul.f32 %v2134_v9, %v774_v35 }
 0x133   :  { %v1073_v19 = vmax.f32 %v1009_v15, 0.0  ;;  %v978_v53 = vadd.f32 %v2142_v13, %v910_v20 }
 0x134   :  { %v780_v17 = vpop.f32.mrf.mxu1  ;;  %v684_v21 = vpop.f32.mrf.mxu2 }
 0x135   :  { %v1740_v22 = vpack.c.bf16 %v1073_v19, %v1072_v18  ;;  %v854_v24 = vadd.f32 %v853_v39, %v684_v21  ;;  %v1042_v31 = vmax.f32 %v978_v53, 0.0  ;;  %v863_v45 = vpop.f32.mrf.mxu3 }
 0x136   :  { %v606_v23 = vpop.f32.mrf.mxu0 }
 0x137   :  { %v776_v16 = vadd.f32 %v775_v12, %v606_v23  ;;  %1800 = vst [vmem:[%s2579_s4 + $0xc0] sm:$0xff] %v1740_v22   ;;  %v942_v30 = vmul.f32 %v2134_v9, %v854_v24 }
 0x139   :  { %v911_v25 = vmul.f32 %v2134_v9, %v776_v16  ;;  %v1010_v38 = vadd.f32 %v2142_v13, %v942_v30 }
 0x13b   :  { %v979_v28 = vadd.f32 %v2142_v13, %v911_v25  ;;  %v1074_v37 = vmax.f32 %v1010_v38, 0.0 }
 0x13c   :  { %v783_v29 = vpop.f32.mrf.mxu1  ;;  %v686_v32 = vpop.f32.mrf.mxu2 }
 0x13d   :  { %v1043_v26 = vmax.f32 %v979_v28, 0.0  ;;  %v856_v33 = vadd.f32 %v855_v42, %v686_v32  ;;  %v865_v55 = vpop.f32.mrf.mxu3 }
 0x13e   :  { %v609_v10 = vpop.f32.mrf.mxu0 }
 0x13f   :  { %v1665_v36 = vpack.c.bf16 %v1043_v26, %v1042_v31  ;;  %v943_v39 = vmul.f32 %v2134_v9, %v856_v33  ;;  %v779_v41 = vadd.f32 %v778_v2, %v609_v10 }
 0x141   :  { %1785 = vst [vmem:[%s2579_s4 + $0x48] sm:$0xff] %v1665_v36   ;;  %v1011_v43 = vadd.f32 %v2142_v13, %v943_v39  ;;  %v912_v47 = vmul.f32 %v2134_v9, %v779_v41 }
 0x143   :  { %v1075_v46 = vmax.f32 %v1011_v43, 0.0  ;;  %v980_v51 = vadd.f32 %v2142_v13, %v912_v47 }
 0x144   :  { %v785_v44 = vpop.f32.mrf.mxu1  ;;  %v689_v48 = vpop.f32.mrf.mxu2 }
 0x145   :  { %v1745_v40 = vpack.c.bf16 %v1075_v46, %v1074_v37  ;;  %v859_v12 = vadd.f32 %v858_v8, %v689_v48  ;;  %v1044_v57 = vmax.f32 %v980_v51, 0.0  ;;  %v868_v15 = vpop.f32.mrf.mxu3 }
 0x146   :  { %v611_v49 = vpop.f32.mrf.mxu0 }
 0x147   :  { %v781_v50 = vadd.f32 %v780_v17, %v611_v49  ;;  %1801 = vst [vmem:[%s2579_s4 + $0xc8] sm:$0xff] %v1745_v40   ;;  %v944_v42 = vmul.f32 %v2134_v9, %v859_v12 }
 0x149   :  { %v913_v52 = vmul.f32 %v2134_v9, %v781_v50  ;;  %v1012_v2 = vadd.f32 %v2142_v13, %v944_v42 }
 0x14b   :  { %v981_v0 = vadd.f32 %v2142_v13, %v913_v52  ;;  %v1076_v56 = vmax.f32 %v1012_v2, 0.0 }
 0x14c   :  { %v788_v54 = vpop.f32.mrf.mxu1  ;;  %v691_v60 = vpop.f32.mrf.mxu2 }
 0x14d   :  { %v1045_v59 = vmax.f32 %v981_v0, 0.0  ;;  %v861_v62 = vadd.f32 %v860_v27, %v691_v60  ;;  %v870_v31 = vpop.f32.mrf.mxu3 }
 0x14e   :  { %v614_v63 = vpop.f32.mrf.mxu0 }
 0x14f   :  { %v1670_v1 = vpack.c.bf16 %v1045_v59, %v1044_v57  ;;  %v945_v58 = vmul.f32 %v2134_v9, %v861_v62  ;;  %v784_v3 = vadd.f32 %v783_v29, %v614_v63 }
 0x151   :  { %1786 = vst [vmem:[%s2579_s4 + $0x50] sm:$0xff] %v1670_v1   ;;  %v1013_v4 = vadd.f32 %v2142_v13, %v945_v58  ;;  %v914_v7 = vmul.f32 %v2134_v9, %v784_v3 }
 0x153   :  { %v1077_v6 = vmax.f32 %v1013_v4, 0.0  ;;  %v982_v18 = vadd.f32 %v2142_v13, %v914_v7 }
 0x154   :  { %v790_v5 = vpop.f32.mrf.mxu1  ;;  %v694_v8 = vpop.f32.mrf.mxu2 }
 0x155   :  { %v1750_v11 = vpack.c.bf16 %v1077_v6, %v1076_v56  ;;  %v864_v17 = vadd.f32 %v863_v45, %v694_v8  ;;  %v1046_v23 = vmax.f32 %v982_v18, 0.0  ;;  %v873_v48 = vpop.f32.mrf.mxu3 }
 0x156   :  { %v616_v61 = vpop.f32.mrf.mxu0 }
 0x157   :  { %v786_v35 = vadd.f32 %v785_v44, %v616_v61  ;;  %1802 = vst [vmem:[%s2579_s4 + $0xd0] sm:$0xff] %v1750_v11   ;;  %v946_v22 = vmul.f32 %v2134_v9, %v864_v17 }
 0x159   :  { %v915_v19 = vmul.f32 %v2134_v9, %v786_v35  ;;  %v1014_v28 = vadd.f32 %v2142_v13, %v946_v22 }
 0x15b   :  { %v983_v20 = vadd.f32 %v2142_v13, %v915_v19  ;;  %v1078_v33 = vmax.f32 %v1014_v28, 0.0 }
 0x15c   :  { %v793_v21 = vpop.f32.mrf.mxu1  ;;  %v696_v24 = vpop.f32.mrf.mxu2 }
 0x15d   :  { %v1047_v16 = vmax.f32 %v983_v20, 0.0  ;;  %v866_v53 = vadd.f32 %v865_v55, %v696_v24  ;;  %v875_v2 = vpop.f32.mrf.mxu3 }
 0x15e   :  { %v619_v25 = vpop.f32.mrf.mxu0 }
 0x15f   :  { %v1675_v27 = vpack.c.bf16 %v1047_v16, %v1046_v23  ;;  %v947_v29 = vmul.f32 %v2134_v9, %v866_v53  ;;  %v789_v30 = vadd.f32 %v788_v54, %v619_v25 }
 0x161   :  { %1787 = vst [vmem:[%s2579_s4 + $0x58] sm:$0xff] %v1675_v27   ;;  %v1015_v26 = vadd.f32 %v2142_v13, %v947_v29  ;;  %v916_v36 = vmul.f32 %v2134_v9, %v789_v30 }
 0x163   :  { %v1079_v10 = vmax.f32 %v1015_v26, 0.0  ;;  %v984_v45 = vadd.f32 %v2142_v13, %v916_v36 }
 0x164   :  { %v795_v32 = vpop.f32.mrf.mxu1  ;;  %v699_v38 = vpop.f32.mrf.mxu2 }
 0x165   :  { %v1755_v39 = vpack.c.bf16 %v1079_v10, %v1078_v33  ;;  %v869_v44 = vadd.f32 %v868_v15, %v699_v38  ;;  %v1048_v49 = vmax.f32 %v984_v45, 0.0  ;;  %v878_v20 = vpop.f32.mrf.mxu3 }
 0x166   :  { %v621_v41 = vpop.f32.mrf.mxu0 }
 0x167   :  { %v791_v43 = vadd.f32 %v790_v5, %v621_v41  ;;  %1803 = vst [vmem:[%s2579_s4 + $0xd8] sm:$0xff] %v1755_v39   ;;  %v948_v40 = vmul.f32 %v2134_v9, %v869_v44 }
 0x169   :  { %v917_v37 = vmul.f32 %v2134_v9, %v791_v43  ;;  %v1016_v54 = vadd.f32 %v2142_v13, %v948_v40 }
 0x16b   :  { %v985_v46 = vadd.f32 %v2142_v13, %v917_v37  ;;  %v1080_v55 = vmax.f32 %v1016_v54, 0.0 }
 0x16c   :  { %v798_v47 = vpop.f32.mrf.mxu1  ;;  %v701_v12 = vpop.f32.mrf.mxu2 }
 0x16d   :  { %v1049_v50 = vmax.f32 %v985_v46, 0.0  ;;  %v871_v51 = vadd.f32 %v870_v31, %v701_v12  ;;  %v880_v33 = vpop.f32.mrf.mxu3 }
 0x16e   :  { %v624_v52 = vpop.f32.mrf.mxu0 }
 0x16f   :  { %v1680_v0 = vpack.c.bf16 %v1049_v50, %v1048_v49  ;;  %v949_v42 = vmul.f32 %v2134_v9, %v871_v51  ;;  %v794_v57 = vadd.f32 %v793_v21, %v624_v52 }
 0x171   :  { %1788 = vst [vmem:[%s2579_s4 + $0x60] sm:$0xff] %v1680_v0   ;;  %v1017_v59 = vadd.f32 %v2142_v13, %v949_v42  ;;  %v918_v63 = vmul.f32 %v2134_v9, %v794_v57  ;;  %v1821_v42 = vld [vmem:[%s2577_s2] ss:$0 sm:$0xff] }
 0x173   :  { %v1081_v62 = vmax.f32 %v1017_v59, 0.0  ;;  %v986_v56 = vadd.f32 %v2142_v13, %v918_v63 }
 0x174   :  { %v800_v60 = vpop.f32.mrf.mxu1  ;;  %v704_v1 = vpop.f32.mrf.mxu2 }
 0x175   :  { %v1760_v58 = vpack.c.bf16 %v1081_v62, %v1080_v55  ;;  %v874_v5 = vadd.f32 %v873_v48, %v704_v1  ;;  %v1050_v61 = vmax.f32 %v986_v56, 0.0  ;;  %v883_v51 = vpop.f32.mrf.mxu3 }
 0x176   :  { %v626_v3 = vpop.f32.mrf.mxu0 }
 0x177   :  { %v796_v4 = vadd.f32 %v795_v32, %v626_v3  ;;  %1804 = vst [vmem:[%s2579_s4 + $0xe0] sm:$0xff] %v1760_v58   ;;  %v950_v11 = vmul.f32 %v2134_v9, %v874_v5 }
 0x179   :  { %v919_v6 = vmul.f32 %v2134_v9, %v796_v4  ;;  %v1018_v21 = vadd.f32 %v2142_v13, %v950_v11 }
 0x17b   :  { %v987_v7 = vadd.f32 %v2142_v13, %v919_v6  ;;  %v1082_v53 = vmax.f32 %v1018_v21, 0.0 }
 0x17c   :  { %v803_v8 = vpop.f32.mrf.mxu1  ;;  %v706_v15 = vpop.f32.mrf.mxu2 }
 0x17d   :  { %v1051_v35 = vmax.f32 %v987_v7, 0.0  ;;  %v876_v17 = vadd.f32 %v875_v2, %v706_v15 }
 0x17e   :  { %v629_v18 = vpop.f32.mrf.mxu0 }
 0x17f   :  { %v1685_v19 = vpack.c.bf16 %v1051_v35, %v1050_v61  ;;  %v951_v22 = vmul.f32 %v2134_v9, %v876_v17  ;;  %v799_v23 = vadd.f32 %v798_v47, %v629_v18 }
 0x181   :  { %1789 = vst [vmem:[%s2579_s4 + $0x68] sm:$0xff] %v1685_v19   ;;  %v1019_v16 = vadd.f32 %v2142_v13, %v951_v22  ;;  %v920_v27 = vmul.f32 %v2134_v9, %v799_v23 }
 0x183   :  { %v1083_v25 = vmax.f32 %v1019_v16, 0.0  ;;  %v988_v32 = vadd.f32 %v2142_v13, %v920_v27 }
 0x184   :  { %v805_v24 = vpop.f32.mrf.mxu1  ;;  %v709_v28 = vpop.f32.mrf.mxu2 }
 0x185   :  { %v1765_v29 = vpack.c.bf16 %v1083_v25, %v1082_v53  ;;  %v879_v26 = vadd.f32 %v878_v20, %v709_v28  ;;  %v1052_v41 = vmax.f32 %v988_v32, 0.0 }
 0x186   :  { %v631_v30 = vpop.f32.mrf.mxu0 }
 0x187   :  { %v801_v31 = vadd.f32 %v800_v60, %v631_v30  ;;  %1805 = vst [vmem:[%s2579_s4 + $0xe8] sm:$0xff] %v1765_v29   ;;  %v952_v39 = vmul.f32 %v2134_v9, %v879_v26  ;;  %v1822_v60 = vld [vmem:[%s2578_s3] ss:$0 sm:$0xff] }
 0x189   :  { %v921_v10 = vmul.f32 %v2134_v9, %v801_v31  ;;  %v1020_v48 = vadd.f32 %v2142_v13, %v952_v39 }
 0x18b   :  { %v989_v36 = vadd.f32 %v2142_v13, %v921_v10  ;;  %v1084_v0 = vmax.f32 %v1020_v48, 0.0 }
 0x18c   :  { %v808_v38 = vpop.f32.mrf.mxu1  ;;  %v711_v44 = vpop.f32.mrf.mxu2 }
 0x18d   :  { %v1053_v43 = vmax.f32 %v989_v36, 0.0  ;;  %v809_v45 = vadd.f32 %v808_v38, %v2144_v14  ;;  %v881_v37 = vadd.f32 %v880_v33, %v711_v44 }
 0x18e   :  { %v634_v46 = vpop.f32.mrf.mxu0 }
 0x18f   :  { %v1690_v47 = vpack.c.bf16 %v1053_v43, %v1052_v41  ;;  %v953_v40 = vmul.f32 %v2134_v9, %v881_v37  ;;  %v804_v49 = vadd.f32 %v803_v8, %v634_v46  ;;  %v924_v50 = vmul.f32 %v2134_v9, %v809_v45  ;;  %v885_v8 = vpop.f32.mrf.mxu3 }
 0x191   :  { %1790 = vst [vmem:[%s2579_s4 + $0x70] sm:$0xff] %v1690_v47   ;;  %v1021_v12 = vadd.f32 %v2142_v13, %v953_v40  ;;  %v922_v57 = vmul.f32 %v1821_v42, %v804_v49  ;;  %v992_v55 = vadd.f32 %v1822_v60, %v924_v50 }
 0x193   :  { %v1085_v14 = vmax.f32 %v1021_v12, 0.0  ;;  %v990_v2 = vadd.f32 %v1822_v60, %v922_v57  ;;  %v1056_v3 = vmax.f32 %v992_v55, 0.0 }
 0x194   :  { %v810_v52 = vpop.f32.mrf.mxu1  ;;  %v714_v59 = vpop.f32.mrf.mxu2 }
 0x195   :  { %v811_v54 = vadd.f32 %v810_v52, %v2175_v34  ;;  %v1770_v9 = vpack.c.bf16 %v1085_v14, %v1084_v0  ;;  %v884_v1 = vadd.f32 %v883_v51, %v714_v59  ;;  %v1054_v7 = vmax.f32 %v990_v2, 0.0 }
 0x196   :  { %v636_v13 = vpop.f32.mrf.mxu0 }
 0x197   :  { %v925_v62 = vmul.f32 %v1821_v42, %v811_v54  ;;  %v806_v63 = vadd.f32 %v805_v24, %v636_v13  ;;  %1806 = vst [vmem:[%s2579_s4 + $0xf0] sm:$0xff] %v1770_v9   ;;  %v954_v6 = vmul.f32 %v1821_v42, %v884_v1 }
 0x199   :  { %v993_v34 = vadd.f32 %v1822_v60, %v925_v62  ;;  %v923_v58 = vmul.f32 %v1821_v42, %v806_v63  ;;  %v1022_v17 = vadd.f32 %v1822_v60, %v954_v6 }
 0x19b   :  { %v1057_v4 = vmax.f32 %v993_v34, 0.0  ;;  %v991_v5 = vadd.f32 %v1822_v60, %v923_v58  ;;  %v1086_v20 = vmax.f32 %v1022_v17, 0.0 }
 0x19c   :  { %v716_v61 = vpop.f32.mrf.mxu2 }
 0x19d   :  { %v1700_v56 = vpack.c.bf16 %v1057_v4, %v1056_v3  ;;  %v1055_v11 = vmax.f32 %v991_v5, 0.0  ;;  %v886_v35 = vadd.f32 %v885_v8, %v716_v61 }
 0x19f   :  { %1792 = vst [vmem:[%s2579_s4 + $0x80] sm:$0xff] %v1700_v56   ;;  %v1695_v15 = vpack.c.bf16 %v1055_v11, %v1054_v7  ;;  %v955_v18 = vmul.f32 %v1821_v42, %v886_v35 }
 0x1a1   :  { %1791 = vst [vmem:[%s2579_s4 + $0x78] sm:$0xff] %v1695_v15   ;;  %v1023_v19 = vadd.f32 %v1822_v60, %v955_v18 }
 0x1a3   :  { %v1087_v21 = vmax.f32 %v1023_v19, 0.0 }
 0x1a5   :  { %v1775_v22 = vpack.c.bf16 %v1087_v21, %v1086_v20 }
 0x1a7   :  { %1807 = vst [vmem:[%s2579_s4 + $0xf8] sm:$0xff] %v1775_v22  }

// kernel: forward.7
= control target key start
LH: loop header
LB: loop body
LE: loop exit
PB: predicated region body
PF: predicated region fallthrough
CT: control target
= control target key end

     0   :  { %vm138_vm0 = vcmask 130048   ;;  %vm205_vm1 = vcmask 261120   ;;  %s2318_s24 = smov 112   ;;  %vm979_vm2 = vcmask 1043456   ;;  %vm972_vm3 = vcmask 64512   ;;  %s2887_s4 = inlined_call_operand.vmem [shape: bf16[16,32], index: 4, kind: input, shape index: {}]   ;;  %s2888_s0 = inlined_call_operand.vmem [shape: bf16[4,32,128], index: 0, kind: input, shape index: {}]   ;;  %s2889_s2 = inlined_call_operand.vmem [shape: f32[1,16], index: 2, kind: input, shape index: {}]   ;;  %s2890_s3 = inlined_call_operand.vmem [shape: f32[1,16], index: 3, kind: input, shape index: {}]   ;;  %s2891_s14 = inlined_call_operand.vmem [shape: f32[1,32], index: 14, kind: input, shape index: {}]   ;;  %s2892_s5 = inlined_call_operand.vmem [shape: f32[1,32], index: 5, kind: input, shape index: {}]   ;;  %s2893_s6 = inlined_call_operand.vmem [shape: f32[1,32], index: 6, kind: input, shape index: {}]   ;;  %s2894_s7 = inlined_call_operand.vmem [shape: bf16[9,32,8], index: 7, kind: input, shape index: {}]   ;;  %s2895_s1 = inlined_call_operand.vmem [shape: bf16[8,32,32], index: 1, kind: input, shape index: {}]   ;;  %s2896_s8 = inlined_call_operand.vmem [shape: f32[1,24], index: 8, kind: input, shape index: {}]   ;;  %s2897_s9 = inlined_call_operand.vmem [shape: f32[1,24], index: 9, kind: input, shape index: {}]   ;;  %s2898_s15 = inlined_call_operand.vmem [shape: f32[1,32], index: 15, kind: input, shape index: {}]   ;;  %s2899_s10 = inlined_call_operand.vmem [shape: bf16[24,32], index: 10, kind: input, shape index: {}]   ;;  %s2900_s11 = inlined_call_operand.vmem [shape: f32[1,32], index: 11, kind: input, shape index: {}]   ;;  %s2901_s12 = inlined_call_operand.vmem [shape: f32[1,32], index: 12, kind: input, shape index: {}]   ;;  %s2902_s13 = inlined_call_operand.vmem [shape: bf16[9,32,8], index: 13, kind: input, shape index: {}]   ;;  %s2903_s16 = inlined_call_operand.vmem [shape: bf16[32,128], index: 16, kind: input, shape index: {}]   ;;  %s2904_s17 = inlined_call_operand.vmem [shape: bf16[32,128], index: 17, kind: output, shape index: {}]  }
   0x1   :  { %2907 = sst [smem:[#allocation2_spill]] %s2887_s4  ;;  %v2308_v29 = vld [vmem:[%s2889_s2] ss:$0 sm:$0xff]  ;;  %v2203_v57 = vld [vmem:[%s2894_s7 + $0x48] sm:$0xff] }
   0x2   :  { %2908 = sst [smem:[#allocation3_spill]] %s2888_s0  ;;  %v2309_v36 = vld [vmem:[%s2890_s3] ss:$0 sm:$0xff]  ;;  %298 = vmatpush.bf16.msra.mxu3 %v2203_v57  ;;  %v2207_v59 = vld [vmem:[%s2894_s7 + $0x8] sm:$0xff]  ;;  %v2218_v57 = vld [vmem:[%s2894_s7 + $0x30] sm:$0xff] }
   0x3   :  { %2909 = sst [smem:[#allocation4_spill]] %s2899_s10  ;;  %v2202_v58 = vld [vmem:[%s2894_s7 + $0x40] sm:$0xff]  ;;  %261 = vmatpush.bf16.msra.mxu2 %v2207_v59 }
   0x4   :  { %s2910_s26 = sld [smem:[#allocation2_spill]]  ;;  %v2206_v60 = vld [vmem:[%s2894_s7] sm:$0xff] }
   0x5   :  { %s2911_s10 = sld [smem:[#allocation3_spill]]  ;;  %v2311_v62 = vld [vmem:[%s2892_s5] ss:$0 sm:$0xff] }
   0x6   :  { %299 = vmatpush.bf16.msra.mxu3 %v2202_v58  ;;  %v2215_v58 = vld [vmem:[%s2894_s7 + $0x28] sm:$0xff] }
   0x7   :  { %262 = vmatpush.bf16.msra.mxu2 %v2206_v60 }
   0xa   :  { %v2201_v0 = vld [vmem:[%s2910_s26] sm:$0xff]  ;;  %470 = vmatpush.bf16.msrb.mxu3 %v2215_v58  ;;  %s2319_s26 = smov 104  }
   0xb   :  { %v2257_v1 = vld [vmem:[%s2911_s10] sm:$0xff]   ;;  %v2299_v2 = vld [vmem:[%s2911_s10 + $0x10] sm:$0xff]   ;;  %152 = vmatpush.bf16.msra.mxu0 %v2201_v0  ;;  %v2298_v15 = vld [vmem:[%s2911_s10 + $0x8] sm:$0xff]  }
   0xc   :  { %v2258_v3 = vunpack.c.l.bf16 %v2257_v1  ;;  %v2259_v4 = vunpack.c.h.bf16 %v2257_v1  ;;  %v2266_v5 = vunpack.c.l.bf16 %v2299_v2  ;;  %v2267_v6 = vunpack.c.h.bf16 %v2299_v2  ;;  %v2301_v7 = vld [vmem:[%s2911_s10 + $0x20] sm:$0xff]   ;;  %v2303_v8 = vld [vmem:[%s2911_s10 + $0x30] sm:$0xff]   ;;  %v2300_v18 = vld [vmem:[%s2911_s10 + $0x18] sm:$0xff]  }
   0xd   :  { %v2274_v9 = vunpack.c.l.bf16 %v2301_v7  ;;  %v2275_v10 = vunpack.c.h.bf16 %v2301_v7  ;;  %v2282_v13 = vunpack.c.l.bf16 %v2303_v8  ;;  %v2283_v14 = vunpack.c.h.bf16 %v2303_v8  ;;  %v2302_v19 = vld [vmem:[%s2911_s10 + $0x28] sm:$0xff]   ;;  %v2304_v24 = vld [vmem:[%s2911_s10 + $0x38] sm:$0xff]   ;;  %v2312_v0 = vld [vmem:[%s2893_s6] ss:$0 sm:$0xff] }
   0xe   :  { %v74_v11 = vadd.f32 %v2266_v5, %v2258_v3  ;;  %v75_v12 = vadd.f32 %v2267_v6, %v2259_v4  ;;  %v2262_v16 = vunpack.c.l.bf16 %v2298_v15  ;;  %v2263_v17 = vunpack.c.h.bf16 %v2298_v15 }
   0xf   :  { %v2270_v22 = vunpack.c.l.bf16 %v2300_v18  ;;  %v2271_v23 = vunpack.c.h.bf16 %v2300_v18  ;;  %v2278_v25 = vunpack.c.l.bf16 %v2302_v19  ;;  %v2279_v26 = vunpack.c.h.bf16 %v2302_v19  ;;  %v2489_v18 = vld [vmem:[%s2895_s1 + $0x10] sm:$0xff]  ;;  %v2502_v19 = vld [vmem:[%s2895_s1 + $0x8] sm:$0xff] }
  0x10   :  { %v87_v20 = vadd.f32 %v2274_v9, %v74_v11  ;;  %v88_v21 = vadd.f32 %v2275_v10, %v75_v12  ;;  %v2286_v32 = vunpack.c.l.bf16 %v2304_v24  ;;  %v2287_v33 = vunpack.c.h.bf16 %v2304_v24 }
  0x11   :  { %v76_v30 = vadd.f32 %v2270_v22, %v2262_v16  ;;  %v77_v31 = vadd.f32 %v2271_v23, %v2263_v17  ;;  %v2483_v17 = vld [vmem:[%s2895_s1] sm:$0xff]  ;;  %v2211_v22 = vld [vmem:[%s2894_s7 + $0x18] sm:$0xff]  ;;  %v2210_v23 = vld [vmem:[%s2894_s7 + $0x10] sm:$0xff] }
  0x12   :  { %v100_v27 = vadd.f32 %v2282_v13, %v87_v20  ;;  %v101_v28 = vadd.f32 %v2283_v14, %v88_v21  ;;  %v2507_v20 = vld [vmem:[%s2895_s1 + $0x18] sm:$0xff]  ;;  %v2516_v21 = vld [vmem:[%s2895_s1 + $0x30] sm:$0xff] }
  0x13   :  { %v89_v37 = vadd.f32 %v2278_v25, %v76_v30  ;;  %v90_v38 = vadd.f32 %v2279_v26, %v77_v31  ;;  %v2533_v31 = vld [vmem:[%s2895_s1 + $0x38] sm:$0xff] }
  0x14   :  { %v2440_v34 = vmul.f32 0.25, %v100_v27  ;;  %v2442_v35 = vmul.f32 0.25, %v101_v28 }
  0x15   :  { %v102_v41 = vadd.f32 %v2286_v32, %v89_v37  ;;  %v103_v42 = vadd.f32 %v2287_v33, %v90_v38 }
  0x16   :  { %v112_v39 = vmul.f32 %v2308_v29, %v2440_v34  ;;  %v113_v40 = vmul.f32 %v2308_v29, %v2442_v35 }
  0x17   :  { %v2449_v47 = vmul.f32 0.25, %v102_v41  ;;  %v2451_v48 = vmul.f32 0.25, %v103_v42  ;;  %v2556_v41 = vld [vmem:[%s2895_s1 + $0x58] sm:$0xff]  ;;  %v2564_v42 = vld [vmem:[%s2895_s1 + $0x28] sm:$0xff] }
  0x18   :  { %v120_v43 = vadd.f32 %v2309_v36, %v112_v39  ;;  %v121_v44 = vadd.f32 %v2309_v36, %v113_v40  ;;  %v2542_v39 = vld [vmem:[%s2895_s1 + $0x50] sm:$0xff]  ;;  %v2549_v40 = vld [vmem:[%s2895_s1 + $0x20] sm:$0xff] }
  0x19   :  { %v114_v50 = vmul.f32 %v2308_v29, %v2449_v47  ;;  %v115_v51 = vmul.f32 %v2308_v29, %v2451_v48 }
  0x1a   :  { %v124_v45 = vmax.f32 %v120_v43, 0.0  ;;  %v125_v46 = vmax.f32 %v121_v44, 0.0  ;;  %v2571_v43 = vld [vmem:[%s2895_s1 + $0x70] sm:$0xff]  ;;  %v2578_v44 = vld [vmem:[%s2895_s1 + $0x40] sm:$0xff] }
  0x1b   :  { %v122_v52 = vadd.f32 %v2309_v36, %v114_v50  ;;  %v123_v53 = vadd.f32 %v2309_v36, %v115_v51  ;;  %v2606_v50 = vld [vmem:[%s2895_s1 + $0x68] sm:$0xff]  ;;  %v2613_v51 = vld [vmem:[%s2891_s14] ss:$0 sm:$0xff] }
  0x1c   :  { %v128_v49 = vpack.c.bf16 %v125_v46, %v124_v45  ;;  %v2585_v45 = vld [vmem:[%s2895_s1 + $0x78] sm:$0xff]  ;;  %v2592_v46 = vld [vmem:[%s2895_s1 + $0x48] sm:$0xff]  ;;  %1652 = vrot.lane.b32.xlu2 %v2613_v51, %s2318_s24  ;;  %1732 = vrot.lane.b32.xlu1 %v2613_v51, %s2319_s26 }
  0x1d   :  { %v126_v54 = vmax.f32 %v122_v52, 0.0  ;;  %v127_v55 = vmax.f32 %v123_v53, 0.0 }
  0x1e   :  { %1813 = vmatmul.msk.bf16.vlgmr.msra.gmra.mxu0 %vm138_vm0, %v128_v49  ;;  %v2599_v49 = vld [vmem:[%s2895_s1 + $0x60] sm:$0xff] }
  0x1f   :  { %v129_v56 = vpack.c.bf16 %v127_v55, %v126_v54  ;;  %v2219_v54 = vld [vmem:[%s2894_s7 + $0x38] sm:$0xff] }
  0x2e   :  { %1814 = vmatmul.msk.bf16.gmra.mxu0 %vm138_vm0, %v129_v56 }
  0x9b   :  { %v154_v61 = vpop.f32.mrf.mxu0 }
  0x9c   :  { %v168_v63 = vmul.f32 %v2311_v62, %v154_v61 }
  0x9e   :  { %v176_v2 = vadd.f32 %v2312_v0, %v168_v63 }
  0xa0   :  { %v180_v5 = vmax.f32 %v176_v2, 0.0  ;;  %v2214_v2 = vld [vmem:[%s2894_s7 + $0x20] sm:$0xff] }
  0xa1   :  { %471 = vmatpush.bf16.msrb.mxu3 %v2214_v2 }
  0xa3   :  { %v156_v1 = vpop.f32.mrf.mxu0 }
  0xa4   :  { %v169_v3 = vmul.f32 %v2311_v62, %v156_v1 }
  0xa6   :  { %v177_v4 = vadd.f32 %v2312_v0, %v169_v3 }
  0xa8   :  { %v181_v6 = vmax.f32 %v177_v4, 0.0 }
  0xaa   :  { %v2475_v7 = vpack.c.bf16 %v181_v6, %v180_v5 }
  0xab   :  { %v159_v8 = vpop.f32.mrf.mxu0 }
  0xac   :  { %1847 = vmatmul.msk.bf16.vlgmr.msra.gmra.mxu3 %vm205_vm1, %v2475_v7  ;;  %v170_v9 = vmul.f32 %v2311_v62, %v159_v8 }
  0xae   :  { %v178_v11 = vadd.f32 %v2312_v0, %v170_v9 }
  0xb0   :  { %v182_v14 = vmax.f32 %v178_v11, 0.0 }
  0xb3   :  { %v161_v10 = vpop.f32.mrf.mxu0 }
  0xb4   :  { %v171_v12 = vmul.f32 %v2311_v62, %v161_v10 }
  0xb6   :  { %v179_v13 = vadd.f32 %v2312_v0, %v171_v12 }
  0xb8   :  { %v183_v15 = vmax.f32 %v179_v13, 0.0  ;;  %v2227_v13 = vld [vmem:[%s2894_s7 + $0x68] sm:$0xff] }
  0xba   :  { %v185_v16 = vpack.c.bf16 %v183_v15, %v182_v14  ;;  %v2226_v15 = vld [vmem:[%s2894_s7 + $0x60] sm:$0xff] }
  0xbc   :  { %218 = vmatpush.bf16.msra.mxu1 %v185_v16  ;;  %1848 = vmatmul.msk.bf16.gmra.mxu3 %vm205_vm1, %v185_v16 }
  0xbd   :  { %338 = vmatpush.bf16.msrb.mxu0 %v185_v16  ;;  %426 = vmatpush.bf16.msrb.mxu2 %v185_v16 }
  0xc0   :  { %219 = vmatpush.bf16.msra.mxu1 %v2475_v7 }
  0xc1   :  { %339 = vmatpush.bf16.msrb.mxu0 %v2475_v7  ;;  %427 = vmatpush.bf16.msrb.mxu2 %v2475_v7 }
  0xc3   :  { %1827 = vmatmul.msk.bf16.vlgmr.msra.gmra.mxu1 %vm205_vm1, %v2483_v17 }
  0xc4   :  { %1861 = vmatmul.msk.bf16.vlgmr.msrb.gmra.mxu0 %vm205_vm1, %v2489_v18  ;;  %382 = vmatpush.bf16.msrb.mxu1 %v2211_v22 }
  0xc5   :  { %514 = vmatpush.bf16.msra.mxu0 %v185_v16 }
  0xc8   :  { %383 = vmatpush.bf16.msrb.mxu1 %v2210_v23 }
  0xc9   :  { %515 = vmatpush.bf16.msra.mxu0 %v2475_v7 }
  0xcc   :  { %558 = vmatpush.bf16.msra.mxu1 %v2219_v54 }
  0xcd   :  { %690 = vmatpush.bf16.msrb.mxu0 %v185_v16 }
  0xd0   :  { %559 = vmatpush.bf16.msra.mxu1 %v2218_v57  ;;  %v2230_v57 = vld [vmem:[%s2894_s7 + $0x70] sm:$0xff] }
  0xd1   :  { %691 = vmatpush.bf16.msrb.mxu0 %v2475_v7 }
  0xd3   :  { %1828 = vmatmul.msk.bf16.gmra.mxu1 %vm205_vm1, %v2502_v19 }
  0xd4   :  { %1862 = vmatmul.msk.bf16.gmra.mxu0 %vm205_vm1, %v2507_v20 }
  0xe4   :  { %1917 = vmatmul.msk.bf16.vlgmr.msra.gmra.mxu0 %vm205_vm1, %v2516_v21 }
  0xe5   :  { %866 = vmatpush.bf16.msra.mxu0 %v185_v16 }
  0xe9   :  { %867 = vmatpush.bf16.msra.mxu0 %v2475_v7 }
  0xf4   :  { %1918 = vmatmul.msk.bf16.gmra.mxu0 %vm205_vm1, %v2533_v31 }
 0x104   :  { %1973 = vmatmul.msk.bf16.vlgmr.msrb.gmra.mxu0 %vm205_vm1, %v2542_v39 }
 0x114   :  { %1974 = vmatmul.msk.bf16.gmra.mxu0 %vm205_vm1, %v2556_v41 }
 0x124   :  { %2029 = vmatmul.msk.bf16.vlgmr.msra.gmra.mxu0 %vm205_vm1, %v2571_v43 }
 0x12f   :  { %v301_v53 = vpop.f32.mrf.mxu3 }
 0x134   :  { %2030 = vmatmul.msk.bf16.gmra.mxu0 %vm205_vm1, %v2585_v45 }
 0x137   :  { %v2628_v63 = vpop.f32.mrf.mxu3 }
 0x13f   :  { %v306_v4 = vpop.f32.mrf.mxu3 }
 0x140   :  { %v221_v24 = vpop.f32.mrf.mxu1 }
 0x141   :  { %v341_v25 = vpop.f32.mrf.mxu0 }
 0x148   :  { %v223_v26 = vpop.f32.mrf.mxu1 }
 0x149   :  { %v231_v27 = vpack.c.bf16 %v223_v26, %v221_v24  ;;  %v343_v28 = vpop.f32.mrf.mxu0 }
 0x14a   :  { %v351_v29 = vpack.c.bf16 %v343_v28, %v341_v25  ;;  %v2222_v25 = vld [vmem:[%s2894_s7 + $0x50] sm:$0xff] }
 0x14b   :  { %1837 = vmatmul.msk.bf16.vlgmr.msra.gmra.mxu2 %vm205_vm1, %v231_v27 }
 0x14c   :  { %602 = vmatpush.bf16.msra.mxu2 %v185_v16  ;;  %1875 = vmatmul.msk.bf16.vlgmr.msrb.gmra.mxu1 %vm205_vm1, %v351_v29 }
 0x14d   :  { %734 = vmatpush.bf16.msrb.mxu1 %v2227_v13 }
 0x150   :  { %603 = vmatpush.bf16.msra.mxu2 %v2475_v7  ;;  %v226_v30 = vpop.f32.mrf.mxu1 }
 0x151   :  { %v346_v32 = vpop.f32.mrf.mxu0  ;;  %735 = vmatpush.bf16.msrb.mxu1 %v2226_v15 }
 0x158   :  { %v228_v33 = vpop.f32.mrf.mxu1 }
 0x159   :  { %v232_v36 = vpack.c.bf16 %v228_v33, %v226_v30  ;;  %v348_v37 = vpop.f32.mrf.mxu0 }
 0x15a   :  { %v352_v38 = vpack.c.bf16 %v348_v37, %v346_v32  ;;  %v2235_v37 = vld [vmem:[%s2894_s7 + $0x88] sm:$0xff] }
 0x15b   :  { %1838 = vmatmul.msk.bf16.gmra.mxu2 %vm205_vm1, %v232_v36 }
 0x15c   :  { %1876 = vmatmul.msk.bf16.gmra.mxu1 %vm205_vm1, %v352_v38 }
 0x161   :  { %v517_v52 = vpop.f32.mrf.mxu0 }
 0x169   :  { %v519_v60 = vpop.f32.mrf.mxu0 }
 0x16a   :  { %v527_v61 = vpack.c.bf16 %v519_v60, %v517_v52  ;;  %v2234_v52 = vld [vmem:[%s2894_s7 + $0x80] sm:$0xff] }
 0x16b   :  { %1889 = vmatmul.msk.bf16.vlgmr.msrb.gmra.mxu2 %vm205_vm1, %v2549_v40 }
 0x16c   :  { %778 = vmatpush.bf16.msrb.mxu2 %v185_v16  ;;  %1931 = vmatmul.msk.bf16.vlgmr.msra.gmra.mxu1 %vm205_vm1, %v527_v61  ;;  %v2223_v16 = vld [vmem:[%s2894_s7 + $0x58] sm:$0xff] }
 0x16d   :  { %646 = vmatpush.bf16.msra.mxu3 %v2223_v16  ;;  %910 = vmatpush.bf16.msra.mxu1 %v2235_v37 }
 0x170   :  { %779 = vmatpush.bf16.msrb.mxu2 %v2475_v7 }
 0x171   :  { %v522_v3 = vpop.f32.mrf.mxu0  ;;  %647 = vmatpush.bf16.msra.mxu3 %v2222_v25  ;;  %911 = vmatpush.bf16.msra.mxu1 %v2234_v52 }
 0x179   :  { %v524_v8 = vpop.f32.mrf.mxu0 }
 0x17a   :  { %v528_v9 = vpack.c.bf16 %v524_v8, %v522_v3 }
 0x17b   :  { %1890 = vmatmul.msk.bf16.gmra.mxu2 %vm205_vm1, %v2564_v42 }
 0x17c   :  { %1932 = vmatmul.msk.bf16.gmra.mxu1 %vm205_vm1, %v528_v9 }
 0x181   :  { %v693_v12 = vpop.f32.mrf.mxu0 }
 0x189   :  { %v695_v22 = vpop.f32.mrf.mxu0 }
 0x18a   :  { %v703_v23 = vpack.c.bf16 %v695_v22, %v693_v12 }
 0x18b   :  { %1945 = vmatmul.msk.bf16.vlgmr.msra.gmra.mxu2 %vm205_vm1, %v2578_v44 }
 0x18c   :  { %1987 = vmatmul.msk.bf16.vlgmr.msrb.gmra.mxu1 %vm205_vm1, %v703_v23 }
 0x191   :  { %v698_v27 = vpop.f32.mrf.mxu0 }
 0x199   :  { %v700_v29 = vpop.f32.mrf.mxu0 }
 0x19a   :  { %v704_v30 = vpack.c.bf16 %v700_v29, %v698_v27 }
 0x19b   :  { %1946 = vmatmul.msk.bf16.gmra.mxu2 %vm205_vm1, %v2592_v46 }
 0x19c   :  { %1988 = vmatmul.msk.bf16.gmra.mxu1 %vm205_vm1, %v704_v30 }
 0x1a1   :  { %v869_v36 = vpop.f32.mrf.mxu0 }
 0x1a9   :  { %v871_v54 = vpop.f32.mrf.mxu0 }
 0x1ab   :  { %2001 = vmatmul.msk.bf16.vlgmr.msrb.gmra.mxu2 %vm205_vm1, %v2599_v49 }
 0x1bb   :  { %2002 = vmatmul.msk.bf16.gmra.mxu2 %vm205_vm1, %v2606_v50 }
 0x1c9   :  { %v385_v55 = vpop.f32.mrf.mxu1 }
 0x1ce   :  { %v264_v56 = vpop.f32.mrf.mxu2 }
 0x1cf   :  { %v302_v59 = vadd.f32 %v301_v53, %v264_v56  ;;  %v2231_v53 = vld [vmem:[%s2894_s7 + $0x78] sm:$0xff] }
 0x1d1   :  { %v2626_v62 = vadd.f32 %v385_v55, %v302_v59  ;;  %v2631_v0 = vpop.f32.mrf.mxu1  ;;  %v879_v55 = vpack.c.bf16 %v871_v54, %v869_v36  ;;  %v874_v59 = vpop.f32.mrf.mxu0 }
 0x1d3   :  { %2043 = vmatmul.msk.bf16.vlgmr.msra.gmra.mxu1 %vm205_vm1, %v879_v55 }
 0x1d6   :  { %v2633_v1 = vpop.f32.mrf.mxu2 }
 0x1d9   :  { %v390_v6 = vpop.f32.mrf.mxu1  ;;  %v876_v61 = vpop.f32.mrf.mxu0 }
 0x1da   :  { %v880_v2 = vpack.c.bf16 %v876_v61, %v874_v59 }
 0x1de   :  { %v269_v5 = vpop.f32.mrf.mxu2 }
 0x1df   :  { %v307_v7 = vadd.f32 %v306_v4, %v269_v5  ;;  %v2313_v5 = vld [vmem:[%s2896_s8] ss:$0 sm:$0xff] }
 0x1e0   :  { %951 = vrot.lane.b32.xlu0 %v2313_v5, %s2318_s24  ;;  %v931_v54 = vmul.f32 %v2313_v5, %v2440_v34  ;;  %v932_v55 = vmul.f32 %v2313_v5, %v2442_v35 }
 0x1e1   :  { %v2638_v10 = vadd.f32 %v390_v6, %v307_v7  ;;  %v2682_v6 = vld [vmem:[%s2898_s15] ss:$0 sm:$0xff]  ;;  %v2692_v16 = vpop.f32.mrf.mxu1  ;;  %s2912_s15 = sld [smem:[#allocation4_spill]] }
 0x1e2   :  { %1659 = vrot.lane.b32.xlu2 %v2682_v6, %s2318_s24  ;;  %v2314_v7 = vld [vmem:[%s2897_s9] ss:$0 sm:$0xff]  ;;  %1739 = vrot.lane.b32.xlu1 %v2682_v6, %s2319_s26 }
 0x1e3   :  { %2044 = vmatmul.msk.bf16.gmra.mxu1 %vm205_vm1, %v880_v2 }
 0x1e6   :  { %v2641_v11 = vpop.f32.mrf.mxu2 }
 0x1e7   :  { %v2236_v59 = vld [vmem:[%s2912_s15] sm:$0xff] }
 0x1e8   :  { %958 = vrot.lane.b32.xlu0 %v2314_v7, %s2318_s24 }
 0x1e9   :  { %v561_v22 = vpop.f32.mrf.mxu1 }
 0x1ee   :  { %v429_v14 = vpop.f32.mrf.mxu2 }
 0x1f1   :  { %v563_v23 = vpop.f32.mrf.mxu1 }
 0x1f6   :  { %v431_v24 = vpop.f32.mrf.mxu2 }
 0x1f7   :  { %v439_v26 = vpack.c.bf16 %v431_v24, %v429_v14  ;;  %v308_v24 = vpop.f32.mrf.mxu3 }
 0x1f9   :  { %1903 = vmatmul.msk.bf16.vlgmr.msrb.gmra.mxu3 %vm205_vm1, %v439_v26  ;;  %v566_v26 = vpop.f32.mrf.mxu1 }
 0x1fa   :  { %822 = vmatpush.bf16.msrb.mxu3 %v2231_v53 }
 0x1fe   :  { %v434_v28 = vpop.f32.mrf.mxu2  ;;  %823 = vmatpush.bf16.msrb.mxu3 %v2230_v57 }
 0x201   :  { %v2695_v30 = vpop.f32.mrf.mxu1 }
 0x206   :  { %v436_v32 = vpop.f32.mrf.mxu2 }
 0x207   :  { %v440_v33 = vpack.c.bf16 %v436_v32, %v434_v28 }
 0x209   :  { %1904 = vmatmul.msk.bf16.gmra.mxu3 %vm205_vm1, %v440_v33  ;;  %v737_v37 = vpop.f32.mrf.mxu1 }
 0x20e   :  { %v605_v38 = vpop.f32.mrf.mxu2 }
 0x211   :  { %v739_v52 = vpop.f32.mrf.mxu1 }
 0x216   :  { %v607_v56 = vpop.f32.mrf.mxu2 }
 0x217   :  { %v615_v58 = vpack.c.bf16 %v607_v56, %v605_v38 }
 0x219   :  { %1959 = vmatmul.msk.bf16.vlgmr.msra.gmra.mxu3 %vm205_vm1, %v615_v58  ;;  %v742_v56 = vpop.f32.mrf.mxu1  ;;  %v939_v58 = vadd.f32 %v2314_v7, %v931_v54 }
 0x21a   :  { %1021 = vmatpush.bf16.msra.mxu3 %v2236_v59 }
 0x21e   :  { %v610_v60 = vpop.f32.mrf.mxu2 }
 0x226   :  { %v612_v3 = vpop.f32.mrf.mxu2 }
 0x227   :  { %v616_v4 = vpack.c.bf16 %v612_v3, %v610_v60  ;;  %v943_v60 = vmax.f32 %v939_v58, 0.0  ;;  %v2704_v3 = vpop.f32.mrf.mxu1  ;;  %v1653_v58 = vpop.permute.xlu2 %1652 }
 0x229   :  { %1960 = vmatmul.msk.bf16.gmra.mxu3 %vm205_vm1, %v616_v4  ;;  %v971_v4 = vld [vmem:[%s2912_s15 + $0x8] sm:$0xf] }
 0x22e   :  { %v781_v8 = vpop.f32.mrf.mxu2 }
 0x236   :  { %v783_v9 = vpop.f32.mrf.mxu2 }
 0x237   :  { %v791_v12 = vpack.c.bf16 %v783_v9, %v781_v8  ;;  %v981_v8 = vsel %vm979_vm2, %v971_v4, 0  ;;  %v304_v9 = vadd.f32 %v2628_v63, %v2633_v1 }
 0x238   :  { %990 = vmatpush.bf16.msra.mxu2 %v981_v8 }
 0x239   :  { %2015 = vmatmul.msk.bf16.vlgmr.msrb.gmra.mxu3 %vm205_vm1, %v791_v12  ;;  %v933_v12 = vmul.f32 %v2313_v5, %v2449_v47 }
 0x23c   :  { %v1660_v8 = vpop.permute.xlu2 %1659 }
 0x23e   :  { %v786_v13 = vpop.f32.mrf.mxu2 }
 0x246   :  { %v788_v14 = vpop.f32.mrf.mxu2 }
 0x247   :  { %v792_v15 = vpack.c.bf16 %v788_v14, %v786_v13  ;;  %v934_v13 = vmul.f32 %v2313_v5, %v2451_v48 }
 0x249   :  { %2016 = vmatmul.msk.bf16.gmra.mxu3 %vm205_vm1, %v792_v15  ;;  %v941_v15 = vadd.f32 %v2314_v7, %v933_v12 }
 0x252   :  { %v952_v63 = vpop.permute.xlu0 %951 }
 0x27c   :  { %v473_v25 = vpop.f32.mrf.mxu3 }
 0x27d   :  { %v483_v27 = vadd.f32 %v473_v25, %v2626_v62  ;;  %v940_v62 = vadd.f32 %v2314_v7, %v932_v55  ;;  %v396_v25 = vadd.f32 %v2631_v0, %v304_v9 }
 0x27f   :  { %v571_v28 = vadd.f32 %v561_v22, %v483_v27  ;;  %v944_v61 = vmax.f32 %v940_v62, 0.0  ;;  %v942_v22 = vadd.f32 %v2314_v7, %v934_v13  ;;  %v945_v27 = vmax.f32 %v941_v15, 0.0 }
 0x280   :  { %v309_v7 = vadd.f32 %v308_v24, %v2641_v11 }
 0x282   :  { %v398_v9 = vadd.f32 %v2692_v16, %v309_v7 }
 0x284   :  { %v475_v29 = vpop.f32.mrf.mxu3 }
 0x285   :  { %v484_v54 = vadd.f32 %v475_v29, %v396_v25 }
 0x287   :  { %v572_v59 = vadd.f32 %v563_v23, %v484_v54 }
 0x28c   :  { %v478_v32 = vpop.f32.mrf.mxu3 }
 0x28d   :  { %v485_v33 = vadd.f32 %v478_v32, %v2638_v10  ;;  %v947_v10 = vpack.c.bf16 %v944_v61, %v943_v60  ;;  %v946_v32 = vmax.f32 %v942_v22, 0.0 }
 0x28f   :  { %v573_v36 = vadd.f32 %v566_v26, %v485_v33  ;;  %2051 = vmatmul.msk.bf16.vlgmr.msra.gmra.mxu3 %vm138_vm0, %v947_v10  ;;  %v913_v33 = vpop.f32.mrf.mxu1  ;;  %v948_v55 = vpack.c.bf16 %v946_v32, %v945_v27 }
 0x294   :  { %v480_v38 = vpop.f32.mrf.mxu3 }
 0x295   :  { %v486_v15 = vadd.f32 %v480_v38, %v398_v9 }
 0x297   :  { %v915_v10 = vpop.f32.mrf.mxu1  ;;  %v574_v24 = vadd.f32 %v2695_v30, %v486_v15 }
 0x29c   :  { %v649_v53 = vpop.f32.mrf.mxu3 }
 0x29d   :  { %v659_v26 = vadd.f32 %v649_v53, %v571_v28 }
 0x29f   :  { %v747_v62 = vadd.f32 %v737_v37, %v659_v26  ;;  %2052 = vmatmul.msk.bf16.gmra.mxu3 %vm138_vm0, %v948_v55  ;;  %v959_v37 = vpop.permute.xlu0 %958 }
 0x2a4   :  { %v651_v57 = vpop.f32.mrf.mxu3 }
 0x2a5   :  { %v660_v5 = vadd.f32 %v651_v57, %v572_v59 }
 0x2a7   :  { %v748_v0 = vadd.f32 %v739_v52, %v660_v5  ;;  %v918_v52 = vpop.f32.mrf.mxu1 }
 0x2ac   :  { %v654_v2 = vpop.f32.mrf.mxu3 }
 0x2ad   :  { %v661_v12 = vadd.f32 %v654_v2, %v573_v36 }
 0x2af   :  { %v749_v11 = vadd.f32 %v742_v56, %v661_v12 }
 0x2b4   :  { %v656_v14 = vpop.f32.mrf.mxu3 }
 0x2b5   :  { %v662_v36 = vadd.f32 %v656_v14, %v574_v24 }
 0x2b7   :  { %v750_v59 = vadd.f32 %v2704_v3, %v662_v36  ;;  %v2238_v3 = vld [vmem:[%s2902_s13 + $0x48] sm:$0xff] }
 0x2b8   :  { %1146 = vmatpush.bf16.msrb.mxu2 %v2238_v3 }
 0x2bc   :  { %v825_v1 = vpop.f32.mrf.mxu3 }
 0x2bd   :  { %v835_v60 = vadd.f32 %v825_v1, %v747_v62 }
 0x2bf   :  { %v923_v61 = vadd.f32 %v913_v33, %v835_v60 }
 0x2c1   :  { %v1655_v28 = vmul.f32 %v1653_v58, %v923_v61  ;;  %v954_v4 = vmul.f32 %v952_v63, %v923_v61  ;;  %v920_v61 = vpop.f32.mrf.mxu1 }
 0x2c3   :  { %v1662_v22 = vadd.f32 %v1660_v8, %v1655_v28  ;;  %v961_v23 = vadd.f32 %v959_v37, %v954_v4 }
 0x2c4   :  { %v827_v53 = vpop.f32.mrf.mxu3 }
 0x2c5   :  { %v836_v29 = vadd.f32 %v827_v53, %v748_v0  ;;  %v1666_v32 = vmax.f32 %v1662_v22, 0.0  ;;  %v965_v54 = vmax.f32 %v961_v23, 0.0  ;;  %v2239_v23 = vld [vmem:[%s2902_s13] sm:$0xff] }
 0x2c7   :  { %v924_v13 = vadd.f32 %v915_v10, %v836_v29 }
 0x2c9   :  { %v955_v25 = vmul.f32 %v952_v63, %v924_v13  ;;  %v1656_v57 = vmul.f32 %v1653_v58, %v924_v13 }
 0x2cb   :  { %v962_v26 = vadd.f32 %v959_v37, %v955_v25  ;;  %v1663_v27 = vadd.f32 %v1660_v8, %v1656_v57  ;;  %v2316_v57 = vld [vmem:[%s2900_s11] ss:$0 sm:$0xff] }
 0x2cc   :  { %v830_v33 = vpop.f32.mrf.mxu3 }
 0x2cd   :  { %v966_v55 = vmax.f32 %v962_v26, 0.0  ;;  %v1667_v62 = vmax.f32 %v1663_v27, 0.0  ;;  %v837_v16 = vadd.f32 %v830_v33, %v749_v11  ;;  %v2317_v11 = vld [vmem:[%s2901_s12] ss:$0 sm:$0xff] }
 0x2cf   :  { %v969_v2 = vpack.c.bf16 %v966_v55, %v965_v54  ;;  %v2719_v38 = vpack.c.bf16 %v1667_v62, %v1666_v32  ;;  %v925_v1 = vadd.f32 %v918_v52, %v837_v16 }
 0x2d1   :  { %2045 = vmatmul.msk.bf16.vlgmr.msra.gmra.mxu2 %vm972_vm3, %v969_v2  ;;  %v956_v60 = vmul.f32 %v952_v63, %v925_v1  ;;  %v1657_v30 = vmul.f32 %v1653_v58, %v925_v1 }
 0x2d3   :  { %v1664_v10 = vadd.f32 %v1660_v8, %v1657_v30  ;;  %v963_v53 = vadd.f32 %v959_v37, %v956_v60 }
 0x2d4   :  { %v832_v56 = vpop.f32.mrf.mxu3 }
 0x2d5   :  { %v838_v5 = vadd.f32 %v832_v56, %v750_v59  ;;  %v1668_v29 = vmax.f32 %v1664_v10, 0.0  ;;  %v967_v12 = vmax.f32 %v963_v53, 0.0 }
 0x2d7   :  { %v926_v7 = vadd.f32 %v920_v61, %v838_v5 }
 0x2d9   :  { %v957_v0 = vmul.f32 %v952_v63, %v926_v7  ;;  %v1658_v28 = vmul.f32 %v1653_v58, %v926_v7  ;;  %v2237_v58 = vld [vmem:[%s2902_s13 + $0x40] sm:$0xff] }
 0x2da   :  { %1147 = vmatpush.bf16.msrb.mxu2 %v2237_v58 }
 0x2db   :  { %v1665_v4 = vadd.f32 %v1660_v8, %v1658_v28  ;;  %v964_v14 = vadd.f32 %v959_v37, %v957_v0  ;;  %v2240_v8 = vld [vmem:[%s2902_s13 + $0x8] sm:$0xff] }
 0x2dc   :  { %1109 = vmatpush.bf16.msrb.mxu1 %v2240_v8 }
 0x2dd   :  { %v1669_v9 = vmax.f32 %v1665_v4, 0.0  ;;  %v968_v13 = vmax.f32 %v964_v14, 0.0 }
 0x2df   :  { %v970_v15 = vpack.c.bf16 %v968_v13, %v967_v12  ;;  %v2723_v22 = vpack.c.bf16 %v1669_v9, %v1668_v29  ;;  %v1672_v9 = vld [vmem:[%s2903_s16 + $0x8] sm:$0xf] }
 0x2e0   :  { %1110 = vmatpush.bf16.msrb.mxu1 %v2239_v23  ;;  %v1680_v12 = vsel %vm979_vm2, %v1672_v9, 0 }
 0x2e1   :  { %2046 = vmatmul.msk.bf16.gmra.mxu2 %vm972_vm3, %v970_v15 }
 0x312   :  { %v1023_v63 = vpop.f32.mrf.mxu3 }
 0x31a   :  { %v1025_v26 = vpop.f32.mrf.mxu3 }
 0x322   :  { %v1028_v55 = vpop.f32.mrf.mxu3 }
 0x32a   :  { %v1030_v56 = vpop.f32.mrf.mxu3 }
 0x354   :  { %v992_v37 = vpop.f32.mrf.mxu2 }
 0x355   :  { %v1024_v25 = vadd.f32 %v1023_v63, %v992_v37  ;;  %v2243_v37 = vld [vmem:[%s2902_s13 + $0x20] sm:$0xff] }
 0x357   :  { %v1037_v27 = vmul.f32 %v2316_v57, %v1024_v25 }
 0x359   :  { %v1045_v32 = vadd.f32 %v2317_v11, %v1037_v27 }
 0x35b   :  { %v1049_v62 = vmax.f32 %v1045_v32, 0.0 }
 0x35c   :  { %v994_v24 = vpop.f32.mrf.mxu2 }
 0x35d   :  { %v1026_v52 = vadd.f32 %v1025_v26, %v994_v24 }
 0x35f   :  { %v1038_v33 = vmul.f32 %v2316_v57, %v1026_v52 }
 0x361   :  { %v1046_v54 = vadd.f32 %v2317_v11, %v1038_v33 }
 0x363   :  { %v1050_v16 = vmax.f32 %v1046_v54, 0.0 }
 0x364   :  { %v997_v36 = vpop.f32.mrf.mxu2 }
 0x365   :  { %v1053_v2 = vpack.c.bf16 %v1050_v16, %v1049_v62  ;;  %v1029_v1 = vadd.f32 %v1028_v55, %v997_v36  ;;  %v2250_v16 = vld [vmem:[%s2902_s13 + $0x68] sm:$0xff] }
 0x367   :  { %2077 = vmatmul.msk.bf16.vlgmr.msrb.gmra.mxu2 %vm205_vm1, %v1053_v2  ;;  %v1039_v59 = vmul.f32 %v2316_v57, %v1029_v1 }
 0x369   :  { %v1047_v5 = vadd.f32 %v2317_v11, %v1039_v59 }
 0x36b   :  { %v1051_v10 = vmax.f32 %v1047_v5, 0.0 }
 0x36c   :  { %v999_v60 = vpop.f32.mrf.mxu2 }
 0x36d   :  { %v1031_v30 = vadd.f32 %v1030_v56, %v999_v60  ;;  %v2247_v60 = vld [vmem:[%s2902_s13 + $0x50] sm:$0xff] }
 0x36f   :  { %v1040_v61 = vmul.f32 %v2316_v57, %v1031_v30 }
 0x371   :  { %v1048_v7 = vadd.f32 %v2317_v11, %v1040_v61 }
 0x373   :  { %v1052_v0 = vmax.f32 %v1048_v7, 0.0 }
 0x375   :  { %v1054_v28 = vpack.c.bf16 %v1052_v0, %v1051_v10 }
 0x377   :  { %1066 = vmatpush.bf16.msrb.mxu0 %v1054_v28  ;;  %2078 = vmatmul.msk.bf16.gmra.mxu2 %vm205_vm1, %v1054_v28 }
 0x378   :  { %1165 = vmatpush.bf16.msrb.mxu3 %v1054_v28  ;;  %1232 = vmatpush.bf16.msra.mxu1 %v1054_v28 }
 0x37b   :  { %1067 = vmatpush.bf16.msrb.mxu0 %v1053_v2 }
 0x37c   :  { %1166 = vmatpush.bf16.msrb.mxu3 %v1053_v2  ;;  %1233 = vmatpush.bf16.msra.mxu1 %v1053_v2 }
 0x37e   :  { %2057 = vmatmul.msk.bf16.vlgmr.msrb.gmra.mxu0 %vm205_vm1, %v2483_v17  ;;  %v2242_v17 = vld [vmem:[%s2902_s13 + $0x18] sm:$0xff] }
 0x37f   :  { %2079 = vmatmul.msk.bf16.vlgmr.msrb.gmra.mxu3 %vm205_vm1, %v2489_v18  ;;  %1209 = vmatpush.bf16.msra.mxu0 %v2242_v17  ;;  %v2241_v18 = vld [vmem:[%s2902_s13 + $0x10] sm:$0xff] }
 0x380   :  { %1299 = vmatpush.bf16.msra.mxu3 %v1054_v28 }
 0x383   :  { %1210 = vmatpush.bf16.msra.mxu0 %v2241_v18  ;;  %v2254_v18 = vld [vmem:[%s2902_s13 + $0x88] sm:$0xff] }
 0x384   :  { %1300 = vmatpush.bf16.msra.mxu3 %v1053_v2 }
 0x388   :  { %1433 = vmatpush.bf16.msrb.mxu3 %v1054_v28 }
 0x38c   :  { %1434 = vmatpush.bf16.msrb.mxu3 %v1053_v2 }
 0x38e   :  { %2058 = vmatmul.msk.bf16.gmra.mxu0 %vm205_vm1, %v2502_v19 }
 0x38f   :  { %2080 = vmatmul.msk.bf16.gmra.mxu3 %vm205_vm1, %v2507_v20 }
 0x39f   :  { %2111 = vmatmul.msk.bf16.vlgmr.msra.gmra.mxu3 %vm205_vm1, %v2516_v21 }
 0x3a0   :  { %1567 = vmatpush.bf16.msra.mxu3 %v1054_v28 }
 0x3a4   :  { %1568 = vmatpush.bf16.msra.mxu3 %v1053_v2 }
 0x3af   :  { %2112 = vmatmul.msk.bf16.gmra.mxu3 %vm205_vm1, %v2533_v31 }
 0x3bf   :  { %2143 = vmatmul.msk.bf16.vlgmr.msrb.gmra.mxu3 %vm205_vm1, %v2542_v39 }
 0x3cf   :  { %2144 = vmatmul.msk.bf16.gmra.mxu3 %vm205_vm1, %v2556_v41 }
 0x3df   :  { %2175 = vmatmul.msk.bf16.vlgmr.msra.gmra.mxu3 %vm205_vm1, %v2571_v43 }
 0x3ea   :  { %v1149_v13 = vpop.f32.mrf.mxu2 }
 0x3ef   :  { %2176 = vmatmul.msk.bf16.gmra.mxu3 %vm205_vm1, %v2585_v45 }
 0x3f2   :  { %v1151_v25 = vpop.f32.mrf.mxu2 }
 0x3fa   :  { %v1154_v52 = vpop.f32.mrf.mxu2 }
 0x3fb   :  { %v1069_v19 = vpop.f32.mrf.mxu0 }
 0x402   :  { %v1168_v20 = vpop.f32.mrf.mxu3 }
 0x403   :  { %v1071_v21 = vpop.f32.mrf.mxu0 }
 0x404   :  { %v1079_v31 = vpack.c.bf16 %v1071_v21, %v1069_v19  ;;  %v2253_v21 = vld [vmem:[%s2902_s13 + $0x80] sm:$0xff] }
 0x406   :  { %2067 = vmatmul.msk.bf16.vlgmr.msrb.gmra.mxu1 %vm205_vm1, %v1079_v31 }
 0x407   :  { %1366 = vmatpush.bf16.msrb.mxu1 %v1054_v28 }
 0x40a   :  { %v1170_v39 = vpop.f32.mrf.mxu3 }
 0x40b   :  { %v1178_v41 = vpack.c.bf16 %v1170_v39, %v1168_v20  ;;  %1367 = vmatpush.bf16.msrb.mxu1 %v1053_v2  ;;  %v1074_v43 = vpop.f32.mrf.mxu0  ;;  %v2252_v20 = vld [vmem:[%s2902_s13 + $0x78] sm:$0xff] }
 0x40d   :  { %2093 = vmatmul.msk.bf16.vlgmr.msra.gmra.mxu0 %vm205_vm1, %v1178_v41 }
 0x412   :  { %v1173_v53 = vpop.f32.mrf.mxu3 }
 0x413   :  { %v1076_v4 = vpop.f32.mrf.mxu0 }
 0x414   :  { %v1080_v14 = vpack.c.bf16 %v1076_v4, %v1074_v43  ;;  %v2251_v43 = vld [vmem:[%s2902_s13 + $0x70] sm:$0xff] }
 0x416   :  { %2068 = vmatmul.msk.bf16.gmra.mxu1 %vm205_vm1, %v1080_v14 }
 0x41a   :  { %v1175_v29 = vpop.f32.mrf.mxu3 }
 0x41b   :  { %v1179_v45 = vpack.c.bf16 %v1175_v29, %v1173_v53 }
 0x41d   :  { %2094 = vmatmul.msk.bf16.gmra.mxu0 %vm205_vm1, %v1179_v45 }
 0x426   :  { %2095 = vmatmul.msk.bf16.vlgmr.msra.gmra.mxu1 %vm205_vm1, %v2549_v40  ;;  %v1302_v40 = vpop.f32.mrf.mxu3 }
 0x427   :  { %1500 = vmatpush.bf16.msra.mxu1 %v1054_v28 }
 0x42b   :  { %1501 = vmatpush.bf16.msra.mxu1 %v1053_v2  ;;  %v2249_v2 = vld [vmem:[%s2902_s13 + $0x60] sm:$0xff] }
 0x436   :  { %2096 = vmatmul.msk.bf16.gmra.mxu1 %vm205_vm1, %v2564_v42  ;;  %v2246_v42 = vld [vmem:[%s2902_s13 + $0x38] sm:$0xff] }
 0x437   :  { %1343 = vmatpush.bf16.msrb.mxu0 %v2246_v42 }
 0x446   :  { %2127 = vmatmul.msk.bf16.vlgmr.msrb.gmra.mxu1 %vm205_vm1, %v2578_v44 }
 0x447   :  { %1689 = vmatpush.bf16.msrb.mxu1 %v1680_v12 }
 0x456   :  { %2128 = vmatmul.msk.bf16.gmra.mxu1 %vm205_vm1, %v2592_v46  ;;  %v2244_v46 = vld [vmem:[%s2902_s13 + $0x28] sm:$0xff] }
 0x457   :  { %1276 = vmatpush.bf16.msra.mxu2 %v2244_v46 }
 0x45b   :  { %1277 = vmatpush.bf16.msra.mxu2 %v2243_v37 }
 0x466   :  { %2159 = vmatmul.msk.bf16.vlgmr.msra.gmra.mxu1 %vm205_vm1, %v2599_v49  ;;  %v2245_v49 = vld [vmem:[%s2902_s13 + $0x30] sm:$0xff] }
 0x467   :  { %1344 = vmatpush.bf16.msrb.mxu0 %v2245_v49 }
 0x46b   :  { %1477 = vmatpush.bf16.msra.mxu0 %v2250_v16 }
 0x46f   :  { %1478 = vmatpush.bf16.msra.mxu0 %v2249_v2 }
 0x476   :  { %2160 = vmatmul.msk.bf16.gmra.mxu1 %vm205_vm1, %v2606_v50  ;;  %v1304_v50 = vpop.f32.mrf.mxu3 }
 0x477   :  { %v1312_v15 = vpack.c.bf16 %v1304_v50, %v1302_v40 }
 0x479   :  { %2125 = vmatmul.msk.bf16.vlgmr.msrb.gmra.mxu0 %vm205_vm1, %v1312_v15  ;;  %v1632_v15 = vmul.f32 %v2613_v51, %v2440_v34  ;;  %v1635_v34 = vmul.f32 %v2613_v51, %v2451_v48 }
 0x47a   :  { %1611 = vmatpush.bf16.msrb.mxu0 %v2254_v18 }
 0x47e   :  { %v1307_v23 = vpop.f32.mrf.mxu3  ;;  %1612 = vmatpush.bf16.msrb.mxu0 %v2253_v21 }
 0x483   :  { %v1112_v44 = vpop.f32.mrf.mxu1 }
 0x484   :  { %v1150_v3 = vadd.f32 %v1149_v13, %v1112_v44  ;;  %v2255_v44 = vld [vmem:[%s2903_s16] sm:$0xff] }
 0x486   :  { %2191 = vmatmul.msk.bf16.vlgmr.msrb.gmra.mxu1 %vm972_vm3, %v2719_v38  ;;  %v1309_v11 = vpop.f32.mrf.mxu3 }
 0x487   :  { %v1313_v24 = vpack.c.bf16 %v1309_v11, %v1307_v23 }
 0x489   :  { %2126 = vmatmul.msk.bf16.gmra.mxu0 %vm205_vm1, %v1313_v24 }
 0x48a   :  { %v1212_v58 = vpop.f32.mrf.mxu0 }
 0x48b   :  { %v2806_v63 = vadd.f32 %v1212_v58, %v1150_v3  ;;  %v1114_v8 = vpop.f32.mrf.mxu1  ;;  %v1633_v3 = vmul.f32 %v2613_v51, %v2442_v35  ;;  %v1640_v58 = vadd.f32 %v2682_v6, %v1632_v15  ;;  %v1643_v35 = vadd.f32 %v2682_v6, %v1635_v34 }
 0x48c   :  { %v1152_v57 = vadd.f32 %v1151_v25, %v1114_v8 }
 0x48d   :  { %v1641_v8 = vadd.f32 %v2682_v6, %v1633_v3  ;;  %v1644_v37 = vmax.f32 %v1640_v58, 0.0  ;;  %v1647_v24 = vmax.f32 %v1643_v35, 0.0 }
 0x48e   :  { %v1436_v62 = vpop.f32.mrf.mxu3 }
 0x48f   :  { %v1645_v23 = vmax.f32 %v1641_v8, 0.0 }
 0x491   :  { %v1648_v25 = vpack.c.bf16 %v1645_v23, %v1644_v37 }
 0x492   :  { %v1214_v26 = vpop.f32.mrf.mxu0 }
 0x493   :  { %v2811_v38 = vadd.f32 %v1214_v26, %v1152_v57  ;;  %v1117_v27 = vpop.f32.mrf.mxu1  ;;  %v1634_v57 = vmul.f32 %v2613_v51, %v2449_v47 }
 0x494   :  { %v1155_v32 = vadd.f32 %v1154_v52, %v1117_v27 }
 0x495   :  { %v1642_v26 = vadd.f32 %v2682_v6, %v1634_v57 }
 0x496   :  { %2192 = vmatmul.msk.bf16.gmra.mxu1 %vm972_vm3, %v2723_v22  ;;  %v2248_v22 = vld [vmem:[%s2902_s13 + $0x58] sm:$0xff]  ;;  %v1438_v1 = vpop.f32.mrf.mxu3 }
 0x497   :  { %1410 = vmatpush.bf16.msrb.mxu2 %v2248_v22  ;;  %v1446_v59 = vpack.c.bf16 %v1438_v1, %v1436_v62  ;;  %v1646_v11 = vmax.f32 %v1642_v26, 0.0  ;;  %v1156_v62 = vpop.f32.mrf.mxu2 }
 0x499   :  { %2157 = vmatmul.msk.bf16.vlgmr.msra.gmra.mxu0 %vm205_vm1, %v1446_v59  ;;  %v1649_v52 = vpack.c.bf16 %v1647_v24, %v1646_v11 }
 0x49a   :  { %v1217_v33 = vpop.f32.mrf.mxu0 }
 0x49b   :  { %v2816_v54 = vadd.f32 %v1217_v33, %v1155_v32  ;;  %v2818_v55 = vpop.f32.mrf.mxu1  ;;  %1411 = vmatpush.bf16.msrb.mxu2 %v2247_v60 }
 0x49e   :  { %v1441_v5 = vpop.f32.mrf.mxu3 }
 0x4a2   :  { %v1219_v27 = vpop.f32.mrf.mxu0 }
 0x4a3   :  { %v1235_v36 = vpop.f32.mrf.mxu1 }
 0x4a6   :  { %v1443_v7 = vpop.f32.mrf.mxu3 }
 0x4a7   :  { %v1447_v10 = vpack.c.bf16 %v1443_v7, %v1441_v5 }
 0x4a9   :  { %2158 = vmatmul.msk.bf16.gmra.mxu0 %vm205_vm1, %v1447_v10 }
 0x4ab   :  { %v1237_v56 = vpop.f32.mrf.mxu1 }
 0x4ac   :  { %v1245_v30 = vpack.c.bf16 %v1237_v56, %v1235_v36 }
 0x4ae   :  { %2109 = vmatmul.msk.bf16.vlgmr.msra.gmra.mxu2 %vm205_vm1, %v1245_v30  ;;  %v1570_v17 = vpop.f32.mrf.mxu3 }
 0x4af   :  { %1544 = vmatpush.bf16.msra.mxu2 %v2252_v20  ;;  %v1733_v20 = vpop.permute.xlu1 %1732 }
 0x4b3   :  { %v1240_v61 = vpop.f32.mrf.mxu1  ;;  %1545 = vmatpush.bf16.msra.mxu2 %v2251_v43 }
 0x4b6   :  { %v1572_v31 = vpop.f32.mrf.mxu3 }
 0x4b7   :  { %v1580_v39 = vpack.c.bf16 %v1572_v31, %v1570_v17 }
 0x4b9   :  { %2189 = vmatmul.msk.bf16.vlgmr.msrb.gmra.mxu0 %vm205_vm1, %v1580_v39 }
 0x4bb   :  { %v1242_v0 = vpop.f32.mrf.mxu1 }
 0x4bc   :  { %v1246_v28 = vpack.c.bf16 %v1242_v0, %v1240_v61  ;;  %v1752_v0 = vld [vmem:[%s2903_s16 + $0xc] sm:$0xf] }
 0x4be   :  { %2110 = vmatmul.msk.bf16.gmra.mxu2 %vm205_vm1, %v1246_v28  ;;  %v1575_v4 = vpop.f32.mrf.mxu3 }
 0x4c3   :  { %v1369_v19 = vpop.f32.mrf.mxu1 }
 0x4c6   :  { %v1577_v29 = vpop.f32.mrf.mxu3 }
 0x4c7   :  { %v1581_v45 = vpack.c.bf16 %v1577_v29, %v1575_v4  ;;  %v1157_v29 = vadd.f32 %v1156_v62, %v2818_v55 }
 0x4c9   :  { %2190 = vmatmul.msk.bf16.gmra.mxu0 %vm205_vm1, %v1581_v45 }
 0x4cb   :  { %v1371_v41 = vpop.f32.mrf.mxu1 }
 0x4cc   :  { %v1379_v53 = vpack.c.bf16 %v1371_v41, %v1369_v19 }
 0x4ce   :  { %2141 = vmatmul.msk.bf16.vlgmr.msrb.gmra.mxu2 %vm205_vm1, %v1379_v53 }
 0x4cf   :  { %1720 = vmatpush.bf16.msrb.mxu2 %v2255_v44 }
 0x4d3   :  { %v1374_v14 = vpop.f32.mrf.mxu1 }
 0x4db   :  { %v1376_v9 = vpop.f32.mrf.mxu1 }
 0x4dc   :  { %v1380_v12 = vpack.c.bf16 %v1376_v9, %v1374_v14 }
 0x4de   :  { %2142 = vmatmul.msk.bf16.gmra.mxu2 %vm205_vm1, %v1380_v12  ;;  %v1740_v12 = vpop.permute.xlu1 %1739 }
 0x4e3   :  { %v1503_v40 = vpop.f32.mrf.mxu1 }
 0x4eb   :  { %v1505_v42 = vpop.f32.mrf.mxu1 }
 0x4ec   :  { %v1513_v46 = vpack.c.bf16 %v1505_v42, %v1503_v40  ;;  %v1225_v40 = vadd.f32 %v1219_v27, %v1157_v29 }
 0x4ee   :  { %2173 = vmatmul.msk.bf16.vlgmr.msra.gmra.mxu2 %vm205_vm1, %v1513_v46 }
 0x4f3   :  { %v1508_v49 = vpop.f32.mrf.mxu1 }
 0x4f6   :  { %v1346_v32 = vpop.f32.mrf.mxu0 }
 0x4fb   :  { %v1510_v13 = vpop.f32.mrf.mxu1 }
 0x4fc   :  { %v1514_v50 = vpack.c.bf16 %v1510_v13, %v1508_v49 }
 0x4fe   :  { %2174 = vmatmul.msk.bf16.gmra.mxu2 %vm205_vm1, %v1514_v50  ;;  %v1348_v33 = vpop.f32.mrf.mxu0 }
 0x506   :  { %v1351_v36 = vpop.f32.mrf.mxu0 }
 0x50e   :  { %2197 = vmatmul.msk.bf16.vlgmr.msrb.gmra.mxu2 %vm138_vm0, %v1648_v25  ;;  %v1353_v48 = vpop.f32.mrf.mxu0 }
 0x516   :  { %v1480_v59 = vpop.f32.mrf.mxu0 }
 0x51e   :  { %2198 = vmatmul.msk.bf16.gmra.mxu2 %vm138_vm0, %v1649_v52  ;;  %v1482_v60 = vpop.f32.mrf.mxu0 }
 0x526   :  { %v1485_v61 = vpop.f32.mrf.mxu0 }
 0x52e   :  { %v1487_v10 = vpop.f32.mrf.mxu0 }
 0x531   :  { %v1279_v16 = vpop.f32.mrf.mxu2 }
 0x532   :  { %v1289_v47 = vadd.f32 %v1279_v16, %v2806_v63  ;;  %v1760_v63 = vsel %vm979_vm2, %v1752_v0, 0 }
 0x533   :  { %1769 = vmatpush.bf16.msrb.mxu3 %v1760_v63 }
 0x534   :  { %v1356_v22 = vadd.f32 %v1346_v32, %v1289_v47 }
 0x536   :  { %v1614_v18 = vpop.f32.mrf.mxu0 }
 0x539   :  { %v1281_v2 = vpop.f32.mrf.mxu2 }
 0x53e   :  { %v1616_v53 = vpop.f32.mrf.mxu0 }
 0x541   :  { %v1284_v51 = vpop.f32.mrf.mxu2 }
 0x542   :  { %v1291_v1 = vadd.f32 %v1284_v51, %v2816_v54  ;;  %v1290_v54 = vadd.f32 %v1281_v2, %v2811_v38 }
 0x544   :  { %v1358_v6 = vadd.f32 %v1351_v36, %v1291_v1  ;;  %v1357_v31 = vadd.f32 %v1348_v33, %v1290_v54 }
 0x546   :  { %v1619_v3 = vpop.f32.mrf.mxu0 }
 0x549   :  { %v1286_v56 = vpop.f32.mrf.mxu2 }
 0x54a   :  { %v1292_v46 = vadd.f32 %v1286_v56, %v1225_v40 }
 0x54c   :  { %v1359_v58 = vadd.f32 %v1353_v48, %v1292_v46 }
 0x54e   :  { %v1621_v11 = vpop.f32.mrf.mxu0 }
 0x551   :  { %v1413_v30 = vpop.f32.mrf.mxu2 }
 0x552   :  { %v1423_v17 = vadd.f32 %v1413_v30, %v1356_v22  ;;  %v1691_v22 = vpop.f32.mrf.mxu1 }
 0x554   :  { %v1490_v19 = vadd.f32 %v1480_v59, %v1423_v17 }
 0x559   :  { %v1415_v5 = vpop.f32.mrf.mxu2 }
 0x55a   :  { %v1424_v41 = vadd.f32 %v1415_v5, %v1357_v31  ;;  %v1693_v51 = vpop.f32.mrf.mxu1 }
 0x55c   :  { %v1491_v4 = vadd.f32 %v1482_v60, %v1424_v41 }
 0x561   :  { %v1418_v7 = vpop.f32.mrf.mxu2 }
 0x562   :  { %v1425_v42 = vadd.f32 %v1418_v7, %v1358_v6 }
 0x564   :  { %v1492_v13 = vadd.f32 %v1485_v61, %v1425_v42  ;;  %v1696_v61 = vpop.f32.mrf.mxu1 }
 0x569   :  { %v1420_v28 = vpop.f32.mrf.mxu2 }
 0x56a   :  { %v1426_v25 = vadd.f32 %v1420_v28, %v1359_v58 }
 0x56c   :  { %v1493_v34 = vadd.f32 %v1487_v10, %v1426_v25  ;;  %v1698_v0 = vpop.f32.mrf.mxu1 }
 0x571   :  { %v1547_v21 = vpop.f32.mrf.mxu2 }
 0x572   :  { %v1557_v39 = vadd.f32 %v1547_v21, %v1490_v19 }
 0x574   :  { %v1624_v43 = vadd.f32 %v1614_v18, %v1557_v39 }
 0x576   :  { %v1735_v45 = vmul.f32 %v1733_v20, %v1624_v43 }
 0x578   :  { %v1742_v38 = vadd.f32 %v1740_v12, %v1735_v45 }
 0x579   :  { %v1549_v14 = vpop.f32.mrf.mxu2 }
 0x57a   :  { %v1558_v9 = vadd.f32 %v1549_v14, %v1491_v4  ;;  %v1746_v8 = vmax.f32 %v1742_v38, 0.0 }
 0x57c   :  { %v1625_v44 = vadd.f32 %v1616_v53, %v1558_v9 }
 0x57e   :  { %v1736_v49 = vmul.f32 %v1733_v20, %v1625_v44 }
 0x580   :  { %v1743_v50 = vadd.f32 %v1740_v12, %v1736_v49 }
 0x581   :  { %v1552_v15 = vpop.f32.mrf.mxu2 }
 0x582   :  { %v1747_v37 = vmax.f32 %v1743_v50, 0.0  ;;  %v1559_v23 = vadd.f32 %v1552_v15, %v1492_v13 }
 0x584   :  { %v1750_v57 = vpack.c.bf16 %v1747_v37, %v1746_v8  ;;  %v1626_v55 = vadd.f32 %v1619_v3, %v1559_v23 }
 0x586   :  { %2199 = vmatmul.msk.bf16.vlgmr.msrb.gmra.mxu3 %vm972_vm3, %v1750_v57  ;;  %v1737_v35 = vmul.f32 %v1733_v20, %v1626_v55 }
 0x588   :  { %v1744_v52 = vadd.f32 %v1740_v12, %v1737_v35 }
 0x589   :  { %v1554_v26 = vpop.f32.mrf.mxu2 }
 0x58a   :  { %v1560_v27 = vadd.f32 %v1554_v26, %v1493_v34  ;;  %v1748_v62 = vmax.f32 %v1744_v52, 0.0 }
 0x58c   :  { %v1627_v24 = vadd.f32 %v1621_v11, %v1560_v27 }
 0x58e   :  { %v1738_v32 = vmul.f32 %v1733_v20, %v1627_v24 }
 0x590   :  { %v1745_v33 = vadd.f32 %v1740_v12, %v1738_v32 }
 0x591   :  { %v1722_v47 = vpop.f32.mrf.mxu2 }
 0x592   :  { %v1749_v16 = vmax.f32 %v1745_v33, 0.0  ;;  %v1723_v1 = vadd.f32 %v1722_v47, %v1691_v22 }
 0x594   :  { %v1751_v36 = vpack.c.bf16 %v1749_v16, %v1748_v62 }
 0x596   :  { %2200 = vmatmul.msk.bf16.gmra.mxu3 %vm972_vm3, %v1751_v36 }
 0x599   :  { %v1724_v2 = vpop.f32.mrf.mxu2 }
 0x59a   :  { %v1725_v6 = vadd.f32 %v1724_v2, %v1693_v51 }
 0x5a1   :  { %v1727_v30 = vpop.f32.mrf.mxu2 }
 0x5a2   :  { %v1728_v63 = vadd.f32 %v1727_v30, %v1696_v61 }
 0x5a9   :  { %v1729_v10 = vpop.f32.mrf.mxu2 }
 0x5aa   :  { %v1730_v28 = vadd.f32 %v1729_v10, %v1698_v0 }
 0x609   :  { %v1771_v48 = vpop.f32.mrf.mxu3 }
 0x60a   :  { %v1781_v56 = vadd.f32 %v1771_v48, %v1723_v1 }
 0x611   :  { %v1773_v59 = vpop.f32.mrf.mxu3 }
 0x612   :  { %v1782_v60 = vadd.f32 %v1773_v59, %v1725_v6 }
 0x614   :  { %v2291_v5 = vpack.c.bf16 %v1782_v60, %v1781_v56 }
 0x616   :  { %2292 = vst [vmem:[%s2904_s17] sm:$0xff] %v2291_v5  }
 0x619   :  { %v1776_v7 = vpop.f32.mrf.mxu3 }
 0x61a   :  { %v1783_v18 = vadd.f32 %v1776_v7, %v1728_v63 }
 0x621   :  { %v1778_v17 = vpop.f32.mrf.mxu3 }
 0x622   :  { %v1784_v54 = vadd.f32 %v1778_v17, %v1730_v28 }
 0x624   :  { %v2296_v19 = vpack.c.bf16 %v1784_v54, %v1783_v18 }
 0x626   :  { %2305 = vst [vmem:[%s2904_s17 + $0x8] sm:$0xff] %v2296_v19  }

// kernel: forward.9
= control target key start
LH: loop header
LB: loop body
LE: loop exit
PB: predicated region body
PF: predicated region fallthrough
CT: control target
= control target key end

     0   :  { %s664_s0 = inlined_call_operand.vmem [shape: bf16[4,2,128], index: 0, kind: input, shape index: {}]   ;;  %s665_s1 = inlined_call_operand.vmem [shape: f32[1,16], index: 1, kind: input, shape index: {}]   ;;  %s666_s2 = inlined_call_operand.vmem [shape: f32[1,16], index: 2, kind: input, shape index: {}]   ;;  %s667_s3 = inlined_call_operand.vmem [shape: bf16[16,32], index: 3, kind: input, shape index: {}]   ;;  %s668_s4 = inlined_call_operand.vmem [shape: f32[1,32], index: 4, kind: input, shape index: {}]   ;;  %s669_s5 = inlined_call_operand.vmem [shape: f32[1,32], index: 5, kind: input, shape index: {}]   ;;  %s670_s6 = inlined_call_operand.vmem [shape: bf16[9,32,8], index: 6, kind: input, shape index: {}]   ;;  %s671_s7 = inlined_call_operand.vmem [shape: f32[1,24], index: 7, kind: input, shape index: {}]   ;;  %s672_s8 = inlined_call_operand.vmem [shape: f32[1,24], index: 8, kind: input, shape index: {}]   ;;  %s673_s9 = inlined_call_operand.vmem [shape: bf16[24,32], index: 9, kind: input, shape index: {}]   ;;  %s674_s10 = inlined_call_operand.vmem [shape: f32[1,32], index: 10, kind: input, shape index: {}]   ;;  %s675_s11 = inlined_call_operand.vmem [shape: f32[1,32], index: 11, kind: input, shape index: {}]   ;;  %s676_s12 = inlined_call_operand.vmem [shape: bf16[9,32,8], index: 12, kind: input, shape index: {}]   ;;  %s677_s13 = inlined_call_operand.vmem [shape: f32[1,32], index: 13, kind: input, shape index: {}]   ;;  %s678_s14 = inlined_call_operand.vmem [shape: f32[1,32], index: 14, kind: input, shape index: {}]   ;;  %s679_s15 = inlined_call_operand.vmem [shape: bf16[32,128], index: 15, kind: input, shape index: {}]   ;;  %s680_s16 = inlined_call_operand.vmem [shape: f32[1,128], index: 16, kind: input, shape index: {}]   ;;  %s681_s17 = inlined_call_operand.hbm [shape: f32[2,128], index: 17, kind: output, shape index: {}]  }
   0x1   :  { %683 = sst [smem:[#allocation5_spill]] %s664_s0 }
   0x2   :  { %684 = sst [smem:[#allocation6_spill]] %s665_s1 }
   0x3   :  { %v435_v0 = vld [vmem:[%s667_s3] sm:$0xff]  ;;  %s685_s28 = sld [smem:[#allocation5_spill]] }
   0x4   :  { %104 = vmatpush.bf16.msra.mxu0 %v435_v0 }
   0x9   :  { %v58_v1 = vld [vmem:[%s685_s28] sm:$0x1]  ;;  %v388_v2 = vld [vmem:[%s685_s28 + $0x1] sm:$0x1]  ;;  %v389_v5 = vld [vmem:[%s685_s28 + $0x2] sm:$0x1] }
   0xa   :  { %v59_v3 = vunpack.c.l.bf16 %v58_v1  ;;  %v62_v4 = vunpack.c.l.bf16 %v388_v2  ;;  %v390_v6 = vld [vmem:[%s685_s28 + $0x3] sm:$0x1]  ;;  %v66_v7 = vunpack.c.l.bf16 %v389_v5 }
   0xb   :  { %v70_v9 = vunpack.c.l.bf16 %v390_v6 }
   0xc   :  { %v63_v8 = vadd.f32 %v62_v4, %v59_v3 }
   0xe   :  { %v67_v10 = vadd.f32 %v66_v7, %v63_v8 }
   0xf   :  { %22 = vsyncpa [#allocation3], 0  ;;  %s686_s21 = sld [smem:[#allocation6_spill]]  ;;  %v446_v14 = vld [vmem:[%s666_s2] ss:$0 sm:$0xff]  ;;  %vm93_vm0 = vcmask 130048  }
  0x10   :  { %v71_v11 = vadd.f32 %v70_v9, %v67_v10  ;;  %v437_v19 = vld [vmem:[%s670_s6 + $0x48] sm:$0xff]  ;;  %v436_v20 = vld [vmem:[%s670_s6 + $0x40] sm:$0xff]  ;;  %s482_s30 = smov 112   ;;  %vm139_vm1 = vcmask 261120   ;;  %vm185_vm2 = vcmask 1043456   ;;  %vm181_vm3 = vcmask 64512  }
  0x11   :  { %149 = vmatpush.bf16.msra.mxu1 %v437_v19  ;;  %v449_v21 = vld [vmem:[%s677_s13] ss:$0 sm:$0xff]  ;;  %v180_v38 = vld [vmem:[%s673_s9 + $0x8] sm:$0xf]  ;;  %v345_v2 = vld [vmem:[%s679_s15 + $0xc] sm:$0xf] }
  0x12   :  { %v72_v13 = vmul.f32 0.25, %v71_v11  ;;  %v450_v22 = vld [vmem:[%s671_s7] ss:$0 sm:$0xff]  ;;  %283 = vrot.lane.b32.xlu1 %v449_v21, %s482_s30  ;;  %v187_v39 = vsel %vm185_vm2, %v180_v38, 0  ;;  %v293_v40 = vld [vmem:[%s679_s15 + $0x8] sm:$0xf] }
  0x13   :  { %170 = vrot.lane.b32.xlu0 %v450_v22, %s482_s30  ;;  %v451_v23 = vld [vmem:[%s678_s14] ss:$0 sm:$0xff]  ;;  %196 = vmatpush.bf16.msra.mxu2 %v187_v39  ;;  %v298_v42 = vsel %vm185_vm2, %v293_v40, 0  ;;  %v440_v61 = vld [vmem:[%s676_s12 + $0x48] sm:$0xff]  ;;  %v350_v4 = vsel %vm185_vm2, %v345_v2, 0  ;;  %s379_s6 = sshll.u32 %s681_s17, 4  ;;  %s380_s6 = int_to_ptr.hbm [resolvable:$true] %s379_s6 }
  0x14   :  { %v452_v24 = vld [vmem:[%s672_s8] ss:$0 sm:$0xff]  ;;  %v160_v34 = vmul.f32 %v450_v22, %v72_v13  ;;  %v273_v43 = vmul.f32 %v449_v21, %v72_v13  ;;  %262 = vmatpush.bf16.msrb.mxu0 %v440_v61 }
  0x15   :  { %v445_v12 = vld [vmem:[%s686_s21] ss:$0 sm:$0xff]  ;;  %150 = vmatpush.bf16.msra.mxu1 %v436_v20 }
  0x16   :  { %v77_v15 = vmul.f32 %v445_v12, %v72_v13  ;;  %v447_v25 = vld [vmem:[%s668_s4] ss:$0 sm:$0xff]  ;;  %v165_v35 = vadd.f32 %v452_v24, %v160_v34  ;;  %v278_v44 = vadd.f32 %v451_v23, %v273_v43 }
  0x17   :  { %v448_v26 = vld [vmem:[%s669_s5] ss:$0 sm:$0xff]  ;;  %307 = vmatpush.bf16.msrb.mxu2 %v298_v42 }
  0x18   :  { %v82_v16 = vadd.f32 %v446_v14, %v77_v15  ;;  %v438_v33 = vld [vmem:[%s673_s9] sm:$0xff]  ;;  %v166_v36 = vmax.f32 %v165_v35, 0.0  ;;  %v279_v45 = vmax.f32 %v278_v44, 0.0  ;;  %s483_s9 = smov 104  }
  0x19   :  { %218 = vmatpush.bf16.msra.mxu3 %v438_v33  ;;  %v441_v41 = vld [vmem:[%s679_s15] sm:$0xff]  ;;  %335 = vrot.lane.b32.xlu2 %v449_v21, %s483_s9 }
  0x1a   :  { %v83_v17 = vmax.f32 %v82_v16, 0.0  ;;  %287 = vrot.lane.b32.xlu1 %v451_v23, %s482_s30  ;;  %v167_v37 = vpack.c.bf16 %v166_v36, %v166_v36  ;;  %v280_v47 = vpack.c.bf16 %v279_v45, %v279_v45  ;;  %v439_v0 = vld [vmem:[%s676_s12 + $0x40] sm:$0xff]  ;;  %359 = vmatpush.bf16.msrb.mxu1 %v350_v4  ;;  %s484_s12 = smov [#allocation2]  }
  0x1b   :  { %174 = vrot.lane.b32.xlu0 %v452_v24, %s482_s30  ;;  %263 = vmatpush.bf16.msrb.mxu0 %v439_v0  ;;  %v453_v5 = vld [vmem:[%s674_s10] ss:$0 sm:$0xff]  ;;  %s377_s15 = sshll.u32 %s484_s12, 4  ;;  %s378_s15 = int_to_ptr.vmem [resolvable:$true] %s377_s15 }
  0x1c   :  { %v84_v18 = vpack.c.bf16 %v83_v17, %v83_v17  ;;  %414 = vmatmul.msk.bf16.vlgmr.msra.gmra.mxu3 %vm93_vm0, %v167_v37  ;;  %v454_v8 = vld [vmem:[%s675_s11] ss:$0 sm:$0xff] }
  0x1d   :  { %329 = vmatpush.bf16.msrb.mxu3 %v441_v41 }
  0x1e   :  { %395 = vmatmul.msk.bf16.vlgmr.msra.gmra.mxu0 %vm93_vm0, %v84_v18 }
  0x21   :  { %339 = vrot.lane.b32.xlu2 %v451_v23, %s483_s9 }
  0x2c   :  { %433 = vmatmul.msk.bf16.vlgmr.msrb.gmra.mxu3 %vm93_vm0, %v280_v47 }
  0x73   :  { %v336_v17 = vpop.permute.xlu2 %335 }
  0x7b   :  { %v340_v19 = vpop.permute.xlu2 %339 }
  0x84   :  { %v284_v51 = vpop.permute.xlu1 %283 }
  0x85   :  { %v171_v46 = vpop.permute.xlu0 %170 }
  0x8c   :  { %v288_v57 = vpop.permute.xlu1 %287 }
  0x8d   :  { %v175_v49 = vpop.permute.xlu0 %174 }
  0x9b   :  { %v106_v27 = vpop.f32.mrf.mxu0 }
  0x9c   :  { %v114_v28 = vmul.f32 %v447_v25, %v106_v27  ;;  %v455_v25 = vld [vmem:[%s680_s16] ss:$0 sm:$0xff] }
  0x9e   :  { %v119_v29 = vadd.f32 %v448_v26, %v114_v28 }
  0x9f   :  { %v220_v62 = vpop.f32.mrf.mxu3 }
  0xa0   :  { %v120_v30 = vmax.f32 %v119_v29, 0.0 }
  0xa2   :  { %v121_v31 = vpack.c.bf16 %v120_v30, %v120_v30 }
  0xa3   :  { %v108_v32 = vpop.f32.mrf.mxu0 }
  0xa4   :  { %408 = vmatmul.msk.bf16.vlgmr.msra.gmra.mxu1 %vm139_vm1, %v121_v31 }
  0xa7   :  { %v222_v63 = vpop.f32.mrf.mxu3 }
  0xaf   :  { %v331_v1 = vpop.f32.mrf.mxu3 }
  0xb7   :  { %v333_v3 = vpop.f32.mrf.mxu3 }
 0x121   :  { %v152_v48 = vpop.f32.mrf.mxu1 }
 0x122   :  { %v173_v50 = vmul.f32 %v171_v46, %v152_v48  ;;  %v286_v56 = vmul.f32 %v284_v51, %v152_v48 }
 0x124   :  { %v177_v52 = vadd.f32 %v175_v49, %v173_v50  ;;  %v290_v58 = vadd.f32 %v288_v57, %v286_v56 }
 0x126   :  { %v178_v53 = vmax.f32 %v177_v52, 0.0  ;;  %v291_v59 = vmax.f32 %v290_v58, 0.0 }
 0x128   :  { %v179_v54 = vpack.c.bf16 %v178_v53, %v178_v53  ;;  %v292_v60 = vpack.c.bf16 %v291_v59, %v291_v59 }
 0x129   :  { %v154_v55 = vpop.f32.mrf.mxu1 }
 0x12a   :  { %409 = vmatmul.msk.bf16.vlgmr.msra.gmra.mxu2 %vm181_vm3, %v179_v54 }
 0x13a   :  { %428 = vmatmul.msk.bf16.vlgmr.msrb.gmra.mxu2 %vm181_vm3, %v292_v60 }
 0x1ad   :  { %v198_v6 = vpop.f32.mrf.mxu2 }
 0x1ae   :  { %v221_v7 = vadd.f32 %v220_v62, %v198_v6 }
 0x1b0   :  { %v228_v9 = vmul.f32 %v453_v5, %v221_v7 }
 0x1b2   :  { %v233_v10 = vadd.f32 %v454_v8, %v228_v9 }
 0x1b4   :  { %v234_v11 = vmax.f32 %v233_v10, 0.0 }
 0x1b5   :  { %v200_v12 = vpop.f32.mrf.mxu2 }
 0x1b6   :  { %v235_v13 = vpack.c.bf16 %v234_v11, %v234_v11 }
 0x1b8   :  { %427 = vmatmul.msk.bf16.vlgmr.msrb.gmra.mxu0 %vm139_vm1, %v235_v13 }
 0x1bd   :  { %v309_v14 = vpop.f32.mrf.mxu2 }
 0x1be   :  { %v332_v15 = vadd.f32 %v331_v1, %v309_v14 }
 0x1c5   :  { %v311_v16 = vpop.f32.mrf.mxu2 }
 0x235   :  { %v265_v18 = vpop.f32.mrf.mxu0 }
 0x236   :  { %v338_v20 = vmul.f32 %v336_v17, %v265_v18 }
 0x238   :  { %v342_v21 = vadd.f32 %v340_v19, %v338_v20 }
 0x23a   :  { %v343_v22 = vmax.f32 %v342_v21, 0.0 }
 0x23c   :  { %v344_v23 = vpack.c.bf16 %v343_v22, %v343_v22 }
 0x23d   :  { %v267_v24 = vpop.f32.mrf.mxu0 }
 0x23e   :  { %434 = vmatmul.msk.bf16.vlgmr.msrb.gmra.mxu1 %vm181_vm3, %v344_v23 }
 0x2bb   :  { %v361_v26 = vpop.f32.mrf.mxu1 }
 0x2bc   :  { %v365_v27 = vadd.f32 %v361_v26, %v332_v15 }
 0x2be   :  { %v370_v28 = vadd.f32 %v455_v25, %v365_v27 }
 0x2c0   :  { %371 = vst [vmem:[#allocation2] sm:$0x3] %v370_v28 }
 0x2c1   :  { %382 = dma.vmem_to_hbm [thread:$0]  %s378_s15, 32, %s380_s6, [#allocation3]  }
 0x2c3   :  { %v363_v29 = vpop.f32.mrf.mxu1 }
 0x2c4   :  { %480 = dma.done.wait [#allocation3], 32  }
 0x2c5   :  { %481 = vsyncadd [#allocation3], 4294967264 }
 0x2c6   :  { %387 = vsyncpa [#allocation3], 1 }

// kernel: forward.8
= control target key start
LH: loop header
LB: loop body
LE: loop exit
PB: predicated region body
PF: predicated region fallthrough
CT: control target
= control target key end

     0   :  { %vm92_vm0 = vcmask 130048   ;;  %vm131_vm1 = vcmask 1043456   ;;  %vm165_vm2 = vcmask 261120   ;;  %vm127_vm3 = vcmask 64512   ;;  %s1885_s4 = inlined_call_operand.vmem [shape: bf16[16,32], index: 4, kind: input, shape index: {}]   ;;  %s1886_s0 = inlined_call_operand.vmem [shape: bf16[4,8,128], index: 0, kind: input, shape index: {}]   ;;  %s1887_s2 = inlined_call_operand.vmem [shape: f32[1,16], index: 2, kind: input, shape index: {}]   ;;  %s1888_s3 = inlined_call_operand.vmem [shape: f32[1,16], index: 3, kind: input, shape index: {}]   ;;  %s1889_s5 = inlined_call_operand.vmem [shape: f32[1,32], index: 5, kind: input, shape index: {}]   ;;  %s1890_s6 = inlined_call_operand.vmem [shape: f32[1,32], index: 6, kind: input, shape index: {}]   ;;  %s1891_s7 = inlined_call_operand.vmem [shape: bf16[9,32,8], index: 7, kind: input, shape index: {}]   ;;  %s1892_s1 = inlined_call_operand.vmem [shape: bf16[8,8,8], index: 1, kind: input, shape index: {}]   ;;  %s1893_s8 = inlined_call_operand.vmem [shape: f32[1,24], index: 8, kind: input, shape index: {}]   ;;  %s1894_s9 = inlined_call_operand.vmem [shape: f32[1,24], index: 9, kind: input, shape index: {}]   ;;  %s1895_s14 = inlined_call_operand.vmem [shape: f32[1,32], index: 14, kind: input, shape index: {}]   ;;  %s1896_s15 = inlined_call_operand.vmem [shape: f32[1,32], index: 15, kind: input, shape index: {}]   ;;  %s1897_s10 = inlined_call_operand.vmem [shape: bf16[24,32], index: 10, kind: input, shape index: {}]   ;;  %s1898_s11 = inlined_call_operand.vmem [shape: f32[1,32], index: 11, kind: input, shape index: {}]   ;;  %s1899_s12 = inlined_call_operand.vmem [shape: f32[1,32], index: 12, kind: input, shape index: {}]   ;;  %s1900_s13 = inlined_call_operand.vmem [shape: bf16[9,32,8], index: 13, kind: input, shape index: {}]   ;;  %s1901_s16 = inlined_call_operand.vmem [shape: bf16[32,128], index: 16, kind: input, shape index: {}]   ;;  %s1902_s17 = inlined_call_operand.vmem [shape: bf16[8,128], index: 17, kind: output, shape index: {}]  }
   0x1   :  { %1905 = sst [smem:[#allocation2_spill]] %s1885_s4  ;;  %v1498_v10 = vld [vmem:[%s1887_s2] ss:$0 sm:$0xff]  ;;  %v1450_v17 = vld [vmem:[%s1891_s7 + $0x48] sm:$0xff]  ;;  %v1647_v31 = vld [vmem:[%s1892_s1 + $0x4] sm:$0xf] }
   0x2   :  { %1906 = sst [smem:[#allocation3_spill]] %s1886_s0  ;;  %v1499_v12 = vld [vmem:[%s1888_s3] ss:$0 sm:$0xff]  ;;  %202 = vmatpush.bf16.msra.mxu3 %v1450_v17  ;;  %v1452_v18 = vld [vmem:[%s1891_s7 + $0x8] sm:$0xff]  ;;  %v1454_v33 = vld [vmem:[%s1891_s7 + $0x18] sm:$0xff] }
   0x3   :  { %1907 = sst [smem:[#allocation4_spill]] %s1897_s10  ;;  %v1449_v19 = vld [vmem:[%s1891_s7 + $0x40] sm:$0xff]  ;;  %175 = vmatpush.bf16.msra.mxu2 %v1452_v18  ;;  %v1656_v32 = vld [vmem:[%s1892_s1 + $0xc] sm:$0xf]  ;;  %v1453_v34 = vld [vmem:[%s1891_s7 + $0x10] sm:$0xff] }
   0x4   :  { %s1908_s26 = sld [smem:[#allocation2_spill]]  ;;  %v1451_v20 = vld [vmem:[%s1891_s7] sm:$0xff]  ;;  %v1671_v40 = vld [vmem:[%s1892_s1 + $0x14] sm:$0xf]  ;;  %v1678_v44 = vld [vmem:[%s1892_s1 + $0x8] sm:$0xf] }
   0x5   :  { %s1909_s10 = sld [smem:[#allocation3_spill]]  ;;  %v1500_v21 = vld [vmem:[%s1889_s5] ss:$0 sm:$0xff]  ;;  %v1685_v45 = vld [vmem:[%s1892_s1 + $0x1c] sm:$0xf]  ;;  %v1456_v48 = vld [vmem:[%s1891_s7 + $0x28] sm:$0xff] }
   0x6   :  { %203 = vmatpush.bf16.msra.mxu3 %v1449_v19  ;;  %v1501_v22 = vld [vmem:[%s1890_s6] ss:$0 sm:$0xff]  ;;  %v1692_v46 = vld [vmem:[%s1892_s1 + $0x10] sm:$0xf]  ;;  %v1699_v47 = vld [vmem:[%s1892_s1 + $0x18] sm:$0xf] }
   0x7   :  { %176 = vmatpush.bf16.msra.mxu2 %v1451_v20  ;;  %v1642_v30 = vld [vmem:[%s1892_s1] sm:$0xf]  ;;  %v1458_v49 = vld [vmem:[%s1891_s7 + $0x38] sm:$0xff]  ;;  %v1457_v51 = vld [vmem:[%s1891_s7 + $0x30] sm:$0xff]  ;;  %s1508_s1 = smov 112  }
   0x8   :  { %v1455_v50 = vld [vmem:[%s1891_s7 + $0x20] sm:$0xff]  ;;  %v1460_v54 = vld [vmem:[%s1891_s7 + $0x58] sm:$0xff]  ;;  %v1462_v55 = vld [vmem:[%s1891_s7 + $0x68] sm:$0xff] }
   0x9   :  { %v1459_v58 = vld [vmem:[%s1891_s7 + $0x50] sm:$0xff]  ;;  %v1461_v59 = vld [vmem:[%s1891_s7 + $0x60] sm:$0xff] }
   0xa   :  { %v1448_v0 = vld [vmem:[%s1908_s26] sm:$0xff]  ;;  %307 = vmatpush.bf16.msrb.mxu3 %v1456_v48 }
   0xb   :  { %v1488_v1 = vld [vmem:[%s1909_s10] sm:$0xff]   ;;  %v1495_v2 = vld [vmem:[%s1909_s10 + $0x8] sm:$0xff]   ;;  %103 = vmatpush.bf16.msra.mxu0 %v1448_v0 }
   0xc   :  { %v1489_v3 = vunpack.c.l.bf16 %v1488_v1  ;;  %v1490_v4 = vunpack.c.h.bf16 %v1488_v1  ;;  %v1493_v5 = vunpack.c.l.bf16 %v1495_v2  ;;  %v1494_v7 = vunpack.c.h.bf16 %v1495_v2  ;;  %v1503_v18 = vld [vmem:[%s1894_s9] ss:$0 sm:$0xff] }
   0xd   :  { %v1759_v20 = vld [vmem:[%s1896_s15] ss:$0 sm:$0xff] }
   0xe   :  { %v62_v6 = vadd.f32 %v1490_v4, %v1489_v3  ;;  %308 = vmatpush.bf16.msrb.mxu3 %v1455_v50  ;;  %v1466_v3 = vld [vmem:[%s1891_s7 + $0x88] sm:$0xff] }
  0x10   :  { %v66_v8 = vadd.f32 %v1493_v5, %v62_v6  ;;  %v1465_v5 = vld [vmem:[%s1891_s7 + $0x80] sm:$0xff] }
  0x12   :  { %v70_v9 = vadd.f32 %v1494_v7, %v66_v8  ;;  %v1464_v7 = vld [vmem:[%s1891_s7 + $0x78] sm:$0xff] }
  0x14   :  { %v1612_v11 = vmul.f32 0.25, %v70_v9 }
  0x16   :  { %v76_v13 = vmul.f32 %v1498_v10, %v1612_v11 }
  0x18   :  { %v81_v14 = vadd.f32 %v1499_v12, %v76_v13  ;;  %v1463_v12 = vld [vmem:[%s1891_s7 + $0x70] sm:$0xff] }
  0x1a   :  { %v82_v15 = vmax.f32 %v81_v14, 0.0  ;;  %v1502_v14 = vld [vmem:[%s1893_s8] ss:$0 sm:$0xff] }
  0x1b   :  { %594 = vrot.lane.b32.xlu0 %v1502_v14, %s1508_s1  ;;  %v584_v17 = vmul.f32 %v1502_v14, %v1612_v11 }
  0x1c   :  { %v83_v16 = vpack.c.bf16 %v82_v15, %v82_v15  ;;  %v1749_v15 = vld [vmem:[%s1895_s14] ss:$0 sm:$0xff]  ;;  %s1910_s14 = sld [smem:[#allocation4_spill]] }
  0x1d   :  { %1089 = vrot.lane.b32.xlu2 %v1749_v15, %s1508_s1  ;;  %v589_v19 = vadd.f32 %v1503_v18, %v584_v17 }
  0x1e   :  { %1185 = vmatmul.msk.bf16.vlgmr.msra.gmra.mxu0 %vm92_vm0, %v83_v16 }
  0x23   :  { %598 = vrot.lane.b32.xlu0 %v1503_v18, %s1508_s1  ;;  %v1473_v18 = vld [vmem:[%s1900_s13 + $0x18] sm:$0xff] }
  0x25   :  { %1093 = vrot.lane.b32.xlu2 %v1759_v20, %s1508_s1  ;;  %s1509_s1 = smov 104  }
  0x26   :  { %1141 = vrot.lane.b32.xlu1 %v1749_v15, %s1509_s1 }
  0x2e   :  { %1145 = vrot.lane.b32.xlu1 %v1759_v20, %s1509_s1 }
  0x9b   :  { %v105_v23 = vpop.f32.mrf.mxu0 }
  0x9c   :  { %v113_v24 = vmul.f32 %v1500_v21, %v105_v23 }
  0x9e   :  { %v118_v25 = vadd.f32 %v1501_v22, %v113_v24 }
  0xa0   :  { %v119_v26 = vmax.f32 %v118_v25, 0.0 }
  0xa2   :  { %v120_v27 = vpack.c.bf16 %v119_v26, %v119_v26 }
  0xa3   :  { %v107_v28 = vpop.f32.mrf.mxu0 }
  0xa4   :  { %v133_v29 = vsel %vm131_vm1, %v120_v27, 0  ;;  %1208 = vmatmul.msk.bf16.vlgmr.msra.gmra.mxu3 %vm165_vm2, %v120_v27 }
  0xa5   :  { %142 = vmatpush.bf16.msra.mxu1 %v133_v29  ;;  %221 = vmatpush.bf16.msrb.mxu0 %v133_v29 }
  0xa6   :  { %274 = vmatpush.bf16.msrb.mxu2 %v133_v29  ;;  %413 = vmatpush.bf16.msra.mxu3 %v1460_v54 }
  0xa8   :  { %1190 = vmatmul.msk.bf16.vlgmr.msra.gmra.mxu1 %vm127_vm3, %v1642_v30  ;;  %1210 = vmatmul.msk.bf16.vlgmr.msrb.gmra.mxu0 %vm127_vm3, %v1647_v31 }
  0xa9   :  { %327 = vmatpush.bf16.msra.mxu0 %v133_v29  ;;  %254 = vmatpush.bf16.msrb.mxu1 %v1454_v33 }
  0xaa   :  { %414 = vmatpush.bf16.msra.mxu3 %v1459_v58 }
  0xad   :  { %433 = vmatpush.bf16.msrb.mxu0 %v133_v29  ;;  %255 = vmatpush.bf16.msrb.mxu1 %v1453_v34 }
  0xb1   :  { %360 = vmatpush.bf16.msra.mxu1 %v1458_v49 }
  0xb5   :  { %361 = vmatpush.bf16.msra.mxu1 %v1457_v51 }
  0xb8   :  { %1240 = vmatmul.msk.bf16.vlgmr.msra.gmra.mxu0 %vm127_vm3, %v1656_v32 }
  0xb9   :  { %539 = vmatpush.bf16.msra.mxu0 %v133_v29 }
  0xc8   :  { %1270 = vmatmul.msk.bf16.vlgmr.msrb.gmra.mxu0 %vm127_vm3, %v1671_v40 }
  0xd8   :  { %1300 = vmatmul.msk.bf16.vlgmr.msra.gmra.mxu0 %vm127_vm3, %v1685_v45 }
 0x125   :  { %v144_v35 = vpop.f32.mrf.mxu1  ;;  %v223_v36 = vpop.f32.mrf.mxu0 }
 0x126   :  { %v148_v37 = vpack.c.bf16 %v144_v35, %v144_v35  ;;  %v227_v38 = vpack.c.bf16 %v223_v36, %v223_v36  ;;  %v590_v35 = vmax.f32 %v589_v19, 0.0 }
 0x127   :  { %v205_v39 = vpop.f32.mrf.mxu3 }
 0x128   :  { %1199 = vmatmul.msk.bf16.vlgmr.msra.gmra.mxu2 %vm165_vm2, %v148_v37  ;;  %1223 = vmatmul.msk.bf16.vlgmr.msrb.gmra.mxu1 %vm165_vm2, %v227_v38  ;;  %v1467_v37 = vld [vmem:[%s1910_s14] sm:$0xff]  ;;  %v591_v38 = vpack.c.bf16 %v590_v35, %v590_v35  ;;  %v1476_v35 = vld [vmem:[%s1900_s13 + $0x30] sm:$0xff] }
 0x129   :  { %380 = vmatpush.bf16.msra.mxu2 %v133_v29  ;;  %466 = vmatpush.bf16.msrb.mxu1 %v1462_v55 }
 0x12d   :  { %v146_v41 = vpop.f32.mrf.mxu1  ;;  %v225_v42 = vpop.f32.mrf.mxu0  ;;  %467 = vmatpush.bf16.msrb.mxu1 %v1461_v59 }
 0x12e   :  { %v604_v42 = vld [vmem:[%s1910_s14 + $0x8] sm:$0xf] }
 0x12f   :  { %v207_v43 = vpop.f32.mrf.mxu3 }
 0x130   :  { %v609_v43 = vsel %vm131_vm1, %v604_v42, 0  ;;  %v1478_v42 = vld [vmem:[%s1900_s13 + $0x50] sm:$0xff] }
 0x135   :  { %v329_v52 = vpop.f32.mrf.mxu0 }
 0x136   :  { %v333_v53 = vpack.c.bf16 %v329_v52, %v329_v52  ;;  %v595_v52 = vpop.permute.xlu0 %594 }
 0x138   :  { %1225 = vmatmul.msk.bf16.vlgmr.msrb.gmra.mxu2 %vm127_vm3, %v1678_v44  ;;  %1253 = vmatmul.msk.bf16.vlgmr.msra.gmra.mxu1 %vm165_vm2, %v333_v53 }
 0x139   :  { %486 = vmatpush.bf16.msrb.mxu2 %v133_v29  ;;  %572 = vmatpush.bf16.msra.mxu1 %v1466_v3  ;;  %v1471_v3 = vld [vmem:[%s1900_s13 + $0x8] sm:$0xff] }
 0x13d   :  { %v331_v56 = vpop.f32.mrf.mxu0  ;;  %573 = vmatpush.bf16.msra.mxu1 %v1465_v5  ;;  %v1470_v5 = vld [vmem:[%s1900_s13] sm:$0xff] }
 0x13e   :  { %v599_v58 = vpop.permute.xlu0 %598 }
 0x145   :  { %v435_v62 = vpop.f32.mrf.mxu0 }
 0x146   :  { %v439_v63 = vpack.c.bf16 %v435_v62, %v435_v62 }
 0x148   :  { %1255 = vmatmul.msk.bf16.vlgmr.msra.gmra.mxu2 %vm127_vm3, %v1692_v46  ;;  %1283 = vmatmul.msk.bf16.vlgmr.msrb.gmra.mxu1 %vm165_vm2, %v439_v63 }
 0x149   :  { %618 = vmatpush.bf16.msra.mxu2 %v609_v43  ;;  %705 = vmatpush.bf16.msrb.mxu1 %v1471_v3  ;;  %v1480_v43 = vld [vmem:[%s1900_s13 + $0x60] sm:$0xff] }
 0x14d   :  { %v437_v4 = vpop.f32.mrf.mxu0  ;;  %706 = vmatpush.bf16.msrb.mxu1 %v1470_v5 }
 0x14e   :  { %v1468_v4 = vld [vmem:[%s1900_s13 + $0x40] sm:$0xff] }
 0x155   :  { %v541_v9 = vpop.f32.mrf.mxu0 }
 0x156   :  { %v545_v10 = vpack.c.bf16 %v541_v9, %v541_v9  ;;  %v1507_v9 = vld [vmem:[%s1899_s12] ss:$0 sm:$0xff] }
 0x158   :  { %1285 = vmatmul.msk.bf16.vlgmr.msrb.gmra.mxu2 %vm127_vm3, %v1699_v47  ;;  %1313 = vmatmul.msk.bf16.vlgmr.msra.gmra.mxu1 %vm165_vm2, %v545_v10 }
 0x15d   :  { %v543_v16 = vpop.f32.mrf.mxu0 }
 0x1a5   :  { %v257_v57 = vpop.f32.mrf.mxu1 }
 0x1ab   :  { %v178_v60 = vpop.f32.mrf.mxu2 }
 0x1ac   :  { %v206_v61 = vadd.f32 %v205_v39, %v178_v60 }
 0x1ad   :  { %v259_v0 = vpop.f32.mrf.mxu1 }
 0x1ae   :  { %v261_v1 = vadd.f32 %v257_v57, %v206_v61 }
 0x1b3   :  { %v180_v2 = vpop.f32.mrf.mxu2 }
 0x1b4   :  { %v1469_v2 = vld [vmem:[%s1900_s13 + $0x48] sm:$0xff] }
 0x1b5   :  { %v363_v27 = vpop.f32.mrf.mxu1  ;;  %732 = vmatpush.bf16.msrb.mxu2 %v1469_v2 }
 0x1b9   :  { %733 = vmatpush.bf16.msrb.mxu2 %v1468_v4  ;;  %v1486_v4 = vld [vmem:[%s1901_s16] sm:$0xff] }
 0x1bb   :  { %v276_v6 = vpop.f32.mrf.mxu2 }
 0x1bc   :  { %v280_v8 = vpack.c.bf16 %v276_v6, %v276_v6  ;;  %v1506_v6 = vld [vmem:[%s1898_s11] ss:$0 sm:$0xff] }
 0x1bd   :  { %v365_v28 = vpop.f32.mrf.mxu1 }
 0x1be   :  { %1238 = vmatmul.msk.bf16.vlgmr.msrb.gmra.mxu3 %vm165_vm2, %v280_v8 }
 0x1bf   :  { %519 = vmatpush.bf16.msrb.mxu3 %v1464_v7 }
 0x1c3   :  { %v278_v13 = vpop.f32.mrf.mxu2  ;;  %520 = vmatpush.bf16.msrb.mxu3 %v1463_v12 }
 0x1c5   :  { %v469_v29 = vpop.f32.mrf.mxu1 }
 0x1cb   :  { %v382_v21 = vpop.f32.mrf.mxu2 }
 0x1cc   :  { %v386_v22 = vpack.c.bf16 %v382_v21, %v382_v21 }
 0x1cd   :  { %v471_v33 = vpop.f32.mrf.mxu1 }
 0x1ce   :  { %1268 = vmatmul.msk.bf16.vlgmr.msra.gmra.mxu3 %vm165_vm2, %v386_v22 }
 0x1cf   :  { %640 = vmatpush.bf16.msra.mxu3 %v1467_v37 }
 0x1d3   :  { %v384_v23 = vpop.f32.mrf.mxu2 }
 0x1d5   :  { %v575_v34 = vpop.f32.mrf.mxu1 }
 0x1db   :  { %v488_v24 = vpop.f32.mrf.mxu2 }
 0x1dc   :  { %v492_v25 = vpack.c.bf16 %v488_v24, %v488_v24  ;;  %v1099_v24 = vld [vmem:[%s1901_s16 + $0x8] sm:$0xf] }
 0x1dd   :  { %v577_v39 = vpop.f32.mrf.mxu1 }
 0x1de   :  { %1298 = vmatmul.msk.bf16.vlgmr.msrb.gmra.mxu3 %vm165_vm2, %v492_v25  ;;  %v1104_v25 = vsel %vm131_vm1, %v1099_v24, 0 }
 0x1e3   :  { %v490_v26 = vpop.f32.mrf.mxu2 }
 0x1e4   :  { %v1090_v26 = vpop.permute.xlu2 %1089 }
 0x1ec   :  { %v1094_v28 = vpop.permute.xlu2 %1093 }
 0x1ee   :  { %1319 = vmatmul.msk.bf16.vlgmr.msra.gmra.mxu3 %vm92_vm0, %v591_v38  ;;  %v1479_v38 = vld [vmem:[%s1900_s13 + $0x58] sm:$0xff] }
 0x241   :  { %v310_v36 = vpop.f32.mrf.mxu3 }
 0x242   :  { %v314_v49 = vadd.f32 %v310_v36, %v261_v1 }
 0x244   :  { %v367_v51 = vadd.f32 %v363_v27, %v314_v49 }
 0x249   :  { %v312_v41 = vpop.f32.mrf.mxu3 }
 0x24a   :  { %v1481_v41 = vld [vmem:[%s1900_s13 + $0x68] sm:$0xff] }
 0x251   :  { %v416_v48 = vpop.f32.mrf.mxu3 }
 0x252   :  { %v420_v53 = vadd.f32 %v416_v48, %v367_v51 }
 0x254   :  { %v473_v54 = vadd.f32 %v469_v29, %v420_v53 }
 0x259   :  { %v418_v50 = vpop.f32.mrf.mxu3 }
 0x261   :  { %v522_v55 = vpop.f32.mrf.mxu3 }
 0x262   :  { %v526_v56 = vadd.f32 %v522_v55, %v473_v54 }
 0x264   :  { %v1772_v57 = vadd.f32 %v575_v34, %v526_v56  ;;  %v1474_v34 = vld [vmem:[%s1900_s13 + $0x20] sm:$0xff]  ;;  %v1485_v56 = vld [vmem:[%s1900_s13 + $0x88] sm:$0xff] }
 0x266   :  { %v597_v59 = vmul.f32 %v595_v52, %v1772_v57  ;;  %v1092_v27 = vmul.f32 %v1090_v26, %v1772_v57 }
 0x268   :  { %v601_v60 = vadd.f32 %v599_v58, %v597_v59  ;;  %v1096_v29 = vadd.f32 %v1094_v28, %v1092_v27  ;;  %v1484_v58 = vld [vmem:[%s1900_s13 + $0x80] sm:$0xff] }
 0x269   :  { %v524_v61 = vpop.f32.mrf.mxu3 }
 0x26a   :  { %v602_v62 = vmax.f32 %v601_v60, 0.0  ;;  %v1483_v60 = vld [vmem:[%s1900_s13 + $0x78] sm:$0xff] }
 0x26c   :  { %v603_v63 = vpack.c.bf16 %v602_v62, %v602_v62 }
 0x26e   :  { %1314 = vmatmul.msk.bf16.vlgmr.msra.gmra.mxu2 %vm127_vm3, %v603_v63 }
 0x271   :  { %v642_v0 = vpop.f32.mrf.mxu3 }
 0x279   :  { %v644_v1 = vpop.f32.mrf.mxu3 }
 0x2f1   :  { %v620_v7 = vpop.f32.mrf.mxu2 }
 0x2f2   :  { %v643_v8 = vadd.f32 %v642_v0, %v620_v7  ;;  %v1482_v0 = vld [vmem:[%s1900_s13 + $0x70] sm:$0xff] }
 0x2f4   :  { %v650_v10 = vmul.f32 %v1506_v6, %v643_v8 }
 0x2f6   :  { %v655_v12 = vadd.f32 %v1507_v9, %v650_v10  ;;  %v1079_v9 = vmul.f32 %v1749_v15, %v1612_v11  ;;  %v1151_v11 = vld [vmem:[%s1901_s16 + $0xc] sm:$0xf] }
 0x2f7   :  { %v1156_v15 = vsel %vm131_vm1, %v1151_v11, 0 }
 0x2f8   :  { %v656_v13 = vmax.f32 %v655_v12, 0.0  ;;  %v1084_v10 = vadd.f32 %v1759_v20, %v1079_v9 }
 0x2f9   :  { %v622_v14 = vpop.f32.mrf.mxu2 }
 0x2fa   :  { %v657_v16 = vpack.c.bf16 %v656_v13, %v656_v13  ;;  %v1085_v13 = vmax.f32 %v1084_v10, 0.0 }
 0x2fc   :  { %v664_v17 = vsel %vm131_vm1, %v657_v16, 0  ;;  %1342 = vmatmul.msk.bf16.vlgmr.msrb.gmra.mxu2 %vm165_vm2, %v657_v16  ;;  %v1086_v14 = vpack.c.bf16 %v1085_v13, %v1085_v13 }
 0x2fd   :  { %673 = vmatpush.bf16.msrb.mxu0 %v664_v17  ;;  %746 = vmatpush.bf16.msrb.mxu3 %v664_v17 }
 0x2fe   :  { %794 = vmatpush.bf16.msra.mxu1 %v664_v17 }
 0x300   :  { %1324 = vmatmul.msk.bf16.vlgmr.msrb.gmra.mxu0 %vm127_vm3, %v1642_v30  ;;  %1343 = vmatmul.msk.bf16.vlgmr.msrb.gmra.mxu3 %vm127_vm3, %v1647_v31  ;;  %v1472_v30 = vld [vmem:[%s1900_s13 + $0x10] sm:$0xff] }
 0x301   :  { %842 = vmatpush.bf16.msra.mxu3 %v664_v17  ;;  %779 = vmatpush.bf16.msra.mxu0 %v1473_v18 }
 0x305   :  { %938 = vmatpush.bf16.msrb.mxu3 %v664_v17  ;;  %780 = vmatpush.bf16.msra.mxu0 %v1472_v30 }
 0x310   :  { %1371 = vmatmul.msk.bf16.vlgmr.msra.gmra.mxu3 %vm127_vm3, %v1656_v32 }
 0x311   :  { %1034 = vmatpush.bf16.msra.mxu3 %v664_v17 }
 0x320   :  { %1399 = vmatmul.msk.bf16.vlgmr.msrb.gmra.mxu3 %vm127_vm3, %v1671_v40 }
 0x321   :  { %1165 = vmatpush.bf16.msrb.mxu3 %v1156_v15 }
 0x330   :  { %1427 = vmatmul.msk.bf16.vlgmr.msra.gmra.mxu3 %vm127_vm3, %v1685_v45 }
 0x37d   :  { %v675_v31 = vpop.f32.mrf.mxu0 }
 0x37e   :  { %v679_v19 = vpack.c.bf16 %v675_v31, %v675_v31 }
 0x37f   :  { %v735_v32 = vpop.f32.mrf.mxu2 }
 0x380   :  { %1333 = vmatmul.msk.bf16.vlgmr.msrb.gmra.mxu1 %vm165_vm2, %v679_v19 }
 0x381   :  { %890 = vmatpush.bf16.msrb.mxu1 %v664_v17 }
 0x383   :  { %v748_v40 = vpop.f32.mrf.mxu3 }
 0x384   :  { %v752_v21 = vpack.c.bf16 %v748_v40, %v748_v40 }
 0x385   :  { %v677_v22 = vpop.f32.mrf.mxu0 }
 0x386   :  { %1356 = vmatmul.msk.bf16.vlgmr.msra.gmra.mxu0 %vm165_vm2, %v752_v21 }
 0x387   :  { %v737_v45 = vpop.f32.mrf.mxu2 }
 0x38b   :  { %v750_v23 = vpop.f32.mrf.mxu3 }
 0x390   :  { %1357 = vmatmul.msk.bf16.vlgmr.msra.gmra.mxu1 %vm127_vm3, %v1678_v44  ;;  %v1097_v44 = vmax.f32 %v1096_v29, 0.0 }
 0x391   :  { %986 = vmatpush.bf16.msra.mxu1 %v664_v17 }
 0x392   :  { %v1098_v33 = vpack.c.bf16 %v1097_v44, %v1097_v44 }
 0x393   :  { %v844_v36 = vpop.f32.mrf.mxu3 }
 0x394   :  { %v848_v37 = vpack.c.bf16 %v844_v36, %v844_v36 }
 0x39b   :  { %v846_v39 = vpop.f32.mrf.mxu3 }
 0x3a0   :  { %1385 = vmatmul.msk.bf16.vlgmr.msrb.gmra.mxu1 %vm127_vm3, %v1692_v46  ;;  %v1475_v46 = vld [vmem:[%s1900_s13 + $0x28] sm:$0xff] }
 0x3a1   :  { %1113 = vmatpush.bf16.msrb.mxu1 %v1104_v25  ;;  %827 = vmatpush.bf16.msra.mxu2 %v1475_v46  ;;  %v1142_v25 = vpop.permute.xlu1 %1141 }
 0x3a3   :  { %v940_v49 = vpop.f32.mrf.mxu3 }
 0x3a4   :  { %v944_v50 = vpack.c.bf16 %v940_v49, %v940_v49 }
 0x3a5   :  { %828 = vmatpush.bf16.msra.mxu2 %v1474_v34 }
 0x3a9   :  { %923 = vmatpush.bf16.msrb.mxu2 %v1479_v38 }
 0x3ab   :  { %v942_v55 = vpop.f32.mrf.mxu3 }
 0x3ad   :  { %924 = vmatpush.bf16.msrb.mxu2 %v1478_v42 }
 0x3b0   :  { %1413 = vmatmul.msk.bf16.vlgmr.msra.gmra.mxu1 %vm127_vm3, %v1699_v47  ;;  %v1477_v47 = vld [vmem:[%s1900_s13 + $0x38] sm:$0xff] }
 0x3b1   :  { %875 = vmatpush.bf16.msrb.mxu0 %v1477_v47 }
 0x3b3   :  { %v1036_v62 = vpop.f32.mrf.mxu3 }
 0x3b4   :  { %v1040_v63 = vpack.c.bf16 %v1036_v62, %v1036_v62 }
 0x3b5   :  { %876 = vmatpush.bf16.msrb.mxu0 %v1476_v35 }
 0x3b8   :  { %1384 = vmatmul.msk.bf16.vlgmr.msrb.gmra.mxu0 %vm165_vm2, %v848_v37 }
 0x3b9   :  { %971 = vmatpush.bf16.msra.mxu0 %v1481_v41 }
 0x3bb   :  { %v1038_v2 = vpop.f32.mrf.mxu3 }
 0x3bd   :  { %972 = vmatpush.bf16.msra.mxu0 %v1480_v43 }
 0x3c0   :  { %1441 = vmatmul.msk.bf16.vlgmr.msrb.gmra.mxu1 %vm127_vm3, %v1098_v33  ;;  %v1146_v33 = vpop.permute.xlu1 %1145 }
 0x3c1   :  { %1067 = vmatpush.bf16.msrb.mxu0 %v1485_v56 }
 0x3c5   :  { %1068 = vmatpush.bf16.msrb.mxu0 %v1484_v58 }
 0x3c8   :  { %1412 = vmatmul.msk.bf16.vlgmr.msra.gmra.mxu0 %vm165_vm2, %v944_v50 }
 0x3d8   :  { %1440 = vmatmul.msk.bf16.vlgmr.msrb.gmra.mxu0 %vm165_vm2, %v1040_v63 }
 0x3fd   :  { %v708_v48 = vpop.f32.mrf.mxu1 }
 0x3fe   :  { %v736_v51 = vadd.f32 %v735_v32, %v708_v48 }
 0x403   :  { %v782_v52 = vpop.f32.mrf.mxu0 }
 0x404   :  { %v786_v53 = vadd.f32 %v782_v52, %v736_v51 }
 0x405   :  { %v710_v54 = vpop.f32.mrf.mxu1 }
 0x40b   :  { %v784_v57 = vpop.f32.mrf.mxu0 }
 0x40d   :  { %v796_v59 = vpop.f32.mrf.mxu1 }
 0x40e   :  { %v800_v61 = vpack.c.bf16 %v796_v59, %v796_v59 }
 0x410   :  { %1370 = vmatmul.msk.bf16.vlgmr.msra.gmra.mxu2 %vm165_vm2, %v800_v61 }
 0x411   :  { %1019 = vmatpush.bf16.msra.mxu2 %v1483_v60 }
 0x415   :  { %v798_v1 = vpop.f32.mrf.mxu1  ;;  %1020 = vmatpush.bf16.msra.mxu2 %v1482_v0 }
 0x41d   :  { %v892_v3 = vpop.f32.mrf.mxu1 }
 0x41e   :  { %v896_v5 = vpack.c.bf16 %v892_v3, %v892_v3 }
 0x420   :  { %1398 = vmatmul.msk.bf16.vlgmr.msrb.gmra.mxu2 %vm165_vm2, %v896_v5 }
 0x421   :  { %1135 = vmatpush.bf16.msrb.mxu2 %v1486_v4 }
 0x425   :  { %v894_v6 = vpop.f32.mrf.mxu1 }
 0x42d   :  { %v988_v7 = vpop.f32.mrf.mxu1 }
 0x42e   :  { %v992_v8 = vpack.c.bf16 %v988_v7, %v988_v7 }
 0x430   :  { %1426 = vmatmul.msk.bf16.vlgmr.msra.gmra.mxu2 %vm165_vm2, %v992_v8 }
 0x435   :  { %v990_v12 = vpop.f32.mrf.mxu1  ;;  %v878_v18 = vpop.f32.mrf.mxu0 }
 0x43d   :  { %v1115_v16 = vpop.f32.mrf.mxu1  ;;  %v880_v30 = vpop.f32.mrf.mxu0 }
 0x440   :  { %1446 = vmatmul.msk.bf16.vlgmr.msrb.gmra.mxu2 %vm92_vm0, %v1086_v14 }
 0x445   :  { %v1117_v17 = vpop.f32.mrf.mxu1  ;;  %v974_v31 = vpop.f32.mrf.mxu0 }
 0x44d   :  { %v976_v19 = vpop.f32.mrf.mxu0 }
 0x455   :  { %v1070_v32 = vpop.f32.mrf.mxu0 }
 0x45d   :  { %v1072_v21 = vpop.f32.mrf.mxu0 }
 0x493   :  { %v830_v40 = vpop.f32.mrf.mxu2 }
 0x494   :  { %v834_v45 = vadd.f32 %v830_v40, %v786_v53 }
 0x496   :  { %v882_v24 = vadd.f32 %v878_v18, %v834_v45 }
 0x49b   :  { %v832_v22 = vpop.f32.mrf.mxu2 }
 0x4a3   :  { %v926_v20 = vpop.f32.mrf.mxu2 }
 0x4a4   :  { %v930_v26 = vadd.f32 %v926_v20, %v882_v24 }
 0x4a6   :  { %v978_v27 = vadd.f32 %v974_v31, %v930_v26 }
 0x4ab   :  { %v928_v23 = vpop.f32.mrf.mxu2 }
 0x4b3   :  { %v1022_v28 = vpop.f32.mrf.mxu2 }
 0x4b4   :  { %v1026_v29 = vadd.f32 %v1022_v28, %v978_v27 }
 0x4b6   :  { %v1074_v44 = vadd.f32 %v1070_v32, %v1026_v29 }
 0x4b8   :  { %v1144_v46 = vmul.f32 %v1142_v25, %v1074_v44 }
 0x4ba   :  { %v1148_v47 = vadd.f32 %v1146_v33, %v1144_v46 }
 0x4bb   :  { %v1024_v34 = vpop.f32.mrf.mxu2 }
 0x4bc   :  { %v1149_v35 = vmax.f32 %v1148_v47, 0.0 }
 0x4be   :  { %v1150_v36 = vpack.c.bf16 %v1149_v35, %v1149_v35 }
 0x4c0   :  { %1447 = vmatmul.msk.bf16.vlgmr.msrb.gmra.mxu3 %vm127_vm3, %v1150_v36 }
 0x4c3   :  { %v1137_v37 = vpop.f32.mrf.mxu2 }
 0x4c4   :  { %v1138_v39 = vadd.f32 %v1137_v37, %v1115_v16 }
 0x4cb   :  { %v1139_v38 = vpop.f32.mrf.mxu2 }
 0x543   :  { %v1167_v41 = vpop.f32.mrf.mxu3 }
 0x544   :  { %v1171_v42 = vadd.f32 %v1167_v41, %v1138_v39 }
 0x546   :  { %v1172_v43 = vpack.c.bf16 %v1171_v42, %v1171_v42 }
 0x548   :  { %1173 = vst [vmem:[%s1902_s17] sm:$0xf] %v1172_v43 }
 0x54b   :  { %v1169_v48 = vpop.f32.mrf.mxu3 }

// kernel: forward.6
= control target key start
LH: loop header
LB: loop body
LE: loop exit
PB: predicated region body
PF: predicated region fallthrough
CT: control target
= control target key end

     0   :  { %vm553_vm0 = vcmask 130048   ;;  %vm833_vm1 = vcmask 261120   ;;  %vm2742_vm2 = vcmask 1043456   ;;  %vm2717_vm3 = vcmask 64512   ;;  %s6294_s27 = smov 104   ;;  %s8426_s4 = inlined_call_operand.vmem [shape: bf16[16,32], index: 4, kind: input, shape index: {}]   ;;  %s8427_s0 = inlined_call_operand.vmem [shape: bf16[9,128,128], index: 0, kind: input, shape index: {}]   ;;  %s8428_s2 = inlined_call_operand.vmem [shape: f32[1,16], index: 2, kind: input, shape index: {}]   ;;  %s8429_s3 = inlined_call_operand.vmem [shape: f32[1,16], index: 3, kind: input, shape index: {}]   ;;  %s8430_s8 = inlined_call_operand.vmem [shape: f32[1,24], index: 8, kind: input, shape index: {}]   ;;  %s8431_s9 = inlined_call_operand.vmem [shape: f32[1,24], index: 9, kind: input, shape index: {}]   ;;  %s8432_s14 = inlined_call_operand.vmem [shape: f32[1,32], index: 14, kind: input, shape index: {}]   ;;  %s8433_s15 = inlined_call_operand.vmem [shape: f32[1,32], index: 15, kind: input, shape index: {}]   ;;  %s8434_s5 = inlined_call_operand.vmem [shape: f32[1,32], index: 5, kind: input, shape index: {}]   ;;  %s8435_s6 = inlined_call_operand.vmem [shape: f32[1,32], index: 6, kind: input, shape index: {}]   ;;  %s8436_s7 = inlined_call_operand.vmem [shape: bf16[9,32,8], index: 7, kind: input, shape index: {}]   ;;  %s8437_s1 = inlined_call_operand.vmem [shape: bf16[8,128,128], index: 1, kind: input, shape index: {}]   ;;  %s8438_s10 = inlined_call_operand.vmem [shape: bf16[24,32], index: 10, kind: input, shape index: {}]   ;;  %s8439_s11 = inlined_call_operand.vmem [shape: f32[1,32], index: 11, kind: input, shape index: {}]   ;;  %s8440_s12 = inlined_call_operand.vmem [shape: f32[1,32], index: 12, kind: input, shape index: {}]   ;;  %s8441_s13 = inlined_call_operand.vmem [shape: bf16[9,32,8], index: 13, kind: input, shape index: {}]   ;;  %s8442_s16 = inlined_call_operand.vmem [shape: bf16[32,128], index: 16, kind: input, shape index: {}]   ;;  %s8443_s17 = inlined_call_operand.vmem [shape: bf16[128,128], index: 17, kind: output, shape index: {}]  }
   0x1   :  { %8458 = sst [smem:[#allocation8_spill]] %s8426_s4 }
   0x2   :  { %8459 = sst [smem:[#allocation9_spill]] %s8427_s0 }
   0x3   :  { %8460 = sst [smem:[#allocation10_spill]] %s8438_s10 }
   0x4   :  { %s8461_s26 = sld [smem:[#allocation8_spill]] }
   0x5   :  { %s8462_s10 = sld [smem:[#allocation9_spill]] }
   0xa   :  { %v5698_v0 = vld [vmem:[%s8461_s26] sm:$0xff] }
   0xb   :  { %v5802_v1 = vld [vmem:[%s8462_s10] sm:$0xff]   ;;  %585 = vmatpush.bf16.msra.mxu0 %v5698_v0  ;;  %v6129_v28 = vld [vmem:[%s8462_s10 + $0x8] sm:$0xff]  }
   0xc   :  { %v6136_v2 = vld [vmem:[%s8462_s10 + $0x40] sm:$0xff]   ;;  %v5803_v3 = vunpack.c.l.bf16 %v5802_v1  ;;  %v5804_v4 = vunpack.c.h.bf16 %v5802_v1  ;;  %v6137_v29 = vld [vmem:[%s8462_s10 + $0x48] sm:$0xff]   ;;  %v5807_v31 = vunpack.c.l.bf16 %v6129_v28  ;;  %v5808_v32 = vunpack.c.h.bf16 %v6129_v28 }
   0xd   :  { %v5835_v5 = vunpack.c.l.bf16 %v6136_v2  ;;  %v5836_v6 = vunpack.c.h.bf16 %v6136_v2  ;;  %v6144_v7 = vld [vmem:[%s8462_s10 + $0x80] sm:$0xff]   ;;  %v5839_v33 = vunpack.c.l.bf16 %v6137_v29  ;;  %v5840_v34 = vunpack.c.h.bf16 %v6137_v29  ;;  %v6145_v35 = vld [vmem:[%s8462_s10 + $0x88] sm:$0xff]  }
   0xe   :  { %v6152_v8 = vld [vmem:[%s8462_s10 + $0xc0] sm:$0xff]   ;;  %v5867_v9 = vunpack.c.l.bf16 %v6144_v7  ;;  %v5868_v10 = vunpack.c.h.bf16 %v6144_v7  ;;  %v6153_v36 = vld [vmem:[%s8462_s10 + $0xc8] sm:$0xff]   ;;  %v5871_v39 = vunpack.c.l.bf16 %v6145_v35  ;;  %v5872_v40 = vunpack.c.h.bf16 %v6145_v35 }
   0xf   :  { %v6160_v11 = vld [vmem:[%s8462_s10 + $0x100] sm:$0xff]   ;;  %v122_v12 = vmax.f32 %v5803_v3, %v5835_v5  ;;  %v123_v13 = vmax.f32 %v5804_v4, %v5836_v6  ;;  %v5899_v14 = vunpack.c.l.bf16 %v6152_v8  ;;  %v5900_v15 = vunpack.c.h.bf16 %v6152_v8  ;;  %v6161_v41 = vld [vmem:[%s8462_s10 + $0x108] sm:$0xff]   ;;  %v6130_v5 = vld [vmem:[%s8462_s10 + $0x10] sm:$0xff]  }
  0x10   :  { %v6168_v16 = vld [vmem:[%s8462_s10 + $0x140] sm:$0xff]   ;;  %v5931_v20 = vunpack.c.l.bf16 %v6160_v11  ;;  %v5932_v21 = vunpack.c.h.bf16 %v6160_v11  ;;  %v124_v43 = vmax.f32 %v5807_v31, %v5839_v33  ;;  %v125_v44 = vmax.f32 %v5808_v32, %v5840_v34  ;;  %v6169_v51 = vld [vmem:[%s8462_s10 + $0x148] sm:$0xff]   ;;  %v6154_v34 = vld [vmem:[%s8462_s10 + $0xd0] sm:$0xff]  }
  0x11   :  { %v6176_v17 = vld [vmem:[%s8462_s10 + $0x180] sm:$0xff]   ;;  %v171_v18 = vmax.f32 %v122_v12, %v5867_v9  ;;  %v172_v19 = vmax.f32 %v123_v13, %v5868_v10  ;;  %v5963_v22 = vunpack.c.l.bf16 %v6168_v16  ;;  %v5964_v23 = vunpack.c.h.bf16 %v6168_v16  ;;  %v6177_v60 = vld [vmem:[%s8462_s10 + $0x188] sm:$0xff]   ;;  %v6138_v10 = vld [vmem:[%s8462_s10 + $0x50] sm:$0xff]  }
  0x12   :  { %v5995_v26 = vunpack.c.l.bf16 %v6176_v17  ;;  %v5996_v27 = vunpack.c.h.bf16 %v6176_v17  ;;  %v6184_v30 = vld [vmem:[%s8462_s10 + $0x1c0] sm:$0xff]   ;;  %v5903_v45 = vunpack.c.l.bf16 %v6153_v36  ;;  %v5904_v46 = vunpack.c.h.bf16 %v6153_v36  ;;  %v6185_v1 = vld [vmem:[%s8462_s10 + $0x1c8] sm:$0xff]  }
  0x13   :  { %v220_v24 = vmax.f32 %v171_v18, %v5899_v14  ;;  %v221_v25 = vmax.f32 %v172_v19, %v5900_v15  ;;  %v6192_v42 = vld [vmem:[%s8462_s10 + $0x200] sm:$0xff]   ;;  %v6027_v49 = vunpack.c.l.bf16 %v6184_v30  ;;  %v6028_v50 = vunpack.c.h.bf16 %v6184_v30  ;;  %v6193_v16 = vld [vmem:[%s8462_s10 + $0x208] sm:$0xff]  }
  0x14   :  { %v173_v52 = vmax.f32 %v124_v43, %v5871_v39  ;;  %v174_v53 = vmax.f32 %v125_v44, %v5872_v40  ;;  %v5935_v54 = vunpack.c.l.bf16 %v6161_v41  ;;  %v5936_v55 = vunpack.c.h.bf16 %v6161_v41  ;;  %v6442_v4 = vld [vmem:[%s8428_s2] ss:$0 sm:$0xff]  ;;  %s8469_s2 = sld [smem:[#allocation10_spill]] }
  0x15   :  { %v269_v37 = vmax.f32 %v220_v24, %v5931_v20  ;;  %v270_v38 = vmax.f32 %v221_v25, %v5932_v21  ;;  %v6059_v58 = vunpack.c.l.bf16 %v6192_v42  ;;  %v6060_v59 = vunpack.c.h.bf16 %v6192_v42  ;;  %v6457_v13 = vld [vmem:[%s8429_s3] ss:$0 sm:$0xff]  ;;  %v6146_v21 = vld [vmem:[%s8462_s10 + $0x90] sm:$0xff]  }
  0x16   :  { %v222_v61 = vmax.f32 %v173_v52, %v5903_v45  ;;  %v223_v62 = vmax.f32 %v174_v53, %v5904_v46  ;;  %v5967_v63 = vunpack.c.l.bf16 %v6169_v51  ;;  %v5968_v0 = vunpack.c.h.bf16 %v6169_v51  ;;  %v6170_v46 = vld [vmem:[%s8462_s10 + $0x150] sm:$0xff]  }
  0x17   :  { %v318_v47 = vmax.f32 %v269_v37, %v5963_v22  ;;  %v319_v48 = vmax.f32 %v270_v38, %v5964_v23  ;;  %v5999_v8 = vunpack.c.l.bf16 %v6177_v60  ;;  %v6000_v9 = vunpack.c.h.bf16 %v6177_v60  ;;  %v6162_v37 = vld [vmem:[%s8462_s10 + $0x110] sm:$0xff]  }
  0x18   :  { %v271_v6 = vmax.f32 %v222_v61, %v5935_v54  ;;  %v272_v7 = vmax.f32 %v223_v62, %v5936_v55  ;;  %v6031_v14 = vunpack.c.l.bf16 %v6185_v1  ;;  %v6032_v15 = vunpack.c.h.bf16 %v6185_v1  ;;  %v6178_v51 = vld [vmem:[%s8462_s10 + $0x190] sm:$0xff]   ;;  %v6131_v61 = vld [vmem:[%s8462_s10 + $0x18] sm:$0xff]  }
  0x19   :  { %v367_v56 = vmax.f32 %v318_v47, %v5995_v26  ;;  %v368_v57 = vmax.f32 %v319_v48, %v5996_v27  ;;  %v5811_v19 = vunpack.c.l.bf16 %v6130_v5  ;;  %v5812_v20 = vunpack.c.h.bf16 %v6130_v5  ;;  %v6194_v60 = vld [vmem:[%s8462_s10 + $0x210] sm:$0xff]  }
  0x1a   :  { %v320_v17 = vmax.f32 %v271_v6, %v5967_v63  ;;  %v321_v18 = vmax.f32 %v272_v7, %v5968_v0  ;;  %v5843_v24 = vunpack.c.l.bf16 %v6138_v10  ;;  %v5844_v25 = vunpack.c.h.bf16 %v6138_v10  ;;  %v6139_v0 = vld [vmem:[%s8462_s10 + $0x58] sm:$0xff]  }
  0x1b   :  { %v416_v2 = vmax.f32 %v367_v56, %v6027_v49  ;;  %v417_v3 = vmax.f32 %v368_v57, %v6028_v50  ;;  %v6063_v28 = vunpack.c.l.bf16 %v6193_v16  ;;  %v6064_v29 = vunpack.c.h.bf16 %v6193_v16  ;;  %v6147_v6 = vld [vmem:[%s8462_s10 + $0x98] sm:$0xff]  }
  0x1c   :  { %v369_v26 = vmax.f32 %v320_v17, %v5999_v8  ;;  %v370_v27 = vmax.f32 %v321_v18, %v6000_v9  ;;  %v5875_v32 = vunpack.c.l.bf16 %v6146_v21  ;;  %v5876_v33 = vunpack.c.h.bf16 %v6146_v21 }
  0x1d   :  { %v6450_v11 = vmax.f32 %v416_v2, %v6059_v58  ;;  %v6452_v12 = vmax.f32 %v417_v3, %v6060_v59  ;;  %v126_v40 = vmax.f32 %v5811_v19, %v5843_v24  ;;  %v127_v41 = vmax.f32 %v5812_v20, %v5844_v25  ;;  %v6186_v59 = vld [vmem:[%s8462_s10 + $0x1d0] sm:$0xff]  }
  0x1e   :  { %v418_v35 = vmax.f32 %v369_v26, %v6031_v14  ;;  %v419_v36 = vmax.f32 %v370_v27, %v6032_v15  ;;  %v5907_v44 = vunpack.c.l.bf16 %v6154_v34  ;;  %v5908_v45 = vunpack.c.h.bf16 %v6154_v34  ;;  %v6155_v14 = vld [vmem:[%s8462_s10 + $0xd8] sm:$0xff]  }
  0x1f   :  { %v485_v22 = vmul.f32 %v6442_v4, %v6450_v11  ;;  %v486_v23 = vmul.f32 %v6442_v4, %v6452_v12  ;;  %v175_v48 = vmax.f32 %v126_v40, %v5875_v32  ;;  %v176_v49 = vmax.f32 %v127_v41, %v5876_v33  ;;  %v6140_v41 = vld [vmem:[%s8462_s10 + $0x60] sm:$0xff]  }
  0x20   :  { %v6477_v42 = vmax.f32 %v418_v35, %v6063_v28  ;;  %v6479_v43 = vmax.f32 %v419_v36, %v6064_v29  ;;  %v5939_v50 = vunpack.c.l.bf16 %v6162_v37  ;;  %v5940_v54 = vunpack.c.h.bf16 %v6162_v37  ;;  %v6171_v36 = vld [vmem:[%s8462_s10 + $0x158] sm:$0xff]  }
  0x21   :  { %v505_v30 = vadd.f32 %v6457_v13, %v485_v22  ;;  %v506_v31 = vadd.f32 %v6457_v13, %v486_v23  ;;  %v224_v55 = vmax.f32 %v175_v48, %v5907_v44  ;;  %v225_v56 = vmax.f32 %v176_v49, %v5908_v45  ;;  %v6163_v23 = vld [vmem:[%s8462_s10 + $0x118] sm:$0xff]   ;;  %v6148_v49 = vld [vmem:[%s8462_s10 + $0xa0] sm:$0xff]  }
  0x22   :  { %v487_v52 = vmul.f32 %v6442_v4, %v6477_v42  ;;  %v488_v53 = vmul.f32 %v6442_v4, %v6479_v43  ;;  %v5971_v57 = vunpack.c.l.bf16 %v6170_v46  ;;  %v5972_v58 = vunpack.c.h.bf16 %v6170_v46  ;;  %v6179_v48 = vld [vmem:[%s8462_s10 + $0x198] sm:$0xff]  }
  0x23   :  { %v521_v38 = vmax.f32 %v505_v30, 0.0  ;;  %v522_v39 = vmax.f32 %v506_v31, 0.0  ;;  %v6003_v63 = vunpack.c.l.bf16 %v6178_v51  ;;  %v273_v2 = vmax.f32 %v224_v55, %v5939_v50 }
  0x24   :  { %v507_v62 = vadd.f32 %v6457_v13, %v487_v52  ;;  %v508_v1 = vadd.f32 %v6457_v13, %v488_v53  ;;  %v274_v3 = vmax.f32 %v225_v56, %v5940_v54  ;;  %v6004_v5 = vunpack.c.h.bf16 %v6178_v51 }
  0x25   :  { %v537_v47 = vpack.c.bf16 %v522_v39, %v521_v38  ;;  %v6035_v7 = vunpack.c.l.bf16 %v6186_v59  ;;  %v6036_v8 = vunpack.c.h.bf16 %v6186_v59  ;;  %v6067_v9 = vunpack.c.l.bf16 %v6194_v60  ;;  %v6132_v39 = vld [vmem:[%s8462_s10 + $0x20] sm:$0xff]  }
  0x26   :  { %v5815_v10 = vunpack.c.l.bf16 %v6131_v61  ;;  %v322_v15 = vmax.f32 %v273_v2, %v5971_v57  ;;  %v323_v16 = vmax.f32 %v274_v3, %v5972_v58  ;;  %v5816_v17 = vunpack.c.h.bf16 %v6131_v61 }
  0x27   :  { %4922 = vmatmul.msk.bf16.vlgmr.msra.gmra.mxu0 %vm553_vm0, %v537_v47  ;;  %v5847_v18 = vunpack.c.l.bf16 %v6139_v0  ;;  %v523_v19 = vmax.f32 %v507_v62, 0.0  ;;  %v5848_v20 = vunpack.c.h.bf16 %v6139_v0  ;;  %v5879_v21 = vunpack.c.l.bf16 %v6147_v6 }
  0x28   :  { %v5880_v22 = vunpack.c.h.bf16 %v6147_v6  ;;  %v371_v24 = vmax.f32 %v322_v15, %v6003_v63  ;;  %v372_v25 = vmax.f32 %v323_v16, %v6004_v5  ;;  %v5911_v27 = vunpack.c.l.bf16 %v6155_v14  ;;  %v6187_v6 = vld [vmem:[%s8462_s10 + $0x1d8] sm:$0xff]  }
  0x29   :  { %v128_v26 = vmax.f32 %v5815_v10, %v5847_v18  ;;  %v524_v28 = vmax.f32 %v508_v1, 0.0  ;;  %v6068_v29 = vunpack.c.h.bf16 %v6194_v60  ;;  %v129_v30 = vmax.f32 %v5816_v17, %v5848_v20  ;;  %v6156_v60 = vld [vmem:[%s8462_s10 + $0xe0] sm:$0xff]  }
  0x2a   :  { %v5912_v31 = vunpack.c.h.bf16 %v6155_v14  ;;  %v420_v32 = vmax.f32 %v371_v24, %v6035_v7  ;;  %v421_v33 = vmax.f32 %v372_v25, %v6036_v8  ;;  %v5943_v35 = vunpack.c.l.bf16 %v6163_v23  ;;  %v6164_v14 = vld [vmem:[%s8462_s10 + $0x120] sm:$0xff]  }
  0x2b   :  { %v177_v34 = vmax.f32 %v128_v26, %v5879_v21  ;;  %v178_v37 = vmax.f32 %v129_v30, %v5880_v22  ;;  %v5944_v38 = vunpack.c.h.bf16 %v6163_v23  ;;  %v538_v44 = vpack.c.bf16 %v524_v28, %v523_v19  ;;  %v6195_v21 = vld [vmem:[%s8462_s10 + $0x218] sm:$0xff]   ;;  %v6172_v26 = vld [vmem:[%s8462_s10 + $0x160] sm:$0xff]   ;;  %v6141_v30 = vld [vmem:[%s8462_s10 + $0x68] sm:$0xff]  }
  0x2c   :  { %v5975_v46 = vunpack.c.l.bf16 %v6171_v36  ;;  %v5976_v47 = vunpack.c.h.bf16 %v6171_v36  ;;  %v6530_v50 = vmax.f32 %v420_v32, %v6067_v9  ;;  %v6532_v51 = vmax.f32 %v421_v33, %v6068_v29  ;;  %v6133_v29 = vld [vmem:[%s8462_s10 + $0x28] sm:$0xff]  }
  0x2d   :  { %v226_v40 = vmax.f32 %v177_v34, %v5911_v27  ;;  %v227_v45 = vmax.f32 %v178_v37, %v5912_v31  ;;  %v5819_v53 = vunpack.c.l.bf16 %v6132_v39  ;;  %v5820_v55 = vunpack.c.h.bf16 %v6132_v39  ;;  %v6180_v39 = vld [vmem:[%s8462_s10 + $0x1a0] sm:$0xff]  }
  0x2e   :  { %v5851_v56 = vunpack.c.l.bf16 %v6140_v41  ;;  %v5852_v57 = vunpack.c.h.bf16 %v6140_v41  ;;  %v6007_v58 = vunpack.c.l.bf16 %v6179_v48  ;;  %v5883_v59 = vunpack.c.l.bf16 %v6148_v49 }
  0x2f   :  { %v275_v52 = vmax.f32 %v226_v40, %v5943_v35  ;;  %v276_v54 = vmax.f32 %v227_v45, %v5944_v38  ;;  %v6008_v61 = vunpack.c.h.bf16 %v6179_v48  ;;  %v5884_v0 = vunpack.c.h.bf16 %v6148_v49 }
  0x30   :  { %v130_v62 = vmax.f32 %v5819_v53, %v5851_v56  ;;  %v131_v63 = vmax.f32 %v5820_v55, %v5852_v57  ;;  %v489_v1 = vmul.f32 %v6442_v4, %v6530_v50  ;;  %v490_v2 = vmul.f32 %v6442_v4, %v6532_v51  ;;  %v6188_v56 = vld [vmem:[%s8462_s10 + $0x1e0] sm:$0xff]  }
  0x31   :  { %v324_v3 = vmax.f32 %v275_v52, %v5975_v46  ;;  %v325_v5 = vmax.f32 %v276_v54, %v5976_v47  ;;  %v5915_v9 = vunpack.c.l.bf16 %v6156_v60  ;;  %v5916_v10 = vunpack.c.h.bf16 %v6156_v60  ;;  %v6149_v46 = vld [vmem:[%s8462_s10 + $0xa8] sm:$0xff]  }
  0x32   :  { %v179_v7 = vmax.f32 %v130_v62, %v5883_v59  ;;  %v180_v8 = vmax.f32 %v131_v63, %v5884_v0  ;;  %v6039_v15 = vunpack.c.l.bf16 %v6187_v6  ;;  %v6040_v16 = vunpack.c.h.bf16 %v6187_v6 }
  0x33   :  { %v509_v17 = vadd.f32 %v6457_v13, %v489_v1  ;;  %v510_v18 = vadd.f32 %v6457_v13, %v490_v2  ;;  %v373_v19 = vmax.f32 %v324_v3, %v6007_v58  ;;  %v374_v20 = vmax.f32 %v325_v5, %v6008_v61  ;;  %v6157_v61 = vld [vmem:[%s8462_s10 + $0xe8] sm:$0xff]   ;;  %v6196_v5 = vld [vmem:[%s8462_s10 + $0x220] sm:$0xff]  }
  0x34   :  { %v228_v22 = vmax.f32 %v179_v7, %v5915_v9  ;;  %v229_v23 = vmax.f32 %v180_v8, %v5916_v10  ;;  %v5947_v24 = vunpack.c.l.bf16 %v6164_v14  ;;  %v5948_v25 = vunpack.c.h.bf16 %v6164_v14  ;;  %v6165_v10 = vld [vmem:[%s8462_s10 + $0x128] sm:$0xff]  }
  0x35   :  { %v6071_v27 = vunpack.c.l.bf16 %v6195_v21  ;;  %v6072_v28 = vunpack.c.h.bf16 %v6195_v21  ;;  %v525_v31 = vmax.f32 %v509_v17, 0.0  ;;  %v526_v32 = vmax.f32 %v510_v18, 0.0 }
  0x36   :  { %v422_v33 = vmax.f32 %v373_v19, %v6039_v15  ;;  %v423_v34 = vmax.f32 %v374_v20, %v6040_v16  ;;  %v277_v35 = vmax.f32 %v228_v22, %v5947_v24  ;;  %v278_v36 = vmax.f32 %v229_v23, %v5948_v25  ;;  %v6173_v24 = vld [vmem:[%s8462_s10 + $0x168] sm:$0xff]  }
  0x37   :  { %4923 = vmatmul.msk.bf16.gmra.mxu0 %vm553_vm0, %v538_v44  ;;  %v5979_v37 = vunpack.c.l.bf16 %v6172_v26  ;;  %v5980_v38 = vunpack.c.h.bf16 %v6172_v26  ;;  %v5823_v40 = vunpack.c.l.bf16 %v6133_v29  ;;  %v5824_v41 = vunpack.c.h.bf16 %v6133_v29 }
  0x38   :  { %v5855_v44 = vunpack.c.l.bf16 %v6141_v30  ;;  %v5856_v45 = vunpack.c.h.bf16 %v6141_v30  ;;  %v539_v47 = vpack.c.bf16 %v526_v32, %v525_v31  ;;  %v6568_v48 = vmax.f32 %v422_v33, %v6071_v27  ;;  %v6134_v27 = vld [vmem:[%s8462_s10 + $0x30] sm:$0xff]  }
  0x39   :  { %v6570_v49 = vmax.f32 %v423_v34, %v6072_v28  ;;  %v326_v52 = vmax.f32 %v277_v35, %v5979_v37  ;;  %v327_v53 = vmax.f32 %v278_v36, %v5980_v38  ;;  %v6011_v54 = vunpack.c.l.bf16 %v6180_v39  ;;  %v6142_v28 = vld [vmem:[%s8462_s10 + $0x70] sm:$0xff]   ;;  %v6181_v35 = vld [vmem:[%s8462_s10 + $0x1a8] sm:$0xff]  }
  0x3a   :  { %v6012_v55 = vunpack.c.h.bf16 %v6180_v39  ;;  %v132_v57 = vmax.f32 %v5823_v40, %v5855_v44  ;;  %v133_v58 = vmax.f32 %v5824_v41, %v5856_v45  ;;  %v5887_v59 = vunpack.c.l.bf16 %v6149_v46  ;;  %v6150_v41 = vld [vmem:[%s8462_s10 + $0xb0] sm:$0xff]  }
  0x3b   :  { %v5888_v60 = vunpack.c.h.bf16 %v6149_v46  ;;  %v491_v62 = vmul.f32 %v6442_v4, %v6568_v48  ;;  %v492_v63 = vmul.f32 %v6442_v4, %v6570_v49  ;;  %v375_v0 = vmax.f32 %v326_v52, %v6011_v54  ;;  %v6189_v54 = vld [vmem:[%s8462_s10 + $0x1e8] sm:$0xff]  }
  0x3c   :  { %v376_v1 = vmax.f32 %v327_v53, %v6012_v55  ;;  %v6043_v2 = vunpack.c.l.bf16 %v6188_v56  ;;  %v6044_v3 = vunpack.c.h.bf16 %v6188_v56  ;;  %v181_v6 = vmax.f32 %v132_v57, %v5887_v59  ;;  %v6158_v59 = vld [vmem:[%s8462_s10 + $0xf0] sm:$0xff]  }
  0x3d   :  { %v182_v7 = vmax.f32 %v133_v58, %v5888_v60  ;;  %v5919_v8 = vunpack.c.l.bf16 %v6157_v61  ;;  %v5920_v9 = vunpack.c.h.bf16 %v6157_v61  ;;  %v511_v14 = vadd.f32 %v6457_v13, %v491_v62 }
  0x3e   :  { %v512_v15 = vadd.f32 %v6457_v13, %v492_v63  ;;  %v424_v16 = vmax.f32 %v375_v0, %v6043_v2  ;;  %v425_v17 = vmax.f32 %v376_v1, %v6044_v3  ;;  %v6075_v18 = vunpack.c.l.bf16 %v6196_v5  ;;  %v6197_v2 = vld [vmem:[%s8462_s10 + $0x228] sm:$0xff]  }
  0x3f   :  { %v6076_v19 = vunpack.c.h.bf16 %v6196_v5  ;;  %v230_v20 = vmax.f32 %v181_v6, %v5919_v8  ;;  %v231_v21 = vmax.f32 %v182_v7, %v5920_v9  ;;  %v5951_v22 = vunpack.c.l.bf16 %v6165_v10  ;;  %v6166_v8 = vld [vmem:[%s8462_s10 + $0x130] sm:$0xff]  }
  0x40   :  { %v5952_v23 = vunpack.c.h.bf16 %v6165_v10  ;;  %v527_v25 = vmax.f32 %v511_v14, 0.0  ;;  %v528_v26 = vmax.f32 %v512_v15, 0.0  ;;  %v6600_v29 = vmax.f32 %v424_v16, %v6075_v18 }
  0x41   :  { %v6602_v30 = vmax.f32 %v425_v17, %v6076_v19  ;;  %v279_v31 = vmax.f32 %v230_v20, %v5951_v22  ;;  %v5983_v33 = vunpack.c.l.bf16 %v6173_v24  ;;  %v5984_v34 = vunpack.c.h.bf16 %v6173_v24  ;;  %v6174_v22 = vld [vmem:[%s8462_s10 + $0x170] sm:$0xff]   ;;  %v6143_v24 = vld [vmem:[%s8462_s10 + $0x78] sm:$0xff]  }
  0x42   :  { %v280_v32 = vmax.f32 %v231_v21, %v5952_v23  ;;  %v5827_v36 = vunpack.c.l.bf16 %v6134_v27  ;;  %v5828_v37 = vunpack.c.h.bf16 %v6134_v27  ;;  %v5859_v38 = vunpack.c.l.bf16 %v6142_v28  ;;  %v6135_v23 = vld [vmem:[%s8462_s10 + $0x38] sm:$0xff]  }
  0x43   :  { %v5860_v39 = vunpack.c.h.bf16 %v6142_v28  ;;  %v540_v40 = vpack.c.bf16 %v528_v26, %v527_v25  ;;  %v493_v44 = vmul.f32 %v6442_v4, %v6600_v29  ;;  %v494_v45 = vmul.f32 %v6442_v4, %v6602_v30 }
  0x44   :  { %v328_v46 = vmax.f32 %v279_v31, %v5983_v33  ;;  %v6015_v52 = vunpack.c.l.bf16 %v6181_v35  ;;  %v6016_v53 = vunpack.c.h.bf16 %v6181_v35  ;;  %v134_v55 = vmax.f32 %v5827_v36, %v5859_v38 }
  0x45   :  { %v135_v56 = vmax.f32 %v5828_v37, %v5860_v39  ;;  %v5891_v57 = vunpack.c.l.bf16 %v6150_v41  ;;  %v5892_v58 = vunpack.c.h.bf16 %v6150_v41  ;;  %v513_v60 = vadd.f32 %v6457_v13, %v493_v44  ;;  %v6151_v39 = vld [vmem:[%s8462_s10 + $0xb8] sm:$0xff]  }
  0x46   :  { %v514_v61 = vadd.f32 %v6457_v13, %v494_v45  ;;  %v377_v62 = vmax.f32 %v328_v46, %v6015_v52  ;;  %v6047_v0 = vunpack.c.l.bf16 %v6189_v54  ;;  %v6048_v1 = vunpack.c.h.bf16 %v6189_v54  ;;  %v6190_v52 = vld [vmem:[%s8462_s10 + $0x1f0] sm:$0xff]  }
  0x47   :  { %4924 = vmatmul.msk.bf16.gmra.mxu0 %vm553_vm0, %v539_v47  ;;  %v329_v47 = vmax.f32 %v280_v32, %v5984_v34  ;;  %v183_v3 = vmax.f32 %v134_v55, %v5891_v57  ;;  %v184_v5 = vmax.f32 %v135_v56, %v5892_v58  ;;  %v5923_v6 = vunpack.c.l.bf16 %v6158_v59  ;;  %v6182_v34 = vld [vmem:[%s8462_s10 + $0x1b0] sm:$0xff]   ;;  %v6159_v57 = vld [vmem:[%s8462_s10 + $0xf8] sm:$0xff]  }
  0x48   :  { %v5924_v7 = vunpack.c.h.bf16 %v6158_v59  ;;  %v6079_v9 = vunpack.c.l.bf16 %v6197_v2  ;;  %v6080_v10 = vunpack.c.h.bf16 %v6197_v2  ;;  %v529_v14 = vmax.f32 %v513_v60, 0.0 }
  0x49   :  { %v378_v63 = vmax.f32 %v329_v47, %v6016_v53  ;;  %v530_v15 = vmax.f32 %v514_v61, 0.0  ;;  %v426_v16 = vmax.f32 %v377_v62, %v6047_v0  ;;  %v232_v18 = vmax.f32 %v183_v3, %v5923_v6  ;;  %v6198_v0 = vld [vmem:[%s8462_s10 + $0x230] sm:$0xff]   ;;  %v6167_v6 = vld [vmem:[%s8462_s10 + $0x138] sm:$0xff]  }
  0x4a   :  { %v233_v19 = vmax.f32 %v184_v5, %v5924_v7  ;;  %v5955_v20 = vunpack.c.l.bf16 %v6166_v8  ;;  %v5956_v21 = vunpack.c.h.bf16 %v6166_v8  ;;  %v5987_v32 = vunpack.c.l.bf16 %v6174_v22 }
  0x4b   :  { %v427_v17 = vmax.f32 %v378_v63, %v6048_v1  ;;  %v541_v25 = vpack.c.bf16 %v530_v15, %v529_v14  ;;  %v6638_v26 = vmax.f32 %v426_v16, %v6079_v9  ;;  %v5988_v33 = vunpack.c.h.bf16 %v6174_v22 }
  0x4c   :  { %v281_v28 = vmax.f32 %v232_v18, %v5955_v20  ;;  %v282_v31 = vmax.f32 %v233_v19, %v5956_v21  ;;  %v5831_v35 = vunpack.c.l.bf16 %v6135_v23  ;;  %v5832_v36 = vunpack.c.h.bf16 %v6135_v23  ;;  %v6175_v20 = vld [vmem:[%s8462_s10 + $0x178] sm:$0xff]  }
  0x4d   :  { %8463 = vst [vmem:[#allocation2_spill] sm:$0xff] %v6638_v26  ;;  %v6640_v27 = vmax.f32 %v427_v17, %v6080_v10  ;;  %v5863_v37 = vunpack.c.l.bf16 %v6143_v24  ;;  %v5864_v38 = vunpack.c.h.bf16 %v6143_v24  ;;  %v6019_v46 = vunpack.c.l.bf16 %v6182_v34 }
  0x4e   :  { %v330_v44 = vmax.f32 %v281_v28, %v5987_v32  ;;  %v331_v45 = vmax.f32 %v282_v31, %v5988_v33  ;;  %v6020_v47 = vunpack.c.h.bf16 %v6182_v34  ;;  %v5895_v55 = vunpack.c.l.bf16 %v6151_v39  ;;  %v6183_v32 = vld [vmem:[%s8462_s10 + $0x1b8] sm:$0xff]  }
  0x4f   :  { %8464 = vst [vmem:[#allocation3_spill] sm:$0xff] %v6640_v27  ;;  %v496_v41 = vmul.f32 %v6442_v4, %v6640_v27  ;;  %v136_v53 = vmax.f32 %v5831_v35, %v5863_v37  ;;  %v137_v54 = vmax.f32 %v5832_v36, %v5864_v38  ;;  %v5896_v56 = vunpack.c.h.bf16 %v6151_v39  ;;  %v6191_v39 = vld [vmem:[%s8462_s10 + $0x1f8] sm:$0xff]  }
  0x50   :  { %v379_v60 = vmax.f32 %v330_v44, %v6019_v46  ;;  %v380_v61 = vmax.f32 %v331_v45, %v6020_v47  ;;  %v6051_v62 = vunpack.c.l.bf16 %v6190_v52  ;;  %v6052_v63 = vunpack.c.h.bf16 %v6190_v52  ;;  %v6199_v52 = vld [vmem:[%s8462_s10 + $0x238] sm:$0xff]   ;;  %s6293_s10 = smov 112  }
  0x51   :  { %v516_v59 = vadd.f32 %v6457_v13, %v496_v41  ;;  %v185_v1 = vmax.f32 %v136_v53, %v5895_v55  ;;  %v186_v2 = vmax.f32 %v137_v54, %v5896_v56  ;;  %v5927_v3 = vunpack.c.l.bf16 %v6159_v57 }
  0x52   :  { %v5928_v5 = vunpack.c.h.bf16 %v6159_v57  ;;  %v428_v9 = vmax.f32 %v379_v60, %v6051_v62  ;;  %v429_v10 = vmax.f32 %v380_v61, %v6052_v63  ;;  %v6083_v14 = vunpack.c.l.bf16 %v6198_v0 }
  0x53   :  { %v532_v8 = vmax.f32 %v516_v59, 0.0  ;;  %v6084_v15 = vunpack.c.h.bf16 %v6198_v0  ;;  %v234_v16 = vmax.f32 %v185_v1, %v5927_v3  ;;  %v5959_v18 = vunpack.c.l.bf16 %v6167_v6 }
  0x54   :  { %v235_v17 = vmax.f32 %v186_v2, %v5928_v5  ;;  %v5960_v19 = vunpack.c.h.bf16 %v6167_v6  ;;  %v6670_v22 = vmax.f32 %v428_v9, %v6083_v14  ;;  %v5991_v28 = vunpack.c.l.bf16 %v6175_v20  ;;  %v5700_v2 = vld [vmem:[%s8436_s7 + $0x48] sm:$0xff]  ;;  %v5699_v6 = vld [vmem:[%s8436_s7 + $0x40] sm:$0xff] }
  0x55   :  { %v6672_v23 = vmax.f32 %v429_v10, %v6084_v15  ;;  %v283_v24 = vmax.f32 %v234_v16, %v5959_v18  ;;  %v5992_v31 = vunpack.c.h.bf16 %v6175_v20  ;;  %v6023_v37 = vunpack.c.l.bf16 %v6183_v32  ;;  %949 = vmatpush.bf16.msra.mxu3 %v5700_v2  ;;  %v6717_v9 = vld [vmem:[%s8435_s6] ss:$0 sm:$0xff] }
  0x56   :  { %8465 = vst [vmem:[#allocation4_spill] sm:$0xff] %v6670_v22  ;;  %v497_v33 = vmul.f32 %v6442_v4, %v6670_v22  ;;  %v6024_v38 = vunpack.c.h.bf16 %v6183_v32  ;;  %v6055_v46 = vunpack.c.l.bf16 %v6191_v39  ;;  %v6056_v47 = vunpack.c.h.bf16 %v6191_v39  ;;  %v5764_v22 = vld [vmem:[%s8437_s1 + $0x198] sm:$0xff] }
  0x57   :  { %4925 = vmatmul.msk.bf16.gmra.mxu0 %vm553_vm0, %v540_v40  ;;  %v495_v40 = vmul.f32 %v6442_v4, %v6638_v26  ;;  %8466 = vst [vmem:[#allocation5_spill] sm:$0xff] %v6672_v23  ;;  %v498_v34 = vmul.f32 %v6442_v4, %v6672_v23  ;;  %v332_v35 = vmax.f32 %v283_v24, %v5991_v28  ;;  %v6087_v57 = vunpack.c.l.bf16 %v6199_v52 }
  0x59   :  { %v515_v58 = vadd.f32 %v6457_v13, %v495_v40  ;;  %v517_v40 = vadd.f32 %v6457_v13, %v497_v33  ;;  %v518_v41 = vadd.f32 %v6457_v13, %v498_v34  ;;  %v381_v44 = vmax.f32 %v332_v35, %v6023_v37  ;;  %950 = vmatpush.bf16.msra.mxu3 %v5699_v6 }
  0x5b   :  { %v531_v7 = vmax.f32 %v515_v58, 0.0  ;;  %v533_v53 = vmax.f32 %v517_v40, 0.0  ;;  %v534_v54 = vmax.f32 %v518_v41, 0.0  ;;  %v430_v55 = vmax.f32 %v381_v44, %v6055_v46 }
  0x5c   :  { %v6088_v58 = vunpack.c.h.bf16 %v6199_v52 }
  0x5d   :  { %v542_v21 = vpack.c.bf16 %v532_v8, %v531_v7  ;;  %v543_v59 = vpack.c.bf16 %v534_v54, %v533_v53  ;;  %v6690_v60 = vmax.f32 %v430_v55, %v6087_v57 }
  0x5f   :  { %8467 = vst [vmem:[#allocation6_spill] sm:$0xff] %v6690_v60  ;;  %v499_v62 = vmul.f32 %v6442_v4, %v6690_v60 }
  0x61   :  { %v519_v0 = vadd.f32 %v6457_v13, %v499_v62 }
  0x63   :  { %v535_v3 = vmax.f32 %v519_v0, 0.0 }
  0x67   :  { %4926 = vmatmul.msk.bf16.gmra.mxu0 %vm553_vm0, %v541_v25  ;;  %v284_v25 = vmax.f32 %v235_v17, %v5960_v19 }
  0x69   :  { %v333_v36 = vmax.f32 %v284_v25, %v5992_v31 }
  0x6b   :  { %v382_v45 = vmax.f32 %v333_v36, %v6024_v38 }
  0x6d   :  { %v431_v56 = vmax.f32 %v382_v45, %v6056_v47 }
  0x6f   :  { %v6692_v61 = vmax.f32 %v431_v56, %v6088_v58 }
  0x71   :  { %8468 = vst [vmem:[#allocation7_spill] sm:$0xff] %v6692_v61  ;;  %v500_v63 = vmul.f32 %v6442_v4, %v6692_v61 }
  0x73   :  { %v520_v1 = vadd.f32 %v6457_v13, %v500_v63  ;;  %v6711_v13 = vld [vmem:[%s8434_s5] ss:$0 sm:$0xff] }
  0x75   :  { %v536_v5 = vmax.f32 %v520_v1, 0.0 }
  0x77   :  { %4927 = vmatmul.msk.bf16.gmra.mxu0 %vm553_vm0, %v542_v21  ;;  %v544_v7 = vpack.c.bf16 %v536_v5, %v535_v3 }
  0x87   :  { %4928 = vmatmul.msk.bf16.gmra.mxu0 %vm553_vm0, %v543_v59 }
  0x97   :  { %4929 = vmatmul.msk.bf16.gmra.mxu0 %vm553_vm0, %v544_v7 }
  0xa4   :  { %v587_v4 = vpop.f32.mrf.mxu0 }
  0xa5   :  { %v631_v8 = vmul.f32 %v6711_v13, %v587_v4 }
  0xa7   :  { %v651_v14 = vadd.f32 %v6717_v9, %v631_v8 }
  0xa9   :  { %v667_v17 = vmax.f32 %v651_v14, 0.0 }
  0xac   :  { %v589_v10 = vpop.f32.mrf.mxu0 }
  0xad   :  { %v632_v15 = vmul.f32 %v6711_v13, %v589_v10 }
  0xaf   :  { %v652_v16 = vadd.f32 %v6717_v9, %v632_v15 }
  0xb1   :  { %v668_v18 = vmax.f32 %v652_v16, 0.0 }
  0xb3   :  { %v6722_v19 = vpack.c.bf16 %v668_v18, %v667_v17 }
  0xb4   :  { %v592_v20 = vpop.f32.mrf.mxu0 }
  0xb5   :  { %4990 = vmatmul.msk.bf16.vlgmr.msra.gmra.mxu3 %vm833_vm1, %v6722_v19  ;;  %v633_v21 = vmul.f32 %v6711_v13, %v592_v20 }
  0xb7   :  { %v653_v25 = vadd.f32 %v6717_v9, %v633_v21 }
  0xb9   :  { %v669_v32 = vmax.f32 %v653_v25, 0.0 }
  0xbc   :  { %v594_v24 = vpop.f32.mrf.mxu0 }
  0xbd   :  { %v634_v28 = vmul.f32 %v6711_v13, %v594_v24 }
  0xbf   :  { %v654_v31 = vadd.f32 %v6717_v9, %v634_v28 }
  0xc1   :  { %v670_v33 = vmax.f32 %v654_v31, 0.0 }
  0xc3   :  { %v6730_v34 = vpack.c.bf16 %v670_v33, %v669_v32 }
  0xc4   :  { %v597_v35 = vpop.f32.mrf.mxu0 }
  0xc5   :  { %4991 = vmatmul.msk.bf16.gmra.mxu3 %vm833_vm1, %v6730_v34  ;;  %v635_v36 = vmul.f32 %v6711_v13, %v597_v35 }
  0xc7   :  { %v655_v38 = vadd.f32 %v6717_v9, %v635_v36 }
  0xc9   :  { %v671_v41 = vmax.f32 %v655_v38, 0.0 }
  0xcc   :  { %v599_v37 = vpop.f32.mrf.mxu0 }
  0xcd   :  { %v636_v39 = vmul.f32 %v6711_v13, %v599_v37 }
  0xcf   :  { %v656_v40 = vadd.f32 %v6717_v9, %v636_v39 }
  0xd1   :  { %v672_v44 = vmax.f32 %v656_v40, 0.0 }
  0xd3   :  { %v6738_v45 = vpack.c.bf16 %v672_v44, %v671_v41 }
  0xd4   :  { %v602_v46 = vpop.f32.mrf.mxu0 }
  0xd5   :  { %4992 = vmatmul.msk.bf16.gmra.mxu3 %vm833_vm1, %v6738_v45  ;;  %v637_v47 = vmul.f32 %v6711_v13, %v602_v46 }
  0xd7   :  { %v657_v53 = vadd.f32 %v6717_v9, %v637_v47 }
  0xd9   :  { %v673_v56 = vmax.f32 %v657_v53, 0.0  ;;  %v5702_v53 = vld [vmem:[%s8437_s1 + $0x8] sm:$0xff] }
  0xdc   :  { %v604_v52 = vpop.f32.mrf.mxu0 }
  0xdd   :  { %v638_v54 = vmul.f32 %v6711_v13, %v604_v52  ;;  %v5721_v52 = vld [vmem:[%s8437_s1 + $0x80] sm:$0xff] }
  0xdf   :  { %v658_v55 = vadd.f32 %v6717_v9, %v638_v54  ;;  %v5712_v54 = vld [vmem:[%s8437_s1 + $0x48] sm:$0xff] }
  0xe1   :  { %v674_v57 = vmax.f32 %v658_v55, 0.0  ;;  %v5703_v55 = vld [vmem:[%s8437_s1 + $0x10] sm:$0xff] }
  0xe3   :  { %v6746_v58 = vpack.c.bf16 %v674_v57, %v673_v56  ;;  %v5713_v56 = vld [vmem:[%s8437_s1 + $0x50] sm:$0xff]  ;;  %v5704_v57 = vld [vmem:[%s8437_s1 + $0x18] sm:$0xff] }
  0xe4   :  { %v607_v59 = vpop.f32.mrf.mxu0 }
  0xe5   :  { %4993 = vmatmul.msk.bf16.gmra.mxu3 %vm833_vm1, %v6746_v58  ;;  %v639_v62 = vmul.f32 %v6711_v13, %v607_v59  ;;  %v5714_v59 = vld [vmem:[%s8437_s1 + $0x58] sm:$0xff] }
  0xe7   :  { %v659_v0 = vadd.f32 %v6717_v9, %v639_v62  ;;  %v5705_v62 = vld [vmem:[%s8437_s1 + $0x20] sm:$0xff] }
  0xe9   :  { %v675_v3 = vmax.f32 %v659_v0, 0.0 }
  0xec   :  { %v609_v63 = vpop.f32.mrf.mxu0 }
  0xed   :  { %v640_v1 = vmul.f32 %v6711_v13, %v609_v63  ;;  %v5715_v63 = vld [vmem:[%s8437_s1 + $0x60] sm:$0xff] }
  0xef   :  { %v660_v2 = vadd.f32 %v6717_v9, %v640_v1  ;;  %v5706_v1 = vld [vmem:[%s8437_s1 + $0x28] sm:$0xff] }
  0xf1   :  { %v676_v5 = vmax.f32 %v660_v2, 0.0  ;;  %v5716_v2 = vld [vmem:[%s8437_s1 + $0x68] sm:$0xff] }
  0xf3   :  { %v6754_v6 = vpack.c.bf16 %v676_v5, %v675_v3 }
  0xf4   :  { %v612_v7 = vpop.f32.mrf.mxu0 }
  0xf5   :  { %4994 = vmatmul.msk.bf16.gmra.mxu3 %vm833_vm1, %v6754_v6  ;;  %v641_v4 = vmul.f32 %v6711_v13, %v612_v7  ;;  %v5707_v7 = vld [vmem:[%s8437_s1 + $0x30] sm:$0xff] }
  0xf7   :  { %v661_v10 = vadd.f32 %v6717_v9, %v641_v4  ;;  %v5717_v4 = vld [vmem:[%s8437_s1 + $0x70] sm:$0xff] }
  0xf9   :  { %v677_v16 = vmax.f32 %v661_v10, 0.0 }
  0xfc   :  { %v614_v8 = vpop.f32.mrf.mxu0 }
  0xfd   :  { %v642_v14 = vmul.f32 %v6711_v13, %v614_v8  ;;  %v5710_v8 = vld [vmem:[%s8436_s7 + $0x8] sm:$0xff] }
  0xfe   :  { %864 = vmatpush.bf16.msra.mxu2 %v5710_v8 }
  0xff   :  { %v662_v15 = vadd.f32 %v6717_v9, %v642_v14  ;;  %v5709_v14 = vld [vmem:[%s8436_s7] sm:$0xff] }
 0x101   :  { %v678_v17 = vmax.f32 %v662_v15, 0.0 }
 0x102   :  { %865 = vmatpush.bf16.msra.mxu2 %v5709_v14 }
 0x103   :  { %v6762_v18 = vpack.c.bf16 %v678_v17, %v677_v16  ;;  %v5708_v16 = vld [vmem:[%s8437_s1 + $0x38] sm:$0xff] }
 0x104   :  { %v617_v20 = vpop.f32.mrf.mxu0  ;;  %v5718_v17 = vld [vmem:[%s8437_s1 + $0x78] sm:$0xff] }
 0x105   :  { %4995 = vmatmul.msk.bf16.gmra.mxu3 %vm833_vm1, %v6762_v18  ;;  %v643_v21 = vmul.f32 %v6711_v13, %v617_v20  ;;  %v5722_v20 = vld [vmem:[%s8437_s1 + $0x88] sm:$0xff] }
 0x107   :  { %v663_v25 = vadd.f32 %v6717_v9, %v643_v21 }
 0x109   :  { %v679_v32 = vmax.f32 %v663_v25, 0.0  ;;  %v5731_v25 = vld [vmem:[%s8437_s1 + $0xc0] sm:$0xff] }
 0x10c   :  { %v619_v24 = vpop.f32.mrf.mxu0 }
 0x10d   :  { %v644_v28 = vmul.f32 %v6711_v13, %v619_v24 }
 0x10f   :  { %v664_v31 = vadd.f32 %v6717_v9, %v644_v28 }
 0x111   :  { %v680_v33 = vmax.f32 %v664_v31, 0.0  ;;  %v5723_v31 = vld [vmem:[%s8437_s1 + $0x90] sm:$0xff] }
 0x113   :  { %v6770_v35 = vpack.c.bf16 %v680_v33, %v679_v32 }
 0x114   :  { %v622_v36 = vpop.f32.mrf.mxu0 }
 0x115   :  { %4996 = vmatmul.msk.bf16.gmra.mxu3 %vm833_vm1, %v6770_v35  ;;  %v645_v37 = vmul.f32 %v6711_v13, %v622_v36 }
 0x117   :  { %v665_v39 = vadd.f32 %v6717_v9, %v645_v37 }
 0x119   :  { %v681_v44 = vmax.f32 %v665_v39, 0.0 }
 0x11c   :  { %v624_v38 = vpop.f32.mrf.mxu0 }
 0x11d   :  { %v646_v40 = vmul.f32 %v6711_v13, %v624_v38  ;;  %v5701_v13 = vld [vmem:[%s8437_s1] sm:$0xff]  ;;  %v5724_v38 = vld [vmem:[%s8437_s1 + $0x98] sm:$0xff] }
 0x11f   :  { %v666_v41 = vadd.f32 %v6717_v9, %v646_v40  ;;  %v5711_v9 = vld [vmem:[%s8437_s1 + $0x40] sm:$0xff] }
 0x121   :  { %v682_v46 = vmax.f32 %v666_v41, 0.0 }
 0x123   :  { %v6778_v47 = vpack.c.bf16 %v682_v46, %v681_v44 }
 0x125   :  { %760 = vmatpush.bf16.msra.mxu1 %v6778_v47  ;;  %4997 = vmatmul.msk.bf16.gmra.mxu3 %vm833_vm1, %v6778_v47 }
 0x126   :  { %1057 = vmatpush.bf16.msrb.mxu0 %v6778_v47  ;;  %1285 = vmatpush.bf16.msrb.mxu3 %v6778_v47 }
 0x129   :  { %761 = vmatpush.bf16.msra.mxu1 %v6770_v35 }
 0x12a   :  { %1058 = vmatpush.bf16.msrb.mxu0 %v6770_v35  ;;  %1286 = vmatpush.bf16.msrb.mxu3 %v6770_v35 }
 0x12d   :  { %762 = vmatpush.bf16.msra.mxu1 %v6762_v18 }
 0x12e   :  { %1059 = vmatpush.bf16.msrb.mxu0 %v6762_v18  ;;  %1287 = vmatpush.bf16.msrb.mxu3 %v6762_v18 }
 0x131   :  { %763 = vmatpush.bf16.msra.mxu1 %v6754_v6 }
 0x132   :  { %1060 = vmatpush.bf16.msrb.mxu0 %v6754_v6  ;;  %1288 = vmatpush.bf16.msrb.mxu3 %v6754_v6 }
 0x135   :  { %764 = vmatpush.bf16.msra.mxu1 %v6746_v58 }
 0x136   :  { %1061 = vmatpush.bf16.msrb.mxu0 %v6746_v58  ;;  %1289 = vmatpush.bf16.msrb.mxu3 %v6746_v58 }
 0x138   :  { %v6871_v0 = vpop.f32.mrf.mxu3 }
 0x139   :  { %765 = vmatpush.bf16.msra.mxu1 %v6738_v45 }
 0x13a   :  { %1062 = vmatpush.bf16.msrb.mxu0 %v6738_v45  ;;  %1290 = vmatpush.bf16.msrb.mxu3 %v6738_v45 }
 0x13d   :  { %766 = vmatpush.bf16.msra.mxu1 %v6730_v34 }
 0x13e   :  { %1063 = vmatpush.bf16.msrb.mxu0 %v6730_v34  ;;  %1291 = vmatpush.bf16.msrb.mxu3 %v6730_v34 }
 0x140   :  { %v6879_v3 = vpop.f32.mrf.mxu3 }
 0x141   :  { %767 = vmatpush.bf16.msra.mxu1 %v6722_v19 }
 0x142   :  { %1064 = vmatpush.bf16.msrb.mxu0 %v6722_v19  ;;  %1292 = vmatpush.bf16.msrb.mxu3 %v6722_v19 }
 0x144   :  { %768 = vmatmul.bf16.vlgmr.msra.gmra.mxu1 %v5701_v13 }
 0x145   :  { %1065 = vmatmul.bf16.vlgmr.msrb.gmra.mxu0 %v5711_v9  ;;  %1293 = vmatmul.bf16.vlgmr.msrb.gmra.mxu3 %v5721_v52 }
 0x146   :  { %1513 = vmatpush.bf16.msra.mxu0 %v6778_v47  ;;  %1741 = vmatpush.bf16.msra.mxu3 %v6778_v47 }
 0x148   :  { %v6881_v5 = vpop.f32.mrf.mxu3 }
 0x14a   :  { %1514 = vmatpush.bf16.msra.mxu0 %v6770_v35  ;;  %1742 = vmatpush.bf16.msra.mxu3 %v6770_v35 }
 0x14e   :  { %1515 = vmatpush.bf16.msra.mxu0 %v6762_v18  ;;  %1743 = vmatpush.bf16.msra.mxu3 %v6762_v18 }
 0x150   :  { %v6892_v10 = vpop.f32.mrf.mxu3 }
 0x152   :  { %1516 = vmatpush.bf16.msra.mxu0 %v6754_v6  ;;  %1744 = vmatpush.bf16.msra.mxu3 %v6754_v6 }
 0x154   :  { %773 = vmatmul.bf16.gmra.mxu1 %v5702_v53  ;;  %v5727_v53 = vld [vmem:[%s8437_s1 + $0xb0] sm:$0xff] }
 0x155   :  { %1070 = vmatmul.bf16.gmra.mxu0 %v5712_v54  ;;  %1298 = vmatmul.bf16.gmra.mxu3 %v5722_v20 }
 0x156   :  { %1517 = vmatpush.bf16.msra.mxu0 %v6746_v58  ;;  %1745 = vmatpush.bf16.msra.mxu3 %v6746_v58 }
 0x158   :  { %v6897_v15 = vpop.f32.mrf.mxu3 }
 0x15a   :  { %1518 = vmatpush.bf16.msra.mxu0 %v6738_v45  ;;  %1746 = vmatpush.bf16.msra.mxu3 %v6738_v45 }
 0x15e   :  { %1519 = vmatpush.bf16.msra.mxu0 %v6730_v34  ;;  %1747 = vmatpush.bf16.msra.mxu3 %v6730_v34 }
 0x160   :  { %v6908_v21 = vpop.f32.mrf.mxu3 }
 0x162   :  { %1520 = vmatpush.bf16.msra.mxu0 %v6722_v19  ;;  %1748 = vmatpush.bf16.msra.mxu3 %v6722_v19 }
 0x164   :  { %778 = vmatmul.bf16.gmra.mxu1 %v5703_v55 }
 0x165   :  { %1075 = vmatmul.bf16.gmra.mxu0 %v5713_v56  ;;  %1303 = vmatmul.bf16.gmra.mxu3 %v5723_v31 }
 0x166   :  { %1969 = vmatpush.bf16.msrb.mxu0 %v6778_v47  ;;  %2197 = vmatpush.bf16.msrb.mxu3 %v6778_v47 }
 0x168   :  { %v6913_v28 = vpop.f32.mrf.mxu3 }
 0x16a   :  { %1970 = vmatpush.bf16.msrb.mxu0 %v6770_v35  ;;  %2198 = vmatpush.bf16.msrb.mxu3 %v6770_v35 }
 0x16e   :  { %1971 = vmatpush.bf16.msrb.mxu0 %v6762_v18  ;;  %2199 = vmatpush.bf16.msrb.mxu3 %v6762_v18 }
 0x170   :  { %v6921_v36 = vpop.f32.mrf.mxu3 }
 0x172   :  { %1972 = vmatpush.bf16.msrb.mxu0 %v6754_v6  ;;  %2200 = vmatpush.bf16.msrb.mxu3 %v6754_v6 }
 0x174   :  { %783 = vmatmul.bf16.gmra.mxu1 %v5704_v57  ;;  %v5720_v57 = vld [vmem:[%s8436_s7 + $0x18] sm:$0xff] }
 0x175   :  { %1080 = vmatmul.bf16.gmra.mxu0 %v5714_v59  ;;  %1308 = vmatmul.bf16.gmra.mxu3 %v5724_v38  ;;  %v5729_v38 = vld [vmem:[%s8436_s7 + $0x20] sm:$0xff] }
 0x176   :  { %1973 = vmatpush.bf16.msrb.mxu0 %v6746_v58  ;;  %2201 = vmatpush.bf16.msrb.mxu3 %v6746_v58 }
 0x177   :  { %1161 = vmatpush.bf16.msrb.mxu2 %v5720_v57 }
 0x178   :  { %v6929_v39 = vpop.f32.mrf.mxu3 }
 0x17a   :  { %1974 = vmatpush.bf16.msrb.mxu0 %v6738_v45  ;;  %2202 = vmatpush.bf16.msrb.mxu3 %v6738_v45 }
 0x17e   :  { %1975 = vmatpush.bf16.msrb.mxu0 %v6730_v34  ;;  %2203 = vmatpush.bf16.msrb.mxu3 %v6730_v34 }
 0x182   :  { %1976 = vmatpush.bf16.msrb.mxu0 %v6722_v19  ;;  %2204 = vmatpush.bf16.msrb.mxu3 %v6722_v19 }
 0x184   :  { %788 = vmatmul.bf16.gmra.mxu1 %v5705_v62 }
 0x185   :  { %1085 = vmatmul.bf16.gmra.mxu0 %v5715_v63  ;;  %v5728_v63 = vld [vmem:[%s8437_s1 + $0xb8] sm:$0xff] }
 0x194   :  { %793 = vmatmul.bf16.gmra.mxu1 %v5706_v1 }
 0x195   :  { %1090 = vmatmul.bf16.gmra.mxu0 %v5716_v2 }
 0x1a4   :  { %798 = vmatmul.bf16.gmra.mxu1 %v5707_v7 }
 0x1a5   :  { %1095 = vmatmul.bf16.gmra.mxu0 %v5717_v4  ;;  %v5719_v4 = vld [vmem:[%s8436_s7 + $0x10] sm:$0xff] }
 0x1a6   :  { %1162 = vmatpush.bf16.msrb.mxu2 %v5719_v4 }
 0x1b4   :  { %803 = vmatmul.bf16.gmra.mxu1 %v5708_v16 }
 0x1b5   :  { %1100 = vmatmul.bf16.gmra.mxu0 %v5718_v17  ;;  %v5741_v17 = vld [vmem:[%s8437_s1 + $0x100] sm:$0xff] }
 0x1c1   :  { %v769_v24 = vpop.f32.mrf.mxu1 }
 0x1c2   :  { %v1066_v7 = vpop.f32.mrf.mxu0 }
 0x1c5   :  { %1521 = vmatmul.bf16.vlgmr.msra.gmra.mxu0 %v5731_v25 }
 0x1c6   :  { %2425 = vmatpush.bf16.msra.mxu0 %v6778_v47 }
 0x1c9   :  { %v771_v32 = vpop.f32.mrf.mxu1 }
 0x1ca   :  { %2426 = vmatpush.bf16.msra.mxu0 %v6770_v35  ;;  %v809_v33 = vpack.c.bf16 %v771_v32, %v769_v24  ;;  %v1068_v16 = vpop.f32.mrf.mxu0  ;;  %v5732_v32 = vld [vmem:[%s8437_s1 + $0xc8] sm:$0xff] }
 0x1cc   :  { %4974 = vmatmul.msk.bf16.vlgmr.msra.gmra.mxu2 %vm833_vm1, %v809_v33  ;;  %v5730_v33 = vld [vmem:[%s8436_s7 + $0x28] sm:$0xff] }
 0x1cd   :  { %1389 = vmatpush.bf16.msrb.mxu1 %v5730_v33 }
 0x1ce   :  { %2427 = vmatpush.bf16.msra.mxu0 %v6762_v18  ;;  %v6934_v18 = vpop.f32.mrf.mxu3 }
 0x1d1   :  { %v774_v37 = vpop.f32.mrf.mxu1  ;;  %1390 = vmatpush.bf16.msrb.mxu1 %v5729_v38 }
 0x1d2   :  { %2428 = vmatpush.bf16.msra.mxu0 %v6754_v6  ;;  %v1071_v31 = vpop.f32.mrf.mxu0 }
 0x1d5   :  { %1526 = vmatmul.bf16.gmra.mxu0 %v5732_v32 }
 0x1d6   :  { %2429 = vmatpush.bf16.msra.mxu0 %v6746_v58  ;;  %v5725_v58 = vld [vmem:[%s8437_s1 + $0xa0] sm:$0xff]  ;;  %v6940_v46 = vpop.f32.mrf.mxu3 }
 0x1d7   :  { %1313 = vmatmul.bf16.gmra.mxu3 %v5725_v58  ;;  %v5742_v58 = vld [vmem:[%s8437_s1 + $0x108] sm:$0xff] }
 0x1d9   :  { %v776_v35 = vpop.f32.mrf.mxu1 }
 0x1da   :  { %2430 = vmatpush.bf16.msra.mxu0 %v6738_v45  ;;  %v810_v40 = vpack.c.bf16 %v776_v35, %v774_v37 }
 0x1dc   :  { %4975 = vmatmul.msk.bf16.gmra.mxu2 %vm833_vm1, %v810_v40 }
 0x1de   :  { %2431 = vmatpush.bf16.msra.mxu0 %v6730_v34  ;;  %v5726_v34 = vld [vmem:[%s8437_s1 + $0xa8] sm:$0xff]  ;;  %v6946_v47 = vpop.f32.mrf.mxu3 }
 0x1e1   :  { %v779_v6 = vpop.f32.mrf.mxu1 }
 0x1e2   :  { %2432 = vmatpush.bf16.msra.mxu0 %v6722_v19 }
 0x1e6   :  { %v6949_v9 = vpop.f32.mrf.mxu3 }
 0x1e7   :  { %1318 = vmatmul.bf16.gmra.mxu3 %v5726_v34 }
 0x1e9   :  { %v781_v41 = vpop.f32.mrf.mxu1 }
 0x1ea   :  { %v811_v44 = vpack.c.bf16 %v781_v41, %v779_v6  ;;  %v1073_v6 = vpop.f32.mrf.mxu0 }
 0x1ec   :  { %4976 = vmatmul.msk.bf16.gmra.mxu2 %vm833_vm1, %v811_v44 }
 0x1ee   :  { %v6954_v54 = vpop.f32.mrf.mxu3 }
 0x1f1   :  { %v784_v45 = vpop.f32.mrf.mxu1 }
 0x1f6   :  { %v6960_v62 = vpop.f32.mrf.mxu3 }
 0x1f7   :  { %1323 = vmatmul.bf16.gmra.mxu3 %v5727_v53 }
 0x1f9   :  { %v786_v19 = vpop.f32.mrf.mxu1 }
 0x1fa   :  { %v812_v13 = vpack.c.bf16 %v786_v19, %v784_v45  ;;  %v1076_v45 = vpop.f32.mrf.mxu0  ;;  %v5733_v19 = vld [vmem:[%s8437_s1 + $0xd0] sm:$0xff] }
 0x1fb   :  { %1531 = vmatmul.bf16.gmra.mxu0 %v5733_v19 }
 0x1fc   :  { %4977 = vmatmul.msk.bf16.gmra.mxu2 %vm833_vm1, %v812_v13 }
 0x1fe   :  { %v6969_v8 = vpop.f32.mrf.mxu3 }
 0x201   :  { %v789_v52 = vpop.f32.mrf.mxu1 }
 0x202   :  { %v1078_v13 = vpop.f32.mrf.mxu0 }
 0x206   :  { %v1294_v20 = vpop.f32.mrf.mxu3 }
 0x207   :  { %1328 = vmatmul.bf16.gmra.mxu3 %v5728_v63  ;;  %v5734_v63 = vld [vmem:[%s8437_s1 + $0xd8] sm:$0xff] }
 0x209   :  { %v791_v55 = vpop.f32.mrf.mxu1 }
 0x20a   :  { %v813_v56 = vpack.c.bf16 %v791_v55, %v789_v52  ;;  %v5743_v55 = vld [vmem:[%s8437_s1 + $0x110] sm:$0xff]  ;;  %v1081_v57 = vpop.f32.mrf.mxu0 }
 0x20b   :  { %1536 = vmatmul.bf16.gmra.mxu0 %v5734_v63 }
 0x20c   :  { %4978 = vmatmul.msk.bf16.gmra.mxu2 %vm833_vm1, %v813_v56  ;;  %v1106_v56 = vpack.c.bf16 %v1068_v16, %v1066_v7  ;;  %v1107_v16 = vpack.c.bf16 %v1073_v6, %v1071_v31 }
 0x20e   :  { %v1296_v37 = vpop.f32.mrf.mxu3 }
 0x20f   :  { %v1334_v40 = vpack.c.bf16 %v1296_v37, %v1294_v20 }
 0x211   :  { %v794_v59 = vpop.f32.mrf.mxu1  ;;  %5126 = vmatmul.msk.bf16.vlgmr.msrb.gmra.mxu1 %vm833_vm1, %v1334_v40  ;;  %v1108_v40 = vpack.c.bf16 %v1078_v13, %v1076_v45 }
 0x216   :  { %v1299_v34 = vpop.f32.mrf.mxu3 }
 0x217   :  { %1749 = vmatmul.bf16.vlgmr.msra.gmra.mxu3 %v5741_v17  ;;  %v5744_v17 = vld [vmem:[%s8437_s1 + $0x118] sm:$0xff] }
 0x219   :  { %v796_v1 = vpop.f32.mrf.mxu1 }
 0x21a   :  { %v814_v2 = vpack.c.bf16 %v796_v1, %v794_v59 }
 0x21c   :  { %4979 = vmatmul.msk.bf16.gmra.mxu2 %vm833_vm1, %v814_v2  ;;  %v1083_v2 = vpop.f32.mrf.mxu0 }
 0x21d   :  { %v1109_v13 = vpack.c.bf16 %v1083_v2, %v1081_v57 }
 0x21e   :  { %v1301_v52 = vpop.f32.mrf.mxu3 }
 0x21f   :  { %v1335_v53 = vpack.c.bf16 %v1301_v52, %v1299_v34 }
 0x221   :  { %v799_v14 = vpop.f32.mrf.mxu1  ;;  %5127 = vmatmul.msk.bf16.gmra.mxu1 %vm833_vm1, %v1335_v53  ;;  %v5746_v53 = vld [vmem:[%s8437_s1 + $0x128] sm:$0xff] }
 0x224   :  { %v1086_v20 = vpop.f32.mrf.mxu0 }
 0x226   :  { %v1304_v59 = vpop.f32.mrf.mxu3 }
 0x227   :  { %1754 = vmatmul.bf16.gmra.mxu3 %v5742_v58 }
 0x229   :  { %v801_v24 = vpop.f32.mrf.mxu1 }
 0x22a   :  { %v815_v25 = vpack.c.bf16 %v801_v24, %v799_v14 }
 0x22c   :  { %4980 = vmatmul.msk.bf16.gmra.mxu2 %vm833_vm1, %v815_v25  ;;  %v5735_v25 = vld [vmem:[%s8437_s1 + $0xe0] sm:$0xff]  ;;  %v1088_v33 = vpop.f32.mrf.mxu0 }
 0x22d   :  { %1541 = vmatmul.bf16.gmra.mxu0 %v5735_v25  ;;  %v1110_v2 = vpack.c.bf16 %v1088_v33, %v1086_v20  ;;  %v5748_v20 = vld [vmem:[%s8437_s1 + $0x138] sm:$0xff] }
 0x22e   :  { %v1306_v4 = vpop.f32.mrf.mxu3 }
 0x22f   :  { %v1336_v14 = vpack.c.bf16 %v1306_v4, %v1304_v59  ;;  %v5737_v59 = vld [vmem:[%s8437_s1 + $0xf0] sm:$0xff] }
 0x231   :  { %v804_v35 = vpop.f32.mrf.mxu1  ;;  %5128 = vmatmul.msk.bf16.gmra.mxu1 %vm833_vm1, %v1336_v14 }
 0x234   :  { %v1091_v6 = vpop.f32.mrf.mxu0 }
 0x236   :  { %v1309_v24 = vpop.f32.mrf.mxu3 }
 0x237   :  { %1759 = vmatmul.bf16.gmra.mxu3 %v5743_v55 }
 0x239   :  { %v806_v41 = vpop.f32.mrf.mxu1 }
 0x23a   :  { %v816_v44 = vpack.c.bf16 %v806_v41, %v804_v35  ;;  %v5745_v35 = vld [vmem:[%s8437_s1 + $0x120] sm:$0xff]  ;;  %v5736_v41 = vld [vmem:[%s8437_s1 + $0xe8] sm:$0xff] }
 0x23c   :  { %4981 = vmatmul.msk.bf16.gmra.mxu2 %vm833_vm1, %v816_v44  ;;  %v1093_v34 = vpop.f32.mrf.mxu0 }
 0x23d   :  { %1546 = vmatmul.bf16.gmra.mxu0 %v5736_v41 }
 0x23e   :  { %v1311_v37 = vpop.f32.mrf.mxu3 }
 0x23f   :  { %v1337_v38 = vpack.c.bf16 %v1311_v37, %v1309_v24  ;;  %v5738_v37 = vld [vmem:[%s8437_s1 + $0xf8] sm:$0xff] }
 0x241   :  { %5129 = vmatmul.msk.bf16.gmra.mxu1 %vm833_vm1, %v1337_v38  ;;  %v5740_v38 = vld [vmem:[%s8436_s7 + $0x38] sm:$0xff] }
 0x242   :  { %1617 = vmatpush.bf16.msra.mxu2 %v5740_v38  ;;  %v5752_v38 = vld [vmem:[%s8437_s1 + $0x148] sm:$0xff] }
 0x244   :  { %v1096_v55 = vpop.f32.mrf.mxu0 }
 0x247   :  { %1764 = vmatmul.bf16.gmra.mxu3 %v5744_v17 }
 0x24c   :  { %5058 = vmatmul.msk.bf16.vlgmr.msrb.gmra.mxu2 %vm833_vm1, %v1106_v56  ;;  %v1098_v4 = vpop.f32.mrf.mxu0 }
 0x24d   :  { %1551 = vmatmul.bf16.gmra.mxu0 %v5737_v59 }
 0x24f   :  { %v7000_v1 = vpop.f32.mrf.mxu2 }
 0x254   :  { %v1101_v24 = vpop.f32.mrf.mxu0 }
 0x257   :  { %v7006_v7 = vpop.f32.mrf.mxu2  ;;  %1769 = vmatmul.bf16.gmra.mxu3 %v5745_v35 }
 0x258   :  { %v955_v26 = vadd.f32 %v6879_v3, %v7006_v7 }
 0x25a   :  { %v1314_v58 = vpop.f32.mrf.mxu3 }
 0x25c   :  { %5059 = vmatmul.msk.bf16.gmra.mxu2 %vm833_vm1, %v1107_v16  ;;  %v5747_v16 = vld [vmem:[%s8437_s1 + $0x130] sm:$0xff] }
 0x25d   :  { %1556 = vmatmul.bf16.gmra.mxu0 %v5738_v37 }
 0x25f   :  { %v7012_v32 = vpop.f32.mrf.mxu2 }
 0x262   :  { %v1316_v19 = vpop.f32.mrf.mxu3 }
 0x263   :  { %v1338_v52 = vpack.c.bf16 %v1316_v19, %v1314_v58  ;;  %v1111_v19 = vpack.c.bf16 %v1093_v34, %v1091_v6  ;;  %v5739_v34 = vld [vmem:[%s8436_s7 + $0x30] sm:$0xff] }
 0x264   :  { %1618 = vmatpush.bf16.msra.mxu2 %v5739_v34 }
 0x265   :  { %5130 = vmatmul.msk.bf16.gmra.mxu1 %vm833_vm1, %v1338_v52 }
 0x267   :  { %v7018_v31 = vpop.f32.mrf.mxu2  ;;  %1774 = vmatmul.bf16.gmra.mxu3 %v5746_v53 }
 0x26a   :  { %v1319_v56 = vpop.f32.mrf.mxu3 }
 0x26c   :  { %5060 = vmatmul.msk.bf16.gmra.mxu2 %vm833_vm1, %v1108_v40  ;;  %v1103_v40 = vpop.f32.mrf.mxu0 }
 0x26f   :  { %v7024_v44 = vpop.f32.mrf.mxu2 }
 0x272   :  { %v1321_v14 = vpop.f32.mrf.mxu3 }
 0x273   :  { %v1339_v17 = vpack.c.bf16 %v1321_v14, %v1319_v56 }
 0x274   :  { %v1522_v53 = vpop.f32.mrf.mxu0 }
 0x275   :  { %5131 = vmatmul.msk.bf16.gmra.mxu1 %vm833_vm1, %v1339_v17 }
 0x277   :  { %v7030_v45 = vpop.f32.mrf.mxu2  ;;  %1779 = vmatmul.bf16.gmra.mxu3 %v5747_v16  ;;  %v5761_v16 = vld [vmem:[%s8437_s1 + $0x180] sm:$0xff] }
 0x27a   :  { %v1324_v25 = vpop.f32.mrf.mxu3 }
 0x27c   :  { %5061 = vmatmul.msk.bf16.gmra.mxu2 %vm833_vm1, %v1109_v13  ;;  %v5751_v13 = vld [vmem:[%s8437_s1 + $0x140] sm:$0xff]  ;;  %v1524_v14 = vpop.f32.mrf.mxu0 }
 0x27d   :  { %1977 = vmatmul.bf16.vlgmr.msrb.gmra.mxu0 %v5751_v13 }
 0x27f   :  { %v7036_v63 = vpop.f32.mrf.mxu2 }
 0x282   :  { %v1326_v58 = vpop.f32.mrf.mxu3 }
 0x283   :  { %v1340_v41 = vpack.c.bf16 %v1326_v58, %v1324_v25  ;;  %v5750_v58 = vld [vmem:[%s8436_s7 + $0x58] sm:$0xff] }
 0x284   :  { %v7074_v25 = vpop.f32.mrf.mxu0  ;;  %1845 = vmatpush.bf16.msra.mxu1 %v5750_v58 }
 0x285   :  { %5132 = vmatmul.msk.bf16.gmra.mxu1 %vm833_vm1, %v1340_v41 }
 0x287   :  { %v7042_v57 = vpop.f32.mrf.mxu2  ;;  %1784 = vmatmul.bf16.gmra.mxu3 %v5748_v20 }
 0x28a   :  { %v1329_v52 = vpop.f32.mrf.mxu3 }
 0x28c   :  { %5062 = vmatmul.msk.bf16.gmra.mxu2 %vm833_vm1, %v1110_v2  ;;  %v1112_v2 = vpack.c.bf16 %v1098_v4, %v1096_v55  ;;  %v5749_v55 = vld [vmem:[%s8436_s7 + $0x50] sm:$0xff]  ;;  %v1529_v20 = vpop.f32.mrf.mxu0 }
 0x28d   :  { %1982 = vmatmul.bf16.gmra.mxu0 %v5752_v38  ;;  %1846 = vmatpush.bf16.msra.mxu1 %v5749_v55  ;;  %v5753_v38 = vld [vmem:[%s8437_s1 + $0x150] sm:$0xff] }
 0x28e   :  { %v1392_v4 = vpop.f32.mrf.mxu1 }
 0x28f   :  { %v7051_v35 = vpop.f32.mrf.mxu2 }
 0x292   :  { %v1331_v59 = vpop.f32.mrf.mxu3 }
 0x293   :  { %v1341_v17 = vpack.c.bf16 %v1331_v59, %v1329_v52  ;;  %v5762_v52 = vld [vmem:[%s8437_s1 + $0x188] sm:$0xff] }
 0x294   :  { %v7094_v34 = vpop.f32.mrf.mxu0 }
 0x295   :  { %5133 = vmatmul.msk.bf16.gmra.mxu1 %vm833_vm1, %v1341_v17  ;;  %v1113_v17 = vpack.c.bf16 %v1103_v40, %v1101_v24  ;;  %v5763_v24 = vld [vmem:[%s8437_s1 + $0x190] sm:$0xff] }
 0x297   :  { %v7057_v33 = vpop.f32.mrf.mxu2  ;;  %2205 = vmatmul.bf16.vlgmr.msrb.gmra.mxu3 %v5761_v16  ;;  %v1394_v16 = vpop.f32.mrf.mxu1 }
 0x29a   :  { %v1750_v37 = vpop.f32.mrf.mxu3 }
 0x29c   :  { %5063 = vmatmul.msk.bf16.gmra.mxu2 %vm833_vm1, %v1111_v19  ;;  %v1534_v55 = vpop.f32.mrf.mxu0 }
 0x29d   :  { %1987 = vmatmul.bf16.gmra.mxu0 %v5753_v38  ;;  %v5754_v38 = vld [vmem:[%s8437_s1 + $0x158] sm:$0xff] }
 0x29f   :  { %v7063_v56 = vpop.f32.mrf.mxu2 }
 0x2a2   :  { %v1752_v19 = vpop.f32.mrf.mxu3 }
 0x2a3   :  { %v1790_v13 = vpack.c.bf16 %v1752_v19, %v1750_v37  ;;  %v1397_v37 = vpop.f32.mrf.mxu1 }
 0x2a4   :  { %v7108_v60 = vpop.f32.mrf.mxu0 }
 0x2a5   :  { %5262 = vmatmul.msk.bf16.vlgmr.msra.gmra.mxu1 %vm833_vm1, %v1790_v13  ;;  %v1562_v13 = vpack.c.bf16 %v1524_v14, %v1522_v53 }
 0x2a7   :  { %v7069_v6 = vpop.f32.mrf.mxu2  ;;  %2210 = vmatmul.bf16.gmra.mxu3 %v5762_v52 }
 0x2ab   :  { %v1399_v61 = vpop.f32.mrf.mxu1 }
 0x2ac   :  { %5064 = vmatmul.msk.bf16.gmra.mxu2 %vm833_vm1, %v1112_v2  ;;  %v1755_v2 = vpop.f32.mrf.mxu3  ;;  %v1539_v53 = vpop.f32.mrf.mxu0 }
 0x2ad   :  { %1992 = vmatmul.bf16.gmra.mxu0 %v5754_v38 }
 0x2af   :  { %v7083_v41 = vpop.f32.mrf.mxu2 }
 0x2b4   :  { %v1757_v19 = vpop.f32.mrf.mxu3 }
 0x2b5   :  { %v1791_v40 = vpack.c.bf16 %v1757_v19, %v1755_v2  ;;  %v953_v2 = vadd.f32 %v6871_v0, %v7000_v1  ;;  %v1563_v1 = vpack.c.bf16 %v1529_v20, %v7074_v25 }
 0x2b7   :  { %v7092_v59 = vpop.f32.mrf.mxu2  ;;  %5263 = vmatmul.msk.bf16.gmra.mxu1 %vm833_vm1, %v1791_v40  ;;  %2215 = vmatmul.bf16.gmra.mxu3 %v5763_v24  ;;  %v1402_v24 = vpop.f32.mrf.mxu1 }
 0x2bc   :  { %5065 = vmatmul.msk.bf16.gmra.mxu2 %vm833_vm1, %v1113_v17  ;;  %v1760_v17 = vpop.f32.mrf.mxu3 }
 0x2bf   :  { %v7100_v58 = vpop.f32.mrf.mxu2  ;;  %v1404_v38 = vpop.f32.mrf.mxu1 }
 0x2c4   :  { %v1762_v14 = vpop.f32.mrf.mxu3 }
 0x2c5   :  { %v1792_v27 = vpack.c.bf16 %v1762_v14, %v1760_v17  ;;  %v5755_v17 = vld [vmem:[%s8437_s1 + $0x160] sm:$0xff]  ;;  %v960_v14 = vadd.f32 %v6892_v10, %v7018_v31  ;;  %v963_v10 = vadd.f32 %v6897_v15, %v7024_v44  ;;  %v1565_v44 = vpack.c.bf16 %v1539_v53, %v7108_v60 }
 0x2c6   :  { %1997 = vmatmul.bf16.gmra.mxu0 %v5755_v17 }
 0x2c7   :  { %v7106_v52 = vpop.f32.mrf.mxu2  ;;  %5264 = vmatmul.msk.bf16.gmra.mxu1 %vm833_vm1, %v1792_v27  ;;  %2220 = vmatmul.bf16.gmra.mxu3 %v5764_v22  ;;  %v958_v27 = vadd.f32 %v6881_v5, %v7012_v32  ;;  %v1407_v7 = vpop.f32.mrf.mxu1  ;;  %v1564_v32 = vpack.c.bf16 %v1534_v55, %v7094_v34 }
 0x2cc   :  { %5194 = vmatmul.msk.bf16.vlgmr.msra.gmra.mxu2 %vm833_vm1, %v1562_v13 }
 0x2cf   :  { %v1164_v19 = vpop.f32.mrf.mxu2 }
 0x2d0   :  { %v1204_v40 = vadd.f32 %v1164_v19, %v953_v2  ;;  %v7127_v2 = vpop.f32.mrf.mxu0  ;;  %v1765_v19 = vpop.f32.mrf.mxu3 }
 0x2d2   :  { %v7116_v23 = vadd.f32 %v1392_v4, %v1204_v40 }
 0x2d7   :  { %v1166_v13 = vpop.f32.mrf.mxu2 }
 0x2d8   :  { %v1205_v0 = vadd.f32 %v1166_v13, %v955_v26  ;;  %v1544_v25 = vpop.f32.mrf.mxu0  ;;  %v1767_v20 = vpop.f32.mrf.mxu3 }
 0x2d9   :  { %v1793_v40 = vpack.c.bf16 %v1767_v20, %v1765_v19  ;;  %v5756_v19 = vld [vmem:[%s8437_s1 + $0x168] sm:$0xff] }
 0x2da   :  { %v7125_v4 = vadd.f32 %v1394_v16, %v1205_v0  ;;  %v5765_v16 = vld [vmem:[%s8437_s1 + $0x1a0] sm:$0xff]  ;;  %v1409_v0 = vpop.f32.mrf.mxu1  ;;  %2002 = vmatmul.bf16.gmra.mxu0 %v5756_v19 }
 0x2db   :  { %5265 = vmatmul.msk.bf16.gmra.mxu1 %vm833_vm1, %v1793_v40  ;;  %2225 = vmatmul.bf16.gmra.mxu3 %v5765_v16  ;;  %v965_v16 = vadd.f32 %v6908_v21, %v7030_v45  ;;  %v968_v21 = vadd.f32 %v6913_v28, %v7036_v63  ;;  %v1566_v63 = vpack.c.bf16 %v1544_v25, %v7127_v2 }
 0x2dc   :  { %5195 = vmatmul.msk.bf16.gmra.mxu2 %vm833_vm1, %v1563_v1 }
 0x2df   :  { %v1169_v22 = vpop.f32.mrf.mxu2 }
 0x2e0   :  { %v1206_v26 = vadd.f32 %v1169_v22, %v958_v27  ;;  %v7146_v1 = vpop.f32.mrf.mxu0  ;;  %v1770_v17 = vpop.f32.mrf.mxu3 }
 0x2e2   :  { %v7135_v3 = vadd.f32 %v1397_v37, %v1206_v26  ;;  %v5766_v26 = vld [vmem:[%s8437_s1 + $0x1a8] sm:$0xff] }
 0x2e7   :  { %v1171_v13 = vpop.f32.mrf.mxu2 }
 0x2e8   :  { %v1207_v5 = vadd.f32 %v1171_v13, %v960_v14  ;;  %v1549_v34 = vpop.f32.mrf.mxu0  ;;  %v1772_v55 = vpop.f32.mrf.mxu3 }
 0x2e9   :  { %v1794_v20 = vpack.c.bf16 %v1772_v55, %v1770_v17 }
 0x2ea   :  { %v7144_v37 = vadd.f32 %v1399_v61, %v1207_v5  ;;  %v1412_v61 = vpop.f32.mrf.mxu1 }
 0x2eb   :  { %5266 = vmatmul.msk.bf16.gmra.mxu1 %vm833_vm1, %v1794_v20  ;;  %2230 = vmatmul.bf16.gmra.mxu3 %v5766_v26 }
 0x2ec   :  { %5196 = vmatmul.msk.bf16.gmra.mxu2 %vm833_vm1, %v1564_v32  ;;  %v5757_v32 = vld [vmem:[%s8437_s1 + $0x170] sm:$0xff] }
 0x2ed   :  { %2007 = vmatmul.bf16.gmra.mxu0 %v5757_v32  ;;  %v5768_v32 = vld [vmem:[%s8437_s1 + $0x1b8] sm:$0xff] }
 0x2ef   :  { %v1174_v31 = vpop.f32.mrf.mxu2 }
 0x2f0   :  { %v1208_v27 = vadd.f32 %v1174_v31, %v963_v10  ;;  %v7165_v13 = vpop.f32.mrf.mxu0  ;;  %v1775_v5 = vpop.f32.mrf.mxu3  ;;  %v5767_v10 = vld [vmem:[%s8437_s1 + $0x1b0] sm:$0xff] }
 0x2f2   :  { %v7154_v22 = vadd.f32 %v1402_v24, %v1208_v27  ;;  %v1414_v14 = vpop.f32.mrf.mxu1  ;;  %v970_v27 = vadd.f32 %v6921_v36, %v7042_v57  ;;  %v5760_v36 = vld [vmem:[%s8436_s7 + $0x68] sm:$0xff]  ;;  %v973_v57 = vadd.f32 %v6929_v39, %v7051_v35  ;;  %v1567_v35 = vpack.c.bf16 %v1549_v34, %v7146_v1 }
 0x2f3   :  { %2073 = vmatpush.bf16.msrb.mxu2 %v5760_v36 }
 0x2f7   :  { %v1176_v40 = vpop.f32.mrf.mxu2 }
 0x2f8   :  { %v1209_v15 = vadd.f32 %v1176_v40, %v965_v16  ;;  %v1554_v53 = vpop.f32.mrf.mxu0  ;;  %v5758_v40 = vld [vmem:[%s8437_s1 + $0x178] sm:$0xff] }
 0x2fa   :  { %v7163_v24 = vadd.f32 %v1404_v38, %v1209_v15  ;;  %v1417_v60 = vpop.f32.mrf.mxu1  ;;  %v1777_v38 = vpop.f32.mrf.mxu3 }
 0x2fb   :  { %v1795_v31 = vpack.c.bf16 %v1777_v38, %v1775_v5  ;;  %2235 = vmatmul.bf16.gmra.mxu3 %v5767_v10 }
 0x2fc   :  { %5197 = vmatmul.msk.bf16.gmra.mxu2 %vm833_vm1, %v1565_v44 }
 0x2fd   :  { %5267 = vmatmul.msk.bf16.gmra.mxu1 %vm833_vm1, %v1795_v31  ;;  %2012 = vmatmul.bf16.gmra.mxu0 %v5758_v40 }
 0x2ff   :  { %v1179_v45 = vpop.f32.mrf.mxu2 }
 0x300   :  { %v1210_v17 = vadd.f32 %v1179_v45, %v968_v21  ;;  %v7184_v20 = vpop.f32.mrf.mxu0  ;;  %v975_v45 = vadd.f32 %v6934_v18, %v7057_v33  ;;  %v978_v18 = vadd.f32 %v6940_v46, %v7063_v56  ;;  %v1568_v46 = vpack.c.bf16 %v1554_v53, %v7165_v13 }
 0x301   :  { %v983_v13 = vadd.f32 %v6949_v9, %v7083_v41 }
 0x302   :  { %v7173_v19 = vadd.f32 %v1407_v7, %v1210_v17  ;;  %v1419_v26 = vpop.f32.mrf.mxu1  ;;  %v1780_v16 = vpop.f32.mrf.mxu3 }
 0x307   :  { %v1181_v55 = vpop.f32.mrf.mxu2 }
 0x308   :  { %v1211_v28 = vadd.f32 %v1181_v55, %v970_v27  ;;  %v1559_v44 = vpop.f32.mrf.mxu0  ;;  %v5771_v27 = vld [vmem:[%s8437_s1 + $0x1c0] sm:$0xff] }
 0x30a   :  { %v7182_v7 = vadd.f32 %v1409_v0, %v1211_v28  ;;  %v1422_v15 = vpop.f32.mrf.mxu1  ;;  %v1782_v5 = vpop.f32.mrf.mxu3 }
 0x30b   :  { %v1796_v21 = vpack.c.bf16 %v1782_v5, %v1780_v16  ;;  %2240 = vmatmul.bf16.gmra.mxu3 %v5768_v32  ;;  %v980_v16 = vadd.f32 %v6946_v47, %v7069_v6  ;;  %v5772_v47 = vld [vmem:[%s8437_s1 + $0x1c8] sm:$0xff]  ;;  %v5770_v6 = vld [vmem:[%s8436_s7 + $0x78] sm:$0xff]  ;;  %v5769_v5 = vld [vmem:[%s8436_s7 + $0x70] sm:$0xff] }
 0x30c   :  { %5198 = vmatmul.msk.bf16.gmra.mxu2 %vm833_vm1, %v1566_v63  ;;  %2301 = vmatpush.bf16.msrb.mxu1 %v5770_v6 }
 0x30d   :  { %5268 = vmatmul.msk.bf16.gmra.mxu1 %vm833_vm1, %v1796_v21  ;;  %2433 = vmatmul.bf16.vlgmr.msra.gmra.mxu0 %v5771_v27 }
 0x30f   :  { %v1184_v2 = vpop.f32.mrf.mxu2 }
 0x310   :  { %v1212_v25 = vadd.f32 %v1184_v2, %v973_v57  ;;  %v7206_v10 = vpop.f32.mrf.mxu0  ;;  %v5759_v57 = vld [vmem:[%s8436_s7 + $0x60] sm:$0xff]  ;;  %2302 = vmatpush.bf16.msrb.mxu1 %v5769_v5 }
 0x311   :  { %2074 = vmatpush.bf16.msrb.mxu2 %v5759_v57 }
 0x312   :  { %v7195_v0 = vadd.f32 %v1412_v61, %v1212_v25  ;;  %v1424_v38 = vpop.f32.mrf.mxu1  ;;  %v1785_v31 = vpop.f32.mrf.mxu3 }
 0x317   :  { %v1186_v17 = vpop.f32.mrf.mxu2 }
 0x318   :  { %v1213_v39 = vadd.f32 %v1186_v17, %v975_v45  ;;  %v1980_v34 = vpop.f32.mrf.mxu0 }
 0x31a   :  { %v7204_v61 = vadd.f32 %v1414_v14, %v1213_v39  ;;  %v1427_v1 = vpop.f32.mrf.mxu1  ;;  %v1787_v14 = vpop.f32.mrf.mxu3 }
 0x31b   :  { %v1797_v63 = vpack.c.bf16 %v1787_v14, %v1785_v31  ;;  %v1569_v31 = vpack.c.bf16 %v1559_v44, %v7184_v20 }
 0x31c   :  { %5199 = vmatmul.msk.bf16.gmra.mxu2 %vm833_vm1, %v1567_v35  ;;  %v985_v35 = vadd.f32 %v6954_v54, %v7092_v59  ;;  %v988_v54 = vadd.f32 %v6960_v62, %v7100_v58 }
 0x31d   :  { %5269 = vmatmul.msk.bf16.gmra.mxu1 %vm833_vm1, %v1797_v63  ;;  %2438 = vmatmul.bf16.gmra.mxu0 %v5772_v47 }
 0x31f   :  { %v1189_v33 = vpop.f32.mrf.mxu2 }
 0x320   :  { %v1214_v55 = vadd.f32 %v1189_v33, %v978_v18  ;;  %v7225_v2 = vpop.f32.mrf.mxu0  ;;  %v5773_v33 = vld [vmem:[%s8437_s1 + $0x1d0] sm:$0xff] }
 0x322   :  { %v7214_v28 = vadd.f32 %v1417_v60, %v1214_v55  ;;  %v1429_v60 = vpop.f32.mrf.mxu1  ;;  %v2206_v25 = vpop.f32.mrf.mxu3 }
 0x327   :  { %v1191_v40 = vpop.f32.mrf.mxu2 }
 0x328   :  { %v1215_v36 = vadd.f32 %v1191_v40, %v980_v16  ;;  %v1985_v21 = vpop.f32.mrf.mxu0  ;;  %v990_v16 = vadd.f32 %v6969_v8, %v7106_v52 }
 0x329   :  { %v2019_v5 = vpack.c.bf16 %v1985_v21, %v7225_v2  ;;  %v6222_v2 = vld [vmem:[%s8433_s15] ss:$0 sm:$0xff] }
 0x32a   :  { %v7223_v56 = vadd.f32 %v1419_v26, %v1215_v36  ;;  %v1848_v45 = vpop.f32.mrf.mxu1  ;;  %v2208_v17 = vpop.f32.mrf.mxu3 }
 0x32b   :  { %v2246_v39 = vpack.c.bf16 %v2208_v17, %v2206_v25 }
 0x32c   :  { %5200 = vmatmul.msk.bf16.gmra.mxu2 %vm833_vm1, %v1568_v46  ;;  %v2018_v46 = vpack.c.bf16 %v1980_v34, %v7206_v10 }
 0x32d   :  { %5398 = vmatmul.msk.bf16.vlgmr.msrb.gmra.mxu1 %vm833_vm1, %v2246_v39  ;;  %2443 = vmatmul.bf16.gmra.mxu0 %v5773_v33 }
 0x32f   :  { %v1194_v53 = vpop.f32.mrf.mxu2 }
 0x330   :  { %v1216_v26 = vadd.f32 %v1194_v53, %v983_v13  ;;  %v7247_v18 = vpop.f32.mrf.mxu0  ;;  %v6221_v53 = vld [vmem:[%s8432_s14] ss:$0 sm:$0xff] }
 0x331   :  { %4381 = vrot.lane.b32.xlu1 %v6221_v53, %s6293_s10 }
 0x332   :  { %v7239_v32 = vadd.f32 %v1422_v15, %v1216_v26  ;;  %v2211_v15 = vpop.f32.mrf.mxu3  ;;  %v1850_v55 = vpop.f32.mrf.mxu1 }
 0x337   :  { %v1196_v9 = vpop.f32.mrf.mxu2 }
 0x338   :  { %v1217_v41 = vadd.f32 %v1196_v9, %v985_v35  ;;  %v1990_v20 = vpop.f32.mrf.mxu0  ;;  %v5775_v9 = vld [vmem:[%s8437_s1 + $0x1e0] sm:$0xff] }
 0x339   :  { %4400 = vrot.lane.b32.xlu1 %v6222_v2, %s6293_s10 }
 0x33a   :  { %v7245_v27 = vadd.f32 %v1424_v38, %v1217_v41  ;;  %v2213_v44 = vpop.f32.mrf.mxu3  ;;  %v1853_v40 = vpop.f32.mrf.mxu1 }
 0x33b   :  { %v2247_v38 = vpack.c.bf16 %v2213_v44, %v2211_v15  ;;  %v2020_v44 = vpack.c.bf16 %v1990_v20, %v7247_v18 }
 0x33c   :  { %5201 = vmatmul.msk.bf16.gmra.mxu2 %vm833_vm1, %v1569_v31 }
 0x33d   :  { %5399 = vmatmul.msk.bf16.gmra.mxu1 %vm833_vm1, %v2247_v38 }
 0x33f   :  { %v1199_v59 = vpop.f32.mrf.mxu2 }
 0x340   :  { %v1218_v14 = vadd.f32 %v1199_v59, %v988_v54  ;;  %v7263_v62 = vpop.f32.mrf.mxu0 }
 0x342   :  { %v7255_v63 = vadd.f32 %v1427_v1, %v1218_v14  ;;  %v2216_v58 = vpop.f32.mrf.mxu3  ;;  %v5774_v1 = vld [vmem:[%s8437_s1 + $0x1d8] sm:$0xff]  ;;  %v1855_v47 = vpop.f32.mrf.mxu1 }
 0x343   :  { %2448 = vmatmul.bf16.gmra.mxu0 %v5774_v1 }
 0x347   :  { %v1201_v36 = vpop.f32.mrf.mxu2 }
 0x348   :  { %v1219_v57 = vadd.f32 %v1201_v36, %v990_v16  ;;  %v1995_v13 = vpop.f32.mrf.mxu0 }
 0x34a   :  { %v7261_v25 = vadd.f32 %v1429_v60, %v1219_v57  ;;  %v2218_v10 = vpop.f32.mrf.mxu3  ;;  %v7275_v60 = vld [vmem:[%s8430_s8] ss:$0 sm:$0xff]  ;;  %v1858_v17 = vpop.f32.mrf.mxu1 }
 0x34b   :  { %v2248_v34 = vpack.c.bf16 %v2218_v10, %v2216_v58  ;;  %2654 = vrot.lane.b32.xlu0 %v7275_v60, %s6293_s10 }
 0x34c   :  { %5330 = vmatmul.msk.bf16.vlgmr.msrb.gmra.mxu2 %vm833_vm1, %v2018_v46 }
 0x34d   :  { %5400 = vmatmul.msk.bf16.gmra.mxu1 %vm833_vm1, %v2248_v34 }
 0x34f   :  { %v1620_v8 = vpop.f32.mrf.mxu2 }
 0x350   :  { %v1660_v52 = vadd.f32 %v1620_v8, %v7116_v23  ;;  %v1998_v39 = vpop.f32.mrf.mxu0 }
 0x352   :  { %v7270_v6 = vadd.f32 %v1848_v45, %v1660_v52  ;;  %v2221_v35 = vpop.f32.mrf.mxu3 }
 0x353   :  { %2453 = vmatmul.bf16.gmra.mxu0 %v5775_v9 }
 0x357   :  { %v1622_v26 = vpop.f32.mrf.mxu2 }
 0x358   :  { %v1661_v23 = vadd.f32 %v1622_v26, %v7125_v4  ;;  %v7293_v4 = vld [vmem:[%s8431_s9] ss:$0 sm:$0xff]  ;;  %v2000_v15 = vpop.f32.mrf.mxu0 }
 0x359   :  { %2673 = vrot.lane.b32.xlu0 %v7293_v4, %s6293_s10  ;;  %v2022_v2 = vpack.c.bf16 %v2000_v15, %v1998_v39 }
 0x35a   :  { %v7284_v45 = vadd.f32 %v1850_v55, %v1661_v23  ;;  %v2223_v33 = vpop.f32.mrf.mxu3  ;;  %v1860_v55 = vpop.f32.mrf.mxu1 }
 0x35b   :  { %v2249_v54 = vpack.c.bf16 %v2223_v33, %v2221_v35  ;;  %v5778_v33 = vld [vmem:[%s8437_s1 + $0x1f8] sm:$0xff] }
 0x35c   :  { %5331 = vmatmul.msk.bf16.gmra.mxu2 %vm833_vm1, %v2019_v5 }
 0x35d   :  { %5401 = vmatmul.msk.bf16.gmra.mxu1 %vm833_vm1, %v2249_v54 }
 0x35f   :  { %v1625_v21 = vpop.f32.mrf.mxu2 }
 0x360   :  { %v1662_v41 = vadd.f32 %v1625_v21, %v7135_v3  ;;  %v2003_v16 = vpop.f32.mrf.mxu0 }
 0x362   :  { %v7300_v31 = vadd.f32 %v1853_v40, %v1662_v41  ;;  %v2226_v3 = vpop.f32.mrf.mxu3  ;;  %v5776_v40 = vld [vmem:[%s8437_s1 + $0x1e8] sm:$0xff]  ;;  %v1863_v36 = vpop.f32.mrf.mxu1 }
 0x363   :  { %2458 = vmatmul.bf16.gmra.mxu0 %v5776_v40 }
 0x367   :  { %v1627_v59 = vpop.f32.mrf.mxu2 }
 0x368   :  { %v1663_v14 = vadd.f32 %v1627_v59, %v7144_v37  ;;  %v2005_v37 = vpop.f32.mrf.mxu0 }
 0x36a   :  { %v7305_v38 = vadd.f32 %v1855_v47, %v1663_v14  ;;  %v2228_v1 = vpop.f32.mrf.mxu3  ;;  %v1865_v52 = vpop.f32.mrf.mxu1  ;;  %v2021_v47 = vpack.c.bf16 %v1995_v13, %v7263_v62 }
 0x36b   :  { %v2250_v18 = vpack.c.bf16 %v2228_v1, %v2226_v3 }
 0x36c   :  { %5332 = vmatmul.msk.bf16.gmra.mxu2 %vm833_vm1, %v2020_v44 }
 0x36d   :  { %5402 = vmatmul.msk.bf16.gmra.mxu1 %vm833_vm1, %v2250_v18 }
 0x36f   :  { %v1630_v57 = vpop.f32.mrf.mxu2 }
 0x370   :  { %v1664_v46 = vadd.f32 %v1630_v57, %v7154_v22  ;;  %v2008_v34 = vpop.f32.mrf.mxu0  ;;  %v5777_v22 = vld [vmem:[%s8437_s1 + $0x1f0] sm:$0xff]  ;;  %v2023_v57 = vpack.c.bf16 %v2005_v37, %v2003_v16  ;;  %v5779_v16 = vld [vmem:[%s8436_s7 + $0x80] sm:$0xff] }
 0x372   :  { %v7312_v58 = vadd.f32 %v1858_v17, %v1664_v46  ;;  %v2231_v53 = vpop.f32.mrf.mxu3 }
 0x373   :  { %2463 = vmatmul.bf16.gmra.mxu0 %v5777_v22 }
 0x377   :  { %v1632_v20 = vpop.f32.mrf.mxu2 }
 0x378   :  { %v1665_v8 = vadd.f32 %v1632_v20, %v7163_v24  ;;  %v1868_v24 = vpop.f32.mrf.mxu1  ;;  %v2010_v17 = vpop.f32.mrf.mxu0 }
 0x379   :  { %v2024_v37 = vpack.c.bf16 %v2010_v17, %v2008_v34 }
 0x37a   :  { %v7317_v10 = vadd.f32 %v1860_v55, %v1665_v8  ;;  %v2233_v35 = vpop.f32.mrf.mxu3  ;;  %v5780_v55 = vld [vmem:[%s8436_s7 + $0x88] sm:$0xff] }
 0x37b   :  { %v2251_v62 = vpack.c.bf16 %v2233_v35, %v2231_v53  ;;  %2529 = vmatpush.bf16.msra.mxu2 %v5780_v55 }
 0x37c   :  { %5333 = vmatmul.msk.bf16.gmra.mxu2 %vm833_vm1, %v2021_v47 }
 0x37d   :  { %5403 = vmatmul.msk.bf16.gmra.mxu1 %vm833_vm1, %v2251_v62 }
 0x37f   :  { %v1635_v26 = vpop.f32.mrf.mxu2  ;;  %2530 = vmatpush.bf16.msra.mxu2 %v5779_v16 }
 0x380   :  { %v1666_v23 = vadd.f32 %v1635_v26, %v7173_v19  ;;  %v7334_v19 = vpop.f32.mrf.mxu1  ;;  %v2013_v54 = vpop.f32.mrf.mxu0 }
 0x382   :  { %v7324_v5 = vadd.f32 %v1863_v36, %v1666_v23  ;;  %v2236_v41 = vpop.f32.mrf.mxu3 }
 0x383   :  { %2468 = vmatmul.bf16.gmra.mxu0 %v5778_v33 }
 0x387   :  { %v1637_v13 = vpop.f32.mrf.mxu2 }
 0x388   :  { %v1667_v9 = vadd.f32 %v1637_v13, %v7182_v7  ;;  %v1873_v44 = vpop.f32.mrf.mxu1  ;;  %v2015_v40 = vpop.f32.mrf.mxu0 }
 0x38a   :  { %v7328_v21 = vadd.f32 %v1865_v52, %v1667_v9  ;;  %v2238_v59 = vpop.f32.mrf.mxu3  ;;  %v2025_v9 = vpack.c.bf16 %v2015_v40, %v2013_v54 }
 0x38b   :  { %v2252_v14 = vpack.c.bf16 %v2238_v59, %v2236_v41 }
 0x38c   :  { %5334 = vmatmul.msk.bf16.gmra.mxu2 %vm833_vm1, %v2022_v2 }
 0x38d   :  { %5404 = vmatmul.msk.bf16.gmra.mxu1 %vm833_vm1, %v2252_v14 }
 0x38f   :  { %v1640_v7 = vpop.f32.mrf.mxu2 }
 0x390   :  { %v1668_v39 = vadd.f32 %v1640_v7, %v7195_v0  ;;  %v7348_v0 = vpop.f32.mrf.mxu1  ;;  %v2434_v20 = vpop.f32.mrf.mxu0 }
 0x392   :  { %v7340_v15 = vadd.f32 %v1868_v24, %v1668_v39  ;;  %v2241_v46 = vpop.f32.mrf.mxu3 }
 0x397   :  { %v1642_v3 = vpop.f32.mrf.mxu2 }
 0x398   :  { %v7344_v36 = vadd.f32 %v1642_v3, %v7204_v61  ;;  %v1878_v22 = vpop.f32.mrf.mxu1 }
 0x39a   :  { %v2243_v52 = vpop.f32.mrf.mxu3 }
 0x39b   :  { %v2253_v47 = vpack.c.bf16 %v2243_v52, %v2241_v46 }
 0x39c   :  { %5335 = vmatmul.msk.bf16.gmra.mxu2 %vm833_vm1, %v2023_v57 }
 0x39d   :  { %5405 = vmatmul.msk.bf16.gmra.mxu1 %vm833_vm1, %v2253_v47 }
 0x39f   :  { %v1645_v1 = vpop.f32.mrf.mxu2 }
 0x3a0   :  { %v1670_v18 = vadd.f32 %v1645_v1, %v7214_v28  ;;  %v2436_v28 = vpop.f32.mrf.mxu0  ;;  %v7363_v35 = vpop.f32.mrf.mxu1 }
 0x3a1   :  { %v2474_v39 = vpack.c.bf16 %v2436_v28, %v2434_v20 }
 0x3a2   :  { %v7350_v8 = vadd.f32 %v1873_v44, %v1670_v18 }
 0x3a7   :  { %v1647_v53 = vpop.f32.mrf.mxu2 }
 0x3a8   :  { %v7354_v61 = vadd.f32 %v1647_v53, %v7223_v56  ;;  %v2439_v62 = vpop.f32.mrf.mxu0  ;;  %v1883_v34 = vpop.f32.mrf.mxu1 }
 0x3ac   :  { %5336 = vmatmul.msk.bf16.gmra.mxu2 %vm833_vm1, %v2024_v37 }
 0x3af   :  { %v1650_v26 = vpop.f32.mrf.mxu2 }
 0x3b0   :  { %v1672_v23 = vadd.f32 %v1650_v26, %v7239_v32  ;;  %v2441_v2 = vpop.f32.mrf.mxu0 }
 0x3b2   :  { %v7361_v24 = vadd.f32 %v1878_v22, %v1672_v23 }
 0x3b7   :  { %v1652_v56 = vpop.f32.mrf.mxu2 }
 0x3b8   :  { %v7366_v13 = vadd.f32 %v1652_v56, %v7245_v27  ;;  %v2444_v7 = vpop.f32.mrf.mxu0 }
 0x3bc   :  { %5337 = vmatmul.msk.bf16.gmra.mxu2 %vm833_vm1, %v2025_v9 }
 0x3bf   :  { %v1655_v17 = vpop.f32.mrf.mxu2 }
 0x3c0   :  { %v1674_v41 = vadd.f32 %v1655_v17, %v7255_v63  ;;  %v2446_v59 = vpop.f32.mrf.mxu0  ;;  %v2475_v63 = vpack.c.bf16 %v2441_v2, %v2439_v62  ;;  %v2716_v17 = vld [vmem:[%s8469_s2 + $0x8] sm:$0xf] }
 0x3c2   :  { %v7370_v33 = vadd.f32 %v1883_v34, %v1674_v41 }
 0x3c7   :  { %v1657_v32 = vpop.f32.mrf.mxu2 }
 0x3c8   :  { %v7373_v55 = vadd.f32 %v1657_v32, %v7261_v25  ;;  %v2449_v3 = vpop.f32.mrf.mxu0 }
 0x3cc   :  { %5466 = vmatmul.msk.bf16.vlgmr.msra.gmra.mxu2 %vm833_vm1, %v2474_v39  ;;  %v5781_v39 = vld [vmem:[%s8469_s2] sm:$0xff] }
 0x3cd   :  { %2832 = vmatpush.bf16.msra.mxu1 %v5781_v39 }
 0x3cf   :  { %v2076_v27 = vpop.f32.mrf.mxu2 }
 0x3d0   :  { %v7377_v54 = vadd.f32 %v2076_v27, %v7270_v6  ;;  %v2451_v46 = vpop.f32.mrf.mxu0  ;;  %v2476_v6 = vpack.c.bf16 %v2446_v59, %v2444_v7 }
 0x3d1   :  { %v2477_v53 = vpack.c.bf16 %v2451_v46, %v2449_v3  ;;  %v2593_v3 = vmul.f32 %v7275_v60, %v6452_v12 }
 0x3d7   :  { %v2078_v14 = vpop.f32.mrf.mxu2 }
 0x3d8   :  { %v7380_v44 = vadd.f32 %v2078_v14, %v7284_v45  ;;  %v2454_v20 = vpop.f32.mrf.mxu0 }
 0x3dc   :  { %5467 = vmatmul.msk.bf16.gmra.mxu2 %vm833_vm1, %v2475_v63  ;;  %v2592_v63 = vmul.f32 %v7275_v60, %v6450_v11 }
 0x3de   :  { %v2612_v46 = vadd.f32 %v7293_v4, %v2592_v63 }
 0x3df   :  { %v2081_v40 = vpop.f32.mrf.mxu2 }
 0x3e0   :  { %v7384_v25 = vadd.f32 %v2081_v40, %v7300_v31  ;;  %v2456_v31 = vpop.f32.mrf.mxu0 }
 0x3e7   :  { %v2083_v57 = vpop.f32.mrf.mxu2 }
 0x3e8   :  { %v7387_v1 = vadd.f32 %v2083_v57, %v7305_v38  ;;  %v2459_v37 = vpop.f32.mrf.mxu0 }
 0x3ec   :  { %5468 = vmatmul.msk.bf16.gmra.mxu2 %vm833_vm1, %v2476_v6  ;;  %v2613_v6 = vadd.f32 %v7293_v4, %v2593_v3 }
 0x3ef   :  { %v2086_v18 = vpop.f32.mrf.mxu2 }
 0x3f0   :  { %v7391_v45 = vadd.f32 %v2086_v18, %v7312_v58  ;;  %v2478_v58 = vpack.c.bf16 %v2456_v31, %v2454_v20  ;;  %v2461_v23 = vpop.f32.mrf.mxu0 }
 0x3f1   :  { %v2479_v9 = vpack.c.bf16 %v2461_v23, %v2459_v37 }
 0x3f7   :  { %v2088_v52 = vpop.f32.mrf.mxu2 }
 0x3f8   :  { %v7394_v47 = vadd.f32 %v2088_v52, %v7317_v10  ;;  %v2464_v56 = vpop.f32.mrf.mxu0  ;;  %v2629_v52 = vmax.f32 %v2613_v6, 0.0 }
 0x3fc   :  { %5469 = vmatmul.msk.bf16.gmra.mxu2 %vm833_vm1, %v2477_v53 }
 0x3ff   :  { %v2091_v16 = vpop.f32.mrf.mxu2 }
 0x400   :  { %v7398_v38 = vadd.f32 %v2091_v16, %v7324_v5  ;;  %v7410_v5 = vpop.f32.mrf.mxu1  ;;  %v2466_v2 = vpop.f32.mrf.mxu0 }
 0x401   :  { %v2480_v7 = vpack.c.bf16 %v2466_v2, %v2464_v56 }
 0x407   :  { %v2093_v22 = vpop.f32.mrf.mxu2 }
 0x408   :  { %v7401_v28 = vadd.f32 %v2093_v22, %v7328_v21  ;;  %v2304_v32 = vpop.f32.mrf.mxu1 }
 0x40c   :  { %5470 = vmatmul.msk.bf16.gmra.mxu2 %vm833_vm1, %v2478_v58  ;;  %v2594_v58 = vmul.f32 %v7275_v60, %v6477_v42 }
 0x40e   :  { %v2614_v23 = vadd.f32 %v7293_v4, %v2594_v58 }
 0x40f   :  { %v2096_v26 = vpop.f32.mrf.mxu2 }
 0x410   :  { %v7405_v10 = vadd.f32 %v2096_v26, %v7340_v15  ;;  %v2744_v15 = vsel %vm2742_vm2, %v2716_v17, 0  ;;  %v2306_v14 = vpop.f32.mrf.mxu1  ;;  %v2595_v26 = vmul.f32 %v7275_v60, %v6479_v43 }
 0x411   :  { %2753 = vmatpush.bf16.msra.mxu3 %v2744_v15 }
 0x412   :  { %v2615_v56 = vadd.f32 %v7293_v4, %v2595_v26 }
 0x414   :  { %v2631_v17 = vmax.f32 %v2615_v56, 0.0 }
 0x417   :  { %v7407_v62 = vpop.f32.mrf.mxu2 }
 0x418   :  { %v2309_v20 = vpop.f32.mrf.mxu1 }
 0x41c   :  { %5471 = vmatmul.msk.bf16.gmra.mxu2 %vm833_vm1, %v2479_v9  ;;  %v7449_v9 = vpop.permute.xlu1 %4381 }
 0x41f   :  { %v2101_v34 = vpop.f32.mrf.mxu2 }
 0x420   :  { %v7413_v21 = vadd.f32 %v2101_v34, %v7350_v8  ;;  %v2469_v8 = vpop.f32.mrf.mxu0  ;;  %v2311_v37 = vpop.f32.mrf.mxu1 }
 0x421   :  { %v7451_v34 = vpop.permute.xlu0 %2654 }
 0x427   :  { %v7419_v41 = vpop.f32.mrf.mxu2 }
 0x428   :  { %v2471_v40 = vpop.f32.mrf.mxu0  ;;  %v7454_v39 = vpop.f32.mrf.mxu1 }
 0x429   :  { %v2481_v18 = vpack.c.bf16 %v2471_v40, %v2469_v8  ;;  %v7460_v40 = vpop.permute.xlu1 %4400 }
 0x42c   :  { %5472 = vmatmul.msk.bf16.gmra.mxu2 %vm833_vm1, %v2480_v7  ;;  %v2344_v7 = vadd.f32 %v2304_v32, %v7377_v54  ;;  %v2596_v54 = vmul.f32 %v7275_v60, %v6530_v50  ;;  %v2597_v32 = vmul.f32 %v7275_v60, %v6532_v51 }
 0x42e   :  { %v2617_v58 = vadd.f32 %v7293_v4, %v2597_v32  ;;  %v2347_v32 = vadd.f32 %v2311_v37, %v7387_v1 }
 0x42f   :  { %v2106_v27 = vpop.f32.mrf.mxu2 }
 0x430   :  { %v7426_v59 = vadd.f32 %v2106_v27, %v7361_v24  ;;  %v2628_v24 = vmax.f32 %v2612_v46, 0.0  ;;  %v2345_v27 = vadd.f32 %v2306_v14, %v7380_v44  ;;  %v7462_v46 = vpop.permute.xlu0 %2673 }
 0x432   :  { %v2644_v31 = vpack.c.bf16 %v2629_v52, %v2628_v24 }
 0x434   :  { %5486 = vmatmul.msk.bf16.vlgmr.msra.gmra.mxu1 %vm553_vm0, %v2644_v31  ;;  %v2616_v31 = vadd.f32 %v7293_v4, %v2596_v54 }
 0x436   :  { %v2632_v56 = vmax.f32 %v2616_v31, 0.0 }
 0x437   :  { %v7432_v57 = vpop.f32.mrf.mxu2 }
 0x43c   :  { %5473 = vmatmul.msk.bf16.gmra.mxu2 %vm833_vm1, %v2481_v18 }
 0x43f   :  { %v2111_v53 = vpop.f32.mrf.mxu2 }
 0x440   :  { %v7438_v16 = vadd.f32 %v2111_v53, %v7370_v33  ;;  %v2630_v33 = vmax.f32 %v2614_v23, 0.0  ;;  %v2316_v53 = vpop.f32.mrf.mxu1 }
 0x442   :  { %v2645_v15 = vpack.c.bf16 %v2631_v17, %v2630_v33  ;;  %v2633_v33 = vmax.f32 %v2617_v58, 0.0 }
 0x444   :  { %5487 = vmatmul.msk.bf16.gmra.mxu1 %vm553_vm0, %v2645_v15 }
 0x447   :  { %v7441_v22 = vpop.f32.mrf.mxu2 }
 0x448   :  { %v2319_v54 = vpop.f32.mrf.mxu1 }
 0x44f   :  { %v2532_v2 = vpop.f32.mrf.mxu2 }
 0x450   :  { %v2572_v8 = vadd.f32 %v2532_v2, %v2344_v7 }
 0x452   :  { %v2657_v63 = vmul.f32 %v7451_v34, %v2572_v8  ;;  %v4384_v3 = vmul.f32 %v7449_v9, %v2572_v8 }
 0x454   :  { %v2676_v44 = vadd.f32 %v7462_v46, %v2657_v63  ;;  %v4403_v52 = vadd.f32 %v7460_v40, %v4384_v3  ;;  %v2346_v63 = vadd.f32 %v2309_v20, %v7384_v25  ;;  %v2598_v25 = vmul.f32 %v7275_v60, %v6568_v48 }
 0x455   :  { %v2599_v20 = vmul.f32 %v7275_v60, %v6570_v49 }
 0x456   :  { %v2692_v17 = vmax.f32 %v2676_v44, 0.0  ;;  %v4419_v15 = vmax.f32 %v4403_v52, 0.0  ;;  %v2618_v37 = vadd.f32 %v7293_v4, %v2598_v25 }
 0x457   :  { %v2534_v6 = vpop.f32.mrf.mxu2 }
 0x458   :  { %v2573_v18 = vadd.f32 %v2534_v6, %v2345_v27  ;;  %v2646_v27 = vpack.c.bf16 %v2633_v33, %v2632_v56 }
 0x45a   :  { %v2658_v24 = vmul.f32 %v7451_v34, %v2573_v18  ;;  %v4385_v14 = vmul.f32 %v7449_v9, %v2573_v18  ;;  %5488 = vmatmul.msk.bf16.gmra.mxu1 %vm553_vm0, %v2646_v27 }
 0x45c   :  { %v2677_v26 = vadd.f32 %v7462_v46, %v2658_v24  ;;  %v4404_v23 = vadd.f32 %v7460_v40, %v4385_v14 }
 0x45e   :  { %v2693_v2 = vmax.f32 %v2677_v26, 0.0  ;;  %v4420_v7 = vmax.f32 %v4404_v23, 0.0  ;;  %v2619_v23 = vadd.f32 %v7293_v4, %v2599_v20 }
 0x45f   :  { %v2537_v8 = vpop.f32.mrf.mxu2 }
 0x460   :  { %v2708_v3 = vpack.c.bf16 %v2693_v2, %v2692_v17  ;;  %v7477_v6 = vpack.c.bf16 %v4420_v7, %v4419_v15  ;;  %v2574_v18 = vadd.f32 %v2537_v8, %v2346_v63  ;;  %v2634_v17 = vmax.f32 %v2618_v37, 0.0  ;;  %v2321_v63 = vpop.f32.mrf.mxu1 }
 0x461   :  { %v2635_v2 = vmax.f32 %v2619_v23, 0.0 }
 0x462   :  { %5474 = vmatmul.msk.bf16.vlgmr.msra.gmra.mxu3 %vm2717_vm3, %v2708_v3  ;;  %v2659_v24 = vmul.f32 %v7451_v34, %v2574_v18  ;;  %v4386_v44 = vmul.f32 %v7449_v9, %v2574_v18 }
 0x463   :  { %v2647_v18 = vpack.c.bf16 %v2635_v2, %v2634_v17 }
 0x464   :  { %v2678_v31 = vadd.f32 %v7462_v46, %v2659_v24  ;;  %v4405_v58 = vadd.f32 %v7460_v40, %v4386_v44 }
 0x466   :  { %v2694_v15 = vmax.f32 %v2678_v31, 0.0  ;;  %v4421_v7 = vmax.f32 %v4405_v58, 0.0 }
 0x467   :  { %v2539_v14 = vpop.f32.mrf.mxu2 }
 0x468   :  { %v2575_v52 = vadd.f32 %v2539_v14, %v2347_v32  ;;  %v2348_v32 = vadd.f32 %v7454_v39, %v7391_v45  ;;  %v2600_v45 = vmul.f32 %v7275_v60, %v6600_v29  ;;  %v2601_v39 = vmul.f32 %v7275_v60, %v6602_v30 }
 0x46a   :  { %v2660_v26 = vmul.f32 %v7451_v34, %v2575_v52  ;;  %v4387_v1 = vmul.f32 %v7449_v9, %v2575_v52  ;;  %5489 = vmatmul.msk.bf16.gmra.mxu1 %vm553_vm0, %v2647_v18  ;;  %v2349_v52 = vadd.f32 %v2316_v53, %v7394_v47  ;;  %v2620_v53 = vadd.f32 %v7293_v4, %v2600_v45 }
 0x46c   :  { %v2679_v56 = vadd.f32 %v7462_v46, %v2660_v26  ;;  %v4406_v33 = vadd.f32 %v7460_v40, %v4387_v1  ;;  %v2324_v26 = vpop.f32.mrf.mxu1  ;;  %v2636_v2 = vmax.f32 %v2620_v53, 0.0 }
 0x46e   :  { %v2695_v8 = vmax.f32 %v2679_v56, 0.0  ;;  %v4422_v27 = vmax.f32 %v4406_v33, 0.0  ;;  %v2621_v56 = vadd.f32 %v7293_v4, %v2601_v39 }
 0x46f   :  { %v2542_v3 = vpop.f32.mrf.mxu2 }
 0x470   :  { %v2709_v24 = vpack.c.bf16 %v2695_v8, %v2694_v15  ;;  %v7498_v44 = vpack.c.bf16 %v4422_v27, %v4421_v7  ;;  %v2576_v14 = vadd.f32 %v2542_v3, %v2348_v32  ;;  %v2637_v15 = vmax.f32 %v2621_v56, 0.0 }
 0x472   :  { %5475 = vmatmul.msk.bf16.gmra.mxu3 %vm2717_vm3, %v2709_v24  ;;  %v2661_v25 = vmul.f32 %v7451_v34, %v2576_v14  ;;  %v4388_v20 = vmul.f32 %v7449_v9, %v2576_v14  ;;  %v2648_v32 = vpack.c.bf16 %v2637_v15, %v2636_v2  ;;  %v2350_v24 = vadd.f32 %v2319_v54, %v7398_v38  ;;  %v8471_v54 = vld [vmem:[#allocation3_spill] sm:$0xff] }
 0x474   :  { %v2680_v1 = vadd.f32 %v7462_v46, %v2661_v25  ;;  %v4407_v37 = vadd.f32 %v7460_v40, %v4388_v20  ;;  %v2326_v20 = vpop.f32.mrf.mxu1 }
 0x476   :  { %v2696_v7 = vmax.f32 %v2680_v1, 0.0  ;;  %v4423_v8 = vmax.f32 %v4407_v37, 0.0  ;;  %v8470_v37 = vld [vmem:[#allocation2_spill] sm:$0xff] }
 0x477   :  { %v2544_v31 = vpop.f32.mrf.mxu2  ;;  %v2602_v38 = vmul.f32 %v7275_v60, %v8470_v37 }
 0x478   :  { %v2577_v58 = vadd.f32 %v2544_v31, %v2349_v52  ;;  %v2351_v31 = vadd.f32 %v2321_v63, %v7401_v28 }
 0x479   :  { %v2622_v63 = vadd.f32 %v7293_v4, %v2602_v38 }
 0x47a   :  { %v2662_v23 = vmul.f32 %v7451_v34, %v2577_v58  ;;  %v4389_v47 = vmul.f32 %v7449_v9, %v2577_v58  ;;  %5490 = vmatmul.msk.bf16.gmra.mxu1 %vm553_vm0, %v2648_v32 }
 0x47c   :  { %v2681_v33 = vadd.f32 %v7462_v46, %v2662_v23  ;;  %v4408_v17 = vadd.f32 %v7460_v40, %v4389_v47  ;;  %v2603_v23 = vmul.f32 %v7275_v60, %v8471_v54  ;;  %v2329_v15 = vpop.f32.mrf.mxu1 }
 0x47e   :  { %v2697_v27 = vmax.f32 %v2681_v33, 0.0  ;;  %v4424_v3 = vmax.f32 %v4408_v17, 0.0  ;;  %v2623_v33 = vadd.f32 %v7293_v4, %v2603_v23 }
 0x47f   :  { %v2547_v18 = vpop.f32.mrf.mxu2 }
 0x480   :  { %v2710_v14 = vpack.c.bf16 %v2697_v27, %v2696_v7  ;;  %v7518_v52 = vpack.c.bf16 %v4424_v3, %v4423_v8  ;;  %v2578_v25 = vadd.f32 %v2547_v18, %v2350_v24  ;;  %v2638_v7 = vmax.f32 %v2622_v63, 0.0 }
 0x481   :  { %v2639_v8 = vmax.f32 %v2623_v33, 0.0 }
 0x482   :  { %5476 = vmatmul.msk.bf16.gmra.mxu3 %vm2717_vm3, %v2710_v14  ;;  %v2663_v58 = vmul.f32 %v7451_v34, %v2578_v25  ;;  %v4390_v45 = vmul.f32 %v7449_v9, %v2578_v25  ;;  %v1897_v25 = vadd.f32 %v7334_v19, %v7344_v36  ;;  %v8472_v36 = vld [vmem:[#allocation4_spill] sm:$0xff] }
 0x483   :  { %v2649_v14 = vpack.c.bf16 %v2639_v8, %v2638_v7 }
 0x484   :  { %v2682_v47 = vadd.f32 %v7462_v46, %v2663_v58  ;;  %v4409_v53 = vadd.f32 %v7460_v40, %v4390_v45 }
 0x486   :  { %v2698_v27 = vmax.f32 %v2682_v47, 0.0  ;;  %v4425_v3 = vmax.f32 %v4409_v53, 0.0  ;;  %v2331_v53 = vpop.f32.mrf.mxu1 }
 0x487   :  { %v2549_v39 = vpop.f32.mrf.mxu2 }
 0x488   :  { %v2579_v1 = vadd.f32 %v2549_v39, %v2351_v31  ;;  %v2352_v31 = vadd.f32 %v2324_v26, %v7405_v10  ;;  %v2125_v39 = vadd.f32 %v7407_v62, %v1897_v25  ;;  %v2604_v10 = vmul.f32 %v7275_v60, %v8472_v36  ;;  %v8473_v26 = vld [vmem:[#allocation5_spill] sm:$0xff] }
 0x48a   :  { %v2664_v56 = vmul.f32 %v7451_v34, %v2579_v1  ;;  %v4391_v28 = vmul.f32 %v7449_v9, %v2579_v1  ;;  %5491 = vmatmul.msk.bf16.gmra.mxu1 %vm553_vm0, %v2649_v14  ;;  %v2353_v38 = vadd.f32 %v2326_v20, %v2125_v39  ;;  %v2354_v39 = vadd.f32 %v2329_v15, %v7413_v21  ;;  %v8475_v15 = vld [vmem:[#allocation7_spill] sm:$0xff] }
 0x48c   :  { %v2683_v17 = vadd.f32 %v7462_v46, %v2664_v56  ;;  %v4410_v2 = vadd.f32 %v7460_v40, %v4391_v28  ;;  %v2605_v28 = vmul.f32 %v7275_v60, %v8473_v26 }
 0x48e   :  { %v2699_v18 = vmax.f32 %v2683_v17, 0.0  ;;  %v4426_v32 = vmax.f32 %v4410_v2, 0.0  ;;  %v2624_v17 = vadd.f32 %v7293_v4, %v2604_v10  ;;  %v2625_v2 = vadd.f32 %v7293_v4, %v2605_v28 }
 0x48f   :  { %v2552_v24 = vpop.f32.mrf.mxu2 }
 0x490   :  { %v2711_v58 = vpack.c.bf16 %v2699_v18, %v2698_v27  ;;  %v7540_v45 = vpack.c.bf16 %v4426_v32, %v4425_v3  ;;  %v2580_v1 = vadd.f32 %v2552_v24, %v2352_v31  ;;  %v2640_v27 = vmax.f32 %v2624_v17, 0.0 }
 0x491   :  { %v2641_v3 = vmax.f32 %v2625_v2, 0.0 }
 0x492   :  { %5477 = vmatmul.msk.bf16.gmra.mxu3 %vm2717_vm3, %v2711_v58  ;;  %v2665_v23 = vmul.f32 %v7451_v34, %v2580_v1  ;;  %v4392_v47 = vmul.f32 %v7449_v9, %v2580_v1  ;;  %v1899_v58 = vadd.f32 %v7348_v0, %v7354_v61  ;;  %v8474_v61 = vld [vmem:[#allocation6_spill] sm:$0xff] }
 0x493   :  { %v2650_v31 = vpack.c.bf16 %v2641_v3, %v2640_v27  ;;  %v2606_v21 = vmul.f32 %v7275_v60, %v8474_v61 }
 0x494   :  { %v2684_v63 = vadd.f32 %v7462_v46, %v2665_v23  ;;  %v4411_v62 = vadd.f32 %v7460_v40, %v4392_v47  ;;  %v2334_v23 = vpop.f32.mrf.mxu1  ;;  %v2127_v47 = vadd.f32 %v7419_v41, %v1899_v58  ;;  %v1901_v58 = vadd.f32 %v7363_v35, %v7366_v13 }
 0x495   :  { %v2626_v2 = vadd.f32 %v7293_v4, %v2606_v21 }
 0x496   :  { %v2700_v18 = vmax.f32 %v2684_v63, 0.0  ;;  %v4427_v32 = vmax.f32 %v4411_v62, 0.0  ;;  %v2607_v62 = vmul.f32 %v7275_v60, %v8475_v15 }
 0x497   :  { %v2554_v56 = vpop.f32.mrf.mxu2  ;;  %v2642_v3 = vmax.f32 %v2626_v2, 0.0 }
 0x498   :  { %v2581_v19 = vadd.f32 %v2554_v56, %v2353_v38 }
 0x49a   :  { %v2666_v33 = vmul.f32 %v7451_v34, %v2581_v19  ;;  %v4393_v20 = vmul.f32 %v7449_v9, %v2581_v19  ;;  %5492 = vmatmul.msk.bf16.gmra.mxu1 %vm553_vm0, %v2650_v31  ;;  %v2355_v19 = vadd.f32 %v2331_v53, %v2127_v47 }
 0x49c   :  { %v2685_v7 = vadd.f32 %v7462_v46, %v2666_v33  ;;  %v4412_v8 = vadd.f32 %v7460_v40, %v4393_v20  ;;  %v2336_v17 = vpop.f32.mrf.mxu1 }
 0x49e   :  { %v2701_v24 = vmax.f32 %v2685_v7, 0.0  ;;  %v4428_v14 = vmax.f32 %v4412_v8, 0.0  ;;  %v2627_v7 = vadd.f32 %v7293_v4, %v2607_v62  ;;  %v2129_v4 = vadd.f32 %v7432_v57, %v1901_v58 }
 0x49f   :  { %v2557_v25 = vpop.f32.mrf.mxu2 }
 0x4a0   :  { %v2712_v1 = vpack.c.bf16 %v2701_v24, %v2700_v18  ;;  %v7562_v38 = vpack.c.bf16 %v4428_v14, %v4427_v32  ;;  %v2582_v56 = vadd.f32 %v2557_v25, %v2354_v39  ;;  %v2643_v18 = vmax.f32 %v2627_v7, 0.0 }
 0x4a1   :  { %v2356_v39 = vadd.f32 %v2334_v23, %v7426_v59  ;;  %v1903_v7 = vadd.f32 %v7410_v5, %v7373_v55 }
 0x4a2   :  { %5478 = vmatmul.msk.bf16.gmra.mxu3 %vm2717_vm3, %v2712_v1  ;;  %v2667_v10 = vmul.f32 %v7451_v34, %v2582_v56  ;;  %v4394_v28 = vmul.f32 %v7449_v9, %v2582_v56  ;;  %v2651_v31 = vpack.c.bf16 %v2643_v18, %v2642_v3 }
 0x4a3   :  { %v2131_v18 = vadd.f32 %v7441_v22, %v1903_v7 }
 0x4a4   :  { %v2686_v33 = vadd.f32 %v7462_v46, %v2667_v10  ;;  %v4413_v41 = vadd.f32 %v7460_v40, %v4394_v28  ;;  %v2357_v10 = vadd.f32 %v2336_v17, %v2129_v4 }
 0x4a6   :  { %v2702_v60 = vmax.f32 %v2686_v33, 0.0  ;;  %v4429_v32 = vmax.f32 %v4413_v41, 0.0 }
 0x4a7   :  { %v2559_v63 = vpop.f32.mrf.mxu2 }
 0x4a8   :  { %v2583_v0 = vadd.f32 %v2559_v63, %v2355_v19  ;;  %v2339_v19 = vpop.f32.mrf.mxu1 }
 0x4aa   :  { %v2668_v20 = vmul.f32 %v7451_v34, %v2583_v0  ;;  %v4395_v53 = vmul.f32 %v7449_v9, %v2583_v0  ;;  %5493 = vmatmul.msk.bf16.gmra.mxu1 %vm553_vm0, %v2651_v31 }
 0x4ac   :  { %v2687_v8 = vadd.f32 %v7462_v46, %v2668_v20  ;;  %v4414_v27 = vadd.f32 %v7460_v40, %v4395_v53 }
 0x4ae   :  { %v2703_v24 = vmax.f32 %v2687_v8, 0.0  ;;  %v4430_v14 = vmax.f32 %v4414_v27, 0.0  ;;  %v2358_v8 = vadd.f32 %v2339_v19, %v7438_v16 }
 0x4af   :  { %v2562_v25 = vpop.f32.mrf.mxu2 }
 0x4b0   :  { %v2713_v1 = vpack.c.bf16 %v2703_v24, %v2702_v60  ;;  %v7584_v47 = vpack.c.bf16 %v4430_v14, %v4429_v32  ;;  %v2584_v56 = vadd.f32 %v2562_v25, %v2356_v39  ;;  %v2341_v17 = vpop.f32.mrf.mxu1 }
 0x4b1   :  { %v2359_v32 = vadd.f32 %v2341_v17, %v2131_v18 }
 0x4b2   :  { %5479 = vmatmul.msk.bf16.gmra.mxu3 %vm2717_vm3, %v2713_v1  ;;  %v2669_v28 = vmul.f32 %v7451_v34, %v2584_v56  ;;  %v4396_v63 = vmul.f32 %v7449_v9, %v2584_v56 }
 0x4b4   :  { %v2688_v13 = vadd.f32 %v7462_v46, %v2669_v28  ;;  %v4415_v59 = vadd.f32 %v7460_v40, %v4396_v63  ;;  %v5783_v63 = vld [vmem:[%s8441_s13 + $0x48] sm:$0xff] }
 0x4b5   :  { %3131 = vmatpush.bf16.msrb.mxu3 %v5783_v63 }
 0x4b6   :  { %v2704_v33 = vmax.f32 %v2688_v13, 0.0  ;;  %v4431_v41 = vmax.f32 %v4415_v59, 0.0  ;;  %v7624_v59 = vld [vmem:[%s8439_s11] ss:$0 sm:$0xff] }
 0x4b7   :  { %v2564_v0 = vpop.f32.mrf.mxu2 }
 0x4b8   :  { %v2585_v35 = vadd.f32 %v2564_v0, %v2357_v10  ;;  %v2834_v31 = vpop.f32.mrf.mxu1 }
 0x4ba   :  { %v2670_v23 = vmul.f32 %v7451_v34, %v2585_v35  ;;  %v4397_v21 = vmul.f32 %v7449_v9, %v2585_v35 }
 0x4bc   :  { %v2689_v57 = vadd.f32 %v7462_v46, %v2670_v23  ;;  %v4416_v62 = vadd.f32 %v7460_v40, %v4397_v21  ;;  %v7630_v21 = vld [vmem:[%s8440_s12] ss:$0 sm:$0xff] }
 0x4be   :  { %v2705_v20 = vmax.f32 %v2689_v57, 0.0  ;;  %v4432_v53 = vmax.f32 %v4416_v62, 0.0 }
 0x4bf   :  { %v2567_v2 = vpop.f32.mrf.mxu2 }
 0x4c0   :  { %v2714_v27 = vpack.c.bf16 %v2705_v20, %v2704_v33  ;;  %v7600_v3 = vpack.c.bf16 %v4432_v53, %v4431_v41  ;;  %v2586_v60 = vadd.f32 %v2567_v2, %v2358_v8  ;;  %v2836_v35 = vpop.f32.mrf.mxu1 }
 0x4c2   :  { %5480 = vmatmul.msk.bf16.gmra.mxu3 %vm2717_vm3, %v2714_v27  ;;  %v2671_v24 = vmul.f32 %v7451_v34, %v2586_v60  ;;  %v4398_v14 = vmul.f32 %v7449_v9, %v2586_v60 }
 0x4c4   :  { %v2690_v55 = vadd.f32 %v7462_v46, %v2671_v24  ;;  %v4417_v5 = vadd.f32 %v7460_v40, %v4398_v14 }
 0x4c6   :  { %v2706_v4 = vmax.f32 %v2690_v55, 0.0  ;;  %v4433_v56 = vmax.f32 %v4417_v5, 0.0 }
 0x4c7   :  { %v2569_v25 = vpop.f32.mrf.mxu2 }
 0x4c8   :  { %v2587_v58 = vadd.f32 %v2569_v25, %v2359_v32 }
 0x4ca   :  { %v2672_v16 = vmul.f32 %v7451_v34, %v2587_v58  ;;  %v4399_v39 = vmul.f32 %v7449_v9, %v2587_v58  ;;  %v5782_v9 = vld [vmem:[%s8441_s13 + $0x40] sm:$0xff]  ;;  %v2839_v34 = vpop.f32.mrf.mxu1 }
 0x4cb   :  { %3132 = vmatpush.bf16.msrb.mxu3 %v5782_v9 }
 0x4cc   :  { %v2691_v22 = vadd.f32 %v7462_v46, %v2672_v16  ;;  %v4418_v1 = vadd.f32 %v7460_v40, %v4399_v39 }
 0x4ce   :  { %v2707_v19 = vmax.f32 %v2691_v22, 0.0  ;;  %v4434_v10 = vmax.f32 %v4418_v1, 0.0 }
 0x4d0   :  { %v2715_v28 = vpack.c.bf16 %v2707_v19, %v2706_v4  ;;  %v7615_v0 = vpack.c.bf16 %v4434_v10, %v4433_v56 }
 0x4d2   :  { %5481 = vmatmul.msk.bf16.gmra.mxu3 %vm2717_vm3, %v2715_v28  ;;  %v2841_v46 = vpop.f32.mrf.mxu1 }
 0x4da   :  { %v2844_v33 = vpop.f32.mrf.mxu1 }
 0x4e2   :  { %v2846_v18 = vpop.f32.mrf.mxu1 }
 0x4e5   :  { %v2755_v40 = vpop.f32.mrf.mxu3 }
 0x4e6   :  { %v2835_v13 = vadd.f32 %v2834_v31, %v2755_v40 }
 0x4e8   :  { %v2878_v23 = vmul.f32 %v7624_v59, %v2835_v13 }
 0x4ea   :  { %v2898_v41 = vadd.f32 %v7630_v21, %v2878_v23  ;;  %v2849_v58 = vpop.f32.mrf.mxu1 }
 0x4ec   :  { %v2914_v17 = vmax.f32 %v2898_v41, 0.0 }
 0x4ed   :  { %v2757_v57 = vpop.f32.mrf.mxu3 }
 0x4ee   :  { %v2837_v62 = vadd.f32 %v2836_v35, %v2757_v57 }
 0x4f0   :  { %v2879_v20 = vmul.f32 %v7624_v59, %v2837_v62 }
 0x4f2   :  { %v2899_v53 = vadd.f32 %v7630_v21, %v2879_v20  ;;  %v2851_v56 = vpop.f32.mrf.mxu1 }
 0x4f4   :  { %v2915_v2 = vmax.f32 %v2899_v53, 0.0 }
 0x4f5   :  { %v2760_v7 = vpop.f32.mrf.mxu3 }
 0x4f6   :  { %v7635_v8 = vpack.c.bf16 %v2915_v2, %v2914_v17  ;;  %v2840_v27 = vadd.f32 %v2839_v34, %v2760_v7 }
 0x4f8   :  { %5522 = vmatmul.msk.bf16.vlgmr.msrb.gmra.mxu3 %vm833_vm1, %v7635_v8  ;;  %v2880_v60 = vmul.f32 %v7624_v59, %v2840_v27 }
 0x4fa   :  { %v2900_v14 = vadd.f32 %v7630_v21, %v2880_v60 }
 0x4fc   :  { %v2916_v55 = vmax.f32 %v2900_v14, 0.0 }
 0x4fd   :  { %v2762_v32 = vpop.f32.mrf.mxu3 }
 0x4fe   :  { %v2842_v24 = vadd.f32 %v2841_v46, %v2762_v32  ;;  %v2854_v46 = vpop.f32.mrf.mxu1 }
 0x500   :  { %v2881_v25 = vmul.f32 %v7624_v59, %v2842_v24 }
 0x502   :  { %v2901_v31 = vadd.f32 %v7630_v21, %v2881_v25 }
 0x504   :  { %v2917_v5 = vmax.f32 %v2901_v31, 0.0 }
 0x505   :  { %v2765_v16 = vpop.f32.mrf.mxu3 }
 0x506   :  { %v7643_v39 = vpack.c.bf16 %v2917_v5, %v2916_v55  ;;  %v2845_v22 = vadd.f32 %v2844_v33, %v2765_v16  ;;  %v2856_v20 = vpop.f32.mrf.mxu1 }
 0x508   :  { %5523 = vmatmul.msk.bf16.gmra.mxu3 %vm833_vm1, %v7643_v39  ;;  %v2882_v1 = vmul.f32 %v7624_v59, %v2845_v22 }
 0x50a   :  { %v2902_v10 = vadd.f32 %v7630_v21, %v2882_v1 }
 0x50c   :  { %v2918_v35 = vmax.f32 %v2902_v10, 0.0 }
 0x50d   :  { %v2767_v4 = vpop.f32.mrf.mxu3 }
 0x50e   :  { %v2847_v19 = vadd.f32 %v2846_v18, %v2767_v4  ;;  %v2859_v60 = vpop.f32.mrf.mxu1 }
 0x510   :  { %v2883_v28 = vmul.f32 %v7624_v59, %v2847_v19 }
 0x512   :  { %v2903_v63 = vadd.f32 %v7630_v21, %v2883_v28 }
 0x514   :  { %v2919_v9 = vmax.f32 %v2903_v63, 0.0 }
 0x515   :  { %v2770_v34 = vpop.f32.mrf.mxu3 }
 0x516   :  { %v7651_v40 = vpack.c.bf16 %v2919_v9, %v2918_v35  ;;  %v2850_v13 = vadd.f32 %v2849_v58, %v2770_v34  ;;  %v2861_v22 = vpop.f32.mrf.mxu1  ;;  %v5785_v34 = vld [vmem:[%s8441_s13 + $0x8] sm:$0xff] }
 0x517   :  { %3046 = vmatpush.bf16.msrb.mxu2 %v5785_v34  ;;  %v6232_v34 = vld [vmem:[%s8437_s1 + $0x58] sm:$0xff] }
 0x518   :  { %5524 = vmatmul.msk.bf16.gmra.mxu3 %vm833_vm1, %v7651_v40  ;;  %v2884_v23 = vmul.f32 %v7624_v59, %v2850_v13 }
 0x51a   :  { %v2904_v33 = vadd.f32 %v7630_v21, %v2884_v23 }
 0x51c   :  { %v2920_v17 = vmax.f32 %v2904_v33, 0.0 }
 0x51d   :  { %v2772_v57 = vpop.f32.mrf.mxu3 }
 0x51e   :  { %v2852_v62 = vadd.f32 %v2851_v56, %v2772_v57  ;;  %v2864_v28 = vpop.f32.mrf.mxu1 }
 0x520   :  { %v2885_v41 = vmul.f32 %v7624_v59, %v2852_v62  ;;  %v5784_v62 = vld [vmem:[%s8441_s13] sm:$0xff] }
 0x521   :  { %3047 = vmatpush.bf16.msrb.mxu2 %v5784_v62  ;;  %v6236_v62 = vld [vmem:[%s8437_s1 + $0x68] sm:$0xff] }
 0x522   :  { %v2905_v53 = vadd.f32 %v7630_v21, %v2885_v41 }
 0x524   :  { %v2921_v2 = vmax.f32 %v2905_v53, 0.0 }
 0x525   :  { %v2775_v7 = vpop.f32.mrf.mxu3 }
 0x526   :  { %v7659_v27 = vpack.c.bf16 %v2921_v2, %v2920_v17  ;;  %v2855_v18 = vadd.f32 %v2854_v46, %v2775_v7  ;;  %v2866_v41 = vpop.f32.mrf.mxu1 }
 0x528   :  { %5525 = vmatmul.msk.bf16.gmra.mxu3 %vm833_vm1, %v7659_v27  ;;  %v2886_v32 = vmul.f32 %v7624_v59, %v2855_v18 }
 0x52a   :  { %v2906_v25 = vadd.f32 %v7630_v21, %v2886_v32 }
 0x52c   :  { %v2922_v55 = vmax.f32 %v2906_v25, 0.0 }
 0x52d   :  { %v2777_v24 = vpop.f32.mrf.mxu3 }
 0x52e   :  { %v2857_v14 = vadd.f32 %v2856_v20, %v2777_v24 }
 0x530   :  { %v2887_v31 = vmul.f32 %v7624_v59, %v2857_v14 }
 0x532   :  { %v2907_v58 = vadd.f32 %v7630_v21, %v2887_v31 }
 0x534   :  { %v2923_v5 = vmax.f32 %v2907_v58, 0.0 }
 0x535   :  { %v2780_v16 = vpop.f32.mrf.mxu3 }
 0x536   :  { %v7667_v1 = vpack.c.bf16 %v2923_v5, %v2922_v55  ;;  %v2860_v4 = vadd.f32 %v2859_v60, %v2780_v16  ;;  %v2869_v60 = vpop.f32.mrf.mxu1 }
 0x538   :  { %5526 = vmatmul.msk.bf16.gmra.mxu3 %vm833_vm1, %v7667_v1  ;;  %v2888_v56 = vmul.f32 %v7624_v59, %v2860_v4 }
 0x53a   :  { %v2908_v63 = vadd.f32 %v7630_v21, %v2888_v56 }
 0x53c   :  { %v2924_v46 = vmax.f32 %v2908_v63, 0.0  ;;  %v6229_v63 = vld [vmem:[%s8437_s1 + $0x8] sm:$0xff] }
 0x53d   :  { %v2782_v19 = vpop.f32.mrf.mxu3 }
 0x53e   :  { %v2862_v10 = vadd.f32 %v2861_v22, %v2782_v19  ;;  %v2871_v55 = vpop.f32.mrf.mxu1 }
 0x540   :  { %v2889_v35 = vmul.f32 %v7624_v59, %v2862_v10 }
 0x542   :  { %v2909_v9 = vadd.f32 %v7630_v21, %v2889_v35  ;;  %v6230_v35 = vld [vmem:[%s8437_s1 + $0x50] sm:$0xff] }
 0x544   :  { %v2925_v13 = vmax.f32 %v2909_v9, 0.0  ;;  %v6231_v9 = vld [vmem:[%s8437_s1 + $0x10] sm:$0xff] }
 0x545   :  { %v2785_v23 = vpop.f32.mrf.mxu3 }
 0x546   :  { %v7678_v57 = vpack.c.bf16 %v2925_v13, %v2924_v46  ;;  %v2865_v33 = vadd.f32 %v2864_v28, %v2785_v23  ;;  %v6233_v46 = vld [vmem:[%s8437_s1 + $0x18] sm:$0xff]  ;;  %v6234_v13 = vld [vmem:[%s8437_s1 + $0x60] sm:$0xff] }
 0x547   :  { %v6235_v23 = vld [vmem:[%s8437_s1 + $0x20] sm:$0xff] }
 0x548   :  { %5527 = vmatmul.msk.bf16.gmra.mxu3 %vm833_vm1, %v7678_v57  ;;  %v2890_v20 = vmul.f32 %v7624_v59, %v2865_v33  ;;  %v6237_v33 = vld [vmem:[%s8437_s1 + $0x28] sm:$0xff] }
 0x54a   :  { %v2910_v2 = vadd.f32 %v7630_v21, %v2890_v20  ;;  %v6239_v20 = vld [vmem:[%s8437_s1 + $0x30] sm:$0xff] }
 0x54c   :  { %v2926_v32 = vmax.f32 %v2910_v2, 0.0  ;;  %v6242_v2 = vld [vmem:[%s8437_s1 + $0xc0] sm:$0xff] }
 0x54d   :  { %v2787_v53 = vpop.f32.mrf.mxu3 }
 0x54e   :  { %v2867_v17 = vadd.f32 %v2866_v41, %v2787_v53  ;;  %v6238_v41 = vld [vmem:[%s8437_s1 + $0x70] sm:$0xff]  ;;  %v6240_v53 = vld [vmem:[%s8437_s1 + $0x78] sm:$0xff] }
 0x550   :  { %v2891_v7 = vmul.f32 %v7624_v59, %v2867_v17  ;;  %v6241_v17 = vld [vmem:[%s8437_s1 + $0x38] sm:$0xff] }
 0x552   :  { %v2911_v18 = vadd.f32 %v7630_v21, %v2891_v7 }
 0x554   :  { %v2927_v24 = vmax.f32 %v2911_v18, 0.0  ;;  %v6243_v18 = vld [vmem:[%s8437_s1 + $0x40] sm:$0xff] }
 0x555   :  { %v2790_v14 = vpop.f32.mrf.mxu3 }
 0x556   :  { %v7689_v25 = vpack.c.bf16 %v2927_v24, %v2926_v32  ;;  %v2870_v31 = vadd.f32 %v2869_v60, %v2790_v14  ;;  %v6244_v60 = vld [vmem:[%s8437_s1 + $0xc8] sm:$0xff] }
 0x558   :  { %5528 = vmatmul.msk.bf16.gmra.mxu3 %vm833_vm1, %v7689_v25  ;;  %v2892_v58 = vmul.f32 %v7624_v59, %v2870_v31  ;;  %v6245_v31 = vld [vmem:[%s8437_s1 + $0xd0] sm:$0xff] }
 0x55a   :  { %v2912_v22 = vadd.f32 %v7630_v21, %v2892_v58 }
 0x55c   :  { %v2928_v19 = vmax.f32 %v2912_v22, 0.0 }
 0x55d   :  { %v2792_v5 = vpop.f32.mrf.mxu3 }
 0x55e   :  { %v2872_v16 = vadd.f32 %v2871_v55, %v2792_v5 }
 0x560   :  { %v2893_v4 = vmul.f32 %v7624_v59, %v2872_v16  ;;  %v6227_v59 = vld [vmem:[%s8437_s1] sm:$0xff]  ;;  %v6246_v16 = vld [vmem:[%s8437_s1 + $0xd8] sm:$0xff] }
 0x562   :  { %v2913_v56 = vadd.f32 %v7630_v21, %v2893_v4  ;;  %v6228_v21 = vld [vmem:[%s8437_s1 + $0x48] sm:$0xff] }
 0x564   :  { %v2929_v10 = vmax.f32 %v2913_v56, 0.0 }
 0x566   :  { %v7697_v28 = vpack.c.bf16 %v2929_v10, %v2928_v19  ;;  %v6247_v19 = vld [vmem:[%s8437_s1 + $0xe0] sm:$0xff] }
 0x568   :  { %2943 = vmatpush.bf16.msrb.mxu0 %v7697_v28  ;;  %5529 = vmatmul.msk.bf16.gmra.mxu3 %vm833_vm1, %v7697_v28 }
 0x569   :  { %6207 = vmatpush.bf16.msrb.mxu1 %v7697_v28  ;;  %3337 = vmatpush.bf16.msra.mxu2 %v7697_v28 }
 0x56c   :  { %2944 = vmatpush.bf16.msrb.mxu0 %v7689_v25 }
 0x56d   :  { %6208 = vmatpush.bf16.msrb.mxu1 %v7689_v25  ;;  %3338 = vmatpush.bf16.msra.mxu2 %v7689_v25 }
 0x570   :  { %2945 = vmatpush.bf16.msrb.mxu0 %v7678_v57 }
 0x571   :  { %6209 = vmatpush.bf16.msrb.mxu1 %v7678_v57  ;;  %3339 = vmatpush.bf16.msra.mxu2 %v7678_v57 }
 0x574   :  { %2946 = vmatpush.bf16.msrb.mxu0 %v7667_v1 }
 0x575   :  { %6210 = vmatpush.bf16.msrb.mxu1 %v7667_v1  ;;  %3340 = vmatpush.bf16.msra.mxu2 %v7667_v1 }
 0x578   :  { %2947 = vmatpush.bf16.msrb.mxu0 %v7659_v27 }
 0x579   :  { %6211 = vmatpush.bf16.msrb.mxu1 %v7659_v27  ;;  %3341 = vmatpush.bf16.msra.mxu2 %v7659_v27 }
 0x57c   :  { %2948 = vmatpush.bf16.msrb.mxu0 %v7651_v40 }
 0x57d   :  { %6212 = vmatpush.bf16.msrb.mxu1 %v7651_v40  ;;  %3342 = vmatpush.bf16.msra.mxu2 %v7651_v40 }
 0x580   :  { %2949 = vmatpush.bf16.msrb.mxu0 %v7643_v39 }
 0x581   :  { %6213 = vmatpush.bf16.msrb.mxu1 %v7643_v39  ;;  %3343 = vmatpush.bf16.msra.mxu2 %v7643_v39 }
 0x584   :  { %2950 = vmatpush.bf16.msrb.mxu0 %v7635_v8 }
 0x585   :  { %6214 = vmatpush.bf16.msrb.mxu1 %v7635_v8  ;;  %3344 = vmatpush.bf16.msra.mxu2 %v7635_v8 }
 0x587   :  { %2951 = vmatmul.bf16.vlgmr.msrb.gmra.mxu0 %v6227_v59 }
 0x588   :  { %3174 = vmatpush.bf16.msra.mxu0 %v7697_v28  ;;  %3187 = vmatmul.bf16.vlgmr.msrb.gmra.mxu1 %v6228_v21 }
 0x589   :  { %3500 = vmatpush.bf16.msra.mxu1 %v7697_v28 }
 0x58c   :  { %3175 = vmatpush.bf16.msra.mxu0 %v7689_v25 }
 0x58d   :  { %3501 = vmatpush.bf16.msra.mxu1 %v7689_v25 }
 0x590   :  { %3176 = vmatpush.bf16.msra.mxu0 %v7678_v57 }
 0x591   :  { %3502 = vmatpush.bf16.msra.mxu1 %v7678_v57 }
 0x594   :  { %3177 = vmatpush.bf16.msra.mxu0 %v7667_v1 }
 0x595   :  { %3503 = vmatpush.bf16.msra.mxu1 %v7667_v1 }
 0x597   :  { %2956 = vmatmul.bf16.gmra.mxu0 %v6229_v63 }
 0x598   :  { %3178 = vmatpush.bf16.msra.mxu0 %v7659_v27  ;;  %3192 = vmatmul.bf16.gmra.mxu1 %v6230_v35 }
 0x599   :  { %3504 = vmatpush.bf16.msra.mxu1 %v7659_v27 }
 0x59c   :  { %3179 = vmatpush.bf16.msra.mxu0 %v7651_v40 }
 0x59d   :  { %3505 = vmatpush.bf16.msra.mxu1 %v7651_v40 }
 0x5a0   :  { %3180 = vmatpush.bf16.msra.mxu0 %v7643_v39 }
 0x5a1   :  { %3506 = vmatpush.bf16.msra.mxu1 %v7643_v39 }
 0x5a4   :  { %3181 = vmatpush.bf16.msra.mxu0 %v7635_v8 }
 0x5a5   :  { %3507 = vmatpush.bf16.msra.mxu1 %v7635_v8 }
 0x5a7   :  { %2961 = vmatmul.bf16.gmra.mxu0 %v6231_v9 }
 0x5a8   :  { %3197 = vmatmul.bf16.gmra.mxu1 %v6232_v34 }
 0x5a9   :  { %3826 = vmatpush.bf16.msrb.mxu1 %v7697_v28 }
 0x5ad   :  { %3827 = vmatpush.bf16.msrb.mxu1 %v7689_v25 }
 0x5b1   :  { %3828 = vmatpush.bf16.msrb.mxu1 %v7678_v57 }
 0x5b5   :  { %3829 = vmatpush.bf16.msrb.mxu1 %v7667_v1 }
 0x5b7   :  { %2966 = vmatmul.bf16.gmra.mxu0 %v6233_v46 }
 0x5b8   :  { %3202 = vmatmul.bf16.gmra.mxu1 %v6234_v13 }
 0x5b9   :  { %3830 = vmatpush.bf16.msrb.mxu1 %v7659_v27 }
 0x5bd   :  { %3831 = vmatpush.bf16.msrb.mxu1 %v7651_v40 }
 0x5c1   :  { %3832 = vmatpush.bf16.msrb.mxu1 %v7643_v39 }
 0x5c5   :  { %3833 = vmatpush.bf16.msrb.mxu1 %v7635_v8 }
 0x5c7   :  { %2971 = vmatmul.bf16.gmra.mxu0 %v6235_v23  ;;  %v5787_v23 = vld [vmem:[%s8441_s13 + $0x18] sm:$0xff] }
 0x5c8   :  { %3207 = vmatmul.bf16.gmra.mxu1 %v6236_v62  ;;  %3278 = vmatpush.bf16.msrb.mxu0 %v5787_v23 }
 0x5d7   :  { %2976 = vmatmul.bf16.gmra.mxu0 %v6237_v33  ;;  %v5786_v33 = vld [vmem:[%s8441_s13 + $0x10] sm:$0xff] }
 0x5d8   :  { %3212 = vmatmul.bf16.gmra.mxu1 %v6238_v41  ;;  %3279 = vmatpush.bf16.msrb.mxu0 %v5786_v33 }
 0x5e7   :  { %2981 = vmatmul.bf16.gmra.mxu0 %v6239_v20 }
 0x5e8   :  { %3217 = vmatmul.bf16.gmra.mxu1 %v6240_v53 }
 0x5f7   :  { %2986 = vmatmul.bf16.gmra.mxu0 %v6241_v17 }
 0x5f8   :  { %3508 = vmatmul.bf16.vlgmr.msra.gmra.mxu1 %v6242_v2 }
 0x5f9   :  { %4152 = vmatpush.bf16.msra.mxu1 %v7697_v28 }
 0x5fd   :  { %4153 = vmatpush.bf16.msra.mxu1 %v7689_v25 }
 0x601   :  { %4154 = vmatpush.bf16.msra.mxu1 %v7678_v57 }
 0x604   :  { %v2952_v7 = vpop.f32.mrf.mxu0 }
 0x605   :  { %4155 = vmatpush.bf16.msra.mxu1 %v7667_v1  ;;  %v3188_v53 = vpop.f32.mrf.mxu1 }
 0x607   :  { %3182 = vmatmul.bf16.vlgmr.msra.gmra.mxu0 %v6243_v18 }
 0x608   :  { %3513 = vmatmul.bf16.gmra.mxu1 %v6244_v60 }
 0x609   :  { %4156 = vmatpush.bf16.msra.mxu1 %v7659_v27 }
 0x60c   :  { %v2954_v32 = vpop.f32.mrf.mxu0 }
 0x60d   :  { %4157 = vmatpush.bf16.msra.mxu1 %v7651_v40  ;;  %v2992_v24 = vpack.c.bf16 %v2954_v32, %v2952_v7  ;;  %v3190_v2 = vpop.f32.mrf.mxu1  ;;  %v6248_v7 = vld [vmem:[%s8437_s1 + $0xe8] sm:$0xff] }
 0x60f   :  { %5506 = vmatmul.msk.bf16.vlgmr.msrb.gmra.mxu2 %vm833_vm1, %v2992_v24 }
 0x610   :  { %3663 = vmatpush.bf16.msrb.mxu2 %v7697_v28 }
 0x611   :  { %4158 = vmatpush.bf16.msra.mxu1 %v7643_v39 }
 0x614   :  { %3664 = vmatpush.bf16.msrb.mxu2 %v7689_v25  ;;  %v2957_v14 = vpop.f32.mrf.mxu0 }
 0x615   :  { %4159 = vmatpush.bf16.msra.mxu1 %v7635_v8  ;;  %v3193_v32 = vpop.f32.mrf.mxu1 }
 0x618   :  { %3665 = vmatpush.bf16.msrb.mxu2 %v7678_v57  ;;  %3518 = vmatmul.bf16.gmra.mxu1 %v6245_v31  ;;  %v6249_v31 = vld [vmem:[%s8437_s1 + $0xf0] sm:$0xff] }
 0x61c   :  { %3666 = vmatpush.bf16.msrb.mxu2 %v7667_v1  ;;  %v2959_v58 = vpop.f32.mrf.mxu0 }
 0x61d   :  { %v2993_v55 = vpack.c.bf16 %v2959_v58, %v2957_v14  ;;  %v3195_v14 = vpop.f32.mrf.mxu1 }
 0x61f   :  { %5507 = vmatmul.msk.bf16.gmra.mxu2 %vm833_vm1, %v2993_v55  ;;  %v6250_v55 = vld [vmem:[%s8437_s1 + $0x80] sm:$0xff] }
 0x620   :  { %3667 = vmatpush.bf16.msrb.mxu2 %v7659_v27 }
 0x624   :  { %3668 = vmatpush.bf16.msrb.mxu2 %v7651_v40  ;;  %v2962_v5 = vpop.f32.mrf.mxu0 }
 0x628   :  { %3669 = vmatpush.bf16.msrb.mxu2 %v7643_v39  ;;  %3523 = vmatmul.bf16.gmra.mxu1 %v6246_v16  ;;  %v3198_v16 = vpop.f32.mrf.mxu1 }
 0x62c   :  { %3670 = vmatpush.bf16.msrb.mxu2 %v7635_v8  ;;  %v2964_v22 = vpop.f32.mrf.mxu0 }
 0x62d   :  { %v2994_v4 = vpack.c.bf16 %v2964_v22, %v2962_v5 }
 0x62f   :  { %5508 = vmatmul.msk.bf16.gmra.mxu2 %vm833_vm1, %v2994_v4  ;;  %v3224_v4 = vpack.c.bf16 %v3190_v2, %v3188_v53 }
 0x634   :  { %v2967_v56 = vpop.f32.mrf.mxu0 }
 0x638   :  { %3528 = vmatmul.bf16.gmra.mxu1 %v6247_v19  ;;  %v6251_v19 = vld [vmem:[%s8437_s1 + $0xf8] sm:$0xff] }
 0x63c   :  { %v2969_v10 = vpop.f32.mrf.mxu0 }
 0x63d   :  { %v2995_v59 = vpack.c.bf16 %v2969_v10, %v2967_v56  ;;  %v3200_v56 = vpop.f32.mrf.mxu1  ;;  %v3225_v10 = vpack.c.bf16 %v3195_v14, %v3193_v32  ;;  %v6259_v32 = vld [vmem:[%s8437_s1 + $0x158] sm:$0xff] }
 0x63f   :  { %5509 = vmatmul.msk.bf16.gmra.mxu2 %vm833_vm1, %v2995_v59 }
 0x644   :  { %v2972_v21 = vpop.f32.mrf.mxu0 }
 0x648   :  { %3533 = vmatmul.bf16.gmra.mxu1 %v6248_v7 }
 0x64c   :  { %v2974_v63 = vpop.f32.mrf.mxu0 }
 0x64d   :  { %v2996_v35 = vpack.c.bf16 %v2974_v63, %v2972_v21  ;;  %v6253_v21 = vld [vmem:[%s8437_s1 + $0x140] sm:$0xff] }
 0x64f   :  { %5510 = vmatmul.msk.bf16.gmra.mxu2 %vm833_vm1, %v2996_v35  ;;  %v3226_v35 = vpack.c.bf16 %v3200_v56, %v3198_v16  ;;  %v6261_v56 = vld [vmem:[%s8437_s1 + $0xb0] sm:$0xff] }
 0x654   :  { %v2977_v9 = vpop.f32.mrf.mxu0 }
 0x658   :  { %3538 = vmatmul.bf16.gmra.mxu1 %v6249_v31  ;;  %v5791_v31 = vld [vmem:[%s8441_s13 + $0x38] sm:$0xff] }
 0x659   :  { %3604 = vmatpush.bf16.msra.mxu0 %v5791_v31 }
 0x65c   :  { %v2979_v34 = vpop.f32.mrf.mxu0 }
 0x65d   :  { %v2997_v46 = vpack.c.bf16 %v2979_v34, %v2977_v9  ;;  %v6255_v9 = vld [vmem:[%s8437_s1 + $0x148] sm:$0xff]  ;;  %v6256_v34 = vld [vmem:[%s8437_s1 + $0x98] sm:$0xff] }
 0x65f   :  { %5511 = vmatmul.msk.bf16.gmra.mxu2 %vm833_vm1, %v2997_v46 }
 0x664   :  { %v2982_v13 = vpop.f32.mrf.mxu0 }
 0x668   :  { %3543 = vmatmul.bf16.gmra.mxu1 %v6251_v19 }
 0x66c   :  { %v2984_v62 = vpop.f32.mrf.mxu0 }
 0x66d   :  { %v2998_v41 = vpack.c.bf16 %v2984_v62, %v2982_v13 }
 0x66f   :  { %5512 = vmatmul.msk.bf16.gmra.mxu2 %vm833_vm1, %v2998_v41  ;;  %v6257_v41 = vld [vmem:[%s8437_s1 + $0x150] sm:$0xff] }
 0x674   :  { %v2987_v20 = vpop.f32.mrf.mxu0 }
 0x67c   :  { %v2989_v17 = vpop.f32.mrf.mxu0 }
 0x67d   :  { %v2999_v18 = vpack.c.bf16 %v2989_v17, %v2987_v20  ;;  %v6258_v20 = vld [vmem:[%s8437_s1 + $0xa0] sm:$0xff] }
 0x67f   :  { %5513 = vmatmul.msk.bf16.gmra.mxu2 %vm833_vm1, %v2999_v18  ;;  %v5789_v18 = vld [vmem:[%s8441_s13 + $0x28] sm:$0xff] }
 0x680   :  { %3441 = vmatpush.bf16.msra.mxu3 %v5789_v18 }
 0x684   :  { %v3183_v60 = vpop.f32.mrf.mxu0 }
 0x68c   :  { %v3185_v24 = vpop.f32.mrf.mxu0 }
 0x68d   :  { %v3223_v58 = vpack.c.bf16 %v3185_v24, %v3183_v60  ;;  %v6260_v24 = vld [vmem:[%s8437_s1 + $0xa8] sm:$0xff] }
 0x68f   :  { %5542 = vmatmul.msk.bf16.vlgmr.msrb.gmra.mxu0 %vm833_vm1, %v3223_v58  ;;  %3345 = vmatmul.bf16.vlgmr.msra.gmra.mxu2 %v6250_v55  ;;  %v3134_v55 = vpop.f32.mrf.mxu3 }
 0x690   :  { %3989 = vmatpush.bf16.msra.mxu2 %v7697_v28 }
 0x692   :  { %v7853_v5 = vpop.f32.mrf.mxu2 }
 0x694   :  { %3990 = vmatpush.bf16.msra.mxu2 %v7689_v25  ;;  %v6252_v25 = vld [vmem:[%s8437_s1 + $0x88] sm:$0xff] }
 0x698   :  { %3991 = vmatpush.bf16.msra.mxu2 %v7678_v57 }
 0x69a   :  { %v7857_v22 = vpop.f32.mrf.mxu2 }
 0x69c   :  { %3992 = vmatpush.bf16.msra.mxu2 %v7667_v1  ;;  %v3203_v1 = vpop.f32.mrf.mxu1 }
 0x69f   :  { %5543 = vmatmul.msk.bf16.gmra.mxu0 %vm833_vm1, %v3224_v4  ;;  %3350 = vmatmul.bf16.gmra.mxu2 %v6252_v25  ;;  %v5790_v25 = vld [vmem:[%s8441_s13 + $0x30] sm:$0xff] }
 0x6a0   :  { %3993 = vmatpush.bf16.msra.mxu2 %v7659_v27  ;;  %3605 = vmatpush.bf16.msra.mxu0 %v5790_v25 }
 0x6a2   :  { %v7868_v57 = vpop.f32.mrf.mxu2 }
 0x6a4   :  { %3994 = vmatpush.bf16.msra.mxu2 %v7651_v40  ;;  %v3205_v59 = vpop.f32.mrf.mxu1  ;;  %3834 = vmatmul.bf16.vlgmr.msrb.gmra.mxu1 %v6253_v21  ;;  %v6254_v40 = vld [vmem:[%s8437_s1 + $0x90] sm:$0xff] }
 0x6a5   :  { %v3227_v62 = vpack.c.bf16 %v3205_v59, %v3203_v1  ;;  %v3136_v59 = vpop.f32.mrf.mxu3 }
 0x6a8   :  { %3995 = vmatpush.bf16.msra.mxu2 %v7643_v39 }
 0x6aa   :  { %v7872_v28 = vpop.f32.mrf.mxu2 }
 0x6ac   :  { %3996 = vmatpush.bf16.msra.mxu2 %v7635_v8  ;;  %v3208_v39 = vpop.f32.mrf.mxu1 }
 0x6af   :  { %5544 = vmatmul.msk.bf16.gmra.mxu0 %vm833_vm1, %v3225_v10  ;;  %3355 = vmatmul.bf16.gmra.mxu2 %v6254_v40  ;;  %v6262_v10 = vld [vmem:[%s8437_s1 + $0x160] sm:$0xff] }
 0x6b0   :  { %v5788_v40 = vld [vmem:[%s8441_s13 + $0x20] sm:$0xff] }
 0x6b1   :  { %3442 = vmatpush.bf16.msra.mxu3 %v5788_v40 }
 0x6b2   :  { %v7882_v27 = vpop.f32.mrf.mxu2 }
 0x6b4   :  { %v3210_v8 = vpop.f32.mrf.mxu1  ;;  %3839 = vmatmul.bf16.gmra.mxu1 %v6255_v9  ;;  %v6263_v9 = vld [vmem:[%s8437_s1 + $0xb8] sm:$0xff] }
 0x6b5   :  { %v3228_v7 = vpack.c.bf16 %v3210_v8, %v3208_v39  ;;  %v3139_v8 = vpop.f32.mrf.mxu3 }
 0x6ba   :  { %v7884_v63 = vpop.f32.mrf.mxu2 }
 0x6bc   :  { %v3213_v13 = vpop.f32.mrf.mxu1 }
 0x6bf   :  { %5545 = vmatmul.msk.bf16.gmra.mxu0 %vm833_vm1, %v3226_v35  ;;  %3360 = vmatmul.bf16.gmra.mxu2 %v6256_v34 }
 0x6c2   :  { %v7893_v46 = vpop.f32.mrf.mxu2 }
 0x6c4   :  { %v3215_v33 = vpop.f32.mrf.mxu1  ;;  %3844 = vmatmul.bf16.gmra.mxu1 %v6257_v41 }
 0x6c5   :  { %v3229_v16 = vpack.c.bf16 %v3215_v33, %v3213_v13  ;;  %v3141_v33 = vpop.f32.mrf.mxu3 }
 0x6ca   :  { %v7895_v23 = vpop.f32.mrf.mxu2 }
 0x6cc   :  { %v3218_v17 = vpop.f32.mrf.mxu1 }
 0x6cd   :  { %v3144_v31 = vpop.f32.mrf.mxu3 }
 0x6cf   :  { %5546 = vmatmul.msk.bf16.gmra.mxu0 %vm833_vm1, %v3227_v62  ;;  %3365 = vmatmul.bf16.gmra.mxu2 %v6258_v20  ;;  %v6264_v62 = vld [vmem:[%s8437_s1 + $0x168] sm:$0xff]  ;;  %v3135_v20 = vadd.f32 %v3134_v55, %v7853_v5  ;;  %v6266_v5 = vld [vmem:[%s8437_s1 + $0x170] sm:$0xff] }
 0x6d2   :  { %v7904_v53 = vpop.f32.mrf.mxu2 }
 0x6d4   :  { %v3220_v60 = vpop.f32.mrf.mxu1  ;;  %3849 = vmatmul.bf16.gmra.mxu1 %v6259_v32  ;;  %v6265_v32 = vld [vmem:[%s8437_s1 + $0x100] sm:$0xff] }
 0x6d5   :  { %v3230_v39 = vpack.c.bf16 %v3220_v60, %v3218_v17 }
 0x6da   :  { %v7906_v2 = vpop.f32.mrf.mxu2 }
 0x6dc   :  { %v3509_v4 = vpop.f32.mrf.mxu1 }
 0x6df   :  { %5547 = vmatmul.msk.bf16.gmra.mxu0 %vm833_vm1, %v3228_v7  ;;  %3370 = vmatmul.bf16.gmra.mxu2 %v6260_v24 }
 0x6e2   :  { %v7918_v14 = vpop.f32.mrf.mxu2 }
 0x6e4   :  { %v3511_v1 = vpop.f32.mrf.mxu1  ;;  %3854 = vmatmul.bf16.gmra.mxu1 %v6262_v10 }
 0x6e5   :  { %v3549_v17 = vpack.c.bf16 %v3511_v1, %v3509_v4  ;;  %v3140_v1 = vadd.f32 %v3139_v8, %v7868_v57 }
 0x6ea   :  { %v7923_v58 = vpop.f32.mrf.mxu2 }
 0x6ec   :  { %v3514_v35 = vpop.f32.mrf.mxu1 }
 0x6ef   :  { %5548 = vmatmul.msk.bf16.gmra.mxu0 %vm833_vm1, %v3229_v16  ;;  %3375 = vmatmul.bf16.gmra.mxu2 %v6261_v56  ;;  %v3137_v16 = vadd.f32 %v3136_v59, %v7857_v22  ;;  %v6267_v22 = vld [vmem:[%s8437_s1 + $0x108] sm:$0xff] }
 0x6f2   :  { %v7929_v19 = vpop.f32.mrf.mxu2 }
 0x6f4   :  { %v3516_v13 = vpop.f32.mrf.mxu1  ;;  %3859 = vmatmul.bf16.gmra.mxu1 %v6264_v62  ;;  %v3146_v62 = vpop.f32.mrf.mxu3 }
 0x6f5   :  { %v3550_v40 = vpack.c.bf16 %v3516_v13, %v3514_v35  ;;  %v6268_v35 = vld [vmem:[%s8437_s1 + $0x178] sm:$0xff] }
 0x6fa   :  { %v7937_v21 = vpop.f32.mrf.mxu2 }
 0x6fc   :  { %v3519_v18 = vpop.f32.mrf.mxu1 }
 0x6ff   :  { %5549 = vmatmul.msk.bf16.gmra.mxu0 %vm833_vm1, %v3230_v39  ;;  %3380 = vmatmul.bf16.gmra.mxu2 %v6263_v9 }
 0x702   :  { %v7946_v34 = vpop.f32.mrf.mxu2 }
 0x704   :  { %v3521_v25 = vpop.f32.mrf.mxu1  ;;  %3864 = vmatmul.bf16.gmra.mxu1 %v6266_v5 }
 0x70a   :  { %v7951_v41 = vpop.f32.mrf.mxu2 }
 0x70c   :  { %v3281_v7 = vpop.f32.mrf.mxu0  ;;  %v3524_v9 = vpop.f32.mrf.mxu1 }
 0x70d   :  { %v7954_v60 = vadd.f32 %v3281_v7, %v3135_v20  ;;  %v3149_v7 = vpop.f32.mrf.mxu3 }
 0x70f   :  { %3671 = vmatmul.bf16.vlgmr.msrb.gmra.mxu2 %v6265_v32  ;;  %5582 = vmatmul.msk.bf16.vlgmr.msra.gmra.mxu0 %vm833_vm1, %v3549_v17  ;;  %v3142_v17 = vadd.f32 %v3141_v33, %v7872_v28  ;;  %v6269_v28 = vld [vmem:[%s8437_s1 + $0x110] sm:$0xff] }
 0x712   :  { %v3346_v24 = vpop.f32.mrf.mxu2 }
 0x714   :  { %v3283_v56 = vpop.f32.mrf.mxu0  ;;  %v3526_v8 = vpop.f32.mrf.mxu1  ;;  %3869 = vmatmul.bf16.gmra.mxu1 %v6268_v35 }
 0x715   :  { %v7964_v55 = vadd.f32 %v3283_v56, %v3137_v16  ;;  %v3551_v56 = vpack.c.bf16 %v3521_v25, %v3519_v18  ;;  %v3151_v33 = vpop.f32.mrf.mxu3  ;;  %v6270_v18 = vld [vmem:[%s8437_s1 + $0x1c0] sm:$0xff] }
 0x71a   :  { %v3348_v4 = vpop.f32.mrf.mxu2 }
 0x71b   :  { %v3386_v10 = vpack.c.bf16 %v3348_v4, %v3346_v24  ;;  %v3145_v24 = vadd.f32 %v3144_v31, %v7882_v27 }
 0x71c   :  { %v3286_v39 = vpop.f32.mrf.mxu0  ;;  %v3529_v4 = vpop.f32.mrf.mxu1 }
 0x71d   :  { %v7967_v20 = vadd.f32 %v3286_v39, %v3140_v1  ;;  %5562 = vmatmul.msk.bf16.vlgmr.msra.gmra.mxu3 %vm833_vm1, %v3386_v10 }
 0x71f   :  { %3676 = vmatmul.bf16.gmra.mxu2 %v6267_v22  ;;  %5583 = vmatmul.msk.bf16.gmra.mxu0 %vm833_vm1, %v3550_v40  ;;  %v3147_v40 = vadd.f32 %v3146_v62, %v7884_v63  ;;  %v3154_v22 = vpop.f32.mrf.mxu3  ;;  %v6271_v63 = vld [vmem:[%s8437_s1 + $0x118] sm:$0xff] }
 0x722   :  { %v3351_v59 = vpop.f32.mrf.mxu2 }
 0x724   :  { %v3288_v57 = vpop.f32.mrf.mxu0  ;;  %v3531_v31 = vpop.f32.mrf.mxu1  ;;  %4160 = vmatmul.bf16.vlgmr.msra.gmra.mxu1 %v6270_v18 }
 0x725   :  { %v7978_v13 = vadd.f32 %v3288_v57, %v3142_v17  ;;  %v3552_v57 = vpack.c.bf16 %v3526_v8, %v3524_v9  ;;  %v6272_v9 = vld [vmem:[%s8437_s1 + $0x1c8] sm:$0xff] }
 0x727   :  { %v3156_v8 = vpop.f32.mrf.mxu3 }
 0x72a   :  { %v3353_v32 = vpop.f32.mrf.mxu2 }
 0x72b   :  { %v3387_v16 = vpack.c.bf16 %v3353_v32, %v3351_v59  ;;  %v3150_v59 = vadd.f32 %v3149_v7, %v7893_v46 }
 0x72c   :  { %v3291_v5 = vpop.f32.mrf.mxu0  ;;  %v3534_v32 = vpop.f32.mrf.mxu1 }
 0x72d   :  { %v7981_v1 = vadd.f32 %v3291_v5, %v3145_v24  ;;  %5563 = vmatmul.msk.bf16.gmra.mxu3 %vm833_vm1, %v3387_v16  ;;  %v3152_v16 = vadd.f32 %v3151_v33, %v7895_v23  ;;  %v6273_v33 = vld [vmem:[%s8437_s1 + $0x120] sm:$0xff] }
 0x72f   :  { %3681 = vmatmul.bf16.gmra.mxu2 %v6269_v28  ;;  %5584 = vmatmul.msk.bf16.gmra.mxu0 %vm833_vm1, %v3551_v56  ;;  %v3155_v28 = vadd.f32 %v3154_v22, %v7904_v53  ;;  %v3159_v23 = vpop.f32.mrf.mxu3 }
 0x732   :  { %v3356_v10 = vpop.f32.mrf.mxu2 }
 0x734   :  { %v3293_v27 = vpop.f32.mrf.mxu0  ;;  %v3536_v46 = vpop.f32.mrf.mxu1  ;;  %4165 = vmatmul.bf16.gmra.mxu1 %v6272_v9 }
 0x735   :  { %v7992_v25 = vadd.f32 %v3293_v27, %v3147_v40  ;;  %v3553_v40 = vpack.c.bf16 %v3531_v31, %v3529_v4  ;;  %v6274_v4 = vld [vmem:[%s8437_s1 + $0x1d0] sm:$0xff] }
 0x73a   :  { %v3358_v39 = vpop.f32.mrf.mxu2 }
 0x73b   :  { %v3388_v17 = vpack.c.bf16 %v3358_v39, %v3356_v10 }
 0x73c   :  { %v3296_v35 = vpop.f32.mrf.mxu0  ;;  %v3539_v18 = vpop.f32.mrf.mxu1 }
 0x73d   :  { %v7995_v24 = vadd.f32 %v3296_v35, %v3150_v59  ;;  %5564 = vmatmul.msk.bf16.gmra.mxu3 %vm833_vm1, %v3388_v17  ;;  %v3157_v17 = vadd.f32 %v3156_v8, %v7906_v2  ;;  %v5793_v2 = vld [vmem:[%s8441_s13 + $0x58] sm:$0xff]  ;;  %v6275_v8 = vld [vmem:[%s8437_s1 + $0x128] sm:$0xff] }
 0x73e   :  { %3767 = vmatpush.bf16.msrb.mxu3 %v5793_v2 }
 0x73f   :  { %3686 = vmatmul.bf16.gmra.mxu2 %v6271_v63  ;;  %5585 = vmatmul.msk.bf16.gmra.mxu0 %vm833_vm1, %v3552_v57  ;;  %v3161_v57 = vpop.f32.mrf.mxu3  ;;  %v3160_v63 = vadd.f32 %v3159_v23, %v7918_v14  ;;  %v5795_v23 = vld [vmem:[%s8441_s13 + $0x68] sm:$0xff] }
 0x740   :  { %3930 = vmatpush.bf16.msrb.mxu0 %v5795_v23 }
 0x742   :  { %v3361_v62 = vpop.f32.mrf.mxu2 }
 0x744   :  { %v3298_v56 = vpop.f32.mrf.mxu0  ;;  %v3541_v22 = vpop.f32.mrf.mxu1  ;;  %4170 = vmatmul.bf16.gmra.mxu1 %v6274_v4 }
 0x745   :  { %v8006_v7 = vadd.f32 %v3298_v56, %v3152_v16  ;;  %v3554_v16 = vpack.c.bf16 %v3536_v46, %v3534_v32  ;;  %v3162_v46 = vadd.f32 %v3161_v57, %v7923_v58 }
 0x747   :  { %v3164_v32 = vpop.f32.mrf.mxu3 }
 0x74a   :  { %v3363_v5 = vpop.f32.mrf.mxu2 }
 0x74b   :  { %v3389_v10 = vpack.c.bf16 %v3363_v5, %v3361_v62 }
 0x74c   :  { %v3301_v27 = vpop.f32.mrf.mxu0  ;;  %v3544_v9 = vpop.f32.mrf.mxu1 }
 0x74d   :  { %v8009_v39 = vadd.f32 %v3301_v27, %v3155_v28  ;;  %5565 = vmatmul.msk.bf16.gmra.mxu3 %vm833_vm1, %v3389_v10 }
 0x74f   :  { %3691 = vmatmul.bf16.gmra.mxu2 %v6273_v33  ;;  %5586 = vmatmul.msk.bf16.gmra.mxu0 %vm833_vm1, %v3553_v40  ;;  %v6276_v40 = vld [vmem:[%s8437_s1 + $0x1d8] sm:$0xff] }
 0x752   :  { %v3366_v59 = vpop.f32.mrf.mxu2 }
 0x754   :  { %v3303_v53 = vpop.f32.mrf.mxu0  ;;  %v3546_v10 = vpop.f32.mrf.mxu1  ;;  %4175 = vmatmul.bf16.gmra.mxu1 %v6276_v40 }
 0x755   :  { %v8020_v31 = vadd.f32 %v3303_v53, %v3157_v17  ;;  %v3555_v53 = vpack.c.bf16 %v3541_v22, %v3539_v18 }
 0x75a   :  { %v3368_v35 = vpop.f32.mrf.mxu2 }
 0x75b   :  { %v3390_v62 = vpack.c.bf16 %v3368_v35, %v3366_v59  ;;  %v3165_v59 = vadd.f32 %v3164_v32, %v7929_v19  ;;  %v3166_v35 = vpop.f32.mrf.mxu3  ;;  %v5794_v19 = vld [vmem:[%s8441_s13 + $0x60] sm:$0xff]  ;;  %v5792_v32 = vld [vmem:[%s8441_s13 + $0x50] sm:$0xff] }
 0x75c   :  { %v3306_v56 = vpop.f32.mrf.mxu0  ;;  %v3835_v4 = vpop.f32.mrf.mxu1  ;;  %v3167_v18 = vadd.f32 %v3166_v35, %v7937_v21  ;;  %3931 = vmatpush.bf16.msrb.mxu0 %v5794_v19  ;;  %v3556_v21 = vpack.c.bf16 %v3546_v10, %v3544_v9  ;;  %3768 = vmatpush.bf16.msrb.mxu3 %v5792_v32  ;;  %v6280_v10 = vld [vmem:[%s8437_s1 + $0x1e8] sm:$0xff]  ;;  %v6282_v32 = vld [vmem:[%s8437_s1 + $0x1f0] sm:$0xff] }
 0x75d   :  { %v8023_v5 = vadd.f32 %v3306_v56, %v3160_v63  ;;  %5566 = vmatmul.msk.bf16.gmra.mxu3 %vm833_vm1, %v3390_v62  ;;  %v6277_v63 = vld [vmem:[%s8437_s1 + $0x130] sm:$0xff]  ;;  %v6278_v56 = vld [vmem:[%s8437_s1 + $0x1e0] sm:$0xff] }
 0x75f   :  { %3696 = vmatmul.bf16.gmra.mxu2 %v6275_v8  ;;  %5587 = vmatmul.msk.bf16.gmra.mxu0 %vm833_vm1, %v3554_v16 }
 0x762   :  { %v3371_v14 = vpop.f32.mrf.mxu2 }
 0x763   :  { %v3169_v8 = vpop.f32.mrf.mxu3 }
 0x764   :  { %v3308_v28 = vpop.f32.mrf.mxu0  ;;  %v3837_v16 = vpop.f32.mrf.mxu1  ;;  %4180 = vmatmul.bf16.gmra.mxu1 %v6278_v56 }
 0x765   :  { %v8037_v27 = vadd.f32 %v3308_v28, %v3162_v46  ;;  %v3170_v46 = vadd.f32 %v3169_v8, %v7946_v34  ;;  %v3875_v19 = vpack.c.bf16 %v3837_v16, %v3835_v4 }
 0x76a   :  { %v3373_v33 = vpop.f32.mrf.mxu2 }
 0x76b   :  { %v3391_v17 = vpack.c.bf16 %v3373_v33, %v3371_v14 }
 0x76c   :  { %v3311_v58 = vpop.f32.mrf.mxu0  ;;  %v3840_v23 = vpop.f32.mrf.mxu1 }
 0x76d   :  { %v8043_v57 = vadd.f32 %v3311_v58, %v3165_v59  ;;  %5567 = vmatmul.msk.bf16.gmra.mxu3 %vm833_vm1, %v3391_v17  ;;  %v6279_v59 = vld [vmem:[%s8437_s1 + $0x138] sm:$0xff]  ;;  %v3171_v17 = vpop.f32.mrf.mxu3 }
 0x76e   :  { %v3172_v34 = vadd.f32 %v3171_v17, %v7951_v41  ;;  %v6281_v41 = vld [vmem:[%s8437_s1 + $0x180] sm:$0xff] }
 0x76f   :  { %3701 = vmatmul.bf16.gmra.mxu2 %v6277_v63  ;;  %5588 = vmatmul.msk.bf16.gmra.mxu0 %vm833_vm1, %v3555_v53 }
 0x772   :  { %v3376_v62 = vpop.f32.mrf.mxu2 }
 0x774   :  { %v3313_v22 = vpop.f32.mrf.mxu0  ;;  %v3842_v9 = vpop.f32.mrf.mxu1  ;;  %4185 = vmatmul.bf16.gmra.mxu1 %v6280_v10 }
 0x775   :  { %v8057_v2 = vadd.f32 %v3313_v22, %v3167_v18 }
 0x77a   :  { %v3378_v14 = vpop.f32.mrf.mxu2 }
 0x77b   :  { %v3392_v28 = vpack.c.bf16 %v3378_v14, %v3376_v62 }
 0x77c   :  { %v3316_v40 = vpop.f32.mrf.mxu0  ;;  %v3845_v22 = vpop.f32.mrf.mxu1 }
 0x77d   :  { %v8063_v33 = vadd.f32 %v3316_v40, %v3170_v46  ;;  %5568 = vmatmul.msk.bf16.gmra.mxu3 %vm833_vm1, %v3392_v28  ;;  %v3876_v46 = vpack.c.bf16 %v3842_v9, %v3840_v23  ;;  %v6283_v40 = vld [vmem:[%s8437_s1 + $0x188] sm:$0xff]  ;;  %v6284_v23 = vld [vmem:[%s8437_s1 + $0x1f8] sm:$0xff] }
 0x77f   :  { %3706 = vmatmul.bf16.gmra.mxu2 %v6279_v59  ;;  %5589 = vmatmul.msk.bf16.gmra.mxu0 %vm833_vm1, %v3556_v21 }
 0x782   :  { %v3381_v53 = vpop.f32.mrf.mxu2 }
 0x784   :  { %v3318_v58 = vpop.f32.mrf.mxu0  ;;  %v3847_v14 = vpop.f32.mrf.mxu1  ;;  %4190 = vmatmul.bf16.gmra.mxu1 %v6282_v32 }
 0x785   :  { %v8074_v35 = vadd.f32 %v3318_v58, %v3172_v34 }
 0x78a   :  { %v3383_v63 = vpop.f32.mrf.mxu2 }
 0x78b   :  { %v3393_v62 = vpack.c.bf16 %v3383_v63, %v3381_v53 }
 0x78c   :  { %v3607_v18 = vpop.f32.mrf.mxu0  ;;  %v3850_v21 = vpop.f32.mrf.mxu1 }
 0x78d   :  { %5569 = vmatmul.msk.bf16.gmra.mxu3 %vm833_vm1, %v3393_v62 }
 0x78f   :  { %3997 = vmatmul.bf16.vlgmr.msra.gmra.mxu2 %v6281_v41  ;;  %5622 = vmatmul.msk.bf16.vlgmr.msrb.gmra.mxu0 %vm833_vm1, %v3875_v19 }
 0x792   :  { %v3672_v56 = vpop.f32.mrf.mxu2 }
 0x794   :  { %v3609_v8 = vpop.f32.mrf.mxu0  ;;  %v3852_v10 = vpop.f32.mrf.mxu1  ;;  %4195 = vmatmul.bf16.gmra.mxu1 %v6284_v23 }
 0x795   :  { %v3878_v23 = vpack.c.bf16 %v3852_v10, %v3850_v21  ;;  %v8120_v21 = vld [vmem:[%s8432_s14] ss:$0 sm:$0xff] }
 0x796   :  { %4599 = vrot.lane.b32.xlu2 %v8120_v21, %s6294_s27 }
 0x79a   :  { %v3674_v4 = vpop.f32.mrf.mxu2 }
 0x79b   :  { %v3712_v16 = vpack.c.bf16 %v3674_v4, %v3672_v56  ;;  %v3877_v56 = vpack.c.bf16 %v3847_v14, %v3845_v22 }
 0x79c   :  { %v3612_v28 = vpop.f32.mrf.mxu0 }
 0x79d   :  { %5602 = vmatmul.msk.bf16.vlgmr.msrb.gmra.mxu3 %vm833_vm1, %v3712_v16 }
 0x79f   :  { %4002 = vmatmul.bf16.gmra.mxu2 %v6283_v40  ;;  %5623 = vmatmul.msk.bf16.gmra.mxu0 %vm833_vm1, %v3876_v46 }
 0x7a0   :  { %v3444_v59 = vpop.f32.mrf.mxu3 }
 0x7a1   :  { %v3484_v17 = vadd.f32 %v3444_v59, %v7954_v60  ;;  %v3855_v60 = vpop.f32.mrf.mxu1 }
 0x7a2   :  { %v3677_v53 = vpop.f32.mrf.mxu2 }
 0x7a3   :  { %v8090_v34 = vadd.f32 %v3607_v18, %v3484_v17  ;;  %v6285_v18 = vld [vmem:[%s8437_s1 + $0x190] sm:$0xff] }
 0x7a4   :  { %v3614_v58 = vpop.f32.mrf.mxu0 }
 0x7a8   :  { %v3446_v9 = vpop.f32.mrf.mxu3 }
 0x7a9   :  { %v3485_v63 = vadd.f32 %v3446_v9, %v7964_v55  ;;  %v3857_v40 = vpop.f32.mrf.mxu1 }
 0x7aa   :  { %v3679_v62 = vpop.f32.mrf.mxu2 }
 0x7ab   :  { %v8096_v19 = vadd.f32 %v3609_v8, %v3485_v63  ;;  %v3713_v41 = vpack.c.bf16 %v3679_v62, %v3677_v53 }
 0x7ac   :  { %v3617_v32 = vpop.f32.mrf.mxu0 }
 0x7ad   :  { %5603 = vmatmul.msk.bf16.gmra.mxu3 %vm833_vm1, %v3713_v41 }
 0x7af   :  { %4007 = vmatmul.bf16.gmra.mxu2 %v6285_v18  ;;  %5624 = vmatmul.msk.bf16.gmra.mxu0 %vm833_vm1, %v3877_v56 }
 0x7b0   :  { %v3449_v4 = vpop.f32.mrf.mxu3 }
 0x7b1   :  { %v3486_v16 = vadd.f32 %v3449_v4, %v7967_v20  ;;  %v3860_v63 = vpop.f32.mrf.mxu1  ;;  %v6286_v20 = vld [vmem:[%s8437_s1 + $0x198] sm:$0xff] }
 0x7b2   :  { %v3682_v55 = vpop.f32.mrf.mxu2 }
 0x7b3   :  { %v8104_v46 = vadd.f32 %v3612_v28, %v3486_v16 }
 0x7b4   :  { %v3619_v8 = vpop.f32.mrf.mxu0 }
 0x7b8   :  { %v3451_v22 = vpop.f32.mrf.mxu3 }
 0x7b9   :  { %v3487_v14 = vadd.f32 %v3451_v22, %v7978_v13  ;;  %v3862_v56 = vpop.f32.mrf.mxu1 }
 0x7ba   :  { %v3684_v59 = vpop.f32.mrf.mxu2 }
 0x7bb   :  { %v8107_v17 = vadd.f32 %v3614_v58, %v3487_v14  ;;  %v3714_v53 = vpack.c.bf16 %v3684_v59, %v3682_v55  ;;  %v3879_v55 = vpack.c.bf16 %v3857_v40, %v3855_v60  ;;  %v8129_v14 = vld [vmem:[%s8433_s15] ss:$0 sm:$0xff] }
 0x7bc   :  { %v3622_v9 = vpop.f32.mrf.mxu0  ;;  %4618 = vrot.lane.b32.xlu2 %v8129_v14, %s6294_s27 }
 0x7bd   :  { %5604 = vmatmul.msk.bf16.gmra.mxu3 %vm833_vm1, %v3714_v53 }
 0x7bf   :  { %4012 = vmatmul.bf16.gmra.mxu2 %v6286_v20  ;;  %5625 = vmatmul.msk.bf16.gmra.mxu0 %vm833_vm1, %v3878_v23 }
 0x7c0   :  { %v3454_v28 = vpop.f32.mrf.mxu3 }
 0x7c1   :  { %v3488_v62 = vadd.f32 %v3454_v28, %v7981_v1  ;;  %v3865_v22 = vpop.f32.mrf.mxu1 }
 0x7c2   :  { %v3687_v13 = vpop.f32.mrf.mxu2 }
 0x7c3   :  { %v8115_v41 = vadd.f32 %v3617_v32, %v3488_v62 }
 0x7c4   :  { %v3624_v58 = vpop.f32.mrf.mxu0 }
 0x7c8   :  { %v3456_v10 = vpop.f32.mrf.mxu3 }
 0x7c9   :  { %v3489_v18 = vadd.f32 %v3456_v10, %v7992_v25  ;;  %v6289_v25 = vld [vmem:[%s8437_s1 + $0x1a0] sm:$0xff]  ;;  %v3867_v23 = vpop.f32.mrf.mxu1 }
 0x7ca   :  { %v3689_v4 = vpop.f32.mrf.mxu2 }
 0x7cb   :  { %v8124_v16 = vadd.f32 %v3619_v8, %v3489_v18  ;;  %v3715_v1 = vpack.c.bf16 %v3689_v4, %v3687_v13  ;;  %v3880_v18 = vpack.c.bf16 %v3862_v56, %v3860_v63 }
 0x7cc   :  { %v3627_v32 = vpop.f32.mrf.mxu0 }
 0x7cd   :  { %5605 = vmatmul.msk.bf16.gmra.mxu3 %vm833_vm1, %v3715_v1 }
 0x7cf   :  { %4017 = vmatmul.bf16.gmra.mxu2 %v6289_v25  ;;  %5626 = vmatmul.msk.bf16.gmra.mxu0 %vm833_vm1, %v3879_v55  ;;  %v5799_v55 = vld [vmem:[%s8441_s13 + $0x88] sm:$0xff] }
 0x7d0   :  { %v3459_v8 = vpop.f32.mrf.mxu3  ;;  %4256 = vmatpush.bf16.msra.mxu0 %v5799_v55 }
 0x7d1   :  { %v3490_v60 = vadd.f32 %v3459_v8, %v7995_v24  ;;  %v3870_v1 = vpop.f32.mrf.mxu1  ;;  %v5797_v24 = vld [vmem:[%s8441_s13 + $0x78] sm:$0xff] }
 0x7d2   :  { %v3692_v40 = vpop.f32.mrf.mxu2  ;;  %4093 = vmatpush.bf16.msra.mxu3 %v5797_v24 }
 0x7d3   :  { %v8138_v59 = vadd.f32 %v3622_v9, %v3490_v60  ;;  %v6290_v9 = vld [vmem:[%s8437_s1 + $0x1a8] sm:$0xff] }
 0x7d4   :  { %v3629_v53 = vpop.f32.mrf.mxu0 }
 0x7d8   :  { %v3461_v20 = vpop.f32.mrf.mxu3 }
 0x7d9   :  { %v3491_v28 = vadd.f32 %v3461_v20, %v8006_v7  ;;  %v3872_v8 = vpop.f32.mrf.mxu1 }
 0x7da   :  { %v3694_v62 = vpop.f32.mrf.mxu2 }
 0x7db   :  { %v8141_v13 = vadd.f32 %v3624_v58, %v3491_v28  ;;  %v3716_v10 = vpack.c.bf16 %v3694_v62, %v3692_v40 }
 0x7dc   :  { %v3632_v4 = vpop.f32.mrf.mxu0 }
 0x7dd   :  { %5606 = vmatmul.msk.bf16.gmra.mxu3 %vm833_vm1, %v3716_v10  ;;  %v3881_v10 = vpack.c.bf16 %v3867_v23, %v3865_v22 }
 0x7df   :  { %4022 = vmatmul.bf16.gmra.mxu2 %v6290_v9  ;;  %5627 = vmatmul.msk.bf16.gmra.mxu0 %vm833_vm1, %v3880_v18  ;;  %v5798_v9 = vld [vmem:[%s8441_s13 + $0x80] sm:$0xff] }
 0x7e0   :  { %v3464_v7 = vpop.f32.mrf.mxu3  ;;  %4257 = vmatpush.bf16.msra.mxu0 %v5798_v9 }
 0x7e1   :  { %v3492_v58 = vadd.f32 %v3464_v7, %v8009_v39  ;;  %v4443_v39 = vld [vmem:[%s8442_s16 + $0x8] sm:$0xf]  ;;  %v4161_v24 = vpop.f32.mrf.mxu1 }
 0x7e2   :  { %v3697_v63 = vpop.f32.mrf.mxu2  ;;  %v4469_v18 = vsel %vm2742_vm2, %v4443_v39, 0 }
 0x7e3   :  { %v8152_v56 = vadd.f32 %v3627_v32, %v3492_v58  ;;  %4478 = vmatpush.bf16.msrb.mxu2 %v4469_v18 }
 0x7e4   :  { %v3634_v25 = vpop.f32.mrf.mxu0 }
 0x7e8   :  { %v3466_v60 = vpop.f32.mrf.mxu3 }
 0x7e9   :  { %v3493_v40 = vadd.f32 %v3466_v60, %v8020_v31  ;;  %v6291_v31 = vld [vmem:[%s8437_s1 + $0x1b0] sm:$0xff] }
 0x7ea   :  { %v3699_v20 = vpop.f32.mrf.mxu2 }
 0x7eb   :  { %v8158_v28 = vadd.f32 %v3629_v53, %v3493_v40  ;;  %v3717_v62 = vpack.c.bf16 %v3699_v20, %v3697_v63  ;;  %v4163_v63 = vpop.f32.mrf.mxu1  ;;  %v5796_v20 = vld [vmem:[%s8441_s13 + $0x70] sm:$0xff] }
 0x7ec   :  { %v3637_v32 = vpop.f32.mrf.mxu0  ;;  %4094 = vmatpush.bf16.msra.mxu3 %v5796_v20 }
 0x7ed   :  { %5607 = vmatmul.msk.bf16.gmra.mxu3 %vm833_vm1, %v3717_v62 }
 0x7ef   :  { %4027 = vmatmul.bf16.gmra.mxu2 %v6291_v31  ;;  %5628 = vmatmul.msk.bf16.gmra.mxu0 %vm833_vm1, %v3881_v10  ;;  %v3882_v10 = vpack.c.bf16 %v3872_v8, %v3870_v1 }
 0x7f0   :  { %v3469_v53 = vpop.f32.mrf.mxu3 }
 0x7f1   :  { %v3494_v22 = vadd.f32 %v3469_v53, %v8023_v5 }
 0x7f2   :  { %v3702_v23 = vpop.f32.mrf.mxu2 }
 0x7f3   :  { %v8173_v7 = vadd.f32 %v3632_v4, %v3494_v22  ;;  %v4166_v18 = vpop.f32.mrf.mxu1  ;;  %v6292_v4 = vld [vmem:[%s8437_s1 + $0x1b8] sm:$0xff] }
 0x7f4   :  { %v3639_v58 = vpop.f32.mrf.mxu0 }
 0x7f8   :  { %v3471_v55 = vpop.f32.mrf.mxu3 }
 0x7f9   :  { %v3495_v60 = vadd.f32 %v3471_v55, %v8037_v27 }
 0x7fa   :  { %v3704_v40 = vpop.f32.mrf.mxu2 }
 0x7fb   :  { %v8179_v62 = vadd.f32 %v3634_v25, %v3495_v60  ;;  %v3718_v5 = vpack.c.bf16 %v3704_v40, %v3702_v23  ;;  %v4168_v1 = vpop.f32.mrf.mxu1  ;;  %v4201_v40 = vpack.c.bf16 %v4163_v63, %v4161_v24 }
 0x7fc   :  { %v3642_v39 = vpop.f32.mrf.mxu0 }
 0x7fd   :  { %5608 = vmatmul.msk.bf16.gmra.mxu3 %vm833_vm1, %v3718_v5 }
 0x7ff   :  { %4032 = vmatmul.bf16.gmra.mxu2 %v6292_v4  ;;  %5629 = vmatmul.msk.bf16.gmra.mxu0 %vm833_vm1, %v3882_v10 }
 0x800   :  { %v3474_v27 = vpop.f32.mrf.mxu3 }
 0x801   :  { %v3496_v31 = vadd.f32 %v3474_v27, %v8043_v57 }
 0x802   :  { %v3707_v53 = vpop.f32.mrf.mxu2 }
 0x803   :  { %v8187_v25 = vadd.f32 %v3637_v32, %v3496_v31  ;;  %v4171_v5 = vpop.f32.mrf.mxu1 }
 0x804   :  { %v3644_v22 = vpop.f32.mrf.mxu0 }
 0x808   :  { %v3476_v8 = vpop.f32.mrf.mxu3 }
 0x809   :  { %v3497_v23 = vadd.f32 %v3476_v8, %v8057_v2  ;;  %v4202_v8 = vpack.c.bf16 %v4168_v1, %v4166_v18 }
 0x80a   :  { %v3709_v9 = vpop.f32.mrf.mxu2 }
 0x80b   :  { %v8190_v55 = vadd.f32 %v3639_v58, %v3497_v23  ;;  %v3719_v60 = vpack.c.bf16 %v3709_v9, %v3707_v53  ;;  %v4173_v58 = vpop.f32.mrf.mxu1 }
 0x80c   :  { %v3933_v20 = vpop.f32.mrf.mxu0 }
 0x80d   :  { %5609 = vmatmul.msk.bf16.gmra.mxu3 %vm833_vm1, %v3719_v60 }
 0x80f   :  { %5670 = vmatmul.msk.bf16.vlgmr.msrb.gmra.mxu2 %vm2717_vm3, %v7477_v6  ;;  %5662 = vmatmul.msk.bf16.vlgmr.msra.gmra.mxu0 %vm833_vm1, %v4201_v40 }
 0x810   :  { %v3479_v57 = vpop.f32.mrf.mxu3 }
 0x811   :  { %v3498_v32 = vadd.f32 %v3479_v57, %v8063_v33 }
 0x812   :  { %v3998_v10 = vpop.f32.mrf.mxu2 }
 0x813   :  { %v8197_v4 = vadd.f32 %v3642_v39, %v3498_v32  ;;  %v4176_v6 = vpop.f32.mrf.mxu1 }
 0x814   :  { %v3935_v2 = vpop.f32.mrf.mxu0 }
 0x818   :  { %v3481_v27 = vpop.f32.mrf.mxu3 }
 0x819   :  { %v3499_v24 = vadd.f32 %v3481_v27, %v8074_v35 }
 0x81a   :  { %v4000_v63 = vpop.f32.mrf.mxu2 }
 0x81b   :  { %v8200_v31 = vadd.f32 %v3644_v22, %v3499_v24  ;;  %v4038_v53 = vpack.c.bf16 %v4000_v63, %v3998_v10  ;;  %v4178_v22 = vpop.f32.mrf.mxu1  ;;  %v4203_v10 = vpack.c.bf16 %v4173_v58, %v4171_v5 }
 0x81c   :  { %v3938_v23 = vpop.f32.mrf.mxu0 }
 0x81d   :  { %5642 = vmatmul.msk.bf16.vlgmr.msra.gmra.mxu3 %vm833_vm1, %v4038_v53 }
 0x81f   :  { %5671 = vmatmul.msk.bf16.gmra.mxu2 %vm2717_vm3, %v7498_v44  ;;  %5663 = vmatmul.msk.bf16.gmra.mxu0 %vm833_vm1, %v4202_v8 }
 0x820   :  { %v3770_v33 = vpop.f32.mrf.mxu3 }
 0x821   :  { %v3810_v39 = vadd.f32 %v3770_v33, %v8090_v34  ;;  %v4204_v33 = vpack.c.bf16 %v4178_v22, %v4176_v6 }
 0x822   :  { %v4003_v9 = vpop.f32.mrf.mxu2 }
 0x823   :  { %v8207_v60 = vadd.f32 %v3933_v20, %v3810_v39  ;;  %v4181_v20 = vpop.f32.mrf.mxu1 }
 0x824   :  { %v3940_v35 = vpop.f32.mrf.mxu0 }
 0x828   :  { %v3772_v40 = vpop.f32.mrf.mxu3 }
 0x829   :  { %v3811_v18 = vadd.f32 %v3772_v40, %v8096_v19 }
 0x82a   :  { %v4005_v1 = vpop.f32.mrf.mxu2 }
 0x82b   :  { %v8210_v57 = vadd.f32 %v3935_v2, %v3811_v18  ;;  %v4039_v32 = vpack.c.bf16 %v4005_v1, %v4003_v9  ;;  %v4183_v39 = vpop.f32.mrf.mxu1 }
 0x82c   :  { %v3943_v27 = vpop.f32.mrf.mxu0 }
 0x82d   :  { %5643 = vmatmul.msk.bf16.gmra.mxu3 %vm833_vm1, %v4039_v32 }
 0x82f   :  { %5672 = vmatmul.msk.bf16.gmra.mxu2 %vm2717_vm3, %v7518_v52  ;;  %5664 = vmatmul.msk.bf16.gmra.mxu0 %vm833_vm1, %v4203_v10  ;;  %v4205_v10 = vpack.c.bf16 %v4183_v39, %v4181_v20 }
 0x830   :  { %v3775_v44 = vpop.f32.mrf.mxu3 }
 0x831   :  { %v3812_v34 = vadd.f32 %v3775_v44, %v8104_v46 }
 0x832   :  { %v4008_v24 = vpop.f32.mrf.mxu2 }
 0x833   :  { %v8217_v63 = vadd.f32 %v3938_v23, %v3812_v34 }
 0x834   :  { %v3945_v19 = vpop.f32.mrf.mxu0 }
 0x838   :  { %v3777_v2 = vpop.f32.mrf.mxu3 }
 0x839   :  { %v3813_v53 = vadd.f32 %v3777_v2, %v8107_v17 }
 0x83a   :  { %v4010_v5 = vpop.f32.mrf.mxu2 }
 0x83b   :  { %v8220_v58 = vadd.f32 %v3940_v35, %v3813_v53  ;;  %v4040_v8 = vpack.c.bf16 %v4010_v5, %v4008_v24  ;;  %v4186_v35 = vpop.f32.mrf.mxu1 }
 0x83c   :  { %v3948_v52 = vpop.f32.mrf.mxu0 }
 0x83d   :  { %5644 = vmatmul.msk.bf16.gmra.mxu3 %vm833_vm1, %v4040_v8 }
 0x83f   :  { %5673 = vmatmul.msk.bf16.gmra.mxu2 %vm2717_vm3, %v7540_v45  ;;  %5665 = vmatmul.msk.bf16.gmra.mxu0 %vm833_vm1, %v4204_v33 }
 0x840   :  { %v3780_v46 = vpop.f32.mrf.mxu3 }
 0x841   :  { %v3814_v23 = vadd.f32 %v3780_v46, %v8115_v41 }
 0x842   :  { %v4013_v9 = vpop.f32.mrf.mxu2 }
 0x843   :  { %v8227_v40 = vadd.f32 %v3943_v27, %v3814_v23  ;;  %v4188_v45 = vpop.f32.mrf.mxu1 }
 0x844   :  { %v3950_v17 = vpop.f32.mrf.mxu0  ;;  %v4206_v33 = vpack.c.bf16 %v4188_v45, %v4186_v35  ;;  %v4319_v45 = vmul.f32 %v8120_v21, %v6450_v11 }
 0x848   :  { %v3782_v18 = vpop.f32.mrf.mxu3 }
 0x849   :  { %v3815_v6 = vadd.f32 %v3782_v18, %v8124_v16 }
 0x84a   :  { %v4015_v22 = vpop.f32.mrf.mxu2 }
 0x84b   :  { %v8230_v1 = vadd.f32 %v3945_v19, %v3815_v6  ;;  %v4041_v32 = vpack.c.bf16 %v4015_v22, %v4013_v9  ;;  %v4191_v20 = vpop.f32.mrf.mxu1 }
 0x84c   :  { %v3953_v44 = vpop.f32.mrf.mxu0 }
 0x84d   :  { %5645 = vmatmul.msk.bf16.gmra.mxu3 %vm833_vm1, %v4041_v32 }
 0x84f   :  { %5674 = vmatmul.msk.bf16.gmra.mxu2 %vm2717_vm3, %v7562_v38  ;;  %5666 = vmatmul.msk.bf16.gmra.mxu0 %vm833_vm1, %v4205_v10 }
 0x850   :  { %v3785_v41 = vpop.f32.mrf.mxu3 }
 0x851   :  { %v3816_v27 = vadd.f32 %v3785_v41, %v8138_v59  ;;  %v4320_v41 = vmul.f32 %v8120_v21, %v6452_v12 }
 0x852   :  { %v4018_v34 = vpop.f32.mrf.mxu2 }
 0x853   :  { %v8237_v24 = vadd.f32 %v3948_v52, %v3816_v27 }
 0x854   :  { %v3955_v16 = vpop.f32.mrf.mxu0 }
 0x858   :  { %v3787_v19 = vpop.f32.mrf.mxu3 }
 0x859   :  { %v3817_v2 = vadd.f32 %v3787_v19, %v8141_v13  ;;  %v4193_v13 = vpop.f32.mrf.mxu1  ;;  %v4339_v19 = vadd.f32 %v8129_v14, %v4319_v45 }
 0x85a   :  { %v4020_v53 = vpop.f32.mrf.mxu2  ;;  %v4207_v22 = vpack.c.bf16 %v4193_v13, %v4191_v20 }
 0x85b   :  { %v8240_v5 = vadd.f32 %v3950_v17, %v3817_v2  ;;  %v4042_v8 = vpack.c.bf16 %v4020_v53, %v4018_v34  ;;  %v4661_v34 = vld [vmem:[%s8442_s16 + $0xc] sm:$0xf] }
 0x85c   :  { %v3958_v38 = vpop.f32.mrf.mxu0 }
 0x85d   :  { %5646 = vmatmul.msk.bf16.gmra.mxu3 %vm833_vm1, %v4042_v8 }
 0x85f   :  { %5675 = vmatmul.msk.bf16.gmra.mxu2 %vm2717_vm3, %v7584_v47  ;;  %5667 = vmatmul.msk.bf16.gmra.mxu0 %vm833_vm1, %v4206_v33 }
 0x860   :  { %v3790_v59 = vpop.f32.mrf.mxu3 }
 0x861   :  { %v3818_v39 = vadd.f32 %v3790_v59, %v8152_v56  ;;  %v4196_v47 = vpop.f32.mrf.mxu1  ;;  %v5800_v56 = vld [vmem:[%s8442_s16] sm:$0xff] }
 0x862   :  { %v4023_v52 = vpop.f32.mrf.mxu2  ;;  %4557 = vmatpush.bf16.msrb.mxu3 %v5800_v56 }
 0x863   :  { %v8247_v46 = vadd.f32 %v3953_v44, %v3818_v39 }
 0x864   :  { %v3960_v23 = vpop.f32.mrf.mxu0 }
 0x868   :  { %v3792_v9 = vpop.f32.mrf.mxu3 }
 0x869   :  { %v3819_v17 = vadd.f32 %v3792_v9, %v8158_v28  ;;  %v4198_v2 = vpop.f32.mrf.mxu1 }
 0x86a   :  { %v4025_v35 = vpop.f32.mrf.mxu2  ;;  %v4208_v12 = vpack.c.bf16 %v4198_v2, %v4196_v47 }
 0x86b   :  { %v8250_v18 = vadd.f32 %v3955_v16, %v3819_v17  ;;  %v4043_v6 = vpack.c.bf16 %v4025_v35, %v4023_v52  ;;  %v4687_v16 = vsel %vm2742_vm2, %v4661_v34, 0 }
 0x86c   :  { %v3963_v32 = vpop.f32.mrf.mxu0  ;;  %4696 = vmatpush.bf16.msrb.mxu1 %v4687_v16  ;;  %v8297_v16 = vpop.permute.xlu2 %4599 }
 0x86d   :  { %5647 = vmatmul.msk.bf16.gmra.mxu3 %vm833_vm1, %v4043_v6 }
 0x86f   :  { %5676 = vmatmul.msk.bf16.gmra.mxu2 %vm2717_vm3, %v7600_v3  ;;  %5668 = vmatmul.msk.bf16.gmra.mxu0 %vm833_vm1, %v4207_v22 }
 0x870   :  { %v3795_v10 = vpop.f32.mrf.mxu3 }
 0x871   :  { %v3820_v28 = vadd.f32 %v3795_v10, %v8173_v7  ;;  %v4340_v7 = vadd.f32 %v8129_v14, %v4320_v41 }
 0x872   :  { %v4028_v44 = vpop.f32.mrf.mxu2 }
 0x873   :  { %v8264_v27 = vadd.f32 %v3958_v38, %v3820_v28  ;;  %v4355_v38 = vmax.f32 %v4339_v19, 0.0  ;;  %v4356_v59 = vmax.f32 %v4340_v7, 0.0 }
 0x874   :  { %v3965_v3 = vpop.f32.mrf.mxu0 }
 0x875   :  { %v4371_v52 = vpack.c.bf16 %v4356_v59, %v4355_v38 }
 0x878   :  { %v3797_v20 = vpop.f32.mrf.mxu3 }
 0x879   :  { %v3821_v11 = vadd.f32 %v3797_v20, %v8179_v62 }
 0x87a   :  { %v4030_v53 = vpop.f32.mrf.mxu2 }
 0x87b   :  { %v8273_v8 = vadd.f32 %v3960_v23, %v3821_v11  ;;  %v4044_v33 = vpack.c.bf16 %v4030_v53, %v4028_v44 }
 0x87c   :  { %v3968_v39 = vpop.f32.mrf.mxu0 }
 0x87d   :  { %5648 = vmatmul.msk.bf16.gmra.mxu3 %vm833_vm1, %v4044_v33 }
 0x87f   :  { %5677 = vmatmul.msk.bf16.gmra.mxu2 %vm2717_vm3, %v7615_v0  ;;  %5669 = vmatmul.msk.bf16.gmra.mxu0 %vm833_vm1, %v4208_v12 }
 0x880   :  { %v3800_v13 = vpop.f32.mrf.mxu3 }
 0x881   :  { %v3822_v9 = vadd.f32 %v3800_v13, %v8187_v25 }
 0x882   :  { %v4033_v62 = vpop.f32.mrf.mxu2 }
 0x883   :  { %v8280_v17 = vadd.f32 %v3963_v32, %v3822_v9  ;;  %v4324_v9 = vmul.f32 %v8120_v21, %v6532_v51 }
 0x884   :  { %v3970_v23 = vpop.f32.mrf.mxu0 }
 0x888   :  { %v3802_v35 = vpop.f32.mrf.mxu3 }
 0x889   :  { %v3823_v6 = vadd.f32 %v3802_v35, %v8190_v55  ;;  %v4321_v55 = vmul.f32 %v8120_v21, %v6477_v42 }
 0x88a   :  { %v4035_v22 = vpop.f32.mrf.mxu2 }
 0x88b   :  { %v8283_v47 = vadd.f32 %v3965_v3, %v3823_v6  ;;  %v4045_v56 = vpack.c.bf16 %v4035_v22, %v4033_v62  ;;  %v4322_v3 = vmul.f32 %v8120_v21, %v6479_v43  ;;  %v4341_v7 = vadd.f32 %v8129_v14, %v4321_v55  ;;  %v8304_v43 = vpop.permute.xlu2 %4618 }
 0x88c   :  { %v4259_v10 = vpop.f32.mrf.mxu0 }
 0x88d   :  { %5649 = vmatmul.msk.bf16.gmra.mxu3 %vm833_vm1, %v4045_v56  ;;  %v4357_v11 = vmax.f32 %v4341_v7, 0.0 }
 0x890   :  { %v3805_v0 = vpop.f32.mrf.mxu3 }
 0x891   :  { %v3824_v28 = vadd.f32 %v3805_v0, %v8197_v4 }
 0x893   :  { %v8287_v44 = vadd.f32 %v3968_v39, %v3824_v28 }
 0x894   :  { %v4261_v25 = vpop.f32.mrf.mxu0 }
 0x898   :  { %v3807_v45 = vpop.f32.mrf.mxu3 }
 0x899   :  { %v3825_v32 = vadd.f32 %v3807_v45, %v8200_v31  ;;  %v4342_v31 = vadd.f32 %v8129_v14, %v4322_v3 }
 0x89b   :  { %v8290_v41 = vadd.f32 %v3970_v23, %v3825_v32  ;;  %v4358_v53 = vmax.f32 %v4342_v31, 0.0 }
 0x89c   :  { %v4264_v34 = vpop.f32.mrf.mxu0 }
 0x89d   :  { %5682 = vmatmul.msk.bf16.vlgmr.msrb.gmra.mxu3 %vm553_vm0, %v4371_v52  ;;  %v4372_v38 = vpack.c.bf16 %v4358_v53, %v4357_v11 }
 0x8a0   :  { %v4096_v4 = vpop.f32.mrf.mxu3 }
 0x8a1   :  { %v4136_v19 = vadd.f32 %v4096_v4, %v8207_v60  ;;  %v4323_v60 = vmul.f32 %v8120_v21, %v6530_v50  ;;  %v4344_v50 = vadd.f32 %v8129_v14, %v4324_v9  ;;  %v4325_v4 = vmul.f32 %v8120_v21, %v6568_v48 }
 0x8a3   :  { %v4299_v20 = vadd.f32 %v4259_v10, %v4136_v19  ;;  %v4343_v23 = vadd.f32 %v8129_v14, %v4323_v60  ;;  %v4360_v28 = vmax.f32 %v4344_v50, 0.0 }
 0x8a4   :  { %v4266_v2 = vpop.f32.mrf.mxu0 }
 0x8a5   :  { %v4602_v33 = vmul.f32 %v8297_v16, %v4299_v20  ;;  %v4359_v0 = vmax.f32 %v4343_v23, 0.0  ;;  %v4345_v20 = vadd.f32 %v8129_v14, %v4325_v4 }
 0x8a7   :  { %v4621_v13 = vadd.f32 %v8304_v43, %v4602_v33  ;;  %v4373_v55 = vpack.c.bf16 %v4360_v28, %v4359_v0 }
 0x8a8   :  { %v4098_v12 = vpop.f32.mrf.mxu3 }
 0x8a9   :  { %v4137_v42 = vadd.f32 %v4098_v12, %v8210_v57  ;;  %v4637_v35 = vmax.f32 %v4621_v13, 0.0 }
 0x8ab   :  { %v4300_v59 = vadd.f32 %v4261_v25, %v4137_v42  ;;  %v4361_v42 = vmax.f32 %v4345_v20, 0.0 }
 0x8ac   :  { %v4269_v39 = vpop.f32.mrf.mxu0 }
 0x8ad   :  { %v4603_v52 = vmul.f32 %v8297_v16, %v4300_v59  ;;  %5683 = vmatmul.msk.bf16.gmra.mxu3 %vm553_vm0, %v4372_v38 }
 0x8af   :  { %v4622_v62 = vadd.f32 %v8304_v43, %v4603_v52 }
 0x8b0   :  { %v4101_v57 = vpop.f32.mrf.mxu3 }
 0x8b1   :  { %v4638_v6 = vmax.f32 %v4622_v62, 0.0  ;;  %v4138_v22 = vadd.f32 %v4101_v57, %v8217_v63  ;;  %v4327_v62 = vmul.f32 %v8120_v21, %v6600_v29 }
 0x8b3   :  { %v4653_v56 = vpack.c.bf16 %v4638_v6, %v4637_v35  ;;  %v4301_v10 = vadd.f32 %v4264_v34, %v4138_v22  ;;  %v4326_v34 = vmul.f32 %v8120_v21, %v6570_v49 }
 0x8b4   :  { %v4271_v25 = vpop.f32.mrf.mxu0 }
 0x8b5   :  { %5690 = vmatmul.msk.bf16.vlgmr.msrb.gmra.mxu1 %vm2717_vm3, %v4653_v56  ;;  %v4604_v51 = vmul.f32 %v8297_v16, %v4301_v10  ;;  %v4346_v48 = vadd.f32 %v8129_v14, %v4326_v34 }
 0x8b7   :  { %v4623_v63 = vadd.f32 %v8304_v43, %v4604_v51  ;;  %v4362_v38 = vmax.f32 %v4346_v48, 0.0 }
 0x8b8   :  { %v4103_v45 = vpop.f32.mrf.mxu3 }
 0x8b9   :  { %v4139_v32 = vadd.f32 %v4103_v45, %v8220_v58  ;;  %v4639_v11 = vmax.f32 %v4623_v63, 0.0  ;;  %v4374_v52 = vpack.c.bf16 %v4362_v38, %v4361_v42  ;;  %v4330_v63 = vmul.f32 %v8120_v21, %v8471_v54 }
 0x8bb   :  { %v4302_v3 = vadd.f32 %v4266_v2, %v4139_v32 }
 0x8bc   :  { %v4274_v58 = vpop.f32.mrf.mxu0 }
 0x8bd   :  { %v4605_v19 = vmul.f32 %v8297_v16, %v4302_v3  ;;  %5684 = vmatmul.msk.bf16.gmra.mxu3 %vm553_vm0, %v4373_v55  ;;  %v4329_v3 = vmul.f32 %v8120_v21, %v8470_v37  ;;  %v4350_v37 = vadd.f32 %v8129_v14, %v4330_v63 }
 0x8bf   :  { %v4624_v7 = vadd.f32 %v8304_v43, %v4605_v19  ;;  %v4366_v48 = vmax.f32 %v4350_v37, 0.0 }
 0x8c0   :  { %v4106_v31 = vpop.f32.mrf.mxu3 }
 0x8c1   :  { %v4640_v2 = vmax.f32 %v4624_v7, 0.0  ;;  %v4140_v53 = vadd.f32 %v4106_v31, %v8227_v40 }
 0x8c3   :  { %v4654_v12 = vpack.c.bf16 %v4640_v2, %v4639_v11  ;;  %v4303_v33 = vadd.f32 %v4269_v39, %v4140_v53  ;;  %v4328_v39 = vmul.f32 %v8120_v21, %v6602_v30 }
 0x8c4   :  { %v4276_v13 = vpop.f32.mrf.mxu0 }
 0x8c5   :  { %5691 = vmatmul.msk.bf16.gmra.mxu1 %vm2717_vm3, %v4654_v12  ;;  %v4606_v49 = vmul.f32 %v8297_v16, %v4303_v33  ;;  %v4348_v29 = vadd.f32 %v8129_v14, %v4328_v39 }
 0x8c7   :  { %v4625_v40 = vadd.f32 %v8304_v43, %v4606_v49  ;;  %v4331_v49 = vmul.f32 %v8120_v21, %v8472_v36 }
 0x8c8   :  { %v4108_v59 = vpop.f32.mrf.mxu3 }
 0x8c9   :  { %v4141_v60 = vadd.f32 %v4108_v59, %v8230_v1  ;;  %v4347_v1 = vadd.f32 %v8129_v14, %v4327_v62  ;;  %v4641_v6 = vmax.f32 %v4625_v40, 0.0  ;;  %v4351_v62 = vadd.f32 %v8129_v14, %v4331_v49 }
 0x8cb   :  { %v4304_v9 = vadd.f32 %v4271_v25, %v4141_v60  ;;  %v4363_v28 = vmax.f32 %v4347_v1, 0.0  ;;  %v4364_v25 = vmax.f32 %v4348_v29, 0.0  ;;  %v4367_v1 = vmax.f32 %v4351_v62, 0.0 }
 0x8cc   :  { %v4279_v10 = vpop.f32.mrf.mxu0 }
 0x8cd   :  { %v4607_v57 = vmul.f32 %v8297_v16, %v4304_v9  ;;  %5685 = vmatmul.msk.bf16.gmra.mxu3 %vm553_vm0, %v4374_v52  ;;  %v4375_v32 = vpack.c.bf16 %v4364_v25, %v4363_v28  ;;  %v4332_v52 = vmul.f32 %v8120_v21, %v8473_v26  ;;  %v4334_v25 = vmul.f32 %v8120_v21, %v8475_v15 }
 0x8cf   :  { %v4626_v23 = vadd.f32 %v8304_v43, %v4607_v57  ;;  %v4352_v36 = vadd.f32 %v8129_v14, %v4332_v52 }
 0x8d0   :  { %v4111_v35 = vpop.f32.mrf.mxu3 }
 0x8d1   :  { %v4642_v22 = vmax.f32 %v4626_v23, 0.0  ;;  %v4142_v50 = vadd.f32 %v4111_v35, %v8237_v24 }
 0x8d3   :  { %v4655_v56 = vpack.c.bf16 %v4642_v22, %v4641_v6  ;;  %v4305_v0 = vadd.f32 %v4274_v58, %v4142_v50  ;;  %v4368_v6 = vmax.f32 %v4352_v36, 0.0 }
 0x8d4   :  { %v4281_v19 = vpop.f32.mrf.mxu0 }
 0x8d5   :  { %5692 = vmatmul.msk.bf16.gmra.mxu1 %vm2717_vm3, %v4655_v56  ;;  %v4608_v30 = vmul.f32 %v8297_v16, %v4305_v0  ;;  %v4377_v29 = vpack.c.bf16 %v4368_v6, %v4367_v1 }
 0x8d7   :  { %v4627_v24 = vadd.f32 %v8304_v43, %v4608_v30 }
 0x8d8   :  { %v4113_v45 = vpop.f32.mrf.mxu3 }
 0x8d9   :  { %v4143_v51 = vadd.f32 %v4113_v45, %v8240_v5  ;;  %v4349_v5 = vadd.f32 %v8129_v14, %v4329_v3  ;;  %v4643_v31 = vmax.f32 %v4627_v24, 0.0 }
 0x8db   :  { %v4306_v55 = vadd.f32 %v4276_v13, %v4143_v51  ;;  %v4365_v53 = vmax.f32 %v4349_v5, 0.0 }
 0x8dc   :  { %v4284_v54 = vpop.f32.mrf.mxu0 }
 0x8dd   :  { %v4609_v4 = vmul.f32 %v8297_v16, %v4306_v55  ;;  %5686 = vmatmul.msk.bf16.gmra.mxu3 %vm553_vm0, %v4375_v32  ;;  %v4376_v38 = vpack.c.bf16 %v4366_v48, %v4365_v53  ;;  %v4480_v53 = vpop.f32.mrf.mxu2 }
 0x8df   :  { %v4628_v34 = vadd.f32 %v8304_v43, %v4609_v4 }
 0x8e0   :  { %v4116_v7 = vpop.f32.mrf.mxu3 }
 0x8e1   :  { %v4644_v20 = vmax.f32 %v4628_v34, 0.0  ;;  %v4144_v58 = vadd.f32 %v4116_v7, %v8247_v46 }
 0x8e3   :  { %v4656_v11 = vpack.c.bf16 %v4644_v20, %v4643_v31  ;;  %v4307_v2 = vadd.f32 %v4279_v10, %v4144_v58 }
 0x8e4   :  { %v4286_v39 = vpop.f32.mrf.mxu0 }
 0x8e5   :  { %5693 = vmatmul.msk.bf16.gmra.mxu1 %vm2717_vm3, %v4656_v11  ;;  %v4610_v33 = vmul.f32 %v8297_v16, %v4307_v2 }
 0x8e7   :  { %v4629_v46 = vadd.f32 %v8304_v43, %v4610_v33 }
 0x8e8   :  { %v4118_v12 = vpop.f32.mrf.mxu3 }
 0x8e9   :  { %v4145_v42 = vadd.f32 %v4118_v12, %v8250_v18  ;;  %v4645_v18 = vmax.f32 %v4629_v46, 0.0 }
 0x8eb   :  { %v4308_v59 = vadd.f32 %v4281_v19, %v4145_v42 }
 0x8ec   :  { %v4289_v10 = vpop.f32.mrf.mxu0 }
 0x8ed   :  { %v4611_v60 = vmul.f32 %v8297_v16, %v4308_v59  ;;  %5687 = vmatmul.msk.bf16.gmra.mxu3 %vm553_vm0, %v4376_v38  ;;  %v4482_v59 = vpop.f32.mrf.mxu2 }
 0x8ef   :  { %v4630_v13 = vadd.f32 %v8304_v43, %v4611_v60 }
 0x8f0   :  { %v4121_v9 = vpop.f32.mrf.mxu3 }
 0x8f1   :  { %v4646_v40 = vmax.f32 %v4630_v13, 0.0  ;;  %v4146_v57 = vadd.f32 %v4121_v9, %v8264_v27  ;;  %v4333_v27 = vmul.f32 %v8120_v21, %v8474_v61  ;;  %v4354_v61 = vadd.f32 %v8129_v14, %v4334_v25 }
 0x8f3   :  { %v4657_v23 = vpack.c.bf16 %v4646_v40, %v4645_v18  ;;  %v4309_v35 = vadd.f32 %v4284_v54, %v4146_v57  ;;  %v4370_v63 = vmax.f32 %v4354_v61, 0.0 }
 0x8f4   :  { %v4291_v19 = vpop.f32.mrf.mxu0 }
 0x8f5   :  { %5694 = vmatmul.msk.bf16.gmra.mxu1 %vm2717_vm3, %v4657_v23  ;;  %v4612_v26 = vmul.f32 %v8297_v16, %v4309_v35  ;;  %v4485_v62 = vpop.f32.mrf.mxu2 }
 0x8f7   :  { %v4631_v0 = vadd.f32 %v8304_v43, %v4612_v26 }
 0x8f8   :  { %v4123_v22 = vpop.f32.mrf.mxu3 }
 0x8f9   :  { %v4147_v50 = vadd.f32 %v4123_v22, %v8273_v8  ;;  %v4353_v8 = vadd.f32 %v8129_v14, %v4333_v27  ;;  %v4647_v51 = vmax.f32 %v4631_v0, 0.0 }
 0x8fb   :  { %v4310_v56 = vadd.f32 %v4286_v39, %v4147_v50  ;;  %v4369_v4 = vmax.f32 %v4353_v8, 0.0 }
 0x8fc   :  { %v4294_v58 = vpop.f32.mrf.mxu0 }
 0x8fd   :  { %v4613_v28 = vmul.f32 %v8297_v16, %v4310_v56  ;;  %5688 = vmatmul.msk.bf16.gmra.mxu3 %vm553_vm0, %v4377_v29  ;;  %v4378_v7 = vpack.c.bf16 %v4370_v63, %v4369_v4  ;;  %v4487_v40 = vpop.f32.mrf.mxu2 }
 0x8ff   :  { %v4632_v45 = vadd.f32 %v8304_v43, %v4613_v28 }
 0x900   :  { %v4126_v30 = vpop.f32.mrf.mxu3 }
 0x901   :  { %v4648_v32 = vmax.f32 %v4632_v45, 0.0  ;;  %v4148_v55 = vadd.f32 %v4126_v30, %v8280_v17 }
 0x903   :  { %v4658_v3 = vpack.c.bf16 %v4648_v32, %v4647_v51  ;;  %v4311_v24 = vadd.f32 %v4289_v10, %v4148_v55 }
 0x904   :  { %v4296_v42 = vpop.f32.mrf.mxu0 }
 0x905   :  { %5695 = vmatmul.msk.bf16.gmra.mxu1 %vm2717_vm3, %v4658_v3  ;;  %v4614_v15 = vmul.f32 %v8297_v16, %v4311_v24  ;;  %v4490_v35 = vpop.f32.mrf.mxu2 }
 0x907   :  { %v4633_v31 = vadd.f32 %v8304_v43, %v4614_v15 }
 0x908   :  { %v4128_v34 = vpop.f32.mrf.mxu3 }
 0x909   :  { %v4149_v21 = vadd.f32 %v4128_v34, %v8283_v47  ;;  %v4649_v37 = vmax.f32 %v4633_v31, 0.0 }
 0x90b   :  { %v4312_v5 = vadd.f32 %v4291_v19, %v4149_v21 }
 0x90d   :  { %v4615_v17 = vmul.f32 %v8297_v16, %v4312_v5  ;;  %5689 = vmatmul.msk.bf16.gmra.mxu3 %vm553_vm0, %v4378_v7  ;;  %v4492_v50 = vpop.f32.mrf.mxu2 }
 0x90f   :  { %v4634_v14 = vadd.f32 %v8304_v43, %v4615_v17 }
 0x910   :  { %v4131_v20 = vpop.f32.mrf.mxu3 }
 0x911   :  { %v4650_v11 = vmax.f32 %v4634_v14, 0.0  ;;  %v4150_v2 = vadd.f32 %v4131_v20, %v8287_v44 }
 0x913   :  { %v4659_v48 = vpack.c.bf16 %v4650_v11, %v4649_v37  ;;  %v4313_v12 = vadd.f32 %v4294_v58, %v4150_v2 }
 0x915   :  { %5696 = vmatmul.msk.bf16.gmra.mxu1 %vm2717_vm3, %v4659_v48  ;;  %v4616_v54 = vmul.f32 %v8297_v16, %v4313_v12  ;;  %v4495_v45 = vpop.f32.mrf.mxu2 }
 0x917   :  { %v4635_v49 = vadd.f32 %v8304_v43, %v4616_v54 }
 0x918   :  { %v4133_v47 = vpop.f32.mrf.mxu3 }
 0x919   :  { %v4151_v33 = vadd.f32 %v4133_v47, %v8290_v41  ;;  %v4651_v52 = vmax.f32 %v4635_v49, 0.0 }
 0x91b   :  { %v4314_v38 = vadd.f32 %v4296_v42, %v4151_v33 }
 0x91d   :  { %v4617_v46 = vmul.f32 %v8297_v16, %v4314_v38  ;;  %v4497_v51 = vpop.f32.mrf.mxu2 }
 0x91f   :  { %v4636_v60 = vadd.f32 %v8304_v43, %v4617_v46 }
 0x920   :  { %v4559_v44 = vpop.f32.mrf.mxu3 }
 0x921   :  { %v4652_v13 = vmax.f32 %v4636_v60, 0.0  ;;  %v4560_v39 = vadd.f32 %v4559_v44, %v4480_v53 }
 0x923   :  { %v4660_v9 = vpack.c.bf16 %v4652_v13, %v4651_v52 }
 0x925   :  { %5697 = vmatmul.msk.bf16.gmra.mxu1 %vm2717_vm3, %v4660_v9  ;;  %v4500_v34 = vpop.f32.mrf.mxu2 }
 0x928   :  { %v4561_v18 = vpop.f32.mrf.mxu3 }
 0x929   :  { %v4562_v23 = vadd.f32 %v4561_v18, %v4482_v59 }
 0x92d   :  { %v4502_v20 = vpop.f32.mrf.mxu2 }
 0x930   :  { %v4564_v57 = vpop.f32.mrf.mxu3 }
 0x931   :  { %v4565_v56 = vadd.f32 %v4564_v57, %v4485_v62 }
 0x932   :  { %v4698_v41 = vpop.f32.mrf.mxu1 }
 0x933   :  { %v4738_v6 = vadd.f32 %v4698_v41, %v4560_v39 }
 0x935   :  { %v4505_v2 = vpop.f32.mrf.mxu2 }
 0x938   :  { %v4566_v36 = vpop.f32.mrf.mxu3 }
 0x939   :  { %v4567_v10 = vadd.f32 %v4566_v36, %v4487_v40 }
 0x93a   :  { %v4700_v1 = vpop.f32.mrf.mxu1 }
 0x93b   :  { %v4739_v16 = vadd.f32 %v4700_v1, %v4562_v23 }
 0x93d   :  { %v6092_v22 = vpack.c.bf16 %v4739_v16, %v4738_v6  ;;  %v4507_v38 = vpop.f32.mrf.mxu2 }
 0x93f   :  { %6093 = vst [vmem:[%s8443_s17] sm:$0xff] %v6092_v22  }
 0x940   :  { %v4569_v43 = vpop.f32.mrf.mxu3 }
 0x941   :  { %v4570_v55 = vadd.f32 %v4569_v43, %v4490_v35 }
 0x942   :  { %v4703_v26 = vpop.f32.mrf.mxu1 }
 0x943   :  { %v4740_v0 = vadd.f32 %v4703_v26, %v4565_v56 }
 0x945   :  { %v4510_v44 = vpop.f32.mrf.mxu2 }
 0x948   :  { %v4571_v29 = vpop.f32.mrf.mxu3 }
 0x949   :  { %v4572_v61 = vadd.f32 %v4571_v29, %v4492_v50 }
 0x94a   :  { %v4705_v27 = vpop.f32.mrf.mxu1 }
 0x94b   :  { %v4741_v28 = vadd.f32 %v4705_v27, %v4567_v10 }
 0x94d   :  { %v6097_v25 = vpack.c.bf16 %v4741_v28, %v4740_v0  ;;  %v4512_v57 = vpop.f32.mrf.mxu2 }
 0x94f   :  { %6200 = vst [vmem:[%s8443_s17 + $0x8] sm:$0xff] %v6097_v25  }
 0x950   :  { %v4574_v30 = vpop.f32.mrf.mxu3 }
 0x951   :  { %v4575_v21 = vadd.f32 %v4574_v30, %v4495_v45 }
 0x952   :  { %v4708_v8 = vpop.f32.mrf.mxu1 }
 0x953   :  { %v4742_v24 = vadd.f32 %v4708_v8, %v4570_v55 }
 0x955   :  { %v4515_v16 = vpop.f32.mrf.mxu2 }
 0x958   :  { %v4576_v32 = vpop.f32.mrf.mxu3 }
 0x959   :  { %v4577_v7 = vadd.f32 %v4576_v32, %v4497_v51 }
 0x95a   :  { %v4710_v3 = vpop.f32.mrf.mxu1 }
 0x95b   :  { %v4743_v4 = vadd.f32 %v4710_v3, %v4572_v61 }
 0x95d   :  { %v6102_v63 = vpack.c.bf16 %v4743_v4, %v4742_v24  ;;  %v4517_v26 = vpop.f32.mrf.mxu2 }
 0x95f   :  { %6201 = vst [vmem:[%s8443_s17 + $0x10] sm:$0xff] %v6102_v63  }
 0x960   :  { %v4579_v19 = vpop.f32.mrf.mxu3 }
 0x961   :  { %v4580_v53 = vadd.f32 %v4579_v19, %v4500_v34 }
 0x962   :  { %v4713_v15 = vpop.f32.mrf.mxu1 }
 0x963   :  { %v4744_v17 = vadd.f32 %v4713_v15, %v4575_v21 }
 0x968   :  { %v4581_v5 = vpop.f32.mrf.mxu3 }
 0x969   :  { %v4582_v48 = vadd.f32 %v4581_v5, %v4502_v20 }
 0x96a   :  { %v4715_v31 = vpop.f32.mrf.mxu1 }
 0x96b   :  { %v4745_v14 = vadd.f32 %v4715_v31, %v4577_v7 }
 0x96d   :  { %v6107_v58 = vpack.c.bf16 %v4745_v14, %v4744_v17 }
 0x96f   :  { %6202 = vst [vmem:[%s8443_s17 + $0x18] sm:$0xff] %v6107_v58  }
 0x970   :  { %v4584_v11 = vpop.f32.mrf.mxu3 }
 0x971   :  { %v4585_v46 = vadd.f32 %v4584_v11, %v4505_v2 }
 0x972   :  { %v4718_v37 = vpop.f32.mrf.mxu1 }
 0x973   :  { %v4746_v47 = vadd.f32 %v4718_v37, %v4580_v53 }
 0x978   :  { %v4586_v42 = vpop.f32.mrf.mxu3 }
 0x979   :  { %v4587_v60 = vadd.f32 %v4586_v42, %v4507_v38 }
 0x97a   :  { %v4720_v12 = vpop.f32.mrf.mxu1 }
 0x97b   :  { %v4747_v54 = vadd.f32 %v4720_v12, %v4582_v48 }
 0x97d   :  { %v6112_v33 = vpack.c.bf16 %v4747_v54, %v4746_v47 }
 0x97f   :  { %6203 = vst [vmem:[%s8443_s17 + $0x20] sm:$0xff] %v6112_v33  }
 0x980   :  { %v4589_v49 = vpop.f32.mrf.mxu3 }
 0x981   :  { %v4590_v41 = vadd.f32 %v4589_v49, %v4510_v44 }
 0x982   :  { %v4723_v59 = vpop.f32.mrf.mxu1 }
 0x983   :  { %v4748_v13 = vadd.f32 %v4723_v59, %v4585_v46 }
 0x988   :  { %v4591_v18 = vpop.f32.mrf.mxu3 }
 0x989   :  { %v4592_v36 = vadd.f32 %v4591_v18, %v4512_v57 }
 0x98a   :  { %v4725_v52 = vpop.f32.mrf.mxu1 }
 0x98b   :  { %v4749_v9 = vadd.f32 %v4725_v52, %v4587_v60 }
 0x98d   :  { %v6117_v62 = vpack.c.bf16 %v4749_v9, %v4748_v13 }
 0x98f   :  { %6204 = vst [vmem:[%s8443_s17 + $0x28] sm:$0xff] %v6117_v62  }
 0x990   :  { %v4594_v1 = vpop.f32.mrf.mxu3 }
 0x991   :  { %v4595_v50 = vadd.f32 %v4594_v1, %v4515_v16 }
 0x992   :  { %v4728_v40 = vpop.f32.mrf.mxu1 }
 0x993   :  { %v4750_v23 = vadd.f32 %v4728_v40, %v4590_v41 }
 0x998   :  { %v4596_v43 = vpop.f32.mrf.mxu3 }
 0x999   :  { %v4597_v29 = vadd.f32 %v4596_v43, %v4517_v26 }
 0x99a   :  { %v4730_v39 = vpop.f32.mrf.mxu1 }
 0x99b   :  { %v4751_v35 = vadd.f32 %v4730_v39, %v4592_v36 }
 0x99d   :  { %v6122_v6 = vpack.c.bf16 %v4751_v35, %v4750_v23 }
 0x99f   :  { %6205 = vst [vmem:[%s8443_s17 + $0x30] sm:$0xff] %v6122_v6  }
 0x9a2   :  { %v4733_v22 = vpop.f32.mrf.mxu1 }
 0x9a3   :  { %v4752_v10 = vadd.f32 %v4733_v22, %v4595_v50 }
 0x9aa   :  { %v4735_v56 = vpop.f32.mrf.mxu1 }
 0x9ab   :  { %v4753_v27 = vadd.f32 %v4735_v56, %v4597_v29 }
 0x9ad   :  { %v6127_v0 = vpack.c.bf16 %v4753_v27, %v4752_v10 }
 0x9af   :  { %6206 = vst [vmem:[%s8443_s17 + $0x38] sm:$0xff] %v6127_v0  }

</bundles_post_ra>
